<compile_context>
chip_gen: v7x
topology: tpu7x:2x2x1
jax: 0.10.0
libtpu: 0.0.40
codegen_flags: <defaults>
</compile_context>

<pallas_src>
import functools

import jax
import jax.numpy as jnp
from jax.experimental import pallas as pl
from jax.experimental.pallas import tpu as pltpu

MATMUL_DTYPE = jnp.bfloat16   # MXU operand dtype; accumulation stays f32
LN_EPS = 1e-12
MASK_FILL = -10000.0


# ----------------------------------------------------------------------------
# static helpers (run at trace/wrapper time)
# ----------------------------------------------------------------------------
def _round_up(x, m):
    return ((x + m - 1) // m) * m


def _pick_chunk(n, candidates):
    """Largest candidate that divides n (else fall back to the full extent)."""
    for c in candidates:
        if c <= n and n % c == 0:
            return c
    return n


def _vmem_limit(weights, act_elems_f32):
    """Single-buffered weights + f32 activation estimate, 2x margin, clamped to
    a value that is legal on v5e / v6e / v7x."""
    wbytes = sum(int(w.size) * jnp.dtype(w.dtype).itemsize for w in weights)
    need = 2 * (wbytes + 4 * int(act_elems_f32)) + (2 << 20)
    return int(max(16 << 20, min(need, 64 << 20)))


def _bf16_tanh_ok():
    """bf16 EUP fast path exists on v6e/v7x; v5e and older have no bf16 VPU/EUP."""
    try:
        kind = jax.devices()[0].device_kind.lower()
    except Exception:
        return False
    return not any(t in kind for t in ("v2", "v3", "v4", "v5"))


_HAS_BUFFERED = hasattr(pl, "Buffered")


def _w_spec(a):
    """Full-extent weight/bias block, constant index map, SINGLE-buffered:
    its block index never changes across the batch grid, so double-buffering
    only wastes VMEM."""
    idx = lambda b: (0, 0)
    if _HAS_BUFFERED:
        try:
            return pl.BlockSpec(a.shape, idx, pipeline_mode=pl.Buffered(1))
        except TypeError:   # older jax without pipeline_mode kwarg
            pass
    return pl.BlockSpec(a.shape, idx)


# ----------------------------------------------------------------------------
# in-kernel math helpers (pure jnp, traced inside the Pallas kernels)
# ----------------------------------------------------------------------------
def _mm(x, w):
    """MXU matmul: cast activations to the (bf16) weight dtype, accumulate f32."""
    return jnp.dot(x.astype(w.dtype), w, preferred_element_type=jnp.float32)


def _ln(x, g, b, eps=LN_EPS):
    mu = jnp.mean(x, axis=-1, keepdims=True)
    var = jnp.mean((x - mu) ** 2, axis=-1, keepdims=True)
    return (x - mu) * jax.lax.rsqrt(var + eps) * g + b


def _gelu(y):
    # TODO(synk): exact erf GELU in HF BERT; tanh approx used here.
    c = jnp.float32(0.7978845608028654)
    return 0.5 * y * (1.0 + jnp.tanh(c * (y + 0.044715 * y * y * y)))


def _mha_to_ctx(q, k, v, bias, n_heads, ctx_ref):
    """Multi-head attention.  Writes the concat-of-heads context (bf16) into
    ctx_ref so the caller can run ONE full-K output-projection matmul.

    q/k/v: (L, H) bf16, q already scaled by 1/sqrt(head_dim).
    bias:  (1, Lk) additive f32 mask or None.
    """
    h_dim = q.shape[-1]
    d = h_dim // n_heads
    for h in range(n_heads):
        lo, hi = h * d, (h + 1) * d
        s = jax.lax.dot_general(q[:, lo:hi], k[:, lo:hi], (((1,), (1,)), ((), ())),
                                preferred_element_type=jnp.float32)
        if bias is not None:
            s = s + bias
        m = jnp.max(s, axis=-1, keepdims=True)
        p = jnp.exp(s - m)
        p = p * pl.reciprocal(jnp.sum(p, axis=-1, keepdims=True), approx=True)
        ctx = jnp.dot(p.astype(MATMUL_DTYPE), v[:, lo:hi],
                      preferred_element_type=jnp.float32)
        ctx_ref[:, pl.ds(lo, d)] = ctx.astype(MATMUL_DTYPE)


def _ffn(x, wi_ref, bi_ref, wo2_ref, bo2_ref, inter_chunk):
    """FFN tiled over the intermediate dim; GELU output goes to bf16 immediately
    so the full (rows, inter) f32 intermediate is never live."""
    xb = x.astype(MATMUL_DTYPE)
    inter = wi_ref.shape[-1]
    out = None
    for c in range(inter // inter_chunk):
        lo = c * inter_chunk
        mid = _gelu(jnp.dot(xb, wi_ref[:, pl.ds(lo, inter_chunk)],
                            preferred_element_type=jnp.float32)
                    + bi_ref[:, pl.ds(lo, inter_chunk)])
        part = jnp.dot(mid.astype(MATMUL_DTYPE), wo2_ref[pl.ds(lo, inter_chunk), :],
                       preferred_element_type=jnp.float32)
        out = part if out is None else out + part
    return out + bo2_ref[...]


# ----------------------------------------------------------------------------
# Pallas kernels
# ----------------------------------------------------------------------------
def _layernorm_kernel(x_ref, g_ref, b_ref, o_ref):
    o_ref[...] = _ln(x_ref[...], g_ref[...], b_ref[...]).astype(o_ref.dtype)


def _encoder_layer_kernel(x_ref, bias_ref,
                          wqkv_ref, bqkv_ref, wo_ref, bo_ref, g1_ref, be1_ref,
                          wi_ref, bi_ref, wo2_ref, bo2_ref, g2_ref, be2_ref,
                          o_ref, ctx_ref, *, n_heads, inter_chunk):
    """One fused BERT encoder layer per (batch) grid step."""
    x = x_ref[0]                                          # (S, H) f32
    h_dim = x.shape[-1]
    scale = 1.0 / float(h_dim // n_heads) ** 0.5

    qkv = _mm(x, wqkv_ref[...]) + bqkv_ref[...]           # (S, 3H) f32
    q = (qkv[:, :h_dim] * scale).astype(MATMUL_DTYPE)     # scale folded into q
    k = qkv[:, h_dim:2 * h_dim].astype(MATMUL_DTYPE)
    v = qkv[:, 2 * h_dim:].astype(MATMUL_DTYPE)
    _mha_to_ctx(q, k, v, bias_ref[0], n_heads, ctx_ref)
    attn = jnp.dot(ctx_ref[...], wo_ref[...],
                   preferred_element_type=jnp.float32) + bo_ref[...]
    x1 = _ln(attn + x, g1_ref[...], be1_ref[...])

    ffn = _ffn(x1, wi_ref, bi_ref, wo2_ref, bo2_ref, inter_chunk)
    o_ref[0] = _ln(ffn + x1, g2_ref[...], be2_ref[...]).astype(o_ref.dtype)


def _decoder_layer_kernel(h_ref, e_ref, ebias_ref,
                          wqkv_s_ref, bqkv_s_ref, wos_ref, bos_ref, gs_ref, bbs_ref,
                          wqc_ref, bqc_ref, wkvc_ref, bkvc_ref, woc_ref, boc_ref,
                          gc_ref, bbc_ref,
                          wi_ref, bi_ref, wo2_ref, bo2_ref, gf_ref, bbf_ref,
                          o_ref, ctx_ref, *, n_heads, inter_chunk, n_real_q):
    """One fused SetDecoder layer: self-attn -> cross-attn -> FFN (res+LN each)."""
    hid = h_ref[0]                                        # (Qp, H)
    enc = e_ref[0]                                        # (S, H)
    h_dim = hid.shape[-1]
    q_pad = hid.shape[0]
    scale = 1.0 / float(h_dim // n_heads) ** 0.5

    # Mask padded query rows out of the self-attention KEYS so the padded-Q
    # result is numerically identical to the unpadded reference.
    if n_real_q < q_pad:
        qcol = jax.lax.broadcasted_iota(jnp.int32, (1, q_pad), 1)
        sbias = jnp.where(qcol < n_real_q, 0.0, MASK_FILL).astype(jnp.float32)
    else:
        sbias = None

    # self-attention over the learned queries
    qkv = _mm(hid, wqkv_s_ref[...]) + bqkv_s_ref[...]     # (Qp, 3H)
    q = (qkv[:, :h_dim] * scale).astype(MATMUL_DTYPE)
    k = qkv[:, h_dim:2 * h_dim].astype(MATMUL_DTYPE)
    v = qkv[:, 2 * h_dim:].astype(MATMUL_DTYPE)
    _mha_to_ctx(q, k, v, sbias, n_heads, ctx_ref)
    a1 = jnp.dot(ctx_ref[...], wos_ref[...],
                 preferred_element_type=jnp.float32) + bos_ref[...]
    h1 = _ln(a1 + hid, gs_ref[...], bbs_ref[...])

    # cross-attention over the encoder sequence (+ padding-mask bias)
    qc = ((_mm(h1, wqc_ref[...]) + bqc_ref[...]) * scale).astype(MATMUL_DTYPE)
    kv = _mm(enc, wkvc_ref[...]) + bkvc_ref[...]          # (S, 2H)
    kc = kv[:, :h_dim].astype(MATMUL_DTYPE)
    vc = kv[:, h_dim:].astype(MATMUL_DTYPE)
    _mha_to_ctx(qc, kc, vc, ebias_ref[0], n_heads, ctx_ref)
    a2 = jnp.dot(ctx_ref[...], woc_ref[...],
                 preferred_element_type=jnp.float32) + boc_ref[...]
    h2 = _ln(a2 + h1, gc_ref[...], bbc_ref[...])

    # FFN
    ffn = _ffn(h2, wi_ref, bi_ref, wo2_ref, bo2_ref, inter_chunk)
    o_ref[0] = _ln(ffn + h2, gf_ref[...], bbf_ref[...]).astype(o_ref.dtype)


def _head_kernel(h_ref, e_ref, m_ref, wcls_ref, bcls_ref,
                 w1_ref, b1_ref, w2_ref, b2_ref, w3_ref,
                 cls_ref, span_ref, *, s_chunk, tanh_dtype):
    """Fused class head + four bi-affine span heads + masked_fill(-10000),
    tiled over the S axis so no (Q, S, H) intermediate is ever fully live."""
    hid = h_ref[0]                                        # (Qp, H) f32
    h_dim = hid.shape[-1]
    s_len = e_ref.shape[1]

    cls_ref[0] = (_mm(hid, wcls_ref[...]) + bcls_ref[...]).astype(cls_ref.dtype)

    hq_all = _mm(hid, w1_ref[...]) + b1_ref[...]          # (Qp, 4H) shared load
    w3_all = w3_ref[...]                                  # (4, H)   f32 element-wise

    for t in range(s_len // s_chunk):
        lo = t * s_chunk
        enc_t = e_ref[0, pl.ds(lo, s_chunk), :]           # (s_chunk, H)
        he_t = _mm(enc_t, w2_ref[...]) + b2_ref[...]      # (s_chunk, 4H)
        keep_t = m_ref[0, :, pl.ds(lo, s_chunk)] > 0.5    # (1, s_chunk)
        for i in range(4):
            hsl = slice(i * h_dim, (i + 1) * h_dim)
            add = hq_all[:, None, hsl] + he_t[None, :, hsl]       # (Qp, s_chunk, H)
            tvals = jnp.tanh(add.astype(tanh_dtype)).astype(jnp.float32)
            w3i = w3_all[i:i + 1, :][:, None, :]                  # (1, 1, H)
            logits = jnp.sum(tvals * w3i, axis=-1)                # (Qp, s_chunk) f32
            span_ref[0, i, :, pl.ds(lo, s_chunk)] = jnp.where(
                keep_t, logits, jnp.float32(MASK_FILL))


# ----------------------------------------------------------------------------
# pallas_call wrappers
# ----------------------------------------------------------------------------
def layer_norm(x, g, b):
    orig = x.shape
    h = orig[-1]
    x2 = x.reshape(-1, h).astype(jnp.float32)
    m = x2.shape[0]
    rb = _pick_chunk(m, (256, 128, 64, 32, 16, 8))
    out = pl.pallas_call(
        _layernorm_kernel,
        grid=(m // rb,),
        out_shape=jax.ShapeDtypeStruct((m, h), jnp.float32),
        in_specs=[pl.BlockSpec((rb, h), lambda i: (i, 0)),
                  _w_spec(g), _w_spec(b)],
        out_specs=pl.BlockSpec((rb, h), lambda i: (i, 0)),
        compiler_params=pltpu.CompilerParams(
            dimension_semantics=("parallel",),
            vmem_limit_bytes=_vmem_limit((g, b), 4 * rb * h)),
    )(x2, g, b)
    return out.reshape(orig)


def encoder_layer(x, bias, lp, n_heads):
    bsz, s, h = x.shape
    a, f = lp["attn"], lp["ffn"]
    weights = (a["wqkv"], a["bqkv"], a["wo"], a["bo"], a["g"], a["b"],
               f["wi"], f["bi"], f["wo"], f["bo"], f["g"], f["b"])
    inter = f["wi"].shape[-1]
    inter_chunk = _pick_chunk(inter, (1536, 1024, 768, 512, 256, 128))
    act_elems = s * (10 * h + 2 * inter_chunk) + 3 * s * s
    return pl.pallas_call(
        functools.partial(_encoder_layer_kernel, n_heads=n_heads,
                          inter_chunk=inter_chunk),
        grid=(bsz,),
        out_shape=jax.ShapeDtypeStruct((bsz, s, h), jnp.float32),
        in_specs=[pl.BlockSpec((1, s, h), lambda b: (b, 0, 0)),
                  pl.BlockSpec((1, 1, s), lambda b: (b, 0, 0))]
                 + [_w_spec(w) for w in weights],
        out_specs=pl.BlockSpec((1, s, h), lambda b: (b, 0, 0)),
        scratch_shapes=[pltpu.VMEM((s, h), MATMUL_DTYPE)],
        compiler_params=pltpu.CompilerParams(
            dimension_semantics=("parallel",),
            vmem_limit_bytes=_vmem_limit(weights, act_elems)),
    )(x, bias, *weights)


def decoder_layer(hidden, enc, enc_bias, lp, n_heads, n_real_q):
    bsz, qp, h = hidden.shape
    s = enc.shape[1]
    sa, ca, f = lp["sa"], lp["ca"], lp["ffn"]
    weights = (sa["wqkv"], sa["bqkv"], sa["wo"], sa["bo"], sa["g"], sa["b"],
               ca["wq"], ca["bq"], ca["wkv"], ca["bkv"], ca["wo"], ca["bo"],
               ca["g"], ca["b"],
               f["wi"], f["bi"], f["wo"], f["bo"], f["g"], f["b"])
    inter = f["wi"].shape[-1]
    inter_chunk = _pick_chunk(inter, (1536, 1024, 768, 512, 256, 128))
    act_elems = (qp * (10 * h + 2 * inter_chunk) + 3 * qp * qp
                 + 3 * qp * s + 3 * s * h)
    return pl.pallas_call(
        functools.partial(_decoder_layer_kernel, n_heads=n_heads,
                          inter_chunk=inter_chunk, n_real_q=n_real_q),
        grid=(bsz,),
        out_shape=jax.ShapeDtypeStruct((bsz, qp, h), jnp.float32),
        in_specs=[pl.BlockSpec((1, qp, h), lambda b: (b, 0, 0)),
                  pl.BlockSpec((1, s, h), lambda b: (b, 0, 0)),
                  pl.BlockSpec((1, 1, s), lambda b: (b, 0, 0))]
                 + [_w_spec(w) for w in weights],
        out_specs=pl.BlockSpec((1, qp, h), lambda b: (b, 0, 0)),
        scratch_shapes=[pltpu.VMEM((qp, h), MATMUL_DTYPE)],
        compiler_params=pltpu.CompilerParams(
            dimension_semantics=("parallel",),
            vmem_limit_bytes=_vmem_limit(weights, act_elems)),
    )(hidden, enc, enc_bias, *weights)


def decode_heads(hidden, enc, attention_mask, hp):
    """Single fused pallas_call: class logits + 4 masked span-logit maps."""
    bsz, qp, h = hidden.shape
    s = enc.shape[1]
    ncls_pad = hp["wcls"].shape[-1]
    mask3 = attention_mask.astype(jnp.float32).reshape(bsz, 1, s)
    weights = (hp["wcls"], hp["bcls"], hp["w1"], hp["b1"], hp["w2"], hp["b2"],
               hp["w3"])
    s_chunk = _pick_chunk(s, (256, 128, 64, 32, 16, 8))
    tanh_dtype = jnp.bfloat16 if _bf16_tanh_ok() else jnp.float32
    act_elems = (qp * 4 * h + s_chunk * 4 * h + 2 * qp * s_chunk * h
                 + 4 * qp * s + qp * ncls_pad + (qp + s) * h)
    cls_logits, span_slab = pl.pallas_call(
        functools.partial(_head_kernel, s_chunk=s_chunk, tanh_dtype=tanh_dtype),
        grid=(bsz,),
        out_shape=(jax.ShapeDtypeStruct((bsz, qp, ncls_pad), jnp.float32),
                   jax.ShapeDtypeStruct((bsz, 4, qp, s), jnp.float32)),
        in_specs=[pl.BlockSpec((1, qp, h), lambda b: (b, 0, 0)),
                  pl.BlockSpec((1, s, h), lambda b: (b, 0, 0)),
                  pl.BlockSpec((1, 1, s), lambda b: (b, 0, 0))]
                 + [_w_spec(w) for w in weights],
        out_specs=(pl.BlockSpec((1, qp, ncls_pad), lambda b: (b, 0, 0)),
                   pl.BlockSpec((1, 4, qp, s), lambda b: (b, 0, 0, 0))),
        compiler_params=pltpu.CompilerParams(
            dimension_semantics=("parallel",),
            vmem_limit_bytes=_vmem_limit(weights, act_elems)),
    )(hidden, enc, mask3, *weights)
    return cls_logits, span_slab


# ----------------------------------------------------------------------------
# Forward pass (glue is plain JAX; all heavy math runs in the fused kernels)
# ----------------------------------------------------------------------------
def set_pred_forward(kp, input_ids, attention_mask, cfg):
    enc_p, dec_p = kp["encoder"], kp["decoder"]
    bsz, seq = input_ids.shape
    n_q = cfg["num_queries"]
    n_cls = cfg["num_classes"] + 1

    # --- BERT-lite encoder ---
    emb = (enc_p["word_emb"][input_ids]
           + enc_p["pos_emb"][jnp.arange(seq)][None, :, :]
           + enc_p["type_emb"][0][None, None, :])
    x = layer_norm(emb, enc_p["emb_ln_g"], enc_p["emb_ln_b"])
    bias = (1.0 - attention_mask.astype(jnp.float32))[:, None, :] * MASK_FILL
    for lp in enc_p["layers"]:
        x = encoder_layer(x, bias, lp, cfg["heads"])
    # NOTE: BERT pooler_output is unused by SetPred4RE's outputs -> dropped.

    # --- SetDecoder (queries padded to a sublane-aligned count) ---
    qln = layer_norm(dec_p["query_embed"], dec_p["q_ln_g"], dec_p["q_ln_b"])
    hidden = jnp.broadcast_to(qln[None, :, :], (bsz,) + qln.shape)
    for lp in dec_p["layers"]:
        hidden = decoder_layer(hidden, x, bias, lp, cfg["heads"], n_real_q=n_q)

    cls_logits, span_slab = decode_heads(hidden, x, attention_mask, dec_p["heads"])
    cls_logits = cls_logits[:, :n_q, :n_cls]        # strip query/class padding
    span_slab = span_slab[:, :, :n_q, :]
    names = ("head_start_logits", "head_end_logits",
             "tail_start_logits", "tail_end_logits")
    out = {"pred_rel_logits": cls_logits}
    for i, name in enumerate(names):
        out[name] = span_slab[:, i]                 # (B, Q, S), mask already fused
    return out


# ----------------------------------------------------------------------------
# Parameters: torch-layout synthetic init + one-time kernel-layout preparation
# ----------------------------------------------------------------------------
def init_params(key, cfg):
    h, inter = cfg["hidden"], cfg["inter"]
    counter = [0]

    def nk():
        counter[0] += 1
        return jax.random.fold_in(key, counter[0])

    def dense(out_dim, in_dim):
        return {"w": 0.02 * jax.random.normal(nk(), (out_dim, in_dim), jnp.float32),
                "b": jnp.zeros((out_dim,), jnp.float32)}

    def ln():
        return jnp.ones((h,), jnp.float32), jnp.zeros((h,), jnp.float32)

    def attn_block():
        g, b = ln()
        return {"q": dense(h, h), "k": dense(h, h), "v": dense(h, h),
                "o": dense(h, h), "ln_g": g, "ln_b": b}

    def ffn():
        g, b = ln()
        return {"wi": dense(inter, h), "wo": dense(h, inter), "ln_g": g, "ln_b": b}

    enc = {"word_emb": 0.02 * jax.random.normal(nk(), (cfg["vocab"], h), jnp.float32),
           "pos_emb": 0.02 * jax.random.normal(nk(), (cfg["max_pos"], h), jnp.float32),
           "type_emb": 0.02 * jax.random.normal(nk(), (cfg["type_vocab"], h), jnp.float32)}
    enc["emb_ln_g"], enc["emb_ln_b"] = ln()
    enc["layers"] = [{"attn": attn_block(), "ffn": ffn()}
                     for _ in range(cfg["enc_layers"])]
    enc["pooler"] = dense(h, h)    # kept for torch parity; unused downstream

    dec = {"query_embed": 0.02 * jax.random.normal(nk(), (cfg["num_queries"], h),
                                                   jnp.float32)}
    dec["q_ln_g"], dec["q_ln_b"] = ln()
    dec["layers"] = [{"self_attn": attn_block(), "cross_attn": attn_block(),
                      "ffn": ffn()} for _ in range(cfg["dec_layers"])]
    dec["cls"] = dense(cfg["num_classes"] + 1, h)
    for name in ("head_start", "head_end", "tail_start", "tail_end"):
        dec[name] = {"m1": dense(h, h), "m2": dense(h, h),
                     "m3": 0.02 * jax.random.normal(nk(), (1, h), jnp.float32)}
    return {"encoder": enc, "decoder": dec}


def prepare_params(p, cfg):
    """One-time torch-layout -> kernel-layout conversion (outside jit):
    pre-transpose, stack Q/K/V and the four span heads, pad the query count to
    a sublane multiple and the class-head width to a lane multiple, cast MXU
    weights to bf16; biases / LN params / element-wise weights stay f32."""
    f32 = jnp.float32
    q_pad = _round_up(cfg["num_queries"], 8)
    n_cls = cfg["num_classes"] + 1
    ncls_pad = _round_up(n_cls, 128)

    def t(w):                     # torch (out, in) -> (in, out), bf16 for the MXU
        return w.T.astype(MATMUL_DTYPE)

    def row(b):                   # (n,) -> (1, n) f32
        return b.reshape(1, -1).astype(f32)

    def self_attn(a):
        return {"wqkv": jnp.concatenate([a["q"]["w"].T, a["k"]["w"].T, a["v"]["w"].T],
                                        axis=1).astype(MATMUL_DTYPE),
                "bqkv": row(jnp.concatenate([a["q"]["b"], a["k"]["b"], a["v"]["b"]])),
                "wo": t(a["o"]["w"]), "bo": row(a["o"]["b"]),
                "g": row(a["ln_g"]), "b": row(a["ln_b"])}

    def cross_attn(a):
        return {"wq": t(a["q"]["w"]), "bq": row(a["q"]["b"]),
                "wkv": jnp.concatenate([a["k"]["w"].T, a["v"]["w"].T],
                                       axis=1).astype(MATMUL_DTYPE),
                "bkv": row(jnp.concatenate([a["k"]["b"], a["v"]["b"]])),
                "wo": t(a["o"]["w"]), "bo": row(a["o"]["b"]),
                "g": row(a["ln_g"]), "b": row(a["ln_b"])}

    def ffn(a):
        return {"wi": t(a["wi"]["w"]), "bi": row(a["wi"]["b"]),
                "wo": t(a["wo"]["w"]), "bo": row(a["wo"]["b"]),
                "g": row(a["ln_g"]), "b": row(a["ln_b"])}

    e = p["encoder"]
    enc = {"word_emb": e["word_emb"].astype(f32),
           "pos_emb": e["pos_emb"].astype(f32),
           "type_emb": e["type_emb"].astype(f32),
           "emb_ln_g": row(e["emb_ln_g"]), "emb_ln_b": row(e["emb_ln_b"]),
           "layers": [{"attn": self_attn(l["attn"]), "ffn": ffn(l["ffn"])}
                      for l in e["layers"]]}
    # (pooler weights intentionally not prepared: pooler_output is unused.)

    d = p["decoder"]
    names = ("head_start", "head_end", "tail_start", "tail_end")
    heads = {"wcls": jnp.pad(t(d["cls"]["w"]), ((0, 0), (0, ncls_pad - n_cls))),
             "bcls": jnp.pad(row(d["cls"]["b"]), ((0, 0), (0, ncls_pad - n_cls))),
             "w1": jnp.concatenate([d[n]["m1"]["w"].T for n in names],
                                   axis=1).astype(MATMUL_DTYPE),
             "b1": row(jnp.concatenate([d[n]["m1"]["b"] for n in names])),
             "w2": jnp.concatenate([d[n]["m2"]["w"].T for n in names],
                                   axis=1).astype(MATMUL_DTYPE),
             "b2": row(jnp.concatenate([d[n]["m2"]["b"] for n in names])),
             "w3": jnp.concatenate([d[n]["m3"] for n in names], axis=0).astype(f32)}
    query = jnp.pad(d["query_embed"],
                    ((0, q_pad - cfg["num_queries"]), (0, 0))).astype(f32)
    dec = {"query_embed": query,
           "q_ln_g": row(d["q_ln_g"]), "q_ln_b": row(d["q_ln_b"]),
           "layers": [{"sa": self_attn(l["self_attn"]),
                       "ca": cross_attn(l["cross_attn"]),
                       "ffn": ffn(l["ffn"])} for l in d["layers"]],
           "heads": heads}
    return {"encoder": enc, "decoder": dec}


# ----------------------------------------------------------------------------
if __name__ == "__main__":
    cfg = dict(vocab=30, max_pos=16, type_vocab=2, hidden=32, heads=4, inter=64,
               enc_layers=2, dec_layers=3, num_queries=15, num_classes=24)
    key = jax.random.PRNGKey(0)
    torch_params = init_params(key, cfg)
    kparams = prepare_params(torch_params, cfg)     # one-time layout/dtype prep

    B, S = 2, 8
    input_ids = jax.random.randint(jax.random.fold_in(key, 9999), (B, S),
                                   0, cfg["vocab"], dtype=jnp.int32)
    attention_mask = jnp.array([[1, 1, 1, 1, 1, 1, 0, 0],
                                [1, 1, 1, 1, 1, 1, 1, 0]], dtype=jnp.int32)

    fwd = jax.jit(functools.partial(set_pred_forward, cfg=cfg))
    out = fwd(kparams, input_ids, attention_mask)
    jax.block_until_ready(out)

    assert out["pred_rel_logits"].shape == (B, cfg["num_queries"],
                                            cfg["num_classes"] + 1)
    for k in ("head_start_logits", "head_end_logits",
              "tail_start_logits", "tail_end_logits"):
        assert out[k].shape == (B, cfg["num_queries"], S)
        # padded positions must be exactly the masked_fill value
        assert bool(jnp.all(out[k][0, :, 6:] == MASK_FILL))
        assert bool(jnp.all(out[k][1, :, 7:] == MASK_FILL))

    print("KERNEL_OK")
</pallas_src>

<mosaic_0001>
module attributes {stable_mosaic.version = 11 : i64} {
  func.func @_layernorm_kernel(%arg0: i32, %arg1: memref<16x32xf32, #tpu.memory_space<vmem>>, %arg2: memref<1x32xf32, #tpu.memory_space<vmem>>, %arg3: memref<1x32xf32, #tpu.memory_space<vmem>>, %arg4: memref<16x32xf32, #tpu.memory_space<vmem>>) attributes {dimension_semantics = [#tpu.dimension_semantics<parallel>], iteration_bounds = array<i64: 1>, scalar_prefetch = 0 : i64, scratch_operands = 0 : i64, tpu.core_type = #tpu.core_type<tc>, window_params = [{transform_indices = @transform_0, window_bounds = array<i64: 16, 32>}, {pipeline_mode = #tpu.pipeline_mode<synchronous>, transform_indices = @transform_1, window_bounds = array<i64: 1, 32>}, {pipeline_mode = #tpu.pipeline_mode<synchronous>, transform_indices = @transform_2, window_bounds = array<i64: 1, 32>}, {transform_indices = @transform_3, window_bounds = array<i64: 16, 32>}]} {
    %c0 = arith.constant 0 : index
    %c0_0 = arith.constant 0 : index
    %0 = vector.load %arg1[%c0, %c0_0] : memref<16x32xf32, #tpu.memory_space<vmem>>, vector<16x32xf32>
    %c0_1 = arith.constant 0 : index
    %c0_2 = arith.constant 0 : index
    %1 = vector.load %arg2[%c0_1, %c0_2] : memref<1x32xf32, #tpu.memory_space<vmem>>, vector<1x32xf32>
    %c0_3 = arith.constant 0 : index
    %c0_4 = arith.constant 0 : index
    %2 = vector.load %arg3[%c0_3, %c0_4] : memref<1x32xf32, #tpu.memory_space<vmem>>, vector<1x32xf32>
    %cst = arith.constant dense<0.000000e+00> : vector<16xf32>
    %3 = vector.multi_reduction <add>, %0, %cst [1] : vector<16x32xf32> to vector<16xf32>
    %4 = vector.shape_cast %3 : vector<16xf32> to vector<16x1xf32>
    %cst_5 = arith.constant 3.200000e+01 : f32
    %5 = vector.broadcast %cst_5 : f32 to vector<16x1xf32>
    %6 = arith.divf %4, %5 : vector<16x1xf32>
    %7 = vector.broadcast %6 : vector<16x1xf32> to vector<16x32xf32>
    %8 = arith.subf %0, %7 : vector<16x32xf32>
    %9 = arith.mulf %8, %8 : vector<16x32xf32>
    %cst_6 = arith.constant dense<0.000000e+00> : vector<16xf32>
    %10 = vector.multi_reduction <add>, %9, %cst_6 [1] : vector<16x32xf32> to vector<16xf32>
    %11 = vector.shape_cast %10 : vector<16xf32> to vector<16x1xf32>
    %cst_7 = arith.constant 3.200000e+01 : f32
    %12 = vector.broadcast %cst_7 : f32 to vector<16x1xf32>
    %13 = arith.divf %11, %12 : vector<16x1xf32>
    %14 = vector.broadcast %6 : vector<16x1xf32> to vector<16x32xf32>
    %15 = arith.subf %0, %14 : vector<16x32xf32>
    %cst_8 = arith.constant 9.99999996E-13 : f32
    %16 = vector.broadcast %cst_8 : f32 to vector<16x1xf32>
    %17 = arith.addf %13, %16 : vector<16x1xf32>
    %18 = math.rsqrt %17 : vector<16x1xf32>
    %19 = vector.broadcast %18 : vector<16x1xf32> to vector<16x32xf32>
    %20 = arith.mulf %15, %19 : vector<16x32xf32>
    %21 = vector.broadcast %1 : vector<1x32xf32> to vector<16x32xf32>
    %22 = arith.mulf %20, %21 : vector<16x32xf32>
    %23 = vector.broadcast %2 : vector<1x32xf32> to vector<16x32xf32>
    %24 = arith.addf %22, %23 : vector<16x32xf32>
    %c0_9 = arith.constant 0 : index
    %c0_10 = arith.constant 0 : index
    %25 = vector.load %arg4[%c0_9, %c0_10] : memref<16x32xf32, #tpu.memory_space<vmem>>, vector<16x32xf32>
    tpu.vector_store %arg4[%c0_9, %c0_10], %24 {strides = array<i32>} : memref<16x32xf32, #tpu.memory_space<vmem>>, vector<16x32xf32>,
    return
  }
  func.func @transform_0(%arg0: i32) -> (i32, i32) {
    %c0_i32 = arith.constant 0 : i32
    %c0_i32_0 = arith.constant 0 : i32
    return %arg0, %c0_i32 : i32, i32
  }
  func.func @transform_1(%arg0: i32) -> (i32, i32) {
    %c0_i32 = arith.constant 0 : i32
    %c0_i32_0 = arith.constant 0 : i32
    %c0_i32_1 = arith.constant 0 : i32
    return %c0_i32, %c0_i32_0 : i32, i32
  }
  func.func @transform_2(%arg0: i32) -> (i32, i32) {
    %c0_i32 = arith.constant 0 : i32
    %c0_i32_0 = arith.constant 0 : i32
    %c0_i32_1 = arith.constant 0 : i32
    return %c0_i32, %c0_i32_0 : i32, i32
  }
  func.func @transform_3(%arg0: i32) -> (i32, i32) {
    %c0_i32 = arith.constant 0 : i32
    %c0_i32_0 = arith.constant 0 : i32
    return %arg0, %c0_i32 : i32, i32
  }
}

module attributes {stable_mosaic.version = 11 : i64} {
  func.func @_encoder_layer_kernel(%arg0: i32, %arg1: memref<1x8x32xf32, #tpu.memory_space<vmem>>, %arg2: memref<1x1x8xf32, #tpu.memory_space<vmem>>, %arg3: memref<32x96xbf16, #tpu.memory_space<vmem>>, %arg4: memref<1x96xf32, #tpu.memory_space<vmem>>, %arg5: memref<32x32xbf16, #tpu.memory_space<vmem>>, %arg6: memref<1x32xf32, #tpu.memory_space<vmem>>, %arg7: memref<1x32xf32, #tpu.memory_space<vmem>>, %arg8: memref<1x32xf32, #tpu.memory_space<vmem>>, %arg9: memref<32x64xbf16, #tpu.memory_space<vmem>>, %arg10: memref<1x64xf32, #tpu.memory_space<vmem>>, %arg11: memref<64x32xbf16, #tpu.memory_space<vmem>>, %arg12: memref<1x32xf32, #tpu.memory_space<vmem>>, %arg13: memref<1x32xf32, #tpu.memory_space<vmem>>, %arg14: memref<1x32xf32, #tpu.memory_space<vmem>>, %arg15: memref<1x8x32xf32, #tpu.memory_space<vmem>>, %arg16: memref<8x32xbf16, #tpu.memory_space<vmem>>) attributes {dimension_semantics = [#tpu.dimension_semantics<parallel>], iteration_bounds = array<i64: 2>, scalar_prefetch = 0 : i64, scratch_operands = 1 : i64, tpu.core_type = #tpu.core_type<tc>, window_params = [{transform_indices = @transform_0, window_bounds = array<i64: 1, 8, 32>}, {transform_indices = @transform_1, window_bounds = array<i64: 1, 1, 8>}, {pipeline_mode = #tpu.pipeline_mode<synchronous>, transform_indices = @transform_2, window_bounds = array<i64: 32, 96>}, {pipeline_mode = #tpu.pipeline_mode<synchronous>, transform_indices = @transform_3, window_bounds = array<i64: 1, 96>}, {pipeline_mode = #tpu.pipeline_mode<synchronous>, transform_indices = @transform_4, window_bounds = array<i64: 32, 32>}, {pipeline_mode = #tpu.pipeline_mode<synchronous>, transform_indices = @transform_5, window_bounds = array<i64: 1, 32>}, {pipeline_mode = #tpu.pipeline_mode<synchronous>, transform_indices = @transform_6, window_bounds = array<i64: 1, 32>}, {pipeline_mode = #tpu.pipeline_mode<synchronous>, transform_indices = @transform_7, window_bounds = array<i64: 1, 32>}, {pipeline_mode = #tpu.pipeline_mode<synchronous>, transform_indices = @transform_8, window_bounds = array<i64: 32, 64>}, {pipeline_mode = #tpu.pipeline_mode<synchronous>, transform_indices = @transform_9, window_bounds = array<i64: 1, 64>}, {pipeline_mode = #tpu.pipeline_mode<synchronous>, transform_indices = @transform_10, window_bounds = array<i64: 64, 32>}, {pipeline_mode = #tpu.pipeline_mode<synchronous>, transform_indices = @transform_11, window_bounds = array<i64: 1, 32>}, {pipeline_mode = #tpu.pipeline_mode<synchronous>, transform_indices = @transform_12, window_bounds = array<i64: 1, 32>}, {pipeline_mode = #tpu.pipeline_mode<synchronous>, transform_indices = @transform_13, window_bounds = array<i64: 1, 32>}, {transform_indices = @transform_14, window_bounds = array<i64: 1, 8, 32>}]} {
    %c0 = arith.constant 0 : index
    %c0_0 = arith.constant 0 : index
    %c0_1 = arith.constant 0 : index
    %0 = vector.load %arg1[%c0, %c0_0, %c0_1] : memref<1x8x32xf32, #tpu.memory_space<vmem>>, vector<1x8x32xf32>
    %1 = vector.shape_cast %0 : vector<1x8x32xf32> to vector<8x32xf32>
    %c0_2 = arith.constant 0 : index
    %c0_3 = arith.constant 0 : index
    %2 = vector.load %arg3[%c0_2, %c0_3] : memref<32x96xbf16, #tpu.memory_space<vmem>>, vector<32x96xbf16>
    %3 = arith.truncf %1 : vector<8x32xf32> to vector<8x32xbf16>
    %cst = arith.constant dense<0.000000e+00> : vector<8x96xf32>
    %4 = tpu.matmul %3, %2, %cst {dimension_numbers = #tpu.dot_dimension_numbers<[1], [0], [0], [1], [0, 0, 1, 1], [], []>} : vector<8x32xbf16>, vector<32x96xbf16>, vector<8x96xf32> -> vector<8x96xf32>
    %c0_4 = arith.constant 0 : index
    %c0_5 = arith.constant 0 : index
    %5 = vector.load %arg4[%c0_4, %c0_5] : memref<1x96xf32, #tpu.memory_space<vmem>>, vector<1x96xf32>
    %6 = vector.broadcast %5 : vector<1x96xf32> to vector<8x96xf32>
    %7 = arith.addf %4, %6 : vector<8x96xf32>
    %8 = vector.extract_strided_slice %7 {offsets = [0, 0], sizes = [8, 32], strides = [1, 1]} : vector<8x96xf32> to vector<8x32xf32>
    %cst_6 = arith.constant 0.353553385 : f32
    %9 = vector.broadcast %cst_6 : f32 to vector<8x32xf32>
    %10 = arith.mulf %8, %9 : vector<8x32xf32>
    %11 = arith.truncf %10 : vector<8x32xf32> to vector<8x32xbf16>
    %12 = vector.extract_strided_slice %7 {offsets = [0, 32], sizes = [8, 32], strides = [1, 1]} : vector<8x96xf32> to vector<8x32xf32>
    %13 = arith.truncf %12 : vector<8x32xf32> to vector<8x32xbf16>
    %14 = vector.extract_strided_slice %7 {offsets = [0, 64], sizes = [8, 32], strides = [1, 1]} : vector<8x96xf32> to vector<8x32xf32>
    %15 = arith.truncf %14 : vector<8x32xf32> to vector<8x32xbf16>
    %c0_7 = arith.constant 0 : index
    %c0_8 = arith.constant 0 : index
    %c0_9 = arith.constant 0 : index
    %16 = vector.load %arg2[%c0_7, %c0_8, %c0_9] : memref<1x1x8xf32, #tpu.memory_space<vmem>>, vector<1x1x8xf32>
    %17 = vector.shape_cast %16 : vector<1x1x8xf32> to vector<1x8xf32>
    %18 = vector.extract_strided_slice %11 {offsets = [0, 0], sizes = [8, 8], strides = [1, 1]} : vector<8x32xbf16> to vector<8x8xbf16>
    %19 = vector.extract_strided_slice %13 {offsets = [0, 0], sizes = [8, 8], strides = [1, 1]} : vector<8x32xbf16> to vector<8x8xbf16>
    %cst_10 = arith.constant dense<0.000000e+00> : vector<8x8xf32>
    %20 = tpu.matmul %18, %19, %cst_10 {dimension_numbers = #tpu.dot_dimension_numbers<[1], [1], [0], [0], [0, 0, 1, 0], [], []>} : vector<8x8xbf16>, vector<8x8xbf16>, vector<8x8xf32> -> vector<8x8xf32>
    %21 = vector.broadcast %17 : vector<1x8xf32> to vector<8x8xf32>
    %22 = arith.addf %20, %21 : vector<8x8xf32>
    %cst_11 = arith.constant dense<0xFF800000> : vector<8xf32>
    %23 = vector.multi_reduction <maximumf>, %22, %cst_11 [1] : vector<8x8xf32> to vector<8xf32>
    %24 = vector.shape_cast %23 : vector<8xf32> to vector<8x1xf32>
    %25 = vector.broadcast %24 : vector<8x1xf32> to vector<8x8xf32>
    %26 = arith.subf %22, %25 : vector<8x8xf32>
    %27 = math.exp %26 : vector<8x8xf32>
    %cst_12 = arith.constant dense<0.000000e+00> : vector<8xf32>
    %28 = vector.multi_reduction <add>, %27, %cst_12 [1] : vector<8x8xf32> to vector<8xf32>
    %29 = vector.shape_cast %28 : vector<8xf32> to vector<8x1xf32>
    %30 = tpu.reciprocal %29 {approx = true} : vector<8x1xf32> -> vector<8x1xf32>
    %31 = vector.broadcast %30 : vector<8x1xf32> to vector<8x8xf32>
    %32 = arith.mulf %27, %31 : vector<8x8xf32>
    %33 = arith.truncf %32 : vector<8x8xf32> to vector<8x8xbf16>
    %34 = vector.extract_strided_slice %15 {offsets = [0, 0], sizes = [8, 8], strides = [1, 1]} : vector<8x32xbf16> to vector<8x8xbf16>
    %cst_13 = arith.constant dense<0.000000e+00> : vector<8x8xf32>
    %35 = tpu.matmul %33, %34, %cst_13 {dimension_numbers = #tpu.dot_dimension_numbers<[1], [0], [0], [1], [0, 0, 1, 1], [], []>} : vector<8x8xbf16>, vector<8x8xbf16>, vector<8x8xf32> -> vector<8x8xf32>
    %36 = arith.truncf %35 : vector<8x8xf32> to vector<8x8xbf16>
    %c0_14 = arith.constant 0 : index
    %c0_15 = arith.constant 0 : index
    %37 = vector.load %arg16[%c0_14, %c0_15] : memref<8x32xbf16, #tpu.memory_space<vmem>>, vector<8x8xbf16>
    tpu.vector_store %arg16[%c0_14, %c0_15], %36 {strides = array<i32>} : memref<8x32xbf16, #tpu.memory_space<vmem>>, vector<8x8xbf16>,
    %38 = vector.extract_strided_slice %11 {offsets = [0, 8], sizes = [8, 8], strides = [1, 1]} : vector<8x32xbf16> to vector<8x8xbf16>
    %39 = vector.extract_strided_slice %13 {offsets = [0, 8], sizes = [8, 8], strides = [1, 1]} : vector<8x32xbf16> to vector<8x8xbf16>
    %cst_16 = arith.constant dense<0.000000e+00> : vector<8x8xf32>
    %40 = tpu.matmul %38, %39, %cst_16 {dimension_numbers = #tpu.dot_dimension_numbers<[1], [1], [0], [0], [0, 0, 1, 0], [], []>} : vector<8x8xbf16>, vector<8x8xbf16>, vector<8x8xf32> -> vector<8x8xf32>
    %41 = vector.broadcast %17 : vector<1x8xf32> to vector<8x8xf32>
    %42 = arith.addf %40, %41 : vector<8x8xf32>
    %cst_17 = arith.constant dense<0xFF800000> : vector<8xf32>
    %43 = vector.multi_reduction <maximumf>, %42, %cst_17 [1] : vector<8x8xf32> to vector<8xf32>
    %44 = vector.shape_cast %43 : vector<8xf32> to vector<8x1xf32>
    %45 = vector.broadcast %44 : vector<8x1xf32> to vector<8x8xf32>
    %46 = arith.subf %42, %45 : vector<8x8xf32>
    %47 = math.exp %46 : vector<8x8xf32>
    %cst_18 = arith.constant dense<0.000000e+00> : vector<8xf32>
    %48 = vector.multi_reduction <add>, %47, %cst_18 [1] : vector<8x8xf32> to vector<8xf32>
    %49 = vector.shape_cast %48 : vector<8xf32> to vector<8x1xf32>
    %50 = tpu.reciprocal %49 {approx = true} : vector<8x1xf32> -> vector<8x1xf32>
    %51 = vector.broadcast %50 : vector<8x1xf32> to vector<8x8xf32>
    %52 = arith.mulf %47, %51 : vector<8x8xf32>
    %53 = arith.truncf %52 : vector<8x8xf32> to vector<8x8xbf16>
    %54 = vector.extract_strided_slice %15 {offsets = [0, 8], sizes = [8, 8], strides = [1, 1]} : vector<8x32xbf16> to vector<8x8xbf16>
    %cst_19 = arith.constant dense<0.000000e+00> : vector<8x8xf32>
    %55 = tpu.matmul %53, %54, %cst_19 {dimension_numbers = #tpu.dot_dimension_numbers<[1], [0], [0], [1], [0, 0, 1, 1], [], []>} : vector<8x8xbf16>, vector<8x8xbf16>, vector<8x8xf32> -> vector<8x8xf32>
    %56 = arith.truncf %55 : vector<8x8xf32> to vector<8x8xbf16>
    %c0_20 = arith.constant 0 : index
    %c8 = arith.constant 8 : index
    %57 = vector.load %arg16[%c0_20, %c8] : memref<8x32xbf16, #tpu.memory_space<vmem>>, vector<8x8xbf16>
    tpu.vector_store %arg16[%c0_20, %c8], %56 {strides = array<i32>} : memref<8x32xbf16, #tpu.memory_space<vmem>>, vector<8x8xbf16>,
    %58 = vector.extract_strided_slice %11 {offsets = [0, 16], sizes = [8, 8], strides = [1, 1]} : vector<8x32xbf16> to vector<8x8xbf16>
    %59 = vector.extract_strided_slice %13 {offsets = [0, 16], sizes = [8, 8], strides = [1, 1]} : vector<8x32xbf16> to vector<8x8xbf16>
    %cst_21 = arith.constant dense<0.000000e+00> : vector<8x8xf32>
    %60 = tpu.matmul %58, %59, %cst_21 {dimension_numbers = #tpu.dot_dimension_numbers<[1], [1], [0], [0], [0, 0, 1, 0], [], []>} : vector<8x8xbf16>, vector<8x8xbf16>, vector<8x8xf32> -> vector<8x8xf32>
    %61 = vector.broadcast %17 : vector<1x8xf32> to vector<8x8xf32>
    %62 = arith.addf %60, %61 : vector<8x8xf32>
    %cst_22 = arith.constant dense<0xFF800000> : vector<8xf32>
    %63 = vector.multi_reduction <maximumf>, %62, %cst_22 [1] : vector<8x8xf32> to vector<8xf32>
    %64 = vector.shape_cast %63 : vector<8xf32> to vector<8x1xf32>
    %65 = vector.broadcast %64 : vector<8x1xf32> to vector<8x8xf32>
    %66 = arith.subf %62, %65 : vector<8x8xf32>
    %67 = math.exp %66 : vector<8x8xf32>
    %cst_23 = arith.constant dense<0.000000e+00> : vector<8xf32>
    %68 = vector.multi_reduction <add>, %67, %cst_23 [1] : vector<8x8xf32> to vector<8xf32>
    %69 = vector.shape_cast %68 : vector<8xf32> to vector<8x1xf32>
    %70 = tpu.reciprocal %69 {approx = true} : vector<8x1xf32> -> vector<8x1xf32>
    %71 = vector.broadcast %70 : vector<8x1xf32> to vector<8x8xf32>
    %72 = arith.mulf %67, %71 : vector<8x8xf32>
    %73 = arith.truncf %72 : vector<8x8xf32> to vector<8x8xbf16>
    %74 = vector.extract_strided_slice %15 {offsets = [0, 16], sizes = [8, 8], strides = [1, 1]} : vector<8x32xbf16> to vector<8x8xbf16>
    %cst_24 = arith.constant dense<0.000000e+00> : vector<8x8xf32>
    %75 = tpu.matmul %73, %74, %cst_24 {dimension_numbers = #tpu.dot_dimension_numbers<[1], [0], [0], [1], [0, 0, 1, 1], [], []>} : vector<8x8xbf16>, vector<8x8xbf16>, vector<8x8xf32> -> vector<8x8xf32>
    %76 = arith.truncf %75 : vector<8x8xf32> to vector<8x8xbf16>
    %c0_25 = arith.constant 0 : index
    %c16 = arith.constant 16 : index
    %77 = vector.load %arg16[%c0_25, %c16] : memref<8x32xbf16, #tpu.memory_space<vmem>>, vector<8x8xbf16>
    tpu.vector_store %arg16[%c0_25, %c16], %76 {strides = array<i32>} : memref<8x32xbf16, #tpu.memory_space<vmem>>, vector<8x8xbf16>,
    %78 = vector.extract_strided_slice %11 {offsets = [0, 24], sizes = [8, 8], strides = [1, 1]} : vector<8x32xbf16> to vector<8x8xbf16>
    %79 = vector.extract_strided_slice %13 {offsets = [0, 24], sizes = [8, 8], strides = [1, 1]} : vector<8x32xbf16> to vector<8x8xbf16>
    %cst_26 = arith.constant dense<0.000000e+00> : vector<8x8xf32>
    %80 = tpu.matmul %78, %79, %cst_26 {dimension_numbers = #tpu.dot_dimension_numbers<[1], [1], [0], [0], [0, 0, 1, 0], [], []>} : vector<8x8xbf16>, vector<8x8xbf16>, vector<8x8xf32> -> vector<8x8xf32>
    %81 = vector.broadcast %17 : vector<1x8xf32> to vector<8x8xf32>
    %82 = arith.addf %80, %81 : vector<8x8xf32>
    %cst_27 = arith.constant dense<0xFF800000> : vector<8xf32>
    %83 = vector.multi_reduction <maximumf>, %82, %cst_27 [1] : vector<8x8xf32> to vector<8xf32>
    %84 = vector.shape_cast %83 : vector<8xf32> to vector<8x1xf32>
    %85 = vector.broadcast %84 : vector<8x1xf32> to vector<8x8xf32>
    %86 = arith.subf %82, %85 : vector<8x8xf32>
    %87 = math.exp %86 : vector<8x8xf32>
    %cst_28 = arith.constant dense<0.000000e+00> : vector<8xf32>
    %88 = vector.multi_reduction <add>, %87, %cst_28 [1] : vector<8x8xf32> to vector<8xf32>
    %89 = vector.shape_cast %88 : vector<8xf32> to vector<8x1xf32>
    %90 = tpu.reciprocal %89 {approx = true} : vector<8x1xf32> -> vector<8x1xf32>
    %91 = vector.broadcast %90 : vector<8x1xf32> to vector<8x8xf32>
    %92 = arith.mulf %87, %91 : vector<8x8xf32>
    %93 = arith.truncf %92 : vector<8x8xf32> to vector<8x8xbf16>
    %94 = vector.extract_strided_slice %15 {offsets = [0, 24], sizes = [8, 8], strides = [1, 1]} : vector<8x32xbf16> to vector<8x8xbf16>
    %cst_29 = arith.constant dense<0.000000e+00> : vector<8x8xf32>
    %95 = tpu.matmul %93, %94, %cst_29 {dimension_numbers = #tpu.dot_dimension_numbers<[1], [0], [0], [1], [0, 0, 1, 1], [], []>} : vector<8x8xbf16>, vector<8x8xbf16>, vector<8x8xf32> -> vector<8x8xf32>
    %96 = arith.truncf %95 : vector<8x8xf32> to vector<8x8xbf16>
    %c0_30 = arith.constant 0 : index
    %c24 = arith.constant 24 : index
    %97 = vector.load %arg16[%c0_30, %c24] : memref<8x32xbf16, #tpu.memory_space<vmem>>, vector<8x8xbf16>
    tpu.vector_store %arg16[%c0_30, %c24], %96 {strides = array<i32>} : memref<8x32xbf16, #tpu.memory_space<vmem>>, vector<8x8xbf16>,
    %c0_31 = arith.constant 0 : index
    %c0_32 = arith.constant 0 : index
    %98 = vector.load %arg16[%c0_31, %c0_32] : memref<8x32xbf16, #tpu.memory_space<vmem>>, vector<8x32xbf16>
    %c0_33 = arith.constant 0 : index
    %c0_34 = arith.constant 0 : index
    %99 = vector.load %arg5[%c0_33, %c0_34] : memref<32x32xbf16, #tpu.memory_space<vmem>>, vector<32x32xbf16>
    %cst_35 = arith.constant dense<0.000000e+00> : vector<8x32xf32>
    %100 = tpu.matmul %98, %99, %cst_35 {dimension_numbers = #tpu.dot_dimension_numbers<[1], [0], [0], [1], [0, 0, 1, 1], [], []>} : vector<8x32xbf16>, vector<32x32xbf16>, vector<8x32xf32> -> vector<8x32xf32>
    %c0_36 = arith.constant 0 : index
    %c0_37 = arith.constant 0 : index
    %101 = vector.load %arg6[%c0_36, %c0_37] : memref<1x32xf32, #tpu.memory_space<vmem>>, vector<1x32xf32>
    %102 = vector.broadcast %101 : vector<1x32xf32> to vector<8x32xf32>
    %103 = arith.addf %100, %102 : vector<8x32xf32>
    %104 = arith.addf %103, %1 : vector<8x32xf32>
    %c0_38 = arith.constant 0 : index
    %c0_39 = arith.constant 0 : index
    %105 = vector.load %arg7[%c0_38, %c0_39] : memref<1x32xf32, #tpu.memory_space<vmem>>, vector<1x32xf32>
    %c0_40 = arith.constant 0 : index
    %c0_41 = arith.constant 0 : index
    %106 = vector.load %arg8[%c0_40, %c0_41] : memref<1x32xf32, #tpu.memory_space<vmem>>, vector<1x32xf32>
    %cst_42 = arith.constant dense<0.000000e+00> : vector<8xf32>
    %107 = vector.multi_reduction <add>, %104, %cst_42 [1] : vector<8x32xf32> to vector<8xf32>
    %108 = vector.shape_cast %107 : vector<8xf32> to vector<8x1xf32>
    %cst_43 = arith.constant 3.200000e+01 : f32
    %109 = vector.broadcast %cst_43 : f32 to vector<8x1xf32>
    %110 = arith.divf %108, %109 : vector<8x1xf32>
    %111 = vector.broadcast %110 : vector<8x1xf32> to vector<8x32xf32>
    %112 = arith.subf %104, %111 : vector<8x32xf32>
    %113 = arith.mulf %112, %112 : vector<8x32xf32>
    %cst_44 = arith.constant dense<0.000000e+00> : vector<8xf32>
    %114 = vector.multi_reduction <add>, %113, %cst_44 [1] : vector<8x32xf32> to vector<8xf32>
    %115 = vector.shape_cast %114 : vector<8xf32> to vector<8x1xf32>
    %cst_45 = arith.constant 3.200000e+01 : f32
    %116 = vector.broadcast %cst_45 : f32 to vector<8x1xf32>
    %117 = arith.divf %115, %116 : vector<8x1xf32>
    %118 = vector.broadcast %110 : vector<8x1xf32> to vector<8x32xf32>
    %119 = arith.subf %104, %118 : vector<8x32xf32>
    %cst_46 = arith.constant 9.99999996E-13 : f32
    %120 = vector.broadcast %cst_46 : f32 to vector<8x1xf32>
    %121 = arith.addf %117, %120 : vector<8x1xf32>
    %122 = math.rsqrt %121 : vector<8x1xf32>
    %123 = vector.broadcast %122 : vector<8x1xf32> to vector<8x32xf32>
    %124 = arith.mulf %119, %123 : vector<8x32xf32>
    %125 = vector.broadcast %105 : vector<1x32xf32> to vector<8x32xf32>
    %126 = arith.mulf %124, %125 : vector<8x32xf32>
    %127 = vector.broadcast %106 : vector<1x32xf32> to vector<8x32xf32>
    %128 = arith.addf %126, %127 : vector<8x32xf32>
    %129 = arith.truncf %128 : vector<8x32xf32> to vector<8x32xbf16>
    %c0_47 = arith.constant 0 : index
    %c0_48 = arith.constant 0 : index
    %130 = vector.load %arg9[%c0_47, %c0_48] : memref<32x64xbf16, #tpu.memory_space<vmem>>, vector<32x64xbf16>
    %cst_49 = arith.constant dense<0.000000e+00> : vector<8x64xf32>
    %131 = tpu.matmul %129, %130, %cst_49 {dimension_numbers = #tpu.dot_dimension_numbers<[1], [0], [0], [1], [0, 0, 1, 1], [], []>} : vector<8x32xbf16>, vector<32x64xbf16>, vector<8x64xf32> -> vector<8x64xf32>
    %c0_50 = arith.constant 0 : index
    %c0_51 = arith.constant 0 : index
    %132 = vector.load %arg10[%c0_50, %c0_51] : memref<1x64xf32, #tpu.memory_space<vmem>>, vector<1x64xf32>
    %133 = vector.broadcast %132 : vector<1x64xf32> to vector<8x64xf32>
    %134 = arith.addf %131, %133 : vector<8x64xf32>
    %cst_52 = arith.constant 5.000000e-01 : f32
    %135 = vector.broadcast %cst_52 : f32 to vector<8x64xf32>
    %136 = arith.mulf %135, %134 : vector<8x64xf32>
    %cst_53 = arith.constant 4.471500e-02 : f32
    %137 = vector.broadcast %cst_53 : f32 to vector<8x64xf32>
    %138 = arith.mulf %137, %134 : vector<8x64xf32>
    %139 = arith.mulf %138, %134 : vector<8x64xf32>
    %140 = arith.mulf %139, %134 : vector<8x64xf32>
    %141 = arith.addf %134, %140 : vector<8x64xf32>
    %cst_54 = arith.constant 0.797884583 : f32
    %142 = vector.broadcast %cst_54 : f32 to vector<8x64xf32>
    %143 = arith.mulf %142, %141 : vector<8x64xf32>
    %144 = math.tanh %143 : vector<8x64xf32>
    %cst_55 = arith.constant 1.000000e+00 : f32
    %145 = vector.broadcast %cst_55 : f32 to vector<8x64xf32>
    %146 = arith.addf %145, %144 : vector<8x64xf32>
    %147 = arith.mulf %136, %146 : vector<8x64xf32>
    %148 = arith.truncf %147 : vector<8x64xf32> to vector<8x64xbf16>
    %c0_56 = arith.constant 0 : index
    %c0_57 = arith.constant 0 : index
    %149 = vector.load %arg11[%c0_56, %c0_57] : memref<64x32xbf16, #tpu.memory_space<vmem>>, vector<64x32xbf16>
    %cst_58 = arith.constant dense<0.000000e+00> : vector<8x32xf32>
    %150 = tpu.matmul %148, %149, %cst_58 {dimension_numbers = #tpu.dot_dimension_numbers<[1], [0], [0], [1], [0, 0, 1, 1], [], []>} : vector<8x64xbf16>, vector<64x32xbf16>, vector<8x32xf32> -> vector<8x32xf32>
    %c0_59 = arith.constant 0 : index
    %c0_60 = arith.constant 0 : index
    %151 = vector.load %arg12[%c0_59, %c0_60] : memref<1x32xf32, #tpu.memory_space<vmem>>, vector<1x32xf32>
    %152 = vector.broadcast %151 : vector<1x32xf32> to vector<8x32xf32>
    %153 = arith.addf %150, %152 : vector<8x32xf32>
    %154 = arith.addf %153, %128 : vector<8x32xf32>
    %c0_61 = arith.constant 0 : index
    %c0_62 = arith.constant 0 : index
    %155 = vector.load %arg13[%c0_61, %c0_62] : memref<1x32xf32, #tpu.memory_space<vmem>>, vector<1x32xf32>
    %c0_63 = arith.constant 0 : index
    %c0_64 = arith.constant 0 : index
    %156 = vector.load %arg14[%c0_63, %c0_64] : memref<1x32xf32, #tpu.memory_space<vmem>>, vector<1x32xf32>
    %cst_65 = arith.constant dense<0.000000e+00> : vector<8xf32>
    %157 = vector.multi_reduction <add>, %154, %cst_65 [1] : vector<8x32xf32> to vector<8xf32>
    %158 = vector.shape_cast %157 : vector<8xf32> to vector<8x1xf32>
    %cst_66 = arith.constant 3.200000e+01 : f32
    %159 = vector.broadcast %cst_66 : f32 to vector<8x1xf32>
    %160 = arith.divf %158, %159 : vector<8x1xf32>
    %161 = vector.broadcast %160 : vector<8x1xf32> to vector<8x32xf32>
    %162 = arith.subf %154, %161 : vector<8x32xf32>
    %163 = arith.mulf %162, %162 : vector<8x32xf32>
    %cst_67 = arith.constant dense<0.000000e+00> : vector<8xf32>
    %164 = vector.multi_reduction <add>, %163, %cst_67 [1] : vector<8x32xf32> to vector<8xf32>
    %165 = vector.shape_cast %164 : vector<8xf32> to vector<8x1xf32>
    %cst_68 = arith.constant 3.200000e+01 : f32
    %166 = vector.broadcast %cst_68 : f32 to vector<8x1xf32>
    %167 = arith.divf %165, %166 : vector<8x1xf32>
    %168 = vector.broadcast %160 : vector<8x1xf32> to vector<8x32xf32>
    %169 = arith.subf %154, %168 : vector<8x32xf32>
    %cst_69 = arith.constant 9.99999996E-13 : f32
    %170 = vector.broadcast %cst_69 : f32 to vector<8x1xf32>
    %171 = arith.addf %167, %170 : vector<8x1xf32>
    %172 = math.rsqrt %171 : vector<8x1xf32>
    %173 = vector.broadcast %172 : vector<8x1xf32> to vector<8x32xf32>
    %174 = arith.mulf %169, %173 : vector<8x32xf32>
    %175 = vector.broadcast %155 : vector<1x32xf32> to vector<8x32xf32>
    %176 = arith.mulf %174, %175 : vector<8x32xf32>
    %177 = vector.broadcast %156 : vector<1x32xf32> to vector<8x32xf32>
    %178 = arith.addf %176, %177 : vector<8x32xf32>
    %c0_70 = arith.constant 0 : index
    %c0_71 = arith.constant 0 : index
    %c0_72 = arith.constant 0 : index
    %179 = vector.load %arg15[%c0_70, %c0_71, %c0_72] : memref<1x8x32xf32, #tpu.memory_space<vmem>>, vector<1x8x32xf32>
    %180 = vector.shape_cast %179 : vector<1x8x32xf32> to vector<8x32xf32>
    %181 = vector.shape_cast %178 : vector<8x32xf32> to vector<1x8x32xf32>
    tpu.vector_store %arg15[%c0_70, %c0_71, %c0_72], %181 {strides = array<i32>} : memref<1x8x32xf32, #tpu.memory_space<vmem>>, vector<1x8x32xf32>,
    return
  }
  func.func @transform_0(%arg0: i32) -> (i32, i32, i32) {
    %c0_i32 = arith.constant 0 : i32
    %c0_i32_0 = arith.constant 0 : i32
    %c0_i32_1 = arith.constant 0 : i32
    return %arg0, %c0_i32, %c0_i32_0 : i32, i32, i32
  }
  func.func @transform_1(%arg0: i32) -> (i32, i32, i32) {
    %c0_i32 = arith.constant 0 : i32
    %c0_i32_0 = arith.constant 0 : i32
    %c0_i32_1 = arith.constant 0 : i32
    return %arg0, %c0_i32, %c0_i32_0 : i32, i32, i32
  }
  func.func @transform_2(%arg0: i32) -> (i32, i32) {
    %c0_i32 = arith.constant 0 : i32
    %c0_i32_0 = arith.constant 0 : i32
    %c0_i32_1 = arith.constant 0 : i32
    return %c0_i32, %c0_i32_0 : i32, i32
  }
  func.func @transform_3(%arg0: i32) -> (i32, i32) {
    %c0_i32 = arith.constant 0 : i32
    %c0_i32_0 = arith.constant 0 : i32
    %c0_i32_1 = arith.constant 0 : i32
    return %c0_i32, %c0_i32_0 : i32, i32
  }
  func.func @transform_4(%arg0: i32) -> (i32, i32) {
    %c0_i32 = arith.constant 0 : i32
    %c0_i32_0 = arith.constant 0 : i32
    %c0_i32_1 = arith.constant 0 : i32
    return %c0_i32, %c0_i32_0 : i32, i32
  }
  func.func @transform_5(%arg0: i32) -> (i32, i32) {
    %c0_i32 = arith.constant 0 : i32
    %c0_i32_0 = arith.constant 0 : i32
    %c0_i32_1 = arith.constant 0 : i32
    return %c0_i32, %c0_i32_0 : i32, i32
  }
  func.func @transform_6(%arg0: i32) -> (i32, i32) {
    %c0_i32 = arith.constant 0 : i32
    %c0_i32_0 = arith.constant 0 : i32
    %c0_i32_1 = arith.constant 0 : i32
    return %c0_i32, %c0_i32_0 : i32, i32
  }
  func.func @transform_7(%arg0: i32) -> (i32, i32) {
    %c0_i32 = arith.constant 0 : i32
    %c0_i32_0 = arith.constant 0 : i32
    %c0_i32_1 = arith.constant 0 : i32
    return %c0_i32, %c0_i32_0 : i32, i32
  }
  func.func @transform_8(%arg0: i32) -> (i32, i32) {
    %c0_i32 = arith.constant 0 : i32
    %c0_i32_0 = arith.constant 0 : i32
    %c0_i32_1 = arith.constant 0 : i32
    return %c0_i32, %c0_i32_0 : i32, i32
  }
  func.func @transform_9(%arg0: i32) -> (i32, i32) {
    %c0_i32 = arith.constant 0 : i32
    %c0_i32_0 = arith.constant 0 : i32
    %c0_i32_1 = arith.constant 0 : i32
    return %c0_i32, %c0_i32_0 : i32, i32
  }
  func.func @transform_10(%arg0: i32) -> (i32, i32) {
    %c0_i32 = arith.constant 0 : i32
    %c0_i32_0 = arith.constant 0 : i32
    %c0_i32_1 = arith.constant 0 : i32
    return %c0_i32, %c0_i32_0 : i32, i32
  }
  func.func @transform_11(%arg0: i32) -> (i32, i32) {
    %c0_i32 = arith.constant 0 : i32
    %c0_i32_0 = arith.constant 0 : i32
    %c0_i32_1 = arith.constant 0 : i32
    return %c0_i32, %c0_i32_0 : i32, i32
  }
  func.func @transform_12(%arg0: i32) -> (i32, i32) {
    %c0_i32 = arith.constant 0 : i32
    %c0_i32_0 = arith.constant 0 : i32
    %c0_i32_1 = arith.constant 0 : i32
    return %c0_i32, %c0_i32_0 : i32, i32
  }
  func.func @transform_13(%arg0: i32) -> (i32, i32) {
    %c0_i32 = arith.constant 0 : i32
    %c0_i32_0 = arith.constant 0 : i32
    %c0_i32_1 = arith.constant 0 : i32
    return %c0_i32, %c0_i32_0 : i32, i32
  }
  func.func @transform_14(%arg0: i32) -> (i32, i32, i32) {
    %c0_i32 = arith.constant 0 : i32
    %c0_i32_0 = arith.constant 0 : i32
    %c0_i32_1 = arith.constant 0 : i32
    return %arg0, %c0_i32, %c0_i32_0 : i32, i32, i32
  }
}

module attributes {stable_mosaic.version = 11 : i64} {
  func.func @_decoder_layer_kernel(%arg0: i32, %arg1: memref<1x16x32xf32, #tpu.memory_space<vmem>>, %arg2: memref<1x8x32xf32, #tpu.memory_space<vmem>>, %arg3: memref<1x1x8xf32, #tpu.memory_space<vmem>>, %arg4: memref<32x96xbf16, #tpu.memory_space<vmem>>, %arg5: memref<1x96xf32, #tpu.memory_space<vmem>>, %arg6: memref<32x32xbf16, #tpu.memory_space<vmem>>, %arg7: memref<1x32xf32, #tpu.memory_space<vmem>>, %arg8: memref<1x32xf32, #tpu.memory_space<vmem>>, %arg9: memref<1x32xf32, #tpu.memory_space<vmem>>, %arg10: memref<32x32xbf16, #tpu.memory_space<vmem>>, %arg11: memref<1x32xf32, #tpu.memory_space<vmem>>, %arg12: memref<32x64xbf16, #tpu.memory_space<vmem>>, %arg13: memref<1x64xf32, #tpu.memory_space<vmem>>, %arg14: memref<32x32xbf16, #tpu.memory_space<vmem>>, %arg15: memref<1x32xf32, #tpu.memory_space<vmem>>, %arg16: memref<1x32xf32, #tpu.memory_space<vmem>>, %arg17: memref<1x32xf32, #tpu.memory_space<vmem>>, %arg18: memref<32x64xbf16, #tpu.memory_space<vmem>>, %arg19: memref<1x64xf32, #tpu.memory_space<vmem>>, %arg20: memref<64x32xbf16, #tpu.memory_space<vmem>>, %arg21: memref<1x32xf32, #tpu.memory_space<vmem>>, %arg22: memref<1x32xf32, #tpu.memory_space<vmem>>, %arg23: memref<1x32xf32, #tpu.memory_space<vmem>>, %arg24: memref<1x16x32xf32, #tpu.memory_space<vmem>>, %arg25: memref<16x32xbf16, #tpu.memory_space<vmem>>) attributes {dimension_semantics = [#tpu.dimension_semantics<parallel>], iteration_bounds = array<i64: 2>, scalar_prefetch = 0 : i64, scratch_operands = 1 : i64, tpu.core_type = #tpu.core_type<tc>, window_params = [{transform_indices = @transform_0, window_bounds = array<i64: 1, 16, 32>}, {transform_indices = @transform_1, window_bounds = array<i64: 1, 8, 32>}, {transform_indices = @transform_2, window_bounds = array<i64: 1, 1, 8>}, {pipeline_mode = #tpu.pipeline_mode<synchronous>, transform_indices = @transform_3, window_bounds = array<i64: 32, 96>}, {pipeline_mode = #tpu.pipeline_mode<synchronous>, transform_indices = @transform_4, window_bounds = array<i64: 1, 96>}, {pipeline_mode = #tpu.pipeline_mode<synchronous>, transform_indices = @transform_5, window_bounds = array<i64: 32, 32>}, {pipeline_mode = #tpu.pipeline_mode<synchronous>, transform_indices = @transform_6, window_bounds = array<i64: 1, 32>}, {pipeline_mode = #tpu.pipeline_mode<synchronous>, transform_indices = @transform_7, window_bounds = array<i64: 1, 32>}, {pipeline_mode = #tpu.pipeline_mode<synchronous>, transform_indices = @transform_8, window_bounds = array<i64: 1, 32>}, {pipeline_mode = #tpu.pipeline_mode<synchronous>, transform_indices = @transform_9, window_bounds = array<i64: 32, 32>}, {pipeline_mode = #tpu.pipeline_mode<synchronous>, transform_indices = @transform_10, window_bounds = array<i64: 1, 32>}, {pipeline_mode = #tpu.pipeline_mode<synchronous>, transform_indices = @transform_11, window_bounds = array<i64: 32, 64>}, {pipeline_mode = #tpu.pipeline_mode<synchronous>, transform_indices = @transform_12, window_bounds = array<i64: 1, 64>}, {pipeline_mode = #tpu.pipeline_mode<synchronous>, transform_indices = @transform_13, window_bounds = array<i64: 32, 32>}, {pipeline_mode = #tpu.pipeline_mode<synchronous>, transform_indices = @transform_14, window_bounds = array<i64: 1, 32>}, {pipeline_mode = #tpu.pipeline_mode<synchronous>, transform_indices = @transform_15, window_bounds = array<i64: 1, 32>}, {pipeline_mode = #tpu.pipeline_mode<synchronous>, transform_indices = @transform_16, window_bounds = array<i64: 1, 32>}, {pipeline_mode = #tpu.pipeline_mode<synchronous>, transform_indices = @transform_17, window_bounds = array<i64: 32, 64>}, {pipeline_mode = #tpu.pipeline_mode<synchronous>, transform_indices = @transform_18, window_bounds = array<i64: 1, 64>}, {pipeline_mode = #tpu.pipeline_mode<synchronous>, transform_indices = @transform_19, window_bounds = array<i64: 64, 32>}, {pipeline_mode = #tpu.pipeline_mode<synchronous>, transform_indices = @transform_20, window_bounds = array<i64: 1, 32>}, {pipeline_mode = #tpu.pipeline_mode<synchronous>, transform_indices = @transform_21, window_bounds = array<i64: 1, 32>}, {pipeline_mode = #tpu.pipeline_mode<synchronous>, transform_indices = @transform_22, window_bounds = array<i64: 1, 32>}, {transform_indices = @transform_23, window_bounds = array<i64: 1, 16, 32>}]} {
    %c0 = arith.constant 0 : index
    %c0_0 = arith.constant 0 : index
    %c0_1 = arith.constant 0 : index
    %0 = vector.load %arg1[%c0, %c0_0, %c0_1] : memref<1x16x32xf32, #tpu.memory_space<vmem>>, vector<1x16x32xf32>
    %1 = vector.shape_cast %0 : vector<1x16x32xf32> to vector<16x32xf32>
    %c0_2 = arith.constant 0 : index
    %c0_3 = arith.constant 0 : index
    %c0_4 = arith.constant 0 : index
    %2 = vector.load %arg2[%c0_2, %c0_3, %c0_4] : memref<1x8x32xf32, #tpu.memory_space<vmem>>, vector<1x8x32xf32>
    %3 = vector.shape_cast %2 : vector<1x8x32xf32> to vector<8x32xf32>
    %4 = tpu.iota {dimensions = array<i32: 1>} : vector<1x16xi32>
    %c15_i32 = arith.constant 15 : i32
    %5 = vector.broadcast %c15_i32 : i32 to vector<1x16xi32>
    %6 = arith.cmpi slt, %4, %5 : vector<1x16xi32>
    %cst = arith.constant 0.000000e+00 : f32
    %cst_5 = arith.constant -1.000000e+04 : f32
    %7 = vector.broadcast %cst : f32 to vector<1x16xf32>
    %8 = vector.broadcast %cst_5 : f32 to vector<1x16xf32>
    %9 = arith.select %6, %7, %8 : vector<1x16xi1>, vector<1x16xf32>
    %c0_6 = arith.constant 0 : index
    %c0_7 = arith.constant 0 : index
    %10 = vector.load %arg4[%c0_6, %c0_7] : memref<32x96xbf16, #tpu.memory_space<vmem>>, vector<32x96xbf16>
    %11 = arith.truncf %1 : vector<16x32xf32> to vector<16x32xbf16>
    %cst_8 = arith.constant dense<0.000000e+00> : vector<16x96xf32>
    %12 = tpu.matmul %11, %10, %cst_8 {dimension_numbers = #tpu.dot_dimension_numbers<[1], [0], [0], [1], [0, 0, 1, 1], [], []>} : vector<16x32xbf16>, vector<32x96xbf16>, vector<16x96xf32> -> vector<16x96xf32>
    %c0_9 = arith.constant 0 : index
    %c0_10 = arith.constant 0 : index
    %13 = vector.load %arg5[%c0_9, %c0_10] : memref<1x96xf32, #tpu.memory_space<vmem>>, vector<1x96xf32>
    %14 = vector.broadcast %13 : vector<1x96xf32> to vector<16x96xf32>
    %15 = arith.addf %12, %14 : vector<16x96xf32>
    %16 = vector.extract_strided_slice %15 {offsets = [0, 0], sizes = [16, 32], strides = [1, 1]} : vector<16x96xf32> to vector<16x32xf32>
    %cst_11 = arith.constant 0.353553385 : f32
    %17 = vector.broadcast %cst_11 : f32 to vector<16x32xf32>
    %18 = arith.mulf %16, %17 : vector<16x32xf32>
    %19 = arith.truncf %18 : vector<16x32xf32> to vector<16x32xbf16>
    %20 = vector.extract_strided_slice %15 {offsets = [0, 32], sizes = [16, 32], strides = [1, 1]} : vector<16x96xf32> to vector<16x32xf32>
    %21 = arith.truncf %20 : vector<16x32xf32> to vector<16x32xbf16>
    %22 = vector.extract_strided_slice %15 {offsets = [0, 64], sizes = [16, 32], strides = [1, 1]} : vector<16x96xf32> to vector<16x32xf32>
    %23 = arith.truncf %22 : vector<16x32xf32> to vector<16x32xbf16>
    %24 = vector.extract_strided_slice %19 {offsets = [0, 0], sizes = [16, 8], strides = [1, 1]} : vector<16x32xbf16> to vector<16x8xbf16>
    %25 = vector.extract_strided_slice %21 {offsets = [0, 0], sizes = [16, 8], strides = [1, 1]} : vector<16x32xbf16> to vector<16x8xbf16>
    %cst_12 = arith.constant dense<0.000000e+00> : vector<16x16xf32>
    %26 = tpu.matmul %24, %25, %cst_12 {dimension_numbers = #tpu.dot_dimension_numbers<[1], [1], [0], [0], [0, 0, 1, 0], [], []>} : vector<16x8xbf16>, vector<16x8xbf16>, vector<16x16xf32> -> vector<16x16xf32>
    %27 = vector.broadcast %9 : vector<1x16xf32> to vector<16x16xf32>
    %28 = arith.addf %26, %27 : vector<16x16xf32>
    %cst_13 = arith.constant dense<0xFF800000> : vector<16xf32>
    %29 = vector.multi_reduction <maximumf>, %28, %cst_13 [1] : vector<16x16xf32> to vector<16xf32>
    %30 = vector.shape_cast %29 : vector<16xf32> to vector<16x1xf32>
    %31 = vector.broadcast %30 : vector<16x1xf32> to vector<16x16xf32>
    %32 = arith.subf %28, %31 : vector<16x16xf32>
    %33 = math.exp %32 : vector<16x16xf32>
    %cst_14 = arith.constant dense<0.000000e+00> : vector<16xf32>
    %34 = vector.multi_reduction <add>, %33, %cst_14 [1] : vector<16x16xf32> to vector<16xf32>
    %35 = vector.shape_cast %34 : vector<16xf32> to vector<16x1xf32>
    %36 = tpu.reciprocal %35 {approx = true} : vector<16x1xf32> -> vector<16x1xf32>
    %37 = vector.broadcast %36 : vector<16x1xf32> to vector<16x16xf32>
    %38 = arith.mulf %33, %37 : vector<16x16xf32>
    %39 = arith.truncf %38 : vector<16x16xf32> to vector<16x16xbf16>
    %40 = vector.extract_strided_slice %23 {offsets = [0, 0], sizes = [16, 8], strides = [1, 1]} : vector<16x32xbf16> to vector<16x8xbf16>
    %cst_15 = arith.constant dense<0.000000e+00> : vector<16x8xf32>
    %41 = tpu.matmul %39, %40, %cst_15 {dimension_numbers = #tpu.dot_dimension_numbers<[1], [0], [0], [1], [0, 0, 1, 1], [], []>} : vector<16x16xbf16>, vector<16x8xbf16>, vector<16x8xf32> -> vector<16x8xf32>
    %42 = arith.truncf %41 : vector<16x8xf32> to vector<16x8xbf16>
    %c0_16 = arith.constant 0 : index
    %c0_17 = arith.constant 0 : index
    %43 = vector.load %arg25[%c0_16, %c0_17] : memref<16x32xbf16, #tpu.memory_space<vmem>>, vector<16x8xbf16>
    tpu.vector_store %arg25[%c0_16, %c0_17], %42 {strides = array<i32>} : memref<16x32xbf16, #tpu.memory_space<vmem>>, vector<16x8xbf16>,
    %44 = vector.extract_strided_slice %19 {offsets = [0, 8], sizes = [16, 8], strides = [1, 1]} : vector<16x32xbf16> to vector<16x8xbf16>
    %45 = vector.extract_strided_slice %21 {offsets = [0, 8], sizes = [16, 8], strides = [1, 1]} : vector<16x32xbf16> to vector<16x8xbf16>
    %cst_18 = arith.constant dense<0.000000e+00> : vector<16x16xf32>
    %46 = tpu.matmul %44, %45, %cst_18 {dimension_numbers = #tpu.dot_dimension_numbers<[1], [1], [0], [0], [0, 0, 1, 0], [], []>} : vector<16x8xbf16>, vector<16x8xbf16>, vector<16x16xf32> -> vector<16x16xf32>
    %47 = vector.broadcast %9 : vector<1x16xf32> to vector<16x16xf32>
    %48 = arith.addf %46, %47 : vector<16x16xf32>
    %cst_19 = arith.constant dense<0xFF800000> : vector<16xf32>
    %49 = vector.multi_reduction <maximumf>, %48, %cst_19 [1] : vector<16x16xf32> to vector<16xf32>
    %50 = vector.shape_cast %49 : vector<16xf32> to vector<16x1xf32>
    %51 = vector.broadcast %50 : vector<16x1xf32> to vector<16x16xf32>
    %52 = arith.subf %48, %51 : vector<16x16xf32>
    %53 = math.exp %52 : vector<16x16xf32>
    %cst_20 = arith.constant dense<0.000000e+00> : vector<16xf32>
    %54 = vector.multi_reduction <add>, %53, %cst_20 [1] : vector<16x16xf32> to vector<16xf32>
    %55 = vector.shape_cast %54 : vector<16xf32> to vector<16x1xf32>
    %56 = tpu.reciprocal %55 {approx = true} : vector<16x1xf32> -> vector<16x1xf32>
    %57 = vector.broadcast %56 : vector<16x1xf32> to vector<16x16xf32>
    %58 = arith.mulf %53, %57 : vector<16x16xf32>
    %59 = arith.truncf %58 : vector<16x16xf32> to vector<16x16xbf16>
    %60 = vector.extract_strided_slice %23 {offsets = [0, 8], sizes = [16, 8], strides = [1, 1]} : vector<16x32xbf16> to vector<16x8xbf16>
    %cst_21 = arith.constant dense<0.000000e+00> : vector<16x8xf32>
    %61 = tpu.matmul %59, %60, %cst_21 {dimension_numbers = #tpu.dot_dimension_numbers<[1], [0], [0], [1], [0, 0, 1, 1], [], []>} : vector<16x16xbf16>, vector<16x8xbf16>, vector<16x8xf32> -> vector<16x8xf32>
    %62 = arith.truncf %61 : vector<16x8xf32> to vector<16x8xbf16>
    %c0_22 = arith.constant 0 : index
    %c8 = arith.constant 8 : index
    %63 = vector.load %arg25[%c0_22, %c8] : memref<16x32xbf16, #tpu.memory_space<vmem>>, vector<16x8xbf16>
    tpu.vector_store %arg25[%c0_22, %c8], %62 {strides = array<i32>} : memref<16x32xbf16, #tpu.memory_space<vmem>>, vector<16x8xbf16>,
    %64 = vector.extract_strided_slice %19 {offsets = [0, 16], sizes = [16, 8], strides = [1, 1]} : vector<16x32xbf16> to vector<16x8xbf16>
    %65 = vector.extract_strided_slice %21 {offsets = [0, 16], sizes = [16, 8], strides = [1, 1]} : vector<16x32xbf16> to vector<16x8xbf16>
    %cst_23 = arith.constant dense<0.000000e+00> : vector<16x16xf32>
    %66 = tpu.matmul %64, %65, %cst_23 {dimension_numbers = #tpu.dot_dimension_numbers<[1], [1], [0], [0], [0, 0, 1, 0], [], []>} : vector<16x8xbf16>, vector<16x8xbf16>, vector<16x16xf32> -> vector<16x16xf32>
    %67 = vector.broadcast %9 : vector<1x16xf32> to vector<16x16xf32>
    %68 = arith.addf %66, %67 : vector<16x16xf32>
    %cst_24 = arith.constant dense<0xFF800000> : vector<16xf32>
    %69 = vector.multi_reduction <maximumf>, %68, %cst_24 [1] : vector<16x16xf32> to vector<16xf32>
    %70 = vector.shape_cast %69 : vector<16xf32> to vector<16x1xf32>
    %71 = vector.broadcast %70 : vector<16x1xf32> to vector<16x16xf32>
    %72 = arith.subf %68, %71 : vector<16x16xf32>
    %73 = math.exp %72 : vector<16x16xf32>
    %cst_25 = arith.constant dense<0.000000e+00> : vector<16xf32>
    %74 = vector.multi_reduction <add>, %73, %cst_25 [1] : vector<16x16xf32> to vector<16xf32>
    %75 = vector.shape_cast %74 : vector<16xf32> to vector<16x1xf32>
    %76 = tpu.reciprocal %75 {approx = true} : vector<16x1xf32> -> vector<16x1xf32>
    %77 = vector.broadcast %76 : vector<16x1xf32> to vector<16x16xf32>
    %78 = arith.mulf %73, %77 : vector<16x16xf32>
    %79 = arith.truncf %78 : vector<16x16xf32> to vector<16x16xbf16>
    %80 = vector.extract_strided_slice %23 {offsets = [0, 16], sizes = [16, 8], strides = [1, 1]} : vector<16x32xbf16> to vector<16x8xbf16>
    %cst_26 = arith.constant dense<0.000000e+00> : vector<16x8xf32>
    %81 = tpu.matmul %79, %80, %cst_26 {dimension_numbers = #tpu.dot_dimension_numbers<[1], [0], [0], [1], [0, 0, 1, 1], [], []>} : vector<16x16xbf16>, vector<16x8xbf16>, vector<16x8xf32> -> vector<16x8xf32>
    %82 = arith.truncf %81 : vector<16x8xf32> to vector<16x8xbf16>
    %c0_27 = arith.constant 0 : index
    %c16 = arith.constant 16 : index
    %83 = vector.load %arg25[%c0_27, %c16] : memref<16x32xbf16, #tpu.memory_space<vmem>>, vector<16x8xbf16>
    tpu.vector_store %arg25[%c0_27, %c16], %82 {strides = array<i32>} : memref<16x32xbf16, #tpu.memory_space<vmem>>, vector<16x8xbf16>,
    %84 = vector.extract_strided_slice %19 {offsets = [0, 24], sizes = [16, 8], strides = [1, 1]} : vector<16x32xbf16> to vector<16x8xbf16>
    %85 = vector.extract_strided_slice %21 {offsets = [0, 24], sizes = [16, 8], strides = [1, 1]} : vector<16x32xbf16> to vector<16x8xbf16>
    %cst_28 = arith.constant dense<0.000000e+00> : vector<16x16xf32>
    %86 = tpu.matmul %84, %85, %cst_28 {dimension_numbers = #tpu.dot_dimension_numbers<[1], [1], [0], [0], [0, 0, 1, 0], [], []>} : vector<16x8xbf16>, vector<16x8xbf16>, vector<16x16xf32> -> vector<16x16xf32>
    %87 = vector.broadcast %9 : vector<1x16xf32> to vector<16x16xf32>
    %88 = arith.addf %86, %87 : vector<16x16xf32>
    %cst_29 = arith.constant dense<0xFF800000> : vector<16xf32>
    %89 = vector.multi_reduction <maximumf>, %88, %cst_29 [1] : vector<16x16xf32> to vector<16xf32>
    %90 = vector.shape_cast %89 : vector<16xf32> to vector<16x1xf32>
    %91 = vector.broadcast %90 : vector<16x1xf32> to vector<16x16xf32>
    %92 = arith.subf %88, %91 : vector<16x16xf32>
    %93 = math.exp %92 : vector<16x16xf32>
    %cst_30 = arith.constant dense<0.000000e+00> : vector<16xf32>
    %94 = vector.multi_reduction <add>, %93, %cst_30 [1] : vector<16x16xf32> to vector<16xf32>
    %95 = vector.shape_cast %94 : vector<16xf32> to vector<16x1xf32>
    %96 = tpu.reciprocal %95 {approx = true} : vector<16x1xf32> -> vector<16x1xf32>
    %97 = vector.broadcast %96 : vector<16x1xf32> to vector<16x16xf32>
    %98 = arith.mulf %93, %97 : vector<16x16xf32>
    %99 = arith.truncf %98 : vector<16x16xf32> to vector<16x16xbf16>
    %100 = vector.extract_strided_slice %23 {offsets = [0, 24], sizes = [16, 8], strides = [1, 1]} : vector<16x32xbf16> to vector<16x8xbf16>
    %cst_31 = arith.constant dense<0.000000e+00> : vector<16x8xf32>
    %101 = tpu.matmul %99, %100, %cst_31 {dimension_numbers = #tpu.dot_dimension_numbers<[1], [0], [0], [1], [0, 0, 1, 1], [], []>} : vector<16x16xbf16>, vector<16x8xbf16>, vector<16x8xf32> -> vector<16x8xf32>
    %102 = arith.truncf %101 : vector<16x8xf32> to vector<16x8xbf16>
    %c0_32 = arith.constant 0 : index
    %c24 = arith.constant 24 : index
    %103 = vector.load %arg25[%c0_32, %c24] : memref<16x32xbf16, #tpu.memory_space<vmem>>, vector<16x8xbf16>
    tpu.vector_store %arg25[%c0_32, %c24], %102 {strides = array<i32>} : memref<16x32xbf16, #tpu.memory_space<vmem>>, vector<16x8xbf16>,
    %c0_33 = arith.constant 0 : index
    %c0_34 = arith.constant 0 : index
    %104 = vector.load %arg25[%c0_33, %c0_34] : memref<16x32xbf16, #tpu.memory_space<vmem>>, vector<16x32xbf16>
    %c0_35 = arith.constant 0 : index
    %c0_36 = arith.constant 0 : index
    %105 = vector.load %arg6[%c0_35, %c0_36] : memref<32x32xbf16, #tpu.memory_space<vmem>>, vector<32x32xbf16>
    %cst_37 = arith.constant dense<0.000000e+00> : vector<16x32xf32>
    %106 = tpu.matmul %104, %105, %cst_37 {dimension_numbers = #tpu.dot_dimension_numbers<[1], [0], [0], [1], [0, 0, 1, 1], [], []>} : vector<16x32xbf16>, vector<32x32xbf16>, vector<16x32xf32> -> vector<16x32xf32>
    %c0_38 = arith.constant 0 : index
    %c0_39 = arith.constant 0 : index
    %107 = vector.load %arg7[%c0_38, %c0_39] : memref<1x32xf32, #tpu.memory_space<vmem>>, vector<1x32xf32>
    %108 = vector.broadcast %107 : vector<1x32xf32> to vector<16x32xf32>
    %109 = arith.addf %106, %108 : vector<16x32xf32>
    %110 = arith.addf %109, %1 : vector<16x32xf32>
    %c0_40 = arith.constant 0 : index
    %c0_41 = arith.constant 0 : index
    %111 = vector.load %arg8[%c0_40, %c0_41] : memref<1x32xf32, #tpu.memory_space<vmem>>, vector<1x32xf32>
    %c0_42 = arith.constant 0 : index
    %c0_43 = arith.constant 0 : index
    %112 = vector.load %arg9[%c0_42, %c0_43] : memref<1x32xf32, #tpu.memory_space<vmem>>, vector<1x32xf32>
    %cst_44 = arith.constant dense<0.000000e+00> : vector<16xf32>
    %113 = vector.multi_reduction <add>, %110, %cst_44 [1] : vector<16x32xf32> to vector<16xf32>
    %114 = vector.shape_cast %113 : vector<16xf32> to vector<16x1xf32>
    %cst_45 = arith.constant 3.200000e+01 : f32
    %115 = vector.broadcast %cst_45 : f32 to vector<16x1xf32>
    %116 = arith.divf %114, %115 : vector<16x1xf32>
    %117 = vector.broadcast %116 : vector<16x1xf32> to vector<16x32xf32>
    %118 = arith.subf %110, %117 : vector<16x32xf32>
    %119 = arith.mulf %118, %118 : vector<16x32xf32>
    %cst_46 = arith.constant dense<0.000000e+00> : vector<16xf32>
    %120 = vector.multi_reduction <add>, %119, %cst_46 [1] : vector<16x32xf32> to vector<16xf32>
    %121 = vector.shape_cast %120 : vector<16xf32> to vector<16x1xf32>
    %cst_47 = arith.constant 3.200000e+01 : f32
    %122 = vector.broadcast %cst_47 : f32 to vector<16x1xf32>
    %123 = arith.divf %121, %122 : vector<16x1xf32>
    %124 = vector.broadcast %116 : vector<16x1xf32> to vector<16x32xf32>
    %125 = arith.subf %110, %124 : vector<16x32xf32>
    %cst_48 = arith.constant 9.99999996E-13 : f32
    %126 = vector.broadcast %cst_48 : f32 to vector<16x1xf32>
    %127 = arith.addf %123, %126 : vector<16x1xf32>
    %128 = math.rsqrt %127 : vector<16x1xf32>
    %129 = vector.broadcast %128 : vector<16x1xf32> to vector<16x32xf32>
    %130 = arith.mulf %125, %129 : vector<16x32xf32>
    %131 = vector.broadcast %111 : vector<1x32xf32> to vector<16x32xf32>
    %132 = arith.mulf %130, %131 : vector<16x32xf32>
    %133 = vector.broadcast %112 : vector<1x32xf32> to vector<16x32xf32>
    %134 = arith.addf %132, %133 : vector<16x32xf32>
    %c0_49 = arith.constant 0 : index
    %c0_50 = arith.constant 0 : index
    %135 = vector.load %arg10[%c0_49, %c0_50] : memref<32x32xbf16, #tpu.memory_space<vmem>>, vector<32x32xbf16>
    %136 = arith.truncf %134 : vector<16x32xf32> to vector<16x32xbf16>
    %cst_51 = arith.constant dense<0.000000e+00> : vector<16x32xf32>
    %137 = tpu.matmul %136, %135, %cst_51 {dimension_numbers = #tpu.dot_dimension_numbers<[1], [0], [0], [1], [0, 0, 1, 1], [], []>} : vector<16x32xbf16>, vector<32x32xbf16>, vector<16x32xf32> -> vector<16x32xf32>
    %c0_52 = arith.constant 0 : index
    %c0_53 = arith.constant 0 : index
    %138 = vector.load %arg11[%c0_52, %c0_53] : memref<1x32xf32, #tpu.memory_space<vmem>>, vector<1x32xf32>
    %139 = vector.broadcast %138 : vector<1x32xf32> to vector<16x32xf32>
    %140 = arith.addf %137, %139 : vector<16x32xf32>
    %cst_54 = arith.constant 0.353553385 : f32
    %141 = vector.broadcast %cst_54 : f32 to vector<16x32xf32>
    %142 = arith.mulf %140, %141 : vector<16x32xf32>
    %143 = arith.truncf %142 : vector<16x32xf32> to vector<16x32xbf16>
    %c0_55 = arith.constant 0 : index
    %c0_56 = arith.constant 0 : index
    %144 = vector.load %arg12[%c0_55, %c0_56] : memref<32x64xbf16, #tpu.memory_space<vmem>>, vector<32x64xbf16>
    %145 = arith.truncf %3 : vector<8x32xf32> to vector<8x32xbf16>
    %cst_57 = arith.constant dense<0.000000e+00> : vector<8x64xf32>
    %146 = tpu.matmul %145, %144, %cst_57 {dimension_numbers = #tpu.dot_dimension_numbers<[1], [0], [0], [1], [0, 0, 1, 1], [], []>} : vector<8x32xbf16>, vector<32x64xbf16>, vector<8x64xf32> -> vector<8x64xf32>
    %c0_58 = arith.constant 0 : index
    %c0_59 = arith.constant 0 : index
    %147 = vector.load %arg13[%c0_58, %c0_59] : memref<1x64xf32, #tpu.memory_space<vmem>>, vector<1x64xf32>
    %148 = vector.broadcast %147 : vector<1x64xf32> to vector<8x64xf32>
    %149 = arith.addf %146, %148 : vector<8x64xf32>
    %150 = vector.extract_strided_slice %149 {offsets = [0, 0], sizes = [8, 32], strides = [1, 1]} : vector<8x64xf32> to vector<8x32xf32>
    %151 = arith.truncf %150 : vector<8x32xf32> to vector<8x32xbf16>
    %152 = vector.extract_strided_slice %149 {offsets = [0, 32], sizes = [8, 32], strides = [1, 1]} : vector<8x64xf32> to vector<8x32xf32>
    %153 = arith.truncf %152 : vector<8x32xf32> to vector<8x32xbf16>
    %c0_60 = arith.constant 0 : index
    %c0_61 = arith.constant 0 : index
    %c0_62 = arith.constant 0 : index
    %154 = vector.load %arg3[%c0_60, %c0_61, %c0_62] : memref<1x1x8xf32, #tpu.memory_space<vmem>>, vector<1x1x8xf32>
    %155 = vector.shape_cast %154 : vector<1x1x8xf32> to vector<1x8xf32>
    %156 = vector.extract_strided_slice %143 {offsets = [0, 0], sizes = [16, 8], strides = [1, 1]} : vector<16x32xbf16> to vector<16x8xbf16>
    %157 = vector.extract_strided_slice %151 {offsets = [0, 0], sizes = [8, 8], strides = [1, 1]} : vector<8x32xbf16> to vector<8x8xbf16>
    %cst_63 = arith.constant dense<0.000000e+00> : vector<16x8xf32>
    %158 = tpu.matmul %156, %157, %cst_63 {dimension_numbers = #tpu.dot_dimension_numbers<[1], [1], [0], [0], [0, 0, 1, 0], [], []>} : vector<16x8xbf16>, vector<8x8xbf16>, vector<16x8xf32> -> vector<16x8xf32>
    %159 = vector.broadcast %155 : vector<1x8xf32> to vector<16x8xf32>
    %160 = arith.addf %158, %159 : vector<16x8xf32>
    %cst_64 = arith.constant dense<0xFF800000> : vector<16xf32>
    %161 = vector.multi_reduction <maximumf>, %160, %cst_64 [1] : vector<16x8xf32> to vector<16xf32>
    %162 = vector.shape_cast %161 : vector<16xf32> to vector<16x1xf32>
    %163 = vector.broadcast %162 : vector<16x1xf32> to vector<16x8xf32>
    %164 = arith.subf %160, %163 : vector<16x8xf32>
    %165 = math.exp %164 : vector<16x8xf32>
    %cst_65 = arith.constant dense<0.000000e+00> : vector<16xf32>
    %166 = vector.multi_reduction <add>, %165, %cst_65 [1] : vector<16x8xf32> to vector<16xf32>
    %167 = vector.shape_cast %166 : vector<16xf32> to vector<16x1xf32>
    %168 = tpu.reciprocal %167 {approx = true} : vector<16x1xf32> -> vector<16x1xf32>
    %169 = vector.broadcast %168 : vector<16x1xf32> to vector<16x8xf32>
    %170 = arith.mulf %165, %169 : vector<16x8xf32>
    %171 = arith.truncf %170 : vector<16x8xf32> to vector<16x8xbf16>
    %172 = vector.extract_strided_slice %153 {offsets = [0, 0], sizes = [8, 8], strides = [1, 1]} : vector<8x32xbf16> to vector<8x8xbf16>
    %cst_66 = arith.constant dense<0.000000e+00> : vector<16x8xf32>
    %173 = tpu.matmul %171, %172, %cst_66 {dimension_numbers = #tpu.dot_dimension_numbers<[1], [0], [0], [1], [0, 0, 1, 1], [], []>} : vector<16x8xbf16>, vector<8x8xbf16>, vector<16x8xf32> -> vector<16x8xf32>
    %174 = arith.truncf %173 : vector<16x8xf32> to vector<16x8xbf16>
    %c0_67 = arith.constant 0 : index
    %c0_68 = arith.constant 0 : index
    %175 = vector.load %arg25[%c0_67, %c0_68] : memref<16x32xbf16, #tpu.memory_space<vmem>>, vector<16x8xbf16>
    tpu.vector_store %arg25[%c0_67, %c0_68], %174 {strides = array<i32>} : memref<16x32xbf16, #tpu.memory_space<vmem>>, vector<16x8xbf16>,
    %176 = vector.extract_strided_slice %143 {offsets = [0, 8], sizes = [16, 8], strides = [1, 1]} : vector<16x32xbf16> to vector<16x8xbf16>
    %177 = vector.extract_strided_slice %151 {offsets = [0, 8], sizes = [8, 8], strides = [1, 1]} : vector<8x32xbf16> to vector<8x8xbf16>
    %cst_69 = arith.constant dense<0.000000e+00> : vector<16x8xf32>
    %178 = tpu.matmul %176, %177, %cst_69 {dimension_numbers = #tpu.dot_dimension_numbers<[1], [1], [0], [0], [0, 0, 1, 0], [], []>} : vector<16x8xbf16>, vector<8x8xbf16>, vector<16x8xf32> -> vector<16x8xf32>
    %179 = vector.broadcast %155 : vector<1x8xf32> to vector<16x8xf32>
    %180 = arith.addf %178, %179 : vector<16x8xf32>
    %cst_70 = arith.constant dense<0xFF800000> : vector<16xf32>
    %181 = vector.multi_reduction <maximumf>, %180, %cst_70 [1] : vector<16x8xf32> to vector<16xf32>
    %182 = vector.shape_cast %181 : vector<16xf32> to vector<16x1xf32>
    %183 = vector.broadcast %182 : vector<16x1xf32> to vector<16x8xf32>
    %184 = arith.subf %180, %183 : vector<16x8xf32>
    %185 = math.exp %184 : vector<16x8xf32>
    %cst_71 = arith.constant dense<0.000000e+00> : vector<16xf32>
    %186 = vector.multi_reduction <add>, %185, %cst_71 [1] : vector<16x8xf32> to vector<16xf32>
    %187 = vector.shape_cast %186 : vector<16xf32> to vector<16x1xf32>
    %188 = tpu.reciprocal %187 {approx = true} : vector<16x1xf32> -> vector<16x1xf32>
    %189 = vector.broadcast %188 : vector<16x1xf32> to vector<16x8xf32>
    %190 = arith.mulf %185, %189 : vector<16x8xf32>
    %191 = arith.truncf %190 : vector<16x8xf32> to vector<16x8xbf16>
    %192 = vector.extract_strided_slice %153 {offsets = [0, 8], sizes = [8, 8], strides = [1, 1]} : vector<8x32xbf16> to vector<8x8xbf16>
    %cst_72 = arith.constant dense<0.000000e+00> : vector<16x8xf32>
    %193 = tpu.matmul %191, %192, %cst_72 {dimension_numbers = #tpu.dot_dimension_numbers<[1], [0], [0], [1], [0, 0, 1, 1], [], []>} : vector<16x8xbf16>, vector<8x8xbf16>, vector<16x8xf32> -> vector<16x8xf32>
    %194 = arith.truncf %193 : vector<16x8xf32> to vector<16x8xbf16>
    %c0_73 = arith.constant 0 : index
    %c8_74 = arith.constant 8 : index
    %195 = vector.load %arg25[%c0_73, %c8_74] : memref<16x32xbf16, #tpu.memory_space<vmem>>, vector<16x8xbf16>
    tpu.vector_store %arg25[%c0_73, %c8_74], %194 {strides = array<i32>} : memref<16x32xbf16, #tpu.memory_space<vmem>>, vector<16x8xbf16>,
    %196 = vector.extract_strided_slice %143 {offsets = [0, 16], sizes = [16, 8], strides = [1, 1]} : vector<16x32xbf16> to vector<16x8xbf16>
    %197 = vector.extract_strided_slice %151 {offsets = [0, 16], sizes = [8, 8], strides = [1, 1]} : vector<8x32xbf16> to vector<8x8xbf16>
    %cst_75 = arith.constant dense<0.000000e+00> : vector<16x8xf32>
    %198 = tpu.matmul %196, %197, %cst_75 {dimension_numbers = #tpu.dot_dimension_numbers<[1], [1], [0], [0], [0, 0, 1, 0], [], []>} : vector<16x8xbf16>, vector<8x8xbf16>, vector<16x8xf32> -> vector<16x8xf32>
    %199 = vector.broadcast %155 : vector<1x8xf32> to vector<16x8xf32>
    %200 = arith.addf %198, %199 : vector<16x8xf32>
    %cst_76 = arith.constant dense<0xFF800000> : vector<16xf32>
    %201 = vector.multi_reduction <maximumf>, %200, %cst_76 [1] : vector<16x8xf32> to vector<16xf32>
    %202 = vector.shape_cast %201 : vector<16xf32> to vector<16x1xf32>
    %203 = vector.broadcast %202 : vector<16x1xf32> to vector<16x8xf32>
    %204 = arith.subf %200, %203 : vector<16x8xf32>
    %205 = math.exp %204 : vector<16x8xf32>
    %cst_77 = arith.constant dense<0.000000e+00> : vector<16xf32>
    %206 = vector.multi_reduction <add>, %205, %cst_77 [1] : vector<16x8xf32> to vector<16xf32>
    %207 = vector.shape_cast %206 : vector<16xf32> to vector<16x1xf32>
    %208 = tpu.reciprocal %207 {approx = true} : vector<16x1xf32> -> vector<16x1xf32>
    %209 = vector.broadcast %208 : vector<16x1xf32> to vector<16x8xf32>
    %210 = arith.mulf %205, %209 : vector<16x8xf32>
    %211 = arith.truncf %210 : vector<16x8xf32> to vector<16x8xbf16>
    %212 = vector.extract_strided_slice %153 {offsets = [0, 16], sizes = [8, 8], strides = [1, 1]} : vector<8x32xbf16> to vector<8x8xbf16>
    %cst_78 = arith.constant dense<0.000000e+00> : vector<16x8xf32>
    %213 = tpu.matmul %211, %212, %cst_78 {dimension_numbers = #tpu.dot_dimension_numbers<[1], [0], [0], [1], [0, 0, 1, 1], [], []>} : vector<16x8xbf16>, vector<8x8xbf16>, vector<16x8xf32> -> vector<16x8xf32>
    %214 = arith.truncf %213 : vector<16x8xf32> to vector<16x8xbf16>
    %c0_79 = arith.constant 0 : index
    %c16_80 = arith.constant 16 : index
    %215 = vector.load %arg25[%c0_79, %c16_80] : memref<16x32xbf16, #tpu.memory_space<vmem>>, vector<16x8xbf16>
    tpu.vector_store %arg25[%c0_79, %c16_80], %214 {strides = array<i32>} : memref<16x32xbf16, #tpu.memory_space<vmem>>, vector<16x8xbf16>,
    %216 = vector.extract_strided_slice %143 {offsets = [0, 24], sizes = [16, 8], strides = [1, 1]} : vector<16x32xbf16> to vector<16x8xbf16>
    %217 = vector.extract_strided_slice %151 {offsets = [0, 24], sizes = [8, 8], strides = [1, 1]} : vector<8x32xbf16> to vector<8x8xbf16>
    %cst_81 = arith.constant dense<0.000000e+00> : vector<16x8xf32>
    %218 = tpu.matmul %216, %217, %cst_81 {dimension_numbers = #tpu.dot_dimension_numbers<[1], [1], [0], [0], [0, 0, 1, 0], [], []>} : vector<16x8xbf16>, vector<8x8xbf16>, vector<16x8xf32> -> vector<16x8xf32>
    %219 = vector.broadcast %155 : vector<1x8xf32> to vector<16x8xf32>
    %220 = arith.addf %218, %219 : vector<16x8xf32>
    %cst_82 = arith.constant dense<0xFF800000> : vector<16xf32>
    %221 = vector.multi_reduction <maximumf>, %220, %cst_82 [1] : vector<16x8xf32> to vector<16xf32>
    %222 = vector.shape_cast %221 : vector<16xf32> to vector<16x1xf32>
    %223 = vector.broadcast %222 : vector<16x1xf32> to vector<16x8xf32>
    %224 = arith.subf %220, %223 : vector<16x8xf32>
    %225 = math.exp %224 : vector<16x8xf32>
    %cst_83 = arith.constant dense<0.000000e+00> : vector<16xf32>
    %226 = vector.multi_reduction <add>, %225, %cst_83 [1] : vector<16x8xf32> to vector<16xf32>
    %227 = vector.shape_cast %226 : vector<16xf32> to vector<16x1xf32>
    %228 = tpu.reciprocal %227 {approx = true} : vector<16x1xf32> -> vector<16x1xf32>
    %229 = vector.broadcast %228 : vector<16x1xf32> to vector<16x8xf32>
    %230 = arith.mulf %225, %229 : vector<16x8xf32>
    %231 = arith.truncf %230 : vector<16x8xf32> to vector<16x8xbf16>
    %232 = vector.extract_strided_slice %153 {offsets = [0, 24], sizes = [8, 8], strides = [1, 1]} : vector<8x32xbf16> to vector<8x8xbf16>
    %cst_84 = arith.constant dense<0.000000e+00> : vector<16x8xf32>
    %233 = tpu.matmul %231, %232, %cst_84 {dimension_numbers = #tpu.dot_dimension_numbers<[1], [0], [0], [1], [0, 0, 1, 1], [], []>} : vector<16x8xbf16>, vector<8x8xbf16>, vector<16x8xf32> -> vector<16x8xf32>
    %234 = arith.truncf %233 : vector<16x8xf32> to vector<16x8xbf16>
    %c0_85 = arith.constant 0 : index
    %c24_86 = arith.constant 24 : index
    %235 = vector.load %arg25[%c0_85, %c24_86] : memref<16x32xbf16, #tpu.memory_space<vmem>>, vector<16x8xbf16>
    tpu.vector_store %arg25[%c0_85, %c24_86], %234 {strides = array<i32>} : memref<16x32xbf16, #tpu.memory_space<vmem>>, vector<16x8xbf16>,
    %c0_87 = arith.constant 0 : index
    %c0_88 = arith.constant 0 : index
    %236 = vector.load %arg25[%c0_87, %c0_88] : memref<16x32xbf16, #tpu.memory_space<vmem>>, vector<16x32xbf16>
    %c0_89 = arith.constant 0 : index
    %c0_90 = arith.constant 0 : index
    %237 = vector.load %arg14[%c0_89, %c0_90] : memref<32x32xbf16, #tpu.memory_space<vmem>>, vector<32x32xbf16>
    %cst_91 = arith.constant dense<0.000000e+00> : vector<16x32xf32>
    %238 = tpu.matmul %236, %237, %cst_91 {dimension_numbers = #tpu.dot_dimension_numbers<[1], [0], [0], [1], [0, 0, 1, 1], [], []>} : vector<16x32xbf16>, vector<32x32xbf16>, vector<16x32xf32> -> vector<16x32xf32>
    %c0_92 = arith.constant 0 : index
    %c0_93 = arith.constant 0 : index
    %239 = vector.load %arg15[%c0_92, %c0_93] : memref<1x32xf32, #tpu.memory_space<vmem>>, vector<1x32xf32>
    %240 = vector.broadcast %239 : vector<1x32xf32> to vector<16x32xf32>
    %241 = arith.addf %238, %240 : vector<16x32xf32>
    %242 = arith.addf %241, %134 : vector<16x32xf32>
    %c0_94 = arith.constant 0 : index
    %c0_95 = arith.constant 0 : index
    %243 = vector.load %arg16[%c0_94, %c0_95] : memref<1x32xf32, #tpu.memory_space<vmem>>, vector<1x32xf32>
    %c0_96 = arith.constant 0 : index
    %c0_97 = arith.constant 0 : index
    %244 = vector.load %arg17[%c0_96, %c0_97] : memref<1x32xf32, #tpu.memory_space<vmem>>, vector<1x32xf32>
    %cst_98 = arith.constant dense<0.000000e+00> : vector<16xf32>
    %245 = vector.multi_reduction <add>, %242, %cst_98 [1] : vector<16x32xf32> to vector<16xf32>
    %246 = vector.shape_cast %245 : vector<16xf32> to vector<16x1xf32>
    %cst_99 = arith.constant 3.200000e+01 : f32
    %247 = vector.broadcast %cst_99 : f32 to vector<16x1xf32>
    %248 = arith.divf %246, %247 : vector<16x1xf32>
    %249 = vector.broadcast %248 : vector<16x1xf32> to vector<16x32xf32>
    %250 = arith.subf %242, %249 : vector<16x32xf32>
    %251 = arith.mulf %250, %250 : vector<16x32xf32>
    %cst_100 = arith.constant dense<0.000000e+00> : vector<16xf32>
    %252 = vector.multi_reduction <add>, %251, %cst_100 [1] : vector<16x32xf32> to vector<16xf32>
    %253 = vector.shape_cast %252 : vector<16xf32> to vector<16x1xf32>
    %cst_101 = arith.constant 3.200000e+01 : f32
    %254 = vector.broadcast %cst_101 : f32 to vector<16x1xf32>
    %255 = arith.divf %253, %254 : vector<16x1xf32>
    %256 = vector.broadcast %248 : vector<16x1xf32> to vector<16x32xf32>
    %257 = arith.subf %242, %256 : vector<16x32xf32>
    %cst_102 = arith.constant 9.99999996E-13 : f32
    %258 = vector.broadcast %cst_102 : f32 to vector<16x1xf32>
    %259 = arith.addf %255, %258 : vector<16x1xf32>
    %260 = math.rsqrt %259 : vector<16x1xf32>
    %261 = vector.broadcast %260 : vector<16x1xf32> to vector<16x32xf32>
    %262 = arith.mulf %257, %261 : vector<16x32xf32>
    %263 = vector.broadcast %243 : vector<1x32xf32> to vector<16x32xf32>
    %264 = arith.mulf %262, %263 : vector<16x32xf32>
    %265 = vector.broadcast %244 : vector<1x32xf32> to vector<16x32xf32>
    %266 = arith.addf %264, %265 : vector<16x32xf32>
    %267 = arith.truncf %266 : vector<16x32xf32> to vector<16x32xbf16>
    %c0_103 = arith.constant 0 : index
    %c0_104 = arith.constant 0 : index
    %268 = vector.load %arg18[%c0_103, %c0_104] : memref<32x64xbf16, #tpu.memory_space<vmem>>, vector<32x64xbf16>
    %cst_105 = arith.constant dense<0.000000e+00> : vector<16x64xf32>
    %269 = tpu.matmul %267, %268, %cst_105 {dimension_numbers = #tpu.dot_dimension_numbers<[1], [0], [0], [1], [0, 0, 1, 1], [], []>} : vector<16x32xbf16>, vector<32x64xbf16>, vector<16x64xf32> -> vector<16x64xf32>
    %c0_106 = arith.constant 0 : index
    %c0_107 = arith.constant 0 : index
    %270 = vector.load %arg19[%c0_106, %c0_107] : memref<1x64xf32, #tpu.memory_space<vmem>>, vector<1x64xf32>
    %271 = vector.broadcast %270 : vector<1x64xf32> to vector<16x64xf32>
    %272 = arith.addf %269, %271 : vector<16x64xf32>
    %cst_108 = arith.constant 5.000000e-01 : f32
    %273 = vector.broadcast %cst_108 : f32 to vector<16x64xf32>
    %274 = arith.mulf %273, %272 : vector<16x64xf32>
    %cst_109 = arith.constant 4.471500e-02 : f32
    %275 = vector.broadcast %cst_109 : f32 to vector<16x64xf32>
    %276 = arith.mulf %275, %272 : vector<16x64xf32>
    %277 = arith.mulf %276, %272 : vector<16x64xf32>
    %278 = arith.mulf %277, %272 : vector<16x64xf32>
    %279 = arith.addf %272, %278 : vector<16x64xf32>
    %cst_110 = arith.constant 0.797884583 : f32
    %280 = vector.broadcast %cst_110 : f32 to vector<16x64xf32>
    %281 = arith.mulf %280, %279 : vector<16x64xf32>
    %282 = math.tanh %281 : vector<16x64xf32>
    %cst_111 = arith.constant 1.000000e+00 : f32
    %283 = vector.broadcast %cst_111 : f32 to vector<16x64xf32>
    %284 = arith.addf %283, %282 : vector<16x64xf32>
    %285 = arith.mulf %274, %284 : vector<16x64xf32>
    %286 = arith.truncf %285 : vector<16x64xf32> to vector<16x64xbf16>
    %c0_112 = arith.constant 0 : index
    %c0_113 = arith.constant 0 : index
    %287 = vector.load %arg20[%c0_112, %c0_113] : memref<64x32xbf16, #tpu.memory_space<vmem>>, vector<64x32xbf16>
    %cst_114 = arith.constant dense<0.000000e+00> : vector<16x32xf32>
    %288 = tpu.matmul %286, %287, %cst_114 {dimension_numbers = #tpu.dot_dimension_numbers<[1], [0], [0], [1], [0, 0, 1, 1], [], []>} : vector<16x64xbf16>, vector<64x32xbf16>, vector<16x32xf32> -> vector<16x32xf32>
    %c0_115 = arith.constant 0 : index
    %c0_116 = arith.constant 0 : index
    %289 = vector.load %arg21[%c0_115, %c0_116] : memref<1x32xf32, #tpu.memory_space<vmem>>, vector<1x32xf32>
    %290 = vector.broadcast %289 : vector<1x32xf32> to vector<16x32xf32>
    %291 = arith.addf %288, %290 : vector<16x32xf32>
    %292 = arith.addf %291, %266 : vector<16x32xf32>
    %c0_117 = arith.constant 0 : index
    %c0_118 = arith.constant 0 : index
    %293 = vector.load %arg22[%c0_117, %c0_118] : memref<1x32xf32, #tpu.memory_space<vmem>>, vector<1x32xf32>
    %c0_119 = arith.constant 0 : index
    %c0_120 = arith.constant 0 : index
    %294 = vector.load %arg23[%c0_119, %c0_120] : memref<1x32xf32, #tpu.memory_space<vmem>>, vector<1x32xf32>
    %cst_121 = arith.constant dense<0.000000e+00> : vector<16xf32>
    %295 = vector.multi_reduction <add>, %292, %cst_121 [1] : vector<16x32xf32> to vector<16xf32>
    %296 = vector.shape_cast %295 : vector<16xf32> to vector<16x1xf32>
    %cst_122 = arith.constant 3.200000e+01 : f32
    %297 = vector.broadcast %cst_122 : f32 to vector<16x1xf32>
    %298 = arith.divf %296, %297 : vector<16x1xf32>
    %299 = vector.broadcast %298 : vector<16x1xf32> to vector<16x32xf32>
    %300 = arith.subf %292, %299 : vector<16x32xf32>
    %301 = arith.mulf %300, %300 : vector<16x32xf32>
    %cst_123 = arith.constant dense<0.000000e+00> : vector<16xf32>
    %302 = vector.multi_reduction <add>, %301, %cst_123 [1] : vector<16x32xf32> to vector<16xf32>
    %303 = vector.shape_cast %302 : vector<16xf32> to vector<16x1xf32>
    %cst_124 = arith.constant 3.200000e+01 : f32
    %304 = vector.broadcast %cst_124 : f32 to vector<16x1xf32>
    %305 = arith.divf %303, %304 : vector<16x1xf32>
    %306 = vector.broadcast %298 : vector<16x1xf32> to vector<16x32xf32>
    %307 = arith.subf %292, %306 : vector<16x32xf32>
    %cst_125 = arith.constant 9.99999996E-13 : f32
    %308 = vector.broadcast %cst_125 : f32 to vector<16x1xf32>
    %309 = arith.addf %305, %308 : vector<16x1xf32>
    %310 = math.rsqrt %309 : vector<16x1xf32>
    %311 = vector.broadcast %310 : vector<16x1xf32> to vector<16x32xf32>
    %312 = arith.mulf %307, %311 : vector<16x32xf32>
    %313 = vector.broadcast %293 : vector<1x32xf32> to vector<16x32xf32>
    %314 = arith.mulf %312, %313 : vector<16x32xf32>
    %315 = vector.broadcast %294 : vector<1x32xf32> to vector<16x32xf32>
    %316 = arith.addf %314, %315 : vector<16x32xf32>
    %c0_126 = arith.constant 0 : index
    %c0_127 = arith.constant 0 : index
    %c0_128 = arith.constant 0 : index
    %317 = vector.load %arg24[%c0_126, %c0_127, %c0_128] : memref<1x16x32xf32, #tpu.memory_space<vmem>>, vector<1x16x32xf32>
    %318 = vector.shape_cast %317 : vector<1x16x32xf32> to vector<16x32xf32>
    %319 = vector.shape_cast %316 : vector<16x32xf32> to vector<1x16x32xf32>
    tpu.vector_store %arg24[%c0_126, %c0_127, %c0_128], %319 {strides = array<i32>} : memref<1x16x32xf32, #tpu.memory_space<vmem>>, vector<1x16x32xf32>,
    return
  }
  func.func @transform_0(%arg0: i32) -> (i32, i32, i32) {
    %c0_i32 = arith.constant 0 : i32
    %c0_i32_0 = arith.constant 0 : i32
    %c0_i32_1 = arith.constant 0 : i32
    return %arg0, %c0_i32, %c0_i32_0 : i32, i32, i32
  }
  func.func @transform_1(%arg0: i32) -> (i32, i32, i32) {
    %c0_i32 = arith.constant 0 : i32
    %c0_i32_0 = arith.constant 0 : i32
    %c0_i32_1 = arith.constant 0 : i32
    return %arg0, %c0_i32, %c0_i32_0 : i32, i32, i32
  }
  func.func @transform_2(%arg0: i32) -> (i32, i32, i32) {
    %c0_i32 = arith.constant 0 : i32
    %c0_i32_0 = arith.constant 0 : i32
    %c0_i32_1 = arith.constant 0 : i32
    return %arg0, %c0_i32, %c0_i32_0 : i32, i32, i32
  }
  func.func @transform_3(%arg0: i32) -> (i32, i32) {
    %c0_i32 = arith.constant 0 : i32
    %c0_i32_0 = arith.constant 0 : i32
    %c0_i32_1 = arith.constant 0 : i32
    return %c0_i32, %c0_i32_0 : i32, i32
  }
  func.func @transform_4(%arg0: i32) -> (i32, i32) {
    %c0_i32 = arith.constant 0 : i32
    %c0_i32_0 = arith.constant 0 : i32
    %c0_i32_1 = arith.constant 0 : i32
    return %c0_i32, %c0_i32_0 : i32, i32
  }
  func.func @transform_5(%arg0: i32) -> (i32, i32) {
    %c0_i32 = arith.constant 0 : i32
    %c0_i32_0 = arith.constant 0 : i32
    %c0_i32_1 = arith.constant 0 : i32
    return %c0_i32, %c0_i32_0 : i32, i32
  }
  func.func @transform_6(%arg0: i32) -> (i32, i32) {
    %c0_i32 = arith.constant 0 : i32
    %c0_i32_0 = arith.constant 0 : i32
    %c0_i32_1 = arith.constant 0 : i32
    return %c0_i32, %c0_i32_0 : i32, i32
  }
  func.func @transform_7(%arg0: i32) -> (i32, i32) {
    %c0_i32 = arith.constant 0 : i32
    %c0_i32_0 = arith.constant 0 : i32
    %c0_i32_1 = arith.constant 0 : i32
    return %c0_i32, %c0_i32_0 : i32, i32
  }
  func.func @transform_8(%arg0: i32) -> (i32, i32) {
    %c0_i32 = arith.constant 0 : i32
    %c0_i32_0 = arith.constant 0 : i32
    %c0_i32_1 = arith.constant 0 : i32
    return %c0_i32, %c0_i32_0 : i32, i32
  }
  func.func @transform_9(%arg0: i32) -> (i32, i32) {
    %c0_i32 = arith.constant 0 : i32
    %c0_i32_0 = arith.constant 0 : i32
    %c0_i32_1 = arith.constant 0 : i32
    return %c0_i32, %c0_i32_0 : i32, i32
  }
  func.func @transform_10(%arg0: i32) -> (i32, i32) {
    %c0_i32 = arith.constant 0 : i32
    %c0_i32_0 = arith.constant 0 : i32
    %c0_i32_1 = arith.constant 0 : i32
    return %c0_i32, %c0_i32_0 : i32, i32
  }
  func.func @transform_11(%arg0: i32) -> (i32, i32) {
    %c0_i32 = arith.constant 0 : i32
    %c0_i32_0 = arith.constant 0 : i32
    %c0_i32_1 = arith.constant 0 : i32
    return %c0_i32, %c0_i32_0 : i32, i32
  }
  func.func @transform_12(%arg0: i32) -> (i32, i32) {
    %c0_i32 = arith.constant 0 : i32
    %c0_i32_0 = arith.constant 0 : i32
    %c0_i32_1 = arith.constant 0 : i32
    return %c0_i32, %c0_i32_0 : i32, i32
  }
  func.func @transform_13(%arg0: i32) -> (i32, i32) {
    %c0_i32 = arith.constant 0 : i32
    %c0_i32_0 = arith.constant 0 : i32
    %c0_i32_1 = arith.constant 0 : i32
    return %c0_i32, %c0_i32_0 : i32, i32
  }
  func.func @transform_14(%arg0: i32) -> (i32, i32) {
    %c0_i32 = arith.constant 0 : i32
    %c0_i32_0 = arith.constant 0 : i32
    %c0_i32_1 = arith.constant 0 : i32
    return %c0_i32, %c0_i32_0 : i32, i32
  }
  func.func @transform_15(%arg0: i32) -> (i32, i32) {
    %c0_i32 = arith.constant 0 : i32
    %c0_i32_0 = arith.constant 0 : i32
    %c0_i32_1 = arith.constant 0 : i32
    return %c0_i32, %c0_i32_0 : i32, i32
  }
  func.func @transform_16(%arg0: i32) -> (i32, i32) {
    %c0_i32 = arith.constant 0 : i32
    %c0_i32_0 = arith.constant 0 : i32
    %c0_i32_1 = arith.constant 0 : i32
    return %c0_i32, %c0_i32_0 : i32, i32
  }
  func.func @transform_17(%arg0: i32) -> (i32, i32) {
    %c0_i32 = arith.constant 0 : i32
    %c0_i32_0 = arith.constant 0 : i32
    %c0_i32_1 = arith.constant 0 : i32
    return %c0_i32, %c0_i32_0 : i32, i32
  }
  func.func @transform_18(%arg0: i32) -> (i32, i32) {
    %c0_i32 = arith.constant 0 : i32
    %c0_i32_0 = arith.constant 0 : i32
    %c0_i32_1 = arith.constant 0 : i32
    return %c0_i32, %c0_i32_0 : i32, i32
  }
  func.func @transform_19(%arg0: i32) -> (i32, i32) {
    %c0_i32 = arith.constant 0 : i32
    %c0_i32_0 = arith.constant 0 : i32
    %c0_i32_1 = arith.constant 0 : i32
    return %c0_i32, %c0_i32_0 : i32, i32
  }
  func.func @transform_20(%arg0: i32) -> (i32, i32) {
    %c0_i32 = arith.constant 0 : i32
    %c0_i32_0 = arith.constant 0 : i32
    %c0_i32_1 = arith.constant 0 : i32
    return %c0_i32, %c0_i32_0 : i32, i32
  }
  func.func @transform_21(%arg0: i32) -> (i32, i32) {
    %c0_i32 = arith.constant 0 : i32
    %c0_i32_0 = arith.constant 0 : i32
    %c0_i32_1 = arith.constant 0 : i32
    return %c0_i32, %c0_i32_0 : i32, i32
  }
  func.func @transform_22(%arg0: i32) -> (i32, i32) {
    %c0_i32 = arith.constant 0 : i32
    %c0_i32_0 = arith.constant 0 : i32
    %c0_i32_1 = arith.constant 0 : i32
    return %c0_i32, %c0_i32_0 : i32, i32
  }
  func.func @transform_23(%arg0: i32) -> (i32, i32, i32) {
    %c0_i32 = arith.constant 0 : i32
    %c0_i32_0 = arith.constant 0 : i32
    %c0_i32_1 = arith.constant 0 : i32
    return %arg0, %c0_i32, %c0_i32_0 : i32, i32, i32
  }
}

module attributes {stable_mosaic.version = 11 : i64} {
  func.func @_decoder_layer_kernel(%arg0: i32, %arg1: memref<1x16x32xf32, #tpu.memory_space<vmem>>, %arg2: memref<1x8x32xf32, #tpu.memory_space<vmem>>, %arg3: memref<1x1x8xf32, #tpu.memory_space<vmem>>, %arg4: memref<32x96xbf16, #tpu.memory_space<vmem>>, %arg5: memref<1x96xf32, #tpu.memory_space<vmem>>, %arg6: memref<32x32xbf16, #tpu.memory_space<vmem>>, %arg7: memref<1x32xf32, #tpu.memory_space<vmem>>, %arg8: memref<1x32xf32, #tpu.memory_space<vmem>>, %arg9: memref<1x32xf32, #tpu.memory_space<vmem>>, %arg10: memref<32x32xbf16, #tpu.memory_space<vmem>>, %arg11: memref<1x32xf32, #tpu.memory_space<vmem>>, %arg12: memref<32x64xbf16, #tpu.memory_space<vmem>>, %arg13: memref<1x64xf32, #tpu.memory_space<vmem>>, %arg14: memref<32x32xbf16, #tpu.memory_space<vmem>>, %arg15: memref<1x32xf32, #tpu.memory_space<vmem>>, %arg16: memref<1x32xf32, #tpu.memory_space<vmem>>, %arg17: memref<1x32xf32, #tpu.memory_space<vmem>>, %arg18: memref<32x64xbf16, #tpu.memory_space<vmem>>, %arg19: memref<1x64xf32, #tpu.memory_space<vmem>>, %arg20: memref<64x32xbf16, #tpu.memory_space<vmem>>, %arg21: memref<1x32xf32, #tpu.memory_space<vmem>>, %arg22: memref<1x32xf32, #tpu.memory_space<vmem>>, %arg23: memref<1x32xf32, #tpu.memory_space<vmem>>, %arg24: memref<1x16x32xf32, #tpu.memory_space<vmem>>, %arg25: memref<16x32xbf16, #tpu.memory_space<vmem>>) attributes {dimension_semantics = [#tpu.dimension_semantics<parallel>], iteration_bounds = array<i64: 2>, scalar_prefetch = 0 : i64, scratch_operands = 1 : i64, tpu.core_type = #tpu.core_type<tc>, window_params = [{transform_indices = @transform_0, window_bounds = array<i64: 1, 16, 32>}, {transform_indices = @transform_1, window_bounds = array<i64: 1, 8, 32>}, {transform_indices = @transform_2, window_bounds = array<i64: 1, 1, 8>}, {pipeline_mode = #tpu.pipeline_mode<synchronous>, transform_indices = @transform_3, window_bounds = array<i64: 32, 96>}, {pipeline_mode = #tpu.pipeline_mode<synchronous>, transform_indices = @transform_4, window_bounds = array<i64: 1, 96>}, {pipeline_mode = #tpu.pipeline_mode<synchronous>, transform_indices = @transform_5, window_bounds = array<i64: 32, 32>}, {pipeline_mode = #tpu.pipeline_mode<synchronous>, transform_indices = @transform_6, window_bounds = array<i64: 1, 32>}, {pipeline_mode = #tpu.pipeline_mode<synchronous>, transform_indices = @transform_7, window_bounds = array<i64: 1, 32>}, {pipeline_mode = #tpu.pipeline_mode<synchronous>, transform_indices = @transform_8, window_bounds = array<i64: 1, 32>}, {pipeline_mode = #tpu.pipeline_mode<synchronous>, transform_indices = @transform_9, window_bounds = array<i64: 32, 32>}, {pipeline_mode = #tpu.pipeline_mode<synchronous>, transform_indices = @transform_10, window_bounds = array<i64: 1, 32>}, {pipeline_mode = #tpu.pipeline_mode<synchronous>, transform_indices = @transform_11, window_bounds = array<i64: 32, 64>}, {pipeline_mode = #tpu.pipeline_mode<synchronous>, transform_indices = @transform_12, window_bounds = array<i64: 1, 64>}, {pipeline_mode = #tpu.pipeline_mode<synchronous>, transform_indices = @transform_13, window_bounds = array<i64: 32, 32>}, {pipeline_mode = #tpu.pipeline_mode<synchronous>, transform_indices = @transform_14, window_bounds = array<i64: 1, 32>}, {pipeline_mode = #tpu.pipeline_mode<synchronous>, transform_indices = @transform_15, window_bounds = array<i64: 1, 32>}, {pipeline_mode = #tpu.pipeline_mode<synchronous>, transform_indices = @transform_16, window_bounds = array<i64: 1, 32>}, {pipeline_mode = #tpu.pipeline_mode<synchronous>, transform_indices = @transform_17, window_bounds = array<i64: 32, 64>}, {pipeline_mode = #tpu.pipeline_mode<synchronous>, transform_indices = @transform_18, window_bounds = array<i64: 1, 64>}, {pipeline_mode = #tpu.pipeline_mode<synchronous>, transform_indices = @transform_19, window_bounds = array<i64: 64, 32>}, {pipeline_mode = #tpu.pipeline_mode<synchronous>, transform_indices = @transform_20, window_bounds = array<i64: 1, 32>}, {pipeline_mode = #tpu.pipeline_mode<synchronous>, transform_indices = @transform_21, window_bounds = array<i64: 1, 32>}, {pipeline_mode = #tpu.pipeline_mode<synchronous>, transform_indices = @transform_22, window_bounds = array<i64: 1, 32>}, {transform_indices = @transform_23, window_bounds = array<i64: 1, 16, 32>}]} {
    %c0 = arith.constant 0 : index
    %c0_0 = arith.constant 0 : index
    %c0_1 = arith.constant 0 : index
    %0 = vector.load %arg1[%c0, %c0_0, %c0_1] : memref<1x16x32xf32, #tpu.memory_space<vmem>>, vector<1x16x32xf32>
    %1 = vector.shape_cast %0 : vector<1x16x32xf32> to vector<16x32xf32>
    %c0_2 = arith.constant 0 : index
    %c0_3 = arith.constant 0 : index
    %c0_4 = arith.constant 0 : index
    %2 = vector.load %arg2[%c0_2, %c0_3, %c0_4] : memref<1x8x32xf32, #tpu.memory_space<vmem>>, vector<1x8x32xf32>
    %3 = vector.shape_cast %2 : vector<1x8x32xf32> to vector<8x32xf32>
    %4 = tpu.iota {dimensions = array<i32: 1>} : vector<1x16xi32>
    %c15_i32 = arith.constant 15 : i32
    %5 = vector.broadcast %c15_i32 : i32 to vector<1x16xi32>
    %6 = arith.cmpi slt, %4, %5 : vector<1x16xi32>
    %cst = arith.constant 0.000000e+00 : f32
    %cst_5 = arith.constant -1.000000e+04 : f32
    %7 = vector.broadcast %cst : f32 to vector<1x16xf32>
    %8 = vector.broadcast %cst_5 : f32 to vector<1x16xf32>
    %9 = arith.select %6, %7, %8 : vector<1x16xi1>, vector<1x16xf32>
    %c0_6 = arith.constant 0 : index
    %c0_7 = arith.constant 0 : index
    %10 = vector.load %arg4[%c0_6, %c0_7] : memref<32x96xbf16, #tpu.memory_space<vmem>>, vector<32x96xbf16>
    %11 = arith.truncf %1 : vector<16x32xf32> to vector<16x32xbf16>
    %cst_8 = arith.constant dense<0.000000e+00> : vector<16x96xf32>
    %12 = tpu.matmul %11, %10, %cst_8 {dimension_numbers = #tpu.dot_dimension_numbers<[1], [0], [0], [1], [0, 0, 1, 1], [], []>} : vector<16x32xbf16>, vector<32x96xbf16>, vector<16x96xf32> -> vector<16x96xf32>
    %c0_9 = arith.constant 0 : index
    %c0_10 = arith.constant 0 : index
    %13 = vector.load %arg5[%c0_9, %c0_10] : memref<1x96xf32, #tpu.memory_space<vmem>>, vector<1x96xf32>
    %14 = vector.broadcast %13 : vector<1x96xf32> to vector<16x96xf32>
    %15 = arith.addf %12, %14 : vector<16x96xf32>
    %16 = vector.extract_strided_slice %15 {offsets = [0, 0], sizes = [16, 32], strides = [1, 1]} : vector<16x96xf32> to vector<16x32xf32>
    %cst_11 = arith.constant 0.353553385 : f32
    %17 = vector.broadcast %cst_11 : f32 to vector<16x32xf32>
    %18 = arith.mulf %16, %17 : vector<16x32xf32>
    %19 = arith.truncf %18 : vector<16x32xf32> to vector<16x32xbf16>
    %20 = vector.extract_strided_slice %15 {offsets = [0, 32], sizes = [16, 32], strides = [1, 1]} : vector<16x96xf32> to vector<16x32xf32>
    %21 = arith.truncf %20 : vector<16x32xf32> to vector<16x32xbf16>
    %22 = vector.extract_strided_slice %15 {offsets = [0, 64], sizes = [16, 32], strides = [1, 1]} : vector<16x96xf32> to vector<16x32xf32>
    %23 = arith.truncf %22 : vector<16x32xf32> to vector<16x32xbf16>
    %24 = vector.extract_strided_slice %19 {offsets = [0, 0], sizes = [16, 8], strides = [1, 1]} : vector<16x32xbf16> to vector<16x8xbf16>
    %25 = vector.extract_strided_slice %21 {offsets = [0, 0], sizes = [16, 8], strides = [1, 1]} : vector<16x32xbf16> to vector<16x8xbf16>
    %cst_12 = arith.constant dense<0.000000e+00> : vector<16x16xf32>
    %26 = tpu.matmul %24, %25, %cst_12 {dimension_numbers = #tpu.dot_dimension_numbers<[1], [1], [0], [0], [0, 0, 1, 0], [], []>} : vector<16x8xbf16>, vector<16x8xbf16>, vector<16x16xf32> -> vector<16x16xf32>
    %27 = vector.broadcast %9 : vector<1x16xf32> to vector<16x16xf32>
    %28 = arith.addf %26, %27 : vector<16x16xf32>
    %cst_13 = arith.constant dense<0xFF800000> : vector<16xf32>
    %29 = vector.multi_reduction <maximumf>, %28, %cst_13 [1] : vector<16x16xf32> to vector<16xf32>
    %30 = vector.shape_cast %29 : vector<16xf32> to vector<16x1xf32>
    %31 = vector.broadcast %30 : vector<16x1xf32> to vector<16x16xf32>
    %32 = arith.subf %28, %31 : vector<16x16xf32>
    %33 = math.exp %32 : vector<16x16xf32>
    %cst_14 = arith.constant dense<0.000000e+00> : vector<16xf32>
    %34 = vector.multi_reduction <add>, %33, %cst_14 [1] : vector<16x16xf32> to vector<16xf32>
    %35 = vector.shape_cast %34 : vector<16xf32> to vector<16x1xf32>
    %36 = tpu.reciprocal %35 {approx = true} : vector<16x1xf32> -> vector<16x1xf32>
    %37 = vector.broadcast %36 : vector<16x1xf32> to vector<16x16xf32>
    %38 = arith.mulf %33, %37 : vector<16x16xf32>
    %39 = arith.truncf %38 : vector<16x16xf32> to vector<16x16xbf16>
    %40 = vector.extract_strided_slice %23 {offsets = [0, 0], sizes = [16, 8], strides = [1, 1]} : vector<16x32xbf16> to vector<16x8xbf16>
    %cst_15 = arith.constant dense<0.000000e+00> : vector<16x8xf32>
    %41 = tpu.matmul %39, %40, %cst_15 {dimension_numbers = #tpu.dot_dimension_numbers<[1], [0], [0], [1], [0, 0, 1, 1], [], []>} : vector<16x16xbf16>, vector<16x8xbf16>, vector<16x8xf32> -> vector<16x8xf32>
    %42 = arith.truncf %41 : vector<16x8xf32> to vector<16x8xbf16>
    %c0_16 = arith.constant 0 : index
    %c0_17 = arith.constant 0 : index
    %43 = vector.load %arg25[%c0_16, %c0_17] : memref<16x32xbf16, #tpu.memory_space<vmem>>, vector<16x8xbf16>
    tpu.vector_store %arg25[%c0_16, %c0_17], %42 {strides = array<i32>} : memref<16x32xbf16, #tpu.memory_space<vmem>>, vector<16x8xbf16>,
    %44 = vector.extract_strided_slice %19 {offsets = [0, 8], sizes = [16, 8], strides = [1, 1]} : vector<16x32xbf16> to vector<16x8xbf16>
    %45 = vector.extract_strided_slice %21 {offsets = [0, 8], sizes = [16, 8], strides = [1, 1]} : vector<16x32xbf16> to vector<16x8xbf16>
    %cst_18 = arith.constant dense<0.000000e+00> : vector<16x16xf32>
    %46 = tpu.matmul %44, %45, %cst_18 {dimension_numbers = #tpu.dot_dimension_numbers<[1], [1], [0], [0], [0, 0, 1, 0], [], []>} : vector<16x8xbf16>, vector<16x8xbf16>, vector<16x16xf32> -> vector<16x16xf32>
    %47 = vector.broadcast %9 : vector<1x16xf32> to vector<16x16xf32>
    %48 = arith.addf %46, %47 : vector<16x16xf32>
    %cst_19 = arith.constant dense<0xFF800000> : vector<16xf32>
    %49 = vector.multi_reduction <maximumf>, %48, %cst_19 [1] : vector<16x16xf32> to vector<16xf32>
    %50 = vector.shape_cast %49 : vector<16xf32> to vector<16x1xf32>
    %51 = vector.broadcast %50 : vector<16x1xf32> to vector<16x16xf32>
    %52 = arith.subf %48, %51 : vector<16x16xf32>
    %53 = math.exp %52 : vector<16x16xf32>
    %cst_20 = arith.constant dense<0.000000e+00> : vector<16xf32>
    %54 = vector.multi_reduction <add>, %53, %cst_20 [1] : vector<16x16xf32> to vector<16xf32>
    %55 = vector.shape_cast %54 : vector<16xf32> to vector<16x1xf32>
    %56 = tpu.reciprocal %55 {approx = true} : vector<16x1xf32> -> vector<16x1xf32>
    %57 = vector.broadcast %56 : vector<16x1xf32> to vector<16x16xf32>
    %58 = arith.mulf %53, %57 : vector<16x16xf32>
    %59 = arith.truncf %58 : vector<16x16xf32> to vector<16x16xbf16>
    %60 = vector.extract_strided_slice %23 {offsets = [0, 8], sizes = [16, 8], strides = [1, 1]} : vector<16x32xbf16> to vector<16x8xbf16>
    %cst_21 = arith.constant dense<0.000000e+00> : vector<16x8xf32>
    %61 = tpu.matmul %59, %60, %cst_21 {dimension_numbers = #tpu.dot_dimension_numbers<[1], [0], [0], [1], [0, 0, 1, 1], [], []>} : vector<16x16xbf16>, vector<16x8xbf16>, vector<16x8xf32> -> vector<16x8xf32>
    %62 = arith.truncf %61 : vector<16x8xf32> to vector<16x8xbf16>
    %c0_22 = arith.constant 0 : index
    %c8 = arith.constant 8 : index
    %63 = vector.load %arg25[%c0_22, %c8] : memref<16x32xbf16, #tpu.memory_space<vmem>>, vector<16x8xbf16>
    tpu.vector_store %arg25[%c0_22, %c8], %62 {strides = array<i32>} : memref<16x32xbf16, #tpu.memory_space<vmem>>, vector<16x8xbf16>,
    %64 = vector.extract_strided_slice %19 {offsets = [0, 16], sizes = [16, 8], strides = [1, 1]} : vector<16x32xbf16> to vector<16x8xbf16>
    %65 = vector.extract_strided_slice %21 {offsets = [0, 16], sizes = [16, 8], strides = [1, 1]} : vector<16x32xbf16> to vector<16x8xbf16>
    %cst_23 = arith.constant dense<0.000000e+00> : vector<16x16xf32>
    %66 = tpu.matmul %64, %65, %cst_23 {dimension_numbers = #tpu.dot_dimension_numbers<[1], [1], [0], [0], [0, 0, 1, 0], [], []>} : vector<16x8xbf16>, vector<16x8xbf16>, vector<16x16xf32> -> vector<16x16xf32>
    %67 = vector.broadcast %9 : vector<1x16xf32> to vector<16x16xf32>
    %68 = arith.addf %66, %67 : vector<16x16xf32>
    %cst_24 = arith.constant dense<0xFF800000> : vector<16xf32>
    %69 = vector.multi_reduction <maximumf>, %68, %cst_24 [1] : vector<16x16xf32> to vector<16xf32>
    %70 = vector.shape_cast %69 : vector<16xf32> to vector<16x1xf32>
    %71 = vector.broadcast %70 : vector<16x1xf32> to vector<16x16xf32>
    %72 = arith.subf %68, %71 : vector<16x16xf32>
    %73 = math.exp %72 : vector<16x16xf32>
    %cst_25 = arith.constant dense<0.000000e+00> : vector<16xf32>
    %74 = vector.multi_reduction <add>, %73, %cst_25 [1] : vector<16x16xf32> to vector<16xf32>
    %75 = vector.shape_cast %74 : vector<16xf32> to vector<16x1xf32>
    %76 = tpu.reciprocal %75 {approx = true} : vector<16x1xf32> -> vector<16x1xf32>
    %77 = vector.broadcast %76 : vector<16x1xf32> to vector<16x16xf32>
    %78 = arith.mulf %73, %77 : vector<16x16xf32>
    %79 = arith.truncf %78 : vector<16x16xf32> to vector<16x16xbf16>
    %80 = vector.extract_strided_slice %23 {offsets = [0, 16], sizes = [16, 8], strides = [1, 1]} : vector<16x32xbf16> to vector<16x8xbf16>
    %cst_26 = arith.constant dense<0.000000e+00> : vector<16x8xf32>
    %81 = tpu.matmul %79, %80, %cst_26 {dimension_numbers = #tpu.dot_dimension_numbers<[1], [0], [0], [1], [0, 0, 1, 1], [], []>} : vector<16x16xbf16>, vector<16x8xbf16>, vector<16x8xf32> -> vector<16x8xf32>
    %82 = arith.truncf %81 : vector<16x8xf32> to vector<16x8xbf16>
    %c0_27 = arith.constant 0 : index
    %c16 = arith.constant 16 : index
    %83 = vector.load %arg25[%c0_27, %c16] : memref<16x32xbf16, #tpu.memory_space<vmem>>, vector<16x8xbf16>
    tpu.vector_store %arg25[%c0_27, %c16], %82 {strides = array<i32>} : memref<16x32xbf16, #tpu.memory_space<vmem>>, vector<16x8xbf16>,
    %84 = vector.extract_strided_slice %19 {offsets = [0, 24], sizes = [16, 8], strides = [1, 1]} : vector<16x32xbf16> to vector<16x8xbf16>
    %85 = vector.extract_strided_slice %21 {offsets = [0, 24], sizes = [16, 8], strides = [1, 1]} : vector<16x32xbf16> to vector<16x8xbf16>
    %cst_28 = arith.constant dense<0.000000e+00> : vector<16x16xf32>
    %86 = tpu.matmul %84, %85, %cst_28 {dimension_numbers = #tpu.dot_dimension_numbers<[1], [1], [0], [0], [0, 0, 1, 0], [], []>} : vector<16x8xbf16>, vector<16x8xbf16>, vector<16x16xf32> -> vector<16x16xf32>
    %87 = vector.broadcast %9 : vector<1x16xf32> to vector<16x16xf32>
    %88 = arith.addf %86, %87 : vector<16x16xf32>
    %cst_29 = arith.constant dense<0xFF800000> : vector<16xf32>
    %89 = vector.multi_reduction <maximumf>, %88, %cst_29 [1] : vector<16x16xf32> to vector<16xf32>
    %90 = vector.shape_cast %89 : vector<16xf32> to vector<16x1xf32>
    %91 = vector.broadcast %90 : vector<16x1xf32> to vector<16x16xf32>
    %92 = arith.subf %88, %91 : vector<16x16xf32>
    %93 = math.exp %92 : vector<16x16xf32>
    %cst_30 = arith.constant dense<0.000000e+00> : vector<16xf32>
    %94 = vector.multi_reduction <add>, %93, %cst_30 [1] : vector<16x16xf32> to vector<16xf32>
    %95 = vector.shape_cast %94 : vector<16xf32> to vector<16x1xf32>
    %96 = tpu.reciprocal %95 {approx = true} : vector<16x1xf32> -> vector<16x1xf32>
    %97 = vector.broadcast %96 : vector<16x1xf32> to vector<16x16xf32>
    %98 = arith.mulf %93, %97 : vector<16x16xf32>
    %99 = arith.truncf %98 : vector<16x16xf32> to vector<16x16xbf16>
    %100 = vector.extract_strided_slice %23 {offsets = [0, 24], sizes = [16, 8], strides = [1, 1]} : vector<16x32xbf16> to vector<16x8xbf16>
    %cst_31 = arith.constant dense<0.000000e+00> : vector<16x8xf32>
    %101 = tpu.matmul %99, %100, %cst_31 {dimension_numbers = #tpu.dot_dimension_numbers<[1], [0], [0], [1], [0, 0, 1, 1], [], []>} : vector<16x16xbf16>, vector<16x8xbf16>, vector<16x8xf32> -> vector<16x8xf32>
    %102 = arith.truncf %101 : vector<16x8xf32> to vector<16x8xbf16>
    %c0_32 = arith.constant 0 : index
    %c24 = arith.constant 24 : index
    %103 = vector.load %arg25[%c0_32, %c24] : memref<16x32xbf16, #tpu.memory_space<vmem>>, vector<16x8xbf16>
    tpu.vector_store %arg25[%c0_32, %c24], %102 {strides = array<i32>} : memref<16x32xbf16, #tpu.memory_space<vmem>>, vector<16x8xbf16>,
    %c0_33 = arith.constant 0 : index
    %c0_34 = arith.constant 0 : index
    %104 = vector.load %arg25[%c0_33, %c0_34] : memref<16x32xbf16, #tpu.memory_space<vmem>>, vector<16x32xbf16>
    %c0_35 = arith.constant 0 : index
    %c0_36 = arith.constant 0 : index
    %105 = vector.load %arg6[%c0_35, %c0_36] : memref<32x32xbf16, #tpu.memory_space<vmem>>, vector<32x32xbf16>
    %cst_37 = arith.constant dense<0.000000e+00> : vector<16x32xf32>
    %106 = tpu.matmul %104, %105, %cst_37 {dimension_numbers = #tpu.dot_dimension_numbers<[1], [0], [0], [1], [0, 0, 1, 1], [], []>} : vector<16x32xbf16>, vector<32x32xbf16>, vector<16x32xf32> -> vector<16x32xf32>
    %c0_38 = arith.constant 0 : index
    %c0_39 = arith.constant 0 : index
    %107 = vector.load %arg7[%c0_38, %c0_39] : memref<1x32xf32, #tpu.memory_space<vmem>>, vector<1x32xf32>
    %108 = vector.broadcast %107 : vector<1x32xf32> to vector<16x32xf32>
    %109 = arith.addf %106, %108 : vector<16x32xf32>
    %110 = arith.addf %109, %1 : vector<16x32xf32>
    %c0_40 = arith.constant 0 : index
    %c0_41 = arith.constant 0 : index
    %111 = vector.load %arg8[%c0_40, %c0_41] : memref<1x32xf32, #tpu.memory_space<vmem>>, vector<1x32xf32>
    %c0_42 = arith.constant 0 : index
    %c0_43 = arith.constant 0 : index
    %112 = vector.load %arg9[%c0_42, %c0_43] : memref<1x32xf32, #tpu.memory_space<vmem>>, vector<1x32xf32>
    %cst_44 = arith.constant dense<0.000000e+00> : vector<16xf32>
    %113 = vector.multi_reduction <add>, %110, %cst_44 [1] : vector<16x32xf32> to vector<16xf32>
    %114 = vector.shape_cast %113 : vector<16xf32> to vector<16x1xf32>
    %cst_45 = arith.constant 3.200000e+01 : f32
    %115 = vector.broadcast %cst_45 : f32 to vector<16x1xf32>
    %116 = arith.divf %114, %115 : vector<16x1xf32>
    %117 = vector.broadcast %116 : vector<16x1xf32> to vector<16x32xf32>
    %118 = arith.subf %110, %117 : vector<16x32xf32>
    %119 = arith.mulf %118, %118 : vector<16x32xf32>
    %cst_46 = arith.constant dense<0.000000e+00> : vector<16xf32>
    %120 = vector.multi_reduction <add>, %119, %cst_46 [1] : vector<16x32xf32> to vector<16xf32>
    %121 = vector.shape_cast %120 : vector<16xf32> to vector<16x1xf32>
    %cst_47 = arith.constant 3.200000e+01 : f32
    %122 = vector.broadcast %cst_47 : f32 to vector<16x1xf32>
    %123 = arith.divf %121, %122 : vector<16x1xf32>
    %124 = vector.broadcast %116 : vector<16x1xf32> to vector<16x32xf32>
    %125 = arith.subf %110, %124 : vector<16x32xf32>
    %cst_48 = arith.constant 9.99999996E-13 : f32
    %126 = vector.broadcast %cst_48 : f32 to vector<16x1xf32>
    %127 = arith.addf %123, %126 : vector<16x1xf32>
    %128 = math.rsqrt %127 : vector<16x1xf32>
    %129 = vector.broadcast %128 : vector<16x1xf32> to vector<16x32xf32>
    %130 = arith.mulf %125, %129 : vector<16x32xf32>
    %131 = vector.broadcast %111 : vector<1x32xf32> to vector<16x32xf32>
    %132 = arith.mulf %130, %131 : vector<16x32xf32>
    %133 = vector.broadcast %112 : vector<1x32xf32> to vector<16x32xf32>
    %134 = arith.addf %132, %133 : vector<16x32xf32>
    %c0_49 = arith.constant 0 : index
    %c0_50 = arith.constant 0 : index
    %135 = vector.load %arg10[%c0_49, %c0_50] : memref<32x32xbf16, #tpu.memory_space<vmem>>, vector<32x32xbf16>
    %136 = arith.truncf %134 : vector<16x32xf32> to vector<16x32xbf16>
    %cst_51 = arith.constant dense<0.000000e+00> : vector<16x32xf32>
    %137 = tpu.matmul %136, %135, %cst_51 {dimension_numbers = #tpu.dot_dimension_numbers<[1], [0], [0], [1], [0, 0, 1, 1], [], []>} : vector<16x32xbf16>, vector<32x32xbf16>, vector<16x32xf32> -> vector<16x32xf32>
    %c0_52 = arith.constant 0 : index
    %c0_53 = arith.constant 0 : index
    %138 = vector.load %arg11[%c0_52, %c0_53] : memref<1x32xf32, #tpu.memory_space<vmem>>, vector<1x32xf32>
    %139 = vector.broadcast %138 : vector<1x32xf32> to vector<16x32xf32>
    %140 = arith.addf %137, %139 : vector<16x32xf32>
    %cst_54 = arith.constant 0.353553385 : f32
    %141 = vector.broadcast %cst_54 : f32 to vector<16x32xf32>
    %142 = arith.mulf %140, %141 : vector<16x32xf32>
    %143 = arith.truncf %142 : vector<16x32xf32> to vector<16x32xbf16>
    %c0_55 = arith.constant 0 : index
    %c0_56 = arith.constant 0 : index
    %144 = vector.load %arg12[%c0_55, %c0_56] : memref<32x64xbf16, #tpu.memory_space<vmem>>, vector<32x64xbf16>
    %145 = arith.truncf %3 : vector<8x32xf32> to vector<8x32xbf16>
    %cst_57 = arith.constant dense<0.000000e+00> : vector<8x64xf32>
    %146 = tpu.matmul %145, %144, %cst_57 {dimension_numbers = #tpu.dot_dimension_numbers<[1], [0], [0], [1], [0, 0, 1, 1], [], []>} : vector<8x32xbf16>, vector<32x64xbf16>, vector<8x64xf32> -> vector<8x64xf32>
    %c0_58 = arith.constant 0 : index
    %c0_59 = arith.constant 0 : index
    %147 = vector.load %arg13[%c0_58, %c0_59] : memref<1x64xf32, #tpu.memory_space<vmem>>, vector<1x64xf32>
    %148 = vector.broadcast %147 : vector<1x64xf32> to vector<8x64xf32>
    %149 = arith.addf %146, %148 : vector<8x64xf32>
    %150 = vector.extract_strided_slice %149 {offsets = [0, 0], sizes = [8, 32], strides = [1, 1]} : vector<8x64xf32> to vector<8x32xf32>
    %151 = arith.truncf %150 : vector<8x32xf32> to vector<8x32xbf16>
    %152 = vector.extract_strided_slice %149 {offsets = [0, 32], sizes = [8, 32], strides = [1, 1]} : vector<8x64xf32> to vector<8x32xf32>
    %153 = arith.truncf %152 : vector<8x32xf32> to vector<8x32xbf16>
    %c0_60 = arith.constant 0 : index
    %c0_61 = arith.constant 0 : index
    %c0_62 = arith.constant 0 : index
    %154 = vector.load %arg3[%c0_60, %c0_61, %c0_62] : memref<1x1x8xf32, #tpu.memory_space<vmem>>, vector<1x1x8xf32>
    %155 = vector.shape_cast %154 : vector<1x1x8xf32> to vector<1x8xf32>
    %156 = vector.extract_strided_slice %143 {offsets = [0, 0], sizes = [16, 8], strides = [1, 1]} : vector<16x32xbf16> to vector<16x8xbf16>
    %157 = vector.extract_strided_slice %151 {offsets = [0, 0], sizes = [8, 8], strides = [1, 1]} : vector<8x32xbf16> to vector<8x8xbf16>
    %cst_63 = arith.constant dense<0.000000e+00> : vector<16x8xf32>
    %158 = tpu.matmul %156, %157, %cst_63 {dimension_numbers = #tpu.dot_dimension_numbers<[1], [1], [0], [0], [0, 0, 1, 0], [], []>} : vector<16x8xbf16>, vector<8x8xbf16>, vector<16x8xf32> -> vector<16x8xf32>
    %159 = vector.broadcast %155 : vector<1x8xf32> to vector<16x8xf32>
    %160 = arith.addf %158, %159 : vector<16x8xf32>
    %cst_64 = arith.constant dense<0xFF800000> : vector<16xf32>
    %161 = vector.multi_reduction <maximumf>, %160, %cst_64 [1] : vector<16x8xf32> to vector<16xf32>
    %162 = vector.shape_cast %161 : vector<16xf32> to vector<16x1xf32>
    %163 = vector.broadcast %162 : vector<16x1xf32> to vector<16x8xf32>
    %164 = arith.subf %160, %163 : vector<16x8xf32>
    %165 = math.exp %164 : vector<16x8xf32>
    %cst_65 = arith.constant dense<0.000000e+00> : vector<16xf32>
    %166 = vector.multi_reduction <add>, %165, %cst_65 [1] : vector<16x8xf32> to vector<16xf32>
    %167 = vector.shape_cast %166 : vector<16xf32> to vector<16x1xf32>
    %168 = tpu.reciprocal %167 {approx = true} : vector<16x1xf32> -> vector<16x1xf32>
    %169 = vector.broadcast %168 : vector<16x1xf32> to vector<16x8xf32>
    %170 = arith.mulf %165, %169 : vector<16x8xf32>
    %171 = arith.truncf %170 : vector<16x8xf32> to vector<16x8xbf16>
    %172 = vector.extract_strided_slice %153 {offsets = [0, 0], sizes = [8, 8], strides = [1, 1]} : vector<8x32xbf16> to vector<8x8xbf16>
    %cst_66 = arith.constant dense<0.000000e+00> : vector<16x8xf32>
    %173 = tpu.matmul %171, %172, %cst_66 {dimension_numbers = #tpu.dot_dimension_numbers<[1], [0], [0], [1], [0, 0, 1, 1], [], []>} : vector<16x8xbf16>, vector<8x8xbf16>, vector<16x8xf32> -> vector<16x8xf32>
    %174 = arith.truncf %173 : vector<16x8xf32> to vector<16x8xbf16>
    %c0_67 = arith.constant 0 : index
    %c0_68 = arith.constant 0 : index
    %175 = vector.load %arg25[%c0_67, %c0_68] : memref<16x32xbf16, #tpu.memory_space<vmem>>, vector<16x8xbf16>
    tpu.vector_store %arg25[%c0_67, %c0_68], %174 {strides = array<i32>} : memref<16x32xbf16, #tpu.memory_space<vmem>>, vector<16x8xbf16>,
    %176 = vector.extract_strided_slice %143 {offsets = [0, 8], sizes = [16, 8], strides = [1, 1]} : vector<16x32xbf16> to vector<16x8xbf16>
    %177 = vector.extract_strided_slice %151 {offsets = [0, 8], sizes = [8, 8], strides = [1, 1]} : vector<8x32xbf16> to vector<8x8xbf16>
    %cst_69 = arith.constant dense<0.000000e+00> : vector<16x8xf32>
    %178 = tpu.matmul %176, %177, %cst_69 {dimension_numbers = #tpu.dot_dimension_numbers<[1], [1], [0], [0], [0, 0, 1, 0], [], []>} : vector<16x8xbf16>, vector<8x8xbf16>, vector<16x8xf32> -> vector<16x8xf32>
    %179 = vector.broadcast %155 : vector<1x8xf32> to vector<16x8xf32>
    %180 = arith.addf %178, %179 : vector<16x8xf32>
    %cst_70 = arith.constant dense<0xFF800000> : vector<16xf32>
    %181 = vector.multi_reduction <maximumf>, %180, %cst_70 [1] : vector<16x8xf32> to vector<16xf32>
    %182 = vector.shape_cast %181 : vector<16xf32> to vector<16x1xf32>
    %183 = vector.broadcast %182 : vector<16x1xf32> to vector<16x8xf32>
    %184 = arith.subf %180, %183 : vector<16x8xf32>
    %185 = math.exp %184 : vector<16x8xf32>
    %cst_71 = arith.constant dense<0.000000e+00> : vector<16xf32>
    %186 = vector.multi_reduction <add>, %185, %cst_71 [1] : vector<16x8xf32> to vector<16xf32>
    %187 = vector.shape_cast %186 : vector<16xf32> to vector<16x1xf32>
    %188 = tpu.reciprocal %187 {approx = true} : vector<16x1xf32> -> vector<16x1xf32>
    %189 = vector.broadcast %188 : vector<16x1xf32> to vector<16x8xf32>
    %190 = arith.mulf %185, %189 : vector<16x8xf32>
    %191 = arith.truncf %190 : vector<16x8xf32> to vector<16x8xbf16>
    %192 = vector.extract_strided_slice %153 {offsets = [0, 8], sizes = [8, 8], strides = [1, 1]} : vector<8x32xbf16> to vector<8x8xbf16>
    %cst_72 = arith.constant dense<0.000000e+00> : vector<16x8xf32>
    %193 = tpu.matmul %191, %192, %cst_72 {dimension_numbers = #tpu.dot_dimension_numbers<[1], [0], [0], [1], [0, 0, 1, 1], [], []>} : vector<16x8xbf16>, vector<8x8xbf16>, vector<16x8xf32> -> vector<16x8xf32>
    %194 = arith.truncf %193 : vector<16x8xf32> to vector<16x8xbf16>
    %c0_73 = arith.constant 0 : index
    %c8_74 = arith.constant 8 : index
    %195 = vector.load %arg25[%c0_73, %c8_74] : memref<16x32xbf16, #tpu.memory_space<vmem>>, vector<16x8xbf16>
    tpu.vector_store %arg25[%c0_73, %c8_74], %194 {strides = array<i32>} : memref<16x32xbf16, #tpu.memory_space<vmem>>, vector<16x8xbf16>,
    %196 = vector.extract_strided_slice %143 {offsets = [0, 16], sizes = [16, 8], strides = [1, 1]} : vector<16x32xbf16> to vector<16x8xbf16>
    %197 = vector.extract_strided_slice %151 {offsets = [0, 16], sizes = [8, 8], strides = [1, 1]} : vector<8x32xbf16> to vector<8x8xbf16>
    %cst_75 = arith.constant dense<0.000000e+00> : vector<16x8xf32>
    %198 = tpu.matmul %196, %197, %cst_75 {dimension_numbers = #tpu.dot_dimension_numbers<[1], [1], [0], [0], [0, 0, 1, 0], [], []>} : vector<16x8xbf16>, vector<8x8xbf16>, vector<16x8xf32> -> vector<16x8xf32>
    %199 = vector.broadcast %155 : vector<1x8xf32> to vector<16x8xf32>
    %200 = arith.addf %198, %199 : vector<16x8xf32>
    %cst_76 = arith.constant dense<0xFF800000> : vector<16xf32>
    %201 = vector.multi_reduction <maximumf>, %200, %cst_76 [1] : vector<16x8xf32> to vector<16xf32>
    %202 = vector.shape_cast %201 : vector<16xf32> to vector<16x1xf32>
    %203 = vector.broadcast %202 : vector<16x1xf32> to vector<16x8xf32>
    %204 = arith.subf %200, %203 : vector<16x8xf32>
    %205 = math.exp %204 : vector<16x8xf32>
    %cst_77 = arith.constant dense<0.000000e+00> : vector<16xf32>
    %206 = vector.multi_reduction <add>, %205, %cst_77 [1] : vector<16x8xf32> to vector<16xf32>
    %207 = vector.shape_cast %206 : vector<16xf32> to vector<16x1xf32>
    %208 = tpu.reciprocal %207 {approx = true} : vector<16x1xf32> -> vector<16x1xf32>
    %209 = vector.broadcast %208 : vector<16x1xf32> to vector<16x8xf32>
    %210 = arith.mulf %205, %209 : vector<16x8xf32>
    %211 = arith.truncf %210 : vector<16x8xf32> to vector<16x8xbf16>
    %212 = vector.extract_strided_slice %153 {offsets = [0, 16], sizes = [8, 8], strides = [1, 1]} : vector<8x32xbf16> to vector<8x8xbf16>
    %cst_78 = arith.constant dense<0.000000e+00> : vector<16x8xf32>
    %213 = tpu.matmul %211, %212, %cst_78 {dimension_numbers = #tpu.dot_dimension_numbers<[1], [0], [0], [1], [0, 0, 1, 1], [], []>} : vector<16x8xbf16>, vector<8x8xbf16>, vector<16x8xf32> -> vector<16x8xf32>
    %214 = arith.truncf %213 : vector<16x8xf32> to vector<16x8xbf16>
    %c0_79 = arith.constant 0 : index
    %c16_80 = arith.constant 16 : index
    %215 = vector.load %arg25[%c0_79, %c16_80] : memref<16x32xbf16, #tpu.memory_space<vmem>>, vector<16x8xbf16>
    tpu.vector_store %arg25[%c0_79, %c16_80], %214 {strides = array<i32>} : memref<16x32xbf16, #tpu.memory_space<vmem>>, vector<16x8xbf16>,
    %216 = vector.extract_strided_slice %143 {offsets = [0, 24], sizes = [16, 8], strides = [1, 1]} : vector<16x32xbf16> to vector<16x8xbf16>
    %217 = vector.extract_strided_slice %151 {offsets = [0, 24], sizes = [8, 8], strides = [1, 1]} : vector<8x32xbf16> to vector<8x8xbf16>
    %cst_81 = arith.constant dense<0.000000e+00> : vector<16x8xf32>
    %218 = tpu.matmul %216, %217, %cst_81 {dimension_numbers = #tpu.dot_dimension_numbers<[1], [1], [0], [0], [0, 0, 1, 0], [], []>} : vector<16x8xbf16>, vector<8x8xbf16>, vector<16x8xf32> -> vector<16x8xf32>
    %219 = vector.broadcast %155 : vector<1x8xf32> to vector<16x8xf32>
    %220 = arith.addf %218, %219 : vector<16x8xf32>
    %cst_82 = arith.constant dense<0xFF800000> : vector<16xf32>
    %221 = vector.multi_reduction <maximumf>, %220, %cst_82 [1] : vector<16x8xf32> to vector<16xf32>
    %222 = vector.shape_cast %221 : vector<16xf32> to vector<16x1xf32>
    %223 = vector.broadcast %222 : vector<16x1xf32> to vector<16x8xf32>
    %224 = arith.subf %220, %223 : vector<16x8xf32>
    %225 = math.exp %224 : vector<16x8xf32>
    %cst_83 = arith.constant dense<0.000000e+00> : vector<16xf32>
    %226 = vector.multi_reduction <add>, %225, %cst_83 [1] : vector<16x8xf32> to vector<16xf32>
    %227 = vector.shape_cast %226 : vector<16xf32> to vector<16x1xf32>
    %228 = tpu.reciprocal %227 {approx = true} : vector<16x1xf32> -> vector<16x1xf32>
    %229 = vector.broadcast %228 : vector<16x1xf32> to vector<16x8xf32>
    %230 = arith.mulf %225, %229 : vector<16x8xf32>
    %231 = arith.truncf %230 : vector<16x8xf32> to vector<16x8xbf16>
    %232 = vector.extract_strided_slice %153 {offsets = [0, 24], sizes = [8, 8], strides = [1, 1]} : vector<8x32xbf16> to vector<8x8xbf16>
    %cst_84 = arith.constant dense<0.000000e+00> : vector<16x8xf32>
    %233 = tpu.matmul %231, %232, %cst_84 {dimension_numbers = #tpu.dot_dimension_numbers<[1], [0], [0], [1], [0, 0, 1, 1], [], []>} : vector<16x8xbf16>, vector<8x8xbf16>, vector<16x8xf32> -> vector<16x8xf32>
    %234 = arith.truncf %233 : vector<16x8xf32> to vector<16x8xbf16>
    %c0_85 = arith.constant 0 : index
    %c24_86 = arith.constant 24 : index
    %235 = vector.load %arg25[%c0_85, %c24_86] : memref<16x32xbf16, #tpu.memory_space<vmem>>, vector<16x8xbf16>
    tpu.vector_store %arg25[%c0_85, %c24_86], %234 {strides = array<i32>} : memref<16x32xbf16, #tpu.memory_space<vmem>>, vector<16x8xbf16>,
    %c0_87 = arith.constant 0 : index
    %c0_88 = arith.constant 0 : index
    %236 = vector.load %arg25[%c0_87, %c0_88] : memref<16x32xbf16, #tpu.memory_space<vmem>>, vector<16x32xbf16>
    %c0_89 = arith.constant 0 : index
    %c0_90 = arith.constant 0 : index
    %237 = vector.load %arg14[%c0_89, %c0_90] : memref<32x32xbf16, #tpu.memory_space<vmem>>, vector<32x32xbf16>
    %cst_91 = arith.constant dense<0.000000e+00> : vector<16x32xf32>
    %238 = tpu.matmul %236, %237, %cst_91 {dimension_numbers = #tpu.dot_dimension_numbers<[1], [0], [0], [1], [0, 0, 1, 1], [], []>} : vector<16x32xbf16>, vector<32x32xbf16>, vector<16x32xf32> -> vector<16x32xf32>
    %c0_92 = arith.constant 0 : index
    %c0_93 = arith.constant 0 : index
    %239 = vector.load %arg15[%c0_92, %c0_93] : memref<1x32xf32, #tpu.memory_space<vmem>>, vector<1x32xf32>
    %240 = vector.broadcast %239 : vector<1x32xf32> to vector<16x32xf32>
    %241 = arith.addf %238, %240 : vector<16x32xf32>
    %242 = arith.addf %241, %134 : vector<16x32xf32>
    %c0_94 = arith.constant 0 : index
    %c0_95 = arith.constant 0 : index
    %243 = vector.load %arg16[%c0_94, %c0_95] : memref<1x32xf32, #tpu.memory_space<vmem>>, vector<1x32xf32>
    %c0_96 = arith.constant 0 : index
    %c0_97 = arith.constant 0 : index
    %244 = vector.load %arg17[%c0_96, %c0_97] : memref<1x32xf32, #tpu.memory_space<vmem>>, vector<1x32xf32>
    %cst_98 = arith.constant dense<0.000000e+00> : vector<16xf32>
    %245 = vector.multi_reduction <add>, %242, %cst_98 [1] : vector<16x32xf32> to vector<16xf32>
    %246 = vector.shape_cast %245 : vector<16xf32> to vector<16x1xf32>
    %cst_99 = arith.constant 3.200000e+01 : f32
    %247 = vector.broadcast %cst_99 : f32 to vector<16x1xf32>
    %248 = arith.divf %246, %247 : vector<16x1xf32>
    %249 = vector.broadcast %248 : vector<16x1xf32> to vector<16x32xf32>
    %250 = arith.subf %242, %249 : vector<16x32xf32>
    %251 = arith.mulf %250, %250 : vector<16x32xf32>
    %cst_100 = arith.constant dense<0.000000e+00> : vector<16xf32>
    %252 = vector.multi_reduction <add>, %251, %cst_100 [1] : vector<16x32xf32> to vector<16xf32>
    %253 = vector.shape_cast %252 : vector<16xf32> to vector<16x1xf32>
    %cst_101 = arith.constant 3.200000e+01 : f32
    %254 = vector.broadcast %cst_101 : f32 to vector<16x1xf32>
    %255 = arith.divf %253, %254 : vector<16x1xf32>
    %256 = vector.broadcast %248 : vector<16x1xf32> to vector<16x32xf32>
    %257 = arith.subf %242, %256 : vector<16x32xf32>
    %cst_102 = arith.constant 9.99999996E-13 : f32
    %258 = vector.broadcast %cst_102 : f32 to vector<16x1xf32>
    %259 = arith.addf %255, %258 : vector<16x1xf32>
    %260 = math.rsqrt %259 : vector<16x1xf32>
    %261 = vector.broadcast %260 : vector<16x1xf32> to vector<16x32xf32>
    %262 = arith.mulf %257, %261 : vector<16x32xf32>
    %263 = vector.broadcast %243 : vector<1x32xf32> to vector<16x32xf32>
    %264 = arith.mulf %262, %263 : vector<16x32xf32>
    %265 = vector.broadcast %244 : vector<1x32xf32> to vector<16x32xf32>
    %266 = arith.addf %264, %265 : vector<16x32xf32>
    %267 = arith.truncf %266 : vector<16x32xf32> to vector<16x32xbf16>
    %c0_103 = arith.constant 0 : index
    %c0_104 = arith.constant 0 : index
    %268 = vector.load %arg18[%c0_103, %c0_104] : memref<32x64xbf16, #tpu.memory_space<vmem>>, vector<32x64xbf16>
    %cst_105 = arith.constant dense<0.000000e+00> : vector<16x64xf32>
    %269 = tpu.matmul %267, %268, %cst_105 {dimension_numbers = #tpu.dot_dimension_numbers<[1], [0], [0], [1], [0, 0, 1, 1], [], []>} : vector<16x32xbf16>, vector<32x64xbf16>, vector<16x64xf32> -> vector<16x64xf32>
    %c0_106 = arith.constant 0 : index
    %c0_107 = arith.constant 0 : index
    %270 = vector.load %arg19[%c0_106, %c0_107] : memref<1x64xf32, #tpu.memory_space<vmem>>, vector<1x64xf32>
    %271 = vector.broadcast %270 : vector<1x64xf32> to vector<16x64xf32>
    %272 = arith.addf %269, %271 : vector<16x64xf32>
    %cst_108 = arith.constant 5.000000e-01 : f32
    %273 = vector.broadcast %cst_108 : f32 to vector<16x64xf32>
    %274 = arith.mulf %273, %272 : vector<16x64xf32>
    %cst_109 = arith.constant 4.471500e-02 : f32
    %275 = vector.broadcast %cst_109 : f32 to vector<16x64xf32>
    %276 = arith.mulf %275, %272 : vector<16x64xf32>
    %277 = arith.mulf %276, %272 : vector<16x64xf32>
    %278 = arith.mulf %277, %272 : vector<16x64xf32>
    %279 = arith.addf %272, %278 : vector<16x64xf32>
    %cst_110 = arith.constant 0.797884583 : f32
    %280 = vector.broadcast %cst_110 : f32 to vector<16x64xf32>
    %281 = arith.mulf %280, %279 : vector<16x64xf32>
    %282 = math.tanh %281 : vector<16x64xf32>
    %cst_111 = arith.constant 1.000000e+00 : f32
    %283 = vector.broadcast %cst_111 : f32 to vector<16x64xf32>
    %284 = arith.addf %283, %282 : vector<16x64xf32>
    %285 = arith.mulf %274, %284 : vector<16x64xf32>
    %286 = arith.truncf %285 : vector<16x64xf32> to vector<16x64xbf16>
    %c0_112 = arith.constant 0 : index
    %c0_113 = arith.constant 0 : index
    %287 = vector.load %arg20[%c0_112, %c0_113] : memref<64x32xbf16, #tpu.memory_space<vmem>>, vector<64x32xbf16>
    %cst_114 = arith.constant dense<0.000000e+00> : vector<16x32xf32>
    %288 = tpu.matmul %286, %287, %cst_114 {dimension_numbers = #tpu.dot_dimension_numbers<[1], [0], [0], [1], [0, 0, 1, 1], [], []>} : vector<16x64xbf16>, vector<64x32xbf16>, vector<16x32xf32> -> vector<16x32xf32>
    %c0_115 = arith.constant 0 : index
    %c0_116 = arith.constant 0 : index
    %289 = vector.load %arg21[%c0_115, %c0_116] : memref<1x32xf32, #tpu.memory_space<vmem>>, vector<1x32xf32>
    %290 = vector.broadcast %289 : vector<1x32xf32> to vector<16x32xf32>
    %291 = arith.addf %288, %290 : vector<16x32xf32>
    %292 = arith.addf %291, %266 : vector<16x32xf32>
    %c0_117 = arith.constant 0 : index
    %c0_118 = arith.constant 0 : index
    %293 = vector.load %arg22[%c0_117, %c0_118] : memref<1x32xf32, #tpu.memory_space<vmem>>, vector<1x32xf32>
    %c0_119 = arith.constant 0 : index
    %c0_120 = arith.constant 0 : index
    %294 = vector.load %arg23[%c0_119, %c0_120] : memref<1x32xf32, #tpu.memory_space<vmem>>, vector<1x32xf32>
    %cst_121 = arith.constant dense<0.000000e+00> : vector<16xf32>
    %295 = vector.multi_reduction <add>, %292, %cst_121 [1] : vector<16x32xf32> to vector<16xf32>
    %296 = vector.shape_cast %295 : vector<16xf32> to vector<16x1xf32>
    %cst_122 = arith.constant 3.200000e+01 : f32
    %297 = vector.broadcast %cst_122 : f32 to vector<16x1xf32>
    %298 = arith.divf %296, %297 : vector<16x1xf32>
    %299 = vector.broadcast %298 : vector<16x1xf32> to vector<16x32xf32>
    %300 = arith.subf %292, %299 : vector<16x32xf32>
    %301 = arith.mulf %300, %300 : vector<16x32xf32>
    %cst_123 = arith.constant dense<0.000000e+00> : vector<16xf32>
    %302 = vector.multi_reduction <add>, %301, %cst_123 [1] : vector<16x32xf32> to vector<16xf32>
    %303 = vector.shape_cast %302 : vector<16xf32> to vector<16x1xf32>
    %cst_124 = arith.constant 3.200000e+01 : f32
    %304 = vector.broadcast %cst_124 : f32 to vector<16x1xf32>
    %305 = arith.divf %303, %304 : vector<16x1xf32>
    %306 = vector.broadcast %298 : vector<16x1xf32> to vector<16x32xf32>
    %307 = arith.subf %292, %306 : vector<16x32xf32>
    %cst_125 = arith.constant 9.99999996E-13 : f32
    %308 = vector.broadcast %cst_125 : f32 to vector<16x1xf32>
    %309 = arith.addf %305, %308 : vector<16x1xf32>
    %310 = math.rsqrt %309 : vector<16x1xf32>
    %311 = vector.broadcast %310 : vector<16x1xf32> to vector<16x32xf32>
    %312 = arith.mulf %307, %311 : vector<16x32xf32>
    %313 = vector.broadcast %293 : vector<1x32xf32> to vector<16x32xf32>
    %314 = arith.mulf %312, %313 : vector<16x32xf32>
    %315 = vector.broadcast %294 : vector<1x32xf32> to vector<16x32xf32>
    %316 = arith.addf %314, %315 : vector<16x32xf32>
    %c0_126 = arith.constant 0 : index
    %c0_127 = arith.constant 0 : index
    %c0_128 = arith.constant 0 : index
    %317 = vector.load %arg24[%c0_126, %c0_127, %c0_128] : memref<1x16x32xf32, #tpu.memory_space<vmem>>, vector<1x16x32xf32>
    %318 = vector.shape_cast %317 : vector<1x16x32xf32> to vector<16x32xf32>
    %319 = vector.shape_cast %316 : vector<16x32xf32> to vector<1x16x32xf32>
    tpu.vector_store %arg24[%c0_126, %c0_127, %c0_128], %319 {strides = array<i32>} : memref<1x16x32xf32, #tpu.memory_space<vmem>>, vector<1x16x32xf32>,
    return
  }
  func.func @transform_0(%arg0: i32) -> (i32, i32, i32) {
    %c0_i32 = arith.constant 0 : i32
    %c0_i32_0 = arith.constant 0 : i32
    %c0_i32_1 = arith.constant 0 : i32
    return %arg0, %c0_i32, %c0_i32_0 : i32, i32, i32
  }
  func.func @transform_1(%arg0: i32) -> (i32, i32, i32) {
    %c0_i32 = arith.constant 0 : i32
    %c0_i32_0 = arith.constant 0 : i32
    %c0_i32_1 = arith.constant 0 : i32
    return %arg0, %c0_i32, %c0_i32_0 : i32, i32, i32
  }
  func.func @transform_2(%arg0: i32) -> (i32, i32, i32) {
    %c0_i32 = arith.constant 0 : i32
    %c0_i32_0 = arith.constant 0 : i32
    %c0_i32_1 = arith.constant 0 : i32
    return %arg0, %c0_i32, %c0_i32_0 : i32, i32, i32
  }
  func.func @transform_3(%arg0: i32) -> (i32, i32) {
    %c0_i32 = arith.constant 0 : i32
    %c0_i32_0 = arith.constant 0 : i32
    %c0_i32_1 = arith.constant 0 : i32
    return %c0_i32, %c0_i32_0 : i32, i32
  }
  func.func @transform_4(%arg0: i32) -> (i32, i32) {
    %c0_i32 = arith.constant 0 : i32
    %c0_i32_0 = arith.constant 0 : i32
    %c0_i32_1 = arith.constant 0 : i32
    return %c0_i32, %c0_i32_0 : i32, i32
  }
  func.func @transform_5(%arg0: i32) -> (i32, i32) {
    %c0_i32 = arith.constant 0 : i32
    %c0_i32_0 = arith.constant 0 : i32
    %c0_i32_1 = arith.constant 0 : i32
    return %c0_i32, %c0_i32_0 : i32, i32
  }
  func.func @transform_6(%arg0: i32) -> (i32, i32) {
    %c0_i32 = arith.constant 0 : i32
    %c0_i32_0 = arith.constant 0 : i32
    %c0_i32_1 = arith.constant 0 : i32
    return %c0_i32, %c0_i32_0 : i32, i32
  }
  func.func @transform_7(%arg0: i32) -> (i32, i32) {
    %c0_i32 = arith.constant 0 : i32
    %c0_i32_0 = arith.constant 0 : i32
    %c0_i32_1 = arith.constant 0 : i32
    return %c0_i32, %c0_i32_0 : i32, i32
  }
  func.func @transform_8(%arg0: i32) -> (i32, i32) {
    %c0_i32 = arith.constant 0 : i32
    %c0_i32_0 = arith.constant 0 : i32
    %c0_i32_1 = arith.constant 0 : i32
    return %c0_i32, %c0_i32_0 : i32, i32
  }
  func.func @transform_9(%arg0: i32) -> (i32, i32) {
    %c0_i32 = arith.constant 0 : i32
    %c0_i32_0 = arith.constant 0 : i32
    %c0_i32_1 = arith.constant 0 : i32
    return %c0_i32, %c0_i32_0 : i32, i32
  }
  func.func @transform_10(%arg0: i32) -> (i32, i32) {
    %c0_i32 = arith.constant 0 : i32
    %c0_i32_0 = arith.constant 0 : i32
    %c0_i32_1 = arith.constant 0 : i32
    return %c0_i32, %c0_i32_0 : i32, i32
  }
  func.func @transform_11(%arg0: i32) -> (i32, i32) {
    %c0_i32 = arith.constant 0 : i32
    %c0_i32_0 = arith.constant 0 : i32
    %c0_i32_1 = arith.constant 0 : i32
    return %c0_i32, %c0_i32_0 : i32, i32
  }
  func.func @transform_12(%arg0: i32) -> (i32, i32) {
    %c0_i32 = arith.constant 0 : i32
    %c0_i32_0 = arith.constant 0 : i32
    %c0_i32_1 = arith.constant 0 : i32
    return %c0_i32, %c0_i32_0 : i32, i32
  }
  func.func @transform_13(%arg0: i32) -> (i32, i32) {
    %c0_i32 = arith.constant 0 : i32
    %c0_i32_0 = arith.constant 0 : i32
    %c0_i32_1 = arith.constant 0 : i32
    return %c0_i32, %c0_i32_0 : i32, i32
  }
  func.func @transform_14(%arg0: i32) -> (i32, i32) {
    %c0_i32 = arith.constant 0 : i32
    %c0_i32_0 = arith.constant 0 : i32
    %c0_i32_1 = arith.constant 0 : i32
    return %c0_i32, %c0_i32_0 : i32, i32
  }
  func.func @transform_15(%arg0: i32) -> (i32, i32) {
    %c0_i32 = arith.constant 0 : i32
    %c0_i32_0 = arith.constant 0 : i32
    %c0_i32_1 = arith.constant 0 : i32
    return %c0_i32, %c0_i32_0 : i32, i32
  }
  func.func @transform_16(%arg0: i32) -> (i32, i32) {
    %c0_i32 = arith.constant 0 : i32
    %c0_i32_0 = arith.constant 0 : i32
    %c0_i32_1 = arith.constant 0 : i32
    return %c0_i32, %c0_i32_0 : i32, i32
  }
  func.func @transform_17(%arg0: i32) -> (i32, i32) {
    %c0_i32 = arith.constant 0 : i32
    %c0_i32_0 = arith.constant 0 : i32
    %c0_i32_1 = arith.constant 0 : i32
    return %c0_i32, %c0_i32_0 : i32, i32
  }
  func.func @transform_18(%arg0: i32) -> (i32, i32) {
    %c0_i32 = arith.constant 0 : i32
    %c0_i32_0 = arith.constant 0 : i32
    %c0_i32_1 = arith.constant 0 : i32
    return %c0_i32, %c0_i32_0 : i32, i32
  }
  func.func @transform_19(%arg0: i32) -> (i32, i32) {
    %c0_i32 = arith.constant 0 : i32
    %c0_i32_0 = arith.constant 0 : i32
    %c0_i32_1 = arith.constant 0 : i32
    return %c0_i32, %c0_i32_0 : i32, i32
  }
  func.func @transform_20(%arg0: i32) -> (i32, i32) {
    %c0_i32 = arith.constant 0 : i32
    %c0_i32_0 = arith.constant 0 : i32
    %c0_i32_1 = arith.constant 0 : i32
    return %c0_i32, %c0_i32_0 : i32, i32
  }
  func.func @transform_21(%arg0: i32) -> (i32, i32) {
    %c0_i32 = arith.constant 0 : i32
    %c0_i32_0 = arith.constant 0 : i32
    %c0_i32_1 = arith.constant 0 : i32
    return %c0_i32, %c0_i32_0 : i32, i32
  }
  func.func @transform_22(%arg0: i32) -> (i32, i32) {
    %c0_i32 = arith.constant 0 : i32
    %c0_i32_0 = arith.constant 0 : i32
    %c0_i32_1 = arith.constant 0 : i32
    return %c0_i32, %c0_i32_0 : i32, i32
  }
  func.func @transform_23(%arg0: i32) -> (i32, i32, i32) {
    %c0_i32 = arith.constant 0 : i32
    %c0_i32_0 = arith.constant 0 : i32
    %c0_i32_1 = arith.constant 0 : i32
    return %arg0, %c0_i32, %c0_i32_0 : i32, i32, i32
  }
}

module attributes {stable_mosaic.version = 11 : i64} {
  func.func @_decoder_layer_kernel(%arg0: i32, %arg1: memref<1x16x32xf32, #tpu.memory_space<vmem>>, %arg2: memref<1x8x32xf32, #tpu.memory_space<vmem>>, %arg3: memref<1x1x8xf32, #tpu.memory_space<vmem>>, %arg4: memref<32x96xbf16, #tpu.memory_space<vmem>>, %arg5: memref<1x96xf32, #tpu.memory_space<vmem>>, %arg6: memref<32x32xbf16, #tpu.memory_space<vmem>>, %arg7: memref<1x32xf32, #tpu.memory_space<vmem>>, %arg8: memref<1x32xf32, #tpu.memory_space<vmem>>, %arg9: memref<1x32xf32, #tpu.memory_space<vmem>>, %arg10: memref<32x32xbf16, #tpu.memory_space<vmem>>, %arg11: memref<1x32xf32, #tpu.memory_space<vmem>>, %arg12: memref<32x64xbf16, #tpu.memory_space<vmem>>, %arg13: memref<1x64xf32, #tpu.memory_space<vmem>>, %arg14: memref<32x32xbf16, #tpu.memory_space<vmem>>, %arg15: memref<1x32xf32, #tpu.memory_space<vmem>>, %arg16: memref<1x32xf32, #tpu.memory_space<vmem>>, %arg17: memref<1x32xf32, #tpu.memory_space<vmem>>, %arg18: memref<32x64xbf16, #tpu.memory_space<vmem>>, %arg19: memref<1x64xf32, #tpu.memory_space<vmem>>, %arg20: memref<64x32xbf16, #tpu.memory_space<vmem>>, %arg21: memref<1x32xf32, #tpu.memory_space<vmem>>, %arg22: memref<1x32xf32, #tpu.memory_space<vmem>>, %arg23: memref<1x32xf32, #tpu.memory_space<vmem>>, %arg24: memref<1x16x32xf32, #tpu.memory_space<vmem>>, %arg25: memref<16x32xbf16, #tpu.memory_space<vmem>>) attributes {dimension_semantics = [#tpu.dimension_semantics<parallel>], iteration_bounds = array<i64: 2>, scalar_prefetch = 0 : i64, scratch_operands = 1 : i64, tpu.core_type = #tpu.core_type<tc>, window_params = [{transform_indices = @transform_0, window_bounds = array<i64: 1, 16, 32>}, {transform_indices = @transform_1, window_bounds = array<i64: 1, 8, 32>}, {transform_indices = @transform_2, window_bounds = array<i64: 1, 1, 8>}, {pipeline_mode = #tpu.pipeline_mode<synchronous>, transform_indices = @transform_3, window_bounds = array<i64: 32, 96>}, {pipeline_mode = #tpu.pipeline_mode<synchronous>, transform_indices = @transform_4, window_bounds = array<i64: 1, 96>}, {pipeline_mode = #tpu.pipeline_mode<synchronous>, transform_indices = @transform_5, window_bounds = array<i64: 32, 32>}, {pipeline_mode = #tpu.pipeline_mode<synchronous>, transform_indices = @transform_6, window_bounds = array<i64: 1, 32>}, {pipeline_mode = #tpu.pipeline_mode<synchronous>, transform_indices = @transform_7, window_bounds = array<i64: 1, 32>}, {pipeline_mode = #tpu.pipeline_mode<synchronous>, transform_indices = @transform_8, window_bounds = array<i64: 1, 32>}, {pipeline_mode = #tpu.pipeline_mode<synchronous>, transform_indices = @transform_9, window_bounds = array<i64: 32, 32>}, {pipeline_mode = #tpu.pipeline_mode<synchronous>, transform_indices = @transform_10, window_bounds = array<i64: 1, 32>}, {pipeline_mode = #tpu.pipeline_mode<synchronous>, transform_indices = @transform_11, window_bounds = array<i64: 32, 64>}, {pipeline_mode = #tpu.pipeline_mode<synchronous>, transform_indices = @transform_12, window_bounds = array<i64: 1, 64>}, {pipeline_mode = #tpu.pipeline_mode<synchronous>, transform_indices = @transform_13, window_bounds = array<i64: 32, 32>}, {pipeline_mode = #tpu.pipeline_mode<synchronous>, transform_indices = @transform_14, window_bounds = array<i64: 1, 32>}, {pipeline_mode = #tpu.pipeline_mode<synchronous>, transform_indices = @transform_15, window_bounds = array<i64: 1, 32>}, {pipeline_mode = #tpu.pipeline_mode<synchronous>, transform_indices = @transform_16, window_bounds = array<i64: 1, 32>}, {pipeline_mode = #tpu.pipeline_mode<synchronous>, transform_indices = @transform_17, window_bounds = array<i64: 32, 64>}, {pipeline_mode = #tpu.pipeline_mode<synchronous>, transform_indices = @transform_18, window_bounds = array<i64: 1, 64>}, {pipeline_mode = #tpu.pipeline_mode<synchronous>, transform_indices = @transform_19, window_bounds = array<i64: 64, 32>}, {pipeline_mode = #tpu.pipeline_mode<synchronous>, transform_indices = @transform_20, window_bounds = array<i64: 1, 32>}, {pipeline_mode = #tpu.pipeline_mode<synchronous>, transform_indices = @transform_21, window_bounds = array<i64: 1, 32>}, {pipeline_mode = #tpu.pipeline_mode<synchronous>, transform_indices = @transform_22, window_bounds = array<i64: 1, 32>}, {transform_indices = @transform_23, window_bounds = array<i64: 1, 16, 32>}]} {
    %c0 = arith.constant 0 : index
    %c0_0 = arith.constant 0 : index
    %c0_1 = arith.constant 0 : index
    %0 = vector.load %arg1[%c0, %c0_0, %c0_1] : memref<1x16x32xf32, #tpu.memory_space<vmem>>, vector<1x16x32xf32>
    %1 = vector.shape_cast %0 : vector<1x16x32xf32> to vector<16x32xf32>
    %c0_2 = arith.constant 0 : index
    %c0_3 = arith.constant 0 : index
    %c0_4 = arith.constant 0 : index
    %2 = vector.load %arg2[%c0_2, %c0_3, %c0_4] : memref<1x8x32xf32, #tpu.memory_space<vmem>>, vector<1x8x32xf32>
    %3 = vector.shape_cast %2 : vector<1x8x32xf32> to vector<8x32xf32>
    %4 = tpu.iota {dimensions = array<i32: 1>} : vector<1x16xi32>
    %c15_i32 = arith.constant 15 : i32
    %5 = vector.broadcast %c15_i32 : i32 to vector<1x16xi32>
    %6 = arith.cmpi slt, %4, %5 : vector<1x16xi32>
    %cst = arith.constant 0.000000e+00 : f32
    %cst_5 = arith.constant -1.000000e+04 : f32
    %7 = vector.broadcast %cst : f32 to vector<1x16xf32>
    %8 = vector.broadcast %cst_5 : f32 to vector<1x16xf32>
    %9 = arith.select %6, %7, %8 : vector<1x16xi1>, vector<1x16xf32>
    %c0_6 = arith.constant 0 : index
    %c0_7 = arith.constant 0 : index
    %10 = vector.load %arg4[%c0_6, %c0_7] : memref<32x96xbf16, #tpu.memory_space<vmem>>, vector<32x96xbf16>
    %11 = arith.truncf %1 : vector<16x32xf32> to vector<16x32xbf16>
    %cst_8 = arith.constant dense<0.000000e+00> : vector<16x96xf32>
    %12 = tpu.matmul %11, %10, %cst_8 {dimension_numbers = #tpu.dot_dimension_numbers<[1], [0], [0], [1], [0, 0, 1, 1], [], []>} : vector<16x32xbf16>, vector<32x96xbf16>, vector<16x96xf32> -> vector<16x96xf32>
    %c0_9 = arith.constant 0 : index
    %c0_10 = arith.constant 0 : index
    %13 = vector.load %arg5[%c0_9, %c0_10] : memref<1x96xf32, #tpu.memory_space<vmem>>, vector<1x96xf32>
    %14 = vector.broadcast %13 : vector<1x96xf32> to vector<16x96xf32>
    %15 = arith.addf %12, %14 : vector<16x96xf32>
    %16 = vector.extract_strided_slice %15 {offsets = [0, 0], sizes = [16, 32], strides = [1, 1]} : vector<16x96xf32> to vector<16x32xf32>
    %cst_11 = arith.constant 0.353553385 : f32
    %17 = vector.broadcast %cst_11 : f32 to vector<16x32xf32>
    %18 = arith.mulf %16, %17 : vector<16x32xf32>
    %19 = arith.truncf %18 : vector<16x32xf32> to vector<16x32xbf16>
    %20 = vector.extract_strided_slice %15 {offsets = [0, 32], sizes = [16, 32], strides = [1, 1]} : vector<16x96xf32> to vector<16x32xf32>
    %21 = arith.truncf %20 : vector<16x32xf32> to vector<16x32xbf16>
    %22 = vector.extract_strided_slice %15 {offsets = [0, 64], sizes = [16, 32], strides = [1, 1]} : vector<16x96xf32> to vector<16x32xf32>
    %23 = arith.truncf %22 : vector<16x32xf32> to vector<16x32xbf16>
    %24 = vector.extract_strided_slice %19 {offsets = [0, 0], sizes = [16, 8], strides = [1, 1]} : vector<16x32xbf16> to vector<16x8xbf16>
    %25 = vector.extract_strided_slice %21 {offsets = [0, 0], sizes = [16, 8], strides = [1, 1]} : vector<16x32xbf16> to vector<16x8xbf16>
    %cst_12 = arith.constant dense<0.000000e+00> : vector<16x16xf32>
    %26 = tpu.matmul %24, %25, %cst_12 {dimension_numbers = #tpu.dot_dimension_numbers<[1], [1], [0], [0], [0, 0, 1, 0], [], []>} : vector<16x8xbf16>, vector<16x8xbf16>, vector<16x16xf32> -> vector<16x16xf32>
    %27 = vector.broadcast %9 : vector<1x16xf32> to vector<16x16xf32>
    %28 = arith.addf %26, %27 : vector<16x16xf32>
    %cst_13 = arith.constant dense<0xFF800000> : vector<16xf32>
    %29 = vector.multi_reduction <maximumf>, %28, %cst_13 [1] : vector<16x16xf32> to vector<16xf32>
    %30 = vector.shape_cast %29 : vector<16xf32> to vector<16x1xf32>
    %31 = vector.broadcast %30 : vector<16x1xf32> to vector<16x16xf32>
    %32 = arith.subf %28, %31 : vector<16x16xf32>
    %33 = math.exp %32 : vector<16x16xf32>
    %cst_14 = arith.constant dense<0.000000e+00> : vector<16xf32>
    %34 = vector.multi_reduction <add>, %33, %cst_14 [1] : vector<16x16xf32> to vector<16xf32>
    %35 = vector.shape_cast %34 : vector<16xf32> to vector<16x1xf32>
    %36 = tpu.reciprocal %35 {approx = true} : vector<16x1xf32> -> vector<16x1xf32>
    %37 = vector.broadcast %36 : vector<16x1xf32> to vector<16x16xf32>
    %38 = arith.mulf %33, %37 : vector<16x16xf32>
    %39 = arith.truncf %38 : vector<16x16xf32> to vector<16x16xbf16>
    %40 = vector.extract_strided_slice %23 {offsets = [0, 0], sizes = [16, 8], strides = [1, 1]} : vector<16x32xbf16> to vector<16x8xbf16>
    %cst_15 = arith.constant dense<0.000000e+00> : vector<16x8xf32>
    %41 = tpu.matmul %39, %40, %cst_15 {dimension_numbers = #tpu.dot_dimension_numbers<[1], [0], [0], [1], [0, 0, 1, 1], [], []>} : vector<16x16xbf16>, vector<16x8xbf16>, vector<16x8xf32> -> vector<16x8xf32>
    %42 = arith.truncf %41 : vector<16x8xf32> to vector<16x8xbf16>
    %c0_16 = arith.constant 0 : index
    %c0_17 = arith.constant 0 : index
    %43 = vector.load %arg25[%c0_16, %c0_17] : memref<16x32xbf16, #tpu.memory_space<vmem>>, vector<16x8xbf16>
    tpu.vector_store %arg25[%c0_16, %c0_17], %42 {strides = array<i32>} : memref<16x32xbf16, #tpu.memory_space<vmem>>, vector<16x8xbf16>,
    %44 = vector.extract_strided_slice %19 {offsets = [0, 8], sizes = [16, 8], strides = [1, 1]} : vector<16x32xbf16> to vector<16x8xbf16>
    %45 = vector.extract_strided_slice %21 {offsets = [0, 8], sizes = [16, 8], strides = [1, 1]} : vector<16x32xbf16> to vector<16x8xbf16>
    %cst_18 = arith.constant dense<0.000000e+00> : vector<16x16xf32>
    %46 = tpu.matmul %44, %45, %cst_18 {dimension_numbers = #tpu.dot_dimension_numbers<[1], [1], [0], [0], [0, 0, 1, 0], [], []>} : vector<16x8xbf16>, vector<16x8xbf16>, vector<16x16xf32> -> vector<16x16xf32>
    %47 = vector.broadcast %9 : vector<1x16xf32> to vector<16x16xf32>
    %48 = arith.addf %46, %47 : vector<16x16xf32>
    %cst_19 = arith.constant dense<0xFF800000> : vector<16xf32>
    %49 = vector.multi_reduction <maximumf>, %48, %cst_19 [1] : vector<16x16xf32> to vector<16xf32>
    %50 = vector.shape_cast %49 : vector<16xf32> to vector<16x1xf32>
    %51 = vector.broadcast %50 : vector<16x1xf32> to vector<16x16xf32>
    %52 = arith.subf %48, %51 : vector<16x16xf32>
    %53 = math.exp %52 : vector<16x16xf32>
    %cst_20 = arith.constant dense<0.000000e+00> : vector<16xf32>
    %54 = vector.multi_reduction <add>, %53, %cst_20 [1] : vector<16x16xf32> to vector<16xf32>
    %55 = vector.shape_cast %54 : vector<16xf32> to vector<16x1xf32>
    %56 = tpu.reciprocal %55 {approx = true} : vector<16x1xf32> -> vector<16x1xf32>
    %57 = vector.broadcast %56 : vector<16x1xf32> to vector<16x16xf32>
    %58 = arith.mulf %53, %57 : vector<16x16xf32>
    %59 = arith.truncf %58 : vector<16x16xf32> to vector<16x16xbf16>
    %60 = vector.extract_strided_slice %23 {offsets = [0, 8], sizes = [16, 8], strides = [1, 1]} : vector<16x32xbf16> to vector<16x8xbf16>
    %cst_21 = arith.constant dense<0.000000e+00> : vector<16x8xf32>
    %61 = tpu.matmul %59, %60, %cst_21 {dimension_numbers = #tpu.dot_dimension_numbers<[1], [0], [0], [1], [0, 0, 1, 1], [], []>} : vector<16x16xbf16>, vector<16x8xbf16>, vector<16x8xf32> -> vector<16x8xf32>
    %62 = arith.truncf %61 : vector<16x8xf32> to vector<16x8xbf16>
    %c0_22 = arith.constant 0 : index
    %c8 = arith.constant 8 : index
    %63 = vector.load %arg25[%c0_22, %c8] : memref<16x32xbf16, #tpu.memory_space<vmem>>, vector<16x8xbf16>
    tpu.vector_store %arg25[%c0_22, %c8], %62 {strides = array<i32>} : memref<16x32xbf16, #tpu.memory_space<vmem>>, vector<16x8xbf16>,
    %64 = vector.extract_strided_slice %19 {offsets = [0, 16], sizes = [16, 8], strides = [1, 1]} : vector<16x32xbf16> to vector<16x8xbf16>
    %65 = vector.extract_strided_slice %21 {offsets = [0, 16], sizes = [16, 8], strides = [1, 1]} : vector<16x32xbf16> to vector<16x8xbf16>
    %cst_23 = arith.constant dense<0.000000e+00> : vector<16x16xf32>
    %66 = tpu.matmul %64, %65, %cst_23 {dimension_numbers = #tpu.dot_dimension_numbers<[1], [1], [0], [0], [0, 0, 1, 0], [], []>} : vector<16x8xbf16>, vector<16x8xbf16>, vector<16x16xf32> -> vector<16x16xf32>
    %67 = vector.broadcast %9 : vector<1x16xf32> to vector<16x16xf32>
    %68 = arith.addf %66, %67 : vector<16x16xf32>
    %cst_24 = arith.constant dense<0xFF800000> : vector<16xf32>
    %69 = vector.multi_reduction <maximumf>, %68, %cst_24 [1] : vector<16x16xf32> to vector<16xf32>
    %70 = vector.shape_cast %69 : vector<16xf32> to vector<16x1xf32>
    %71 = vector.broadcast %70 : vector<16x1xf32> to vector<16x16xf32>
    %72 = arith.subf %68, %71 : vector<16x16xf32>
    %73 = math.exp %72 : vector<16x16xf32>
    %cst_25 = arith.constant dense<0.000000e+00> : vector<16xf32>
    %74 = vector.multi_reduction <add>, %73, %cst_25 [1] : vector<16x16xf32> to vector<16xf32>
    %75 = vector.shape_cast %74 : vector<16xf32> to vector<16x1xf32>
    %76 = tpu.reciprocal %75 {approx = true} : vector<16x1xf32> -> vector<16x1xf32>
    %77 = vector.broadcast %76 : vector<16x1xf32> to vector<16x16xf32>
    %78 = arith.mulf %73, %77 : vector<16x16xf32>
    %79 = arith.truncf %78 : vector<16x16xf32> to vector<16x16xbf16>
    %80 = vector.extract_strided_slice %23 {offsets = [0, 16], sizes = [16, 8], strides = [1, 1]} : vector<16x32xbf16> to vector<16x8xbf16>
    %cst_26 = arith.constant dense<0.000000e+00> : vector<16x8xf32>
    %81 = tpu.matmul %79, %80, %cst_26 {dimension_numbers = #tpu.dot_dimension_numbers<[1], [0], [0], [1], [0, 0, 1, 1], [], []>} : vector<16x16xbf16>, vector<16x8xbf16>, vector<16x8xf32> -> vector<16x8xf32>
    %82 = arith.truncf %81 : vector<16x8xf32> to vector<16x8xbf16>
    %c0_27 = arith.constant 0 : index
    %c16 = arith.constant 16 : index
    %83 = vector.load %arg25[%c0_27, %c16] : memref<16x32xbf16, #tpu.memory_space<vmem>>, vector<16x8xbf16>
    tpu.vector_store %arg25[%c0_27, %c16], %82 {strides = array<i32>} : memref<16x32xbf16, #tpu.memory_space<vmem>>, vector<16x8xbf16>,
    %84 = vector.extract_strided_slice %19 {offsets = [0, 24], sizes = [16, 8], strides = [1, 1]} : vector<16x32xbf16> to vector<16x8xbf16>
    %85 = vector.extract_strided_slice %21 {offsets = [0, 24], sizes = [16, 8], strides = [1, 1]} : vector<16x32xbf16> to vector<16x8xbf16>
    %cst_28 = arith.constant dense<0.000000e+00> : vector<16x16xf32>
    %86 = tpu.matmul %84, %85, %cst_28 {dimension_numbers = #tpu.dot_dimension_numbers<[1], [1], [0], [0], [0, 0, 1, 0], [], []>} : vector<16x8xbf16>, vector<16x8xbf16>, vector<16x16xf32> -> vector<16x16xf32>
    %87 = vector.broadcast %9 : vector<1x16xf32> to vector<16x16xf32>
    %88 = arith.addf %86, %87 : vector<16x16xf32>
    %cst_29 = arith.constant dense<0xFF800000> : vector<16xf32>
    %89 = vector.multi_reduction <maximumf>, %88, %cst_29 [1] : vector<16x16xf32> to vector<16xf32>
    %90 = vector.shape_cast %89 : vector<16xf32> to vector<16x1xf32>
    %91 = vector.broadcast %90 : vector<16x1xf32> to vector<16x16xf32>
    %92 = arith.subf %88, %91 : vector<16x16xf32>
    %93 = math.exp %92 : vector<16x16xf32>
    %cst_30 = arith.constant dense<0.000000e+00> : vector<16xf32>
    %94 = vector.multi_reduction <add>, %93, %cst_30 [1] : vector<16x16xf32> to vector<16xf32>
    %95 = vector.shape_cast %94 : vector<16xf32> to vector<16x1xf32>
    %96 = tpu.reciprocal %95 {approx = true} : vector<16x1xf32> -> vector<16x1xf32>
    %97 = vector.broadcast %96 : vector<16x1xf32> to vector<16x16xf32>
    %98 = arith.mulf %93, %97 : vector<16x16xf32>
    %99 = arith.truncf %98 : vector<16x16xf32> to vector<16x16xbf16>
    %100 = vector.extract_strided_slice %23 {offsets = [0, 24], sizes = [16, 8], strides = [1, 1]} : vector<16x32xbf16> to vector<16x8xbf16>
    %cst_31 = arith.constant dense<0.000000e+00> : vector<16x8xf32>
    %101 = tpu.matmul %99, %100, %cst_31 {dimension_numbers = #tpu.dot_dimension_numbers<[1], [0], [0], [1], [0, 0, 1, 1], [], []>} : vector<16x16xbf16>, vector<16x8xbf16>, vector<16x8xf32> -> vector<16x8xf32>
    %102 = arith.truncf %101 : vector<16x8xf32> to vector<16x8xbf16>
    %c0_32 = arith.constant 0 : index
    %c24 = arith.constant 24 : index
    %103 = vector.load %arg25[%c0_32, %c24] : memref<16x32xbf16, #tpu.memory_space<vmem>>, vector<16x8xbf16>
    tpu.vector_store %arg25[%c0_32, %c24], %102 {strides = array<i32>} : memref<16x32xbf16, #tpu.memory_space<vmem>>, vector<16x8xbf16>,
    %c0_33 = arith.constant 0 : index
    %c0_34 = arith.constant 0 : index
    %104 = vector.load %arg25[%c0_33, %c0_34] : memref<16x32xbf16, #tpu.memory_space<vmem>>, vector<16x32xbf16>
    %c0_35 = arith.constant 0 : index
    %c0_36 = arith.constant 0 : index
    %105 = vector.load %arg6[%c0_35, %c0_36] : memref<32x32xbf16, #tpu.memory_space<vmem>>, vector<32x32xbf16>
    %cst_37 = arith.constant dense<0.000000e+00> : vector<16x32xf32>
    %106 = tpu.matmul %104, %105, %cst_37 {dimension_numbers = #tpu.dot_dimension_numbers<[1], [0], [0], [1], [0, 0, 1, 1], [], []>} : vector<16x32xbf16>, vector<32x32xbf16>, vector<16x32xf32> -> vector<16x32xf32>
    %c0_38 = arith.constant 0 : index
    %c0_39 = arith.constant 0 : index
    %107 = vector.load %arg7[%c0_38, %c0_39] : memref<1x32xf32, #tpu.memory_space<vmem>>, vector<1x32xf32>
    %108 = vector.broadcast %107 : vector<1x32xf32> to vector<16x32xf32>
    %109 = arith.addf %106, %108 : vector<16x32xf32>
    %110 = arith.addf %109, %1 : vector<16x32xf32>
    %c0_40 = arith.constant 0 : index
    %c0_41 = arith.constant 0 : index
    %111 = vector.load %arg8[%c0_40, %c0_41] : memref<1x32xf32, #tpu.memory_space<vmem>>, vector<1x32xf32>
    %c0_42 = arith.constant 0 : index
    %c0_43 = arith.constant 0 : index
    %112 = vector.load %arg9[%c0_42, %c0_43] : memref<1x32xf32, #tpu.memory_space<vmem>>, vector<1x32xf32>
    %cst_44 = arith.constant dense<0.000000e+00> : vector<16xf32>
    %113 = vector.multi_reduction <add>, %110, %cst_44 [1] : vector<16x32xf32> to vector<16xf32>
    %114 = vector.shape_cast %113 : vector<16xf32> to vector<16x1xf32>
    %cst_45 = arith.constant 3.200000e+01 : f32
    %115 = vector.broadcast %cst_45 : f32 to vector<16x1xf32>
    %116 = arith.divf %114, %115 : vector<16x1xf32>
    %117 = vector.broadcast %116 : vector<16x1xf32> to vector<16x32xf32>
    %118 = arith.subf %110, %117 : vector<16x32xf32>
    %119 = arith.mulf %118, %118 : vector<16x32xf32>
    %cst_46 = arith.constant dense<0.000000e+00> : vector<16xf32>
    %120 = vector.multi_reduction <add>, %119, %cst_46 [1] : vector<16x32xf32> to vector<16xf32>
    %121 = vector.shape_cast %120 : vector<16xf32> to vector<16x1xf32>
    %cst_47 = arith.constant 3.200000e+01 : f32
    %122 = vector.broadcast %cst_47 : f32 to vector<16x1xf32>
    %123 = arith.divf %121, %122 : vector<16x1xf32>
    %124 = vector.broadcast %116 : vector<16x1xf32> to vector<16x32xf32>
    %125 = arith.subf %110, %124 : vector<16x32xf32>
    %cst_48 = arith.constant 9.99999996E-13 : f32
    %126 = vector.broadcast %cst_48 : f32 to vector<16x1xf32>
    %127 = arith.addf %123, %126 : vector<16x1xf32>
    %128 = math.rsqrt %127 : vector<16x1xf32>
    %129 = vector.broadcast %128 : vector<16x1xf32> to vector<16x32xf32>
    %130 = arith.mulf %125, %129 : vector<16x32xf32>
    %131 = vector.broadcast %111 : vector<1x32xf32> to vector<16x32xf32>
    %132 = arith.mulf %130, %131 : vector<16x32xf32>
    %133 = vector.broadcast %112 : vector<1x32xf32> to vector<16x32xf32>
    %134 = arith.addf %132, %133 : vector<16x32xf32>
    %c0_49 = arith.constant 0 : index
    %c0_50 = arith.constant 0 : index
    %135 = vector.load %arg10[%c0_49, %c0_50] : memref<32x32xbf16, #tpu.memory_space<vmem>>, vector<32x32xbf16>
    %136 = arith.truncf %134 : vector<16x32xf32> to vector<16x32xbf16>
    %cst_51 = arith.constant dense<0.000000e+00> : vector<16x32xf32>
    %137 = tpu.matmul %136, %135, %cst_51 {dimension_numbers = #tpu.dot_dimension_numbers<[1], [0], [0], [1], [0, 0, 1, 1], [], []>} : vector<16x32xbf16>, vector<32x32xbf16>, vector<16x32xf32> -> vector<16x32xf32>
    %c0_52 = arith.constant 0 : index
    %c0_53 = arith.constant 0 : index
    %138 = vector.load %arg11[%c0_52, %c0_53] : memref<1x32xf32, #tpu.memory_space<vmem>>, vector<1x32xf32>
    %139 = vector.broadcast %138 : vector<1x32xf32> to vector<16x32xf32>
    %140 = arith.addf %137, %139 : vector<16x32xf32>
    %cst_54 = arith.constant 0.353553385 : f32
    %141 = vector.broadcast %cst_54 : f32 to vector<16x32xf32>
    %142 = arith.mulf %140, %141 : vector<16x32xf32>
    %143 = arith.truncf %142 : vector<16x32xf32> to vector<16x32xbf16>
    %c0_55 = arith.constant 0 : index
    %c0_56 = arith.constant 0 : index
    %144 = vector.load %arg12[%c0_55, %c0_56] : memref<32x64xbf16, #tpu.memory_space<vmem>>, vector<32x64xbf16>
    %145 = arith.truncf %3 : vector<8x32xf32> to vector<8x32xbf16>
    %cst_57 = arith.constant dense<0.000000e+00> : vector<8x64xf32>
    %146 = tpu.matmul %145, %144, %cst_57 {dimension_numbers = #tpu.dot_dimension_numbers<[1], [0], [0], [1], [0, 0, 1, 1], [], []>} : vector<8x32xbf16>, vector<32x64xbf16>, vector<8x64xf32> -> vector<8x64xf32>
    %c0_58 = arith.constant 0 : index
    %c0_59 = arith.constant 0 : index
    %147 = vector.load %arg13[%c0_58, %c0_59] : memref<1x64xf32, #tpu.memory_space<vmem>>, vector<1x64xf32>
    %148 = vector.broadcast %147 : vector<1x64xf32> to vector<8x64xf32>
    %149 = arith.addf %146, %148 : vector<8x64xf32>
    %150 = vector.extract_strided_slice %149 {offsets = [0, 0], sizes = [8, 32], strides = [1, 1]} : vector<8x64xf32> to vector<8x32xf32>
    %151 = arith.truncf %150 : vector<8x32xf32> to vector<8x32xbf16>
    %152 = vector.extract_strided_slice %149 {offsets = [0, 32], sizes = [8, 32], strides = [1, 1]} : vector<8x64xf32> to vector<8x32xf32>
    %153 = arith.truncf %152 : vector<8x32xf32> to vector<8x32xbf16>
    %c0_60 = arith.constant 0 : index
    %c0_61 = arith.constant 0 : index
    %c0_62 = arith.constant 0 : index
    %154 = vector.load %arg3[%c0_60, %c0_61, %c0_62] : memref<1x1x8xf32, #tpu.memory_space<vmem>>, vector<1x1x8xf32>
    %155 = vector.shape_cast %154 : vector<1x1x8xf32> to vector<1x8xf32>
    %156 = vector.extract_strided_slice %143 {offsets = [0, 0], sizes = [16, 8], strides = [1, 1]} : vector<16x32xbf16> to vector<16x8xbf16>
    %157 = vector.extract_strided_slice %151 {offsets = [0, 0], sizes = [8, 8], strides = [1, 1]} : vector<8x32xbf16> to vector<8x8xbf16>
    %cst_63 = arith.constant dense<0.000000e+00> : vector<16x8xf32>
    %158 = tpu.matmul %156, %157, %cst_63 {dimension_numbers = #tpu.dot_dimension_numbers<[1], [1], [0], [0], [0, 0, 1, 0], [], []>} : vector<16x8xbf16>, vector<8x8xbf16>, vector<16x8xf32> -> vector<16x8xf32>
    %159 = vector.broadcast %155 : vector<1x8xf32> to vector<16x8xf32>
    %160 = arith.addf %158, %159 : vector<16x8xf32>
    %cst_64 = arith.constant dense<0xFF800000> : vector<16xf32>
    %161 = vector.multi_reduction <maximumf>, %160, %cst_64 [1] : vector<16x8xf32> to vector<16xf32>
    %162 = vector.shape_cast %161 : vector<16xf32> to vector<16x1xf32>
    %163 = vector.broadcast %162 : vector<16x1xf32> to vector<16x8xf32>
    %164 = arith.subf %160, %163 : vector<16x8xf32>
    %165 = math.exp %164 : vector<16x8xf32>
    %cst_65 = arith.constant dense<0.000000e+00> : vector<16xf32>
    %166 = vector.multi_reduction <add>, %165, %cst_65 [1] : vector<16x8xf32> to vector<16xf32>
    %167 = vector.shape_cast %166 : vector<16xf32> to vector<16x1xf32>
    %168 = tpu.reciprocal %167 {approx = true} : vector<16x1xf32> -> vector<16x1xf32>
    %169 = vector.broadcast %168 : vector<16x1xf32> to vector<16x8xf32>
    %170 = arith.mulf %165, %169 : vector<16x8xf32>
    %171 = arith.truncf %170 : vector<16x8xf32> to vector<16x8xbf16>
    %172 = vector.extract_strided_slice %153 {offsets = [0, 0], sizes = [8, 8], strides = [1, 1]} : vector<8x32xbf16> to vector<8x8xbf16>
    %cst_66 = arith.constant dense<0.000000e+00> : vector<16x8xf32>
    %173 = tpu.matmul %171, %172, %cst_66 {dimension_numbers = #tpu.dot_dimension_numbers<[1], [0], [0], [1], [0, 0, 1, 1], [], []>} : vector<16x8xbf16>, vector<8x8xbf16>, vector<16x8xf32> -> vector<16x8xf32>
    %174 = arith.truncf %173 : vector<16x8xf32> to vector<16x8xbf16>
    %c0_67 = arith.constant 0 : index
    %c0_68 = arith.constant 0 : index
    %175 = vector.load %arg25[%c0_67, %c0_68] : memref<16x32xbf16, #tpu.memory_space<vmem>>, vector<16x8xbf16>
    tpu.vector_store %arg25[%c0_67, %c0_68], %174 {strides = array<i32>} : memref<16x32xbf16, #tpu.memory_space<vmem>>, vector<16x8xbf16>,
    %176 = vector.extract_strided_slice %143 {offsets = [0, 8], sizes = [16, 8], strides = [1, 1]} : vector<16x32xbf16> to vector<16x8xbf16>
    %177 = vector.extract_strided_slice %151 {offsets = [0, 8], sizes = [8, 8], strides = [1, 1]} : vector<8x32xbf16> to vector<8x8xbf16>
    %cst_69 = arith.constant dense<0.000000e+00> : vector<16x8xf32>
    %178 = tpu.matmul %176, %177, %cst_69 {dimension_numbers = #tpu.dot_dimension_numbers<[1], [1], [0], [0], [0, 0, 1, 0], [], []>} : vector<16x8xbf16>, vector<8x8xbf16>, vector<16x8xf32> -> vector<16x8xf32>
    %179 = vector.broadcast %155 : vector<1x8xf32> to vector<16x8xf32>
    %180 = arith.addf %178, %179 : vector<16x8xf32>
    %cst_70 = arith.constant dense<0xFF800000> : vector<16xf32>
    %181 = vector.multi_reduction <maximumf>, %180, %cst_70 [1] : vector<16x8xf32> to vector<16xf32>
    %182 = vector.shape_cast %181 : vector<16xf32> to vector<16x1xf32>
    %183 = vector.broadcast %182 : vector<16x1xf32> to vector<16x8xf32>
    %184 = arith.subf %180, %183 : vector<16x8xf32>
    %185 = math.exp %184 : vector<16x8xf32>
    %cst_71 = arith.constant dense<0.000000e+00> : vector<16xf32>
    %186 = vector.multi_reduction <add>, %185, %cst_71 [1] : vector<16x8xf32> to vector<16xf32>
    %187 = vector.shape_cast %186 : vector<16xf32> to vector<16x1xf32>
    %188 = tpu.reciprocal %187 {approx = true} : vector<16x1xf32> -> vector<16x1xf32>
    %189 = vector.broadcast %188 : vector<16x1xf32> to vector<16x8xf32>
    %190 = arith.mulf %185, %189 : vector<16x8xf32>
    %191 = arith.truncf %190 : vector<16x8xf32> to vector<16x8xbf16>
    %192 = vector.extract_strided_slice %153 {offsets = [0, 8], sizes = [8, 8], strides = [1, 1]} : vector<8x32xbf16> to vector<8x8xbf16>
    %cst_72 = arith.constant dense<0.000000e+00> : vector<16x8xf32>
    %193 = tpu.matmul %191, %192, %cst_72 {dimension_numbers = #tpu.dot_dimension_numbers<[1], [0], [0], [1], [0, 0, 1, 1], [], []>} : vector<16x8xbf16>, vector<8x8xbf16>, vector<16x8xf32> -> vector<16x8xf32>
    %194 = arith.truncf %193 : vector<16x8xf32> to vector<16x8xbf16>
    %c0_73 = arith.constant 0 : index
    %c8_74 = arith.constant 8 : index
    %195 = vector.load %arg25[%c0_73, %c8_74] : memref<16x32xbf16, #tpu.memory_space<vmem>>, vector<16x8xbf16>
    tpu.vector_store %arg25[%c0_73, %c8_74], %194 {strides = array<i32>} : memref<16x32xbf16, #tpu.memory_space<vmem>>, vector<16x8xbf16>,
    %196 = vector.extract_strided_slice %143 {offsets = [0, 16], sizes = [16, 8], strides = [1, 1]} : vector<16x32xbf16> to vector<16x8xbf16>
    %197 = vector.extract_strided_slice %151 {offsets = [0, 16], sizes = [8, 8], strides = [1, 1]} : vector<8x32xbf16> to vector<8x8xbf16>
    %cst_75 = arith.constant dense<0.000000e+00> : vector<16x8xf32>
    %198 = tpu.matmul %196, %197, %cst_75 {dimension_numbers = #tpu.dot_dimension_numbers<[1], [1], [0], [0], [0, 0, 1, 0], [], []>} : vector<16x8xbf16>, vector<8x8xbf16>, vector<16x8xf32> -> vector<16x8xf32>
    %199 = vector.broadcast %155 : vector<1x8xf32> to vector<16x8xf32>
    %200 = arith.addf %198, %199 : vector<16x8xf32>
    %cst_76 = arith.constant dense<0xFF800000> : vector<16xf32>
    %201 = vector.multi_reduction <maximumf>, %200, %cst_76 [1] : vector<16x8xf32> to vector<16xf32>
    %202 = vector.shape_cast %201 : vector<16xf32> to vector<16x1xf32>
    %203 = vector.broadcast %202 : vector<16x1xf32> to vector<16x8xf32>
    %204 = arith.subf %200, %203 : vector<16x8xf32>
    %205 = math.exp %204 : vector<16x8xf32>
    %cst_77 = arith.constant dense<0.000000e+00> : vector<16xf32>
    %206 = vector.multi_reduction <add>, %205, %cst_77 [1] : vector<16x8xf32> to vector<16xf32>
    %207 = vector.shape_cast %206 : vector<16xf32> to vector<16x1xf32>
    %208 = tpu.reciprocal %207 {approx = true} : vector<16x1xf32> -> vector<16x1xf32>
    %209 = vector.broadcast %208 : vector<16x1xf32> to vector<16x8xf32>
    %210 = arith.mulf %205, %209 : vector<16x8xf32>
    %211 = arith.truncf %210 : vector<16x8xf32> to vector<16x8xbf16>
    %212 = vector.extract_strided_slice %153 {offsets = [0, 16], sizes = [8, 8], strides = [1, 1]} : vector<8x32xbf16> to vector<8x8xbf16>
    %cst_78 = arith.constant dense<0.000000e+00> : vector<16x8xf32>
    %213 = tpu.matmul %211, %212, %cst_78 {dimension_numbers = #tpu.dot_dimension_numbers<[1], [0], [0], [1], [0, 0, 1, 1], [], []>} : vector<16x8xbf16>, vector<8x8xbf16>, vector<16x8xf32> -> vector<16x8xf32>
    %214 = arith.truncf %213 : vector<16x8xf32> to vector<16x8xbf16>
    %c0_79 = arith.constant 0 : index
    %c16_80 = arith.constant 16 : index
    %215 = vector.load %arg25[%c0_79, %c16_80] : memref<16x32xbf16, #tpu.memory_space<vmem>>, vector<16x8xbf16>
    tpu.vector_store %arg25[%c0_79, %c16_80], %214 {strides = array<i32>} : memref<16x32xbf16, #tpu.memory_space<vmem>>, vector<16x8xbf16>,
    %216 = vector.extract_strided_slice %143 {offsets = [0, 24], sizes = [16, 8], strides = [1, 1]} : vector<16x32xbf16> to vector<16x8xbf16>
    %217 = vector.extract_strided_slice %151 {offsets = [0, 24], sizes = [8, 8], strides = [1, 1]} : vector<8x32xbf16> to vector<8x8xbf16>
    %cst_81 = arith.constant dense<0.000000e+00> : vector<16x8xf32>
    %218 = tpu.matmul %216, %217, %cst_81 {dimension_numbers = #tpu.dot_dimension_numbers<[1], [1], [0], [0], [0, 0, 1, 0], [], []>} : vector<16x8xbf16>, vector<8x8xbf16>, vector<16x8xf32> -> vector<16x8xf32>
    %219 = vector.broadcast %155 : vector<1x8xf32> to vector<16x8xf32>
    %220 = arith.addf %218, %219 : vector<16x8xf32>
    %cst_82 = arith.constant dense<0xFF800000> : vector<16xf32>
    %221 = vector.multi_reduction <maximumf>, %220, %cst_82 [1] : vector<16x8xf32> to vector<16xf32>
    %222 = vector.shape_cast %221 : vector<16xf32> to vector<16x1xf32>
    %223 = vector.broadcast %222 : vector<16x1xf32> to vector<16x8xf32>
    %224 = arith.subf %220, %223 : vector<16x8xf32>
    %225 = math.exp %224 : vector<16x8xf32>
    %cst_83 = arith.constant dense<0.000000e+00> : vector<16xf32>
    %226 = vector.multi_reduction <add>, %225, %cst_83 [1] : vector<16x8xf32> to vector<16xf32>
    %227 = vector.shape_cast %226 : vector<16xf32> to vector<16x1xf32>
    %228 = tpu.reciprocal %227 {approx = true} : vector<16x1xf32> -> vector<16x1xf32>
    %229 = vector.broadcast %228 : vector<16x1xf32> to vector<16x8xf32>
    %230 = arith.mulf %225, %229 : vector<16x8xf32>
    %231 = arith.truncf %230 : vector<16x8xf32> to vector<16x8xbf16>
    %232 = vector.extract_strided_slice %153 {offsets = [0, 24], sizes = [8, 8], strides = [1, 1]} : vector<8x32xbf16> to vector<8x8xbf16>
    %cst_84 = arith.constant dense<0.000000e+00> : vector<16x8xf32>
    %233 = tpu.matmul %231, %232, %cst_84 {dimension_numbers = #tpu.dot_dimension_numbers<[1], [0], [0], [1], [0, 0, 1, 1], [], []>} : vector<16x8xbf16>, vector<8x8xbf16>, vector<16x8xf32> -> vector<16x8xf32>
    %234 = arith.truncf %233 : vector<16x8xf32> to vector<16x8xbf16>
    %c0_85 = arith.constant 0 : index
    %c24_86 = arith.constant 24 : index
    %235 = vector.load %arg25[%c0_85, %c24_86] : memref<16x32xbf16, #tpu.memory_space<vmem>>, vector<16x8xbf16>
    tpu.vector_store %arg25[%c0_85, %c24_86], %234 {strides = array<i32>} : memref<16x32xbf16, #tpu.memory_space<vmem>>, vector<16x8xbf16>,
    %c0_87 = arith.constant 0 : index
    %c0_88 = arith.constant 0 : index
    %236 = vector.load %arg25[%c0_87, %c0_88] : memref<16x32xbf16, #tpu.memory_space<vmem>>, vector<16x32xbf16>
    %c0_89 = arith.constant 0 : index
    %c0_90 = arith.constant 0 : index
    %237 = vector.load %arg14[%c0_89, %c0_90] : memref<32x32xbf16, #tpu.memory_space<vmem>>, vector<32x32xbf16>
    %cst_91 = arith.constant dense<0.000000e+00> : vector<16x32xf32>
    %238 = tpu.matmul %236, %237, %cst_91 {dimension_numbers = #tpu.dot_dimension_numbers<[1], [0], [0], [1], [0, 0, 1, 1], [], []>} : vector<16x32xbf16>, vector<32x32xbf16>, vector<16x32xf32> -> vector<16x32xf32>
    %c0_92 = arith.constant 0 : index
    %c0_93 = arith.constant 0 : index
    %239 = vector.load %arg15[%c0_92, %c0_93] : memref<1x32xf32, #tpu.memory_space<vmem>>, vector<1x32xf32>
    %240 = vector.broadcast %239 : vector<1x32xf32> to vector<16x32xf32>
    %241 = arith.addf %238, %240 : vector<16x32xf32>
    %242 = arith.addf %241, %134 : vector<16x32xf32>
    %c0_94 = arith.constant 0 : index
    %c0_95 = arith.constant 0 : index
    %243 = vector.load %arg16[%c0_94, %c0_95] : memref<1x32xf32, #tpu.memory_space<vmem>>, vector<1x32xf32>
    %c0_96 = arith.constant 0 : index
    %c0_97 = arith.constant 0 : index
    %244 = vector.load %arg17[%c0_96, %c0_97] : memref<1x32xf32, #tpu.memory_space<vmem>>, vector<1x32xf32>
    %cst_98 = arith.constant dense<0.000000e+00> : vector<16xf32>
    %245 = vector.multi_reduction <add>, %242, %cst_98 [1] : vector<16x32xf32> to vector<16xf32>
    %246 = vector.shape_cast %245 : vector<16xf32> to vector<16x1xf32>
    %cst_99 = arith.constant 3.200000e+01 : f32
    %247 = vector.broadcast %cst_99 : f32 to vector<16x1xf32>
    %248 = arith.divf %246, %247 : vector<16x1xf32>
    %249 = vector.broadcast %248 : vector<16x1xf32> to vector<16x32xf32>
    %250 = arith.subf %242, %249 : vector<16x32xf32>
    %251 = arith.mulf %250, %250 : vector<16x32xf32>
    %cst_100 = arith.constant dense<0.000000e+00> : vector<16xf32>
    %252 = vector.multi_reduction <add>, %251, %cst_100 [1] : vector<16x32xf32> to vector<16xf32>
    %253 = vector.shape_cast %252 : vector<16xf32> to vector<16x1xf32>
    %cst_101 = arith.constant 3.200000e+01 : f32
    %254 = vector.broadcast %cst_101 : f32 to vector<16x1xf32>
    %255 = arith.divf %253, %254 : vector<16x1xf32>
    %256 = vector.broadcast %248 : vector<16x1xf32> to vector<16x32xf32>
    %257 = arith.subf %242, %256 : vector<16x32xf32>
    %cst_102 = arith.constant 9.99999996E-13 : f32
    %258 = vector.broadcast %cst_102 : f32 to vector<16x1xf32>
    %259 = arith.addf %255, %258 : vector<16x1xf32>
    %260 = math.rsqrt %259 : vector<16x1xf32>
    %261 = vector.broadcast %260 : vector<16x1xf32> to vector<16x32xf32>
    %262 = arith.mulf %257, %261 : vector<16x32xf32>
    %263 = vector.broadcast %243 : vector<1x32xf32> to vector<16x32xf32>
    %264 = arith.mulf %262, %263 : vector<16x32xf32>
    %265 = vector.broadcast %244 : vector<1x32xf32> to vector<16x32xf32>
    %266 = arith.addf %264, %265 : vector<16x32xf32>
    %267 = arith.truncf %266 : vector<16x32xf32> to vector<16x32xbf16>
    %c0_103 = arith.constant 0 : index
    %c0_104 = arith.constant 0 : index
    %268 = vector.load %arg18[%c0_103, %c0_104] : memref<32x64xbf16, #tpu.memory_space<vmem>>, vector<32x64xbf16>
    %cst_105 = arith.constant dense<0.000000e+00> : vector<16x64xf32>
    %269 = tpu.matmul %267, %268, %cst_105 {dimension_numbers = #tpu.dot_dimension_numbers<[1], [0], [0], [1], [0, 0, 1, 1], [], []>} : vector<16x32xbf16>, vector<32x64xbf16>, vector<16x64xf32> -> vector<16x64xf32>
    %c0_106 = arith.constant 0 : index
    %c0_107 = arith.constant 0 : index
    %270 = vector.load %arg19[%c0_106, %c0_107] : memref<1x64xf32, #tpu.memory_space<vmem>>, vector<1x64xf32>
    %271 = vector.broadcast %270 : vector<1x64xf32> to vector<16x64xf32>
    %272 = arith.addf %269, %271 : vector<16x64xf32>
    %cst_108 = arith.constant 5.000000e-01 : f32
    %273 = vector.broadcast %cst_108 : f32 to vector<16x64xf32>
    %274 = arith.mulf %273, %272 : vector<16x64xf32>
    %cst_109 = arith.constant 4.471500e-02 : f32
    %275 = vector.broadcast %cst_109 : f32 to vector<16x64xf32>
    %276 = arith.mulf %275, %272 : vector<16x64xf32>
    %277 = arith.mulf %276, %272 : vector<16x64xf32>
    %278 = arith.mulf %277, %272 : vector<16x64xf32>
    %279 = arith.addf %272, %278 : vector<16x64xf32>
    %cst_110 = arith.constant 0.797884583 : f32
    %280 = vector.broadcast %cst_110 : f32 to vector<16x64xf32>
    %281 = arith.mulf %280, %279 : vector<16x64xf32>
    %282 = math.tanh %281 : vector<16x64xf32>
    %cst_111 = arith.constant 1.000000e+00 : f32
    %283 = vector.broadcast %cst_111 : f32 to vector<16x64xf32>
    %284 = arith.addf %283, %282 : vector<16x64xf32>
    %285 = arith.mulf %274, %284 : vector<16x64xf32>
    %286 = arith.truncf %285 : vector<16x64xf32> to vector<16x64xbf16>
    %c0_112 = arith.constant 0 : index
    %c0_113 = arith.constant 0 : index
    %287 = vector.load %arg20[%c0_112, %c0_113] : memref<64x32xbf16, #tpu.memory_space<vmem>>, vector<64x32xbf16>
    %cst_114 = arith.constant dense<0.000000e+00> : vector<16x32xf32>
    %288 = tpu.matmul %286, %287, %cst_114 {dimension_numbers = #tpu.dot_dimension_numbers<[1], [0], [0], [1], [0, 0, 1, 1], [], []>} : vector<16x64xbf16>, vector<64x32xbf16>, vector<16x32xf32> -> vector<16x32xf32>
    %c0_115 = arith.constant 0 : index
    %c0_116 = arith.constant 0 : index
    %289 = vector.load %arg21[%c0_115, %c0_116] : memref<1x32xf32, #tpu.memory_space<vmem>>, vector<1x32xf32>
    %290 = vector.broadcast %289 : vector<1x32xf32> to vector<16x32xf32>
    %291 = arith.addf %288, %290 : vector<16x32xf32>
    %292 = arith.addf %291, %266 : vector<16x32xf32>
    %c0_117 = arith.constant 0 : index
    %c0_118 = arith.constant 0 : index
    %293 = vector.load %arg22[%c0_117, %c0_118] : memref<1x32xf32, #tpu.memory_space<vmem>>, vector<1x32xf32>
    %c0_119 = arith.constant 0 : index
    %c0_120 = arith.constant 0 : index
    %294 = vector.load %arg23[%c0_119, %c0_120] : memref<1x32xf32, #tpu.memory_space<vmem>>, vector<1x32xf32>
    %cst_121 = arith.constant dense<0.000000e+00> : vector<16xf32>
    %295 = vector.multi_reduction <add>, %292, %cst_121 [1] : vector<16x32xf32> to vector<16xf32>
    %296 = vector.shape_cast %295 : vector<16xf32> to vector<16x1xf32>
    %cst_122 = arith.constant 3.200000e+01 : f32
    %297 = vector.broadcast %cst_122 : f32 to vector<16x1xf32>
    %298 = arith.divf %296, %297 : vector<16x1xf32>
    %299 = vector.broadcast %298 : vector<16x1xf32> to vector<16x32xf32>
    %300 = arith.subf %292, %299 : vector<16x32xf32>
    %301 = arith.mulf %300, %300 : vector<16x32xf32>
    %cst_123 = arith.constant dense<0.000000e+00> : vector<16xf32>
    %302 = vector.multi_reduction <add>, %301, %cst_123 [1] : vector<16x32xf32> to vector<16xf32>
    %303 = vector.shape_cast %302 : vector<16xf32> to vector<16x1xf32>
    %cst_124 = arith.constant 3.200000e+01 : f32
    %304 = vector.broadcast %cst_124 : f32 to vector<16x1xf32>
    %305 = arith.divf %303, %304 : vector<16x1xf32>
    %306 = vector.broadcast %298 : vector<16x1xf32> to vector<16x32xf32>
    %307 = arith.subf %292, %306 : vector<16x32xf32>
    %cst_125 = arith.constant 9.99999996E-13 : f32
    %308 = vector.broadcast %cst_125 : f32 to vector<16x1xf32>
    %309 = arith.addf %305, %308 : vector<16x1xf32>
    %310 = math.rsqrt %309 : vector<16x1xf32>
    %311 = vector.broadcast %310 : vector<16x1xf32> to vector<16x32xf32>
    %312 = arith.mulf %307, %311 : vector<16x32xf32>
    %313 = vector.broadcast %293 : vector<1x32xf32> to vector<16x32xf32>
    %314 = arith.mulf %312, %313 : vector<16x32xf32>
    %315 = vector.broadcast %294 : vector<1x32xf32> to vector<16x32xf32>
    %316 = arith.addf %314, %315 : vector<16x32xf32>
    %c0_126 = arith.constant 0 : index
    %c0_127 = arith.constant 0 : index
    %c0_128 = arith.constant 0 : index
    %317 = vector.load %arg24[%c0_126, %c0_127, %c0_128] : memref<1x16x32xf32, #tpu.memory_space<vmem>>, vector<1x16x32xf32>
    %318 = vector.shape_cast %317 : vector<1x16x32xf32> to vector<16x32xf32>
    %319 = vector.shape_cast %316 : vector<16x32xf32> to vector<1x16x32xf32>
    tpu.vector_store %arg24[%c0_126, %c0_127, %c0_128], %319 {strides = array<i32>} : memref<1x16x32xf32, #tpu.memory_space<vmem>>, vector<1x16x32xf32>,
    return
  }
  func.func @transform_0(%arg0: i32) -> (i32, i32, i32) {
    %c0_i32 = arith.constant 0 : i32
    %c0_i32_0 = arith.constant 0 : i32
    %c0_i32_1 = arith.constant 0 : i32
    return %arg0, %c0_i32, %c0_i32_0 : i32, i32, i32
  }
  func.func @transform_1(%arg0: i32) -> (i32, i32, i32) {
    %c0_i32 = arith.constant 0 : i32
    %c0_i32_0 = arith.constant 0 : i32
    %c0_i32_1 = arith.constant 0 : i32
    return %arg0, %c0_i32, %c0_i32_0 : i32, i32, i32
  }
  func.func @transform_2(%arg0: i32) -> (i32, i32, i32) {
    %c0_i32 = arith.constant 0 : i32
    %c0_i32_0 = arith.constant 0 : i32
    %c0_i32_1 = arith.constant 0 : i32
    return %arg0, %c0_i32, %c0_i32_0 : i32, i32, i32
  }
  func.func @transform_3(%arg0: i32) -> (i32, i32) {
    %c0_i32 = arith.constant 0 : i32
    %c0_i32_0 = arith.constant 0 : i32
    %c0_i32_1 = arith.constant 0 : i32
    return %c0_i32, %c0_i32_0 : i32, i32
  }
  func.func @transform_4(%arg0: i32) -> (i32, i32) {
    %c0_i32 = arith.constant 0 : i32
    %c0_i32_0 = arith.constant 0 : i32
    %c0_i32_1 = arith.constant 0 : i32
    return %c0_i32, %c0_i32_0 : i32, i32
  }
  func.func @transform_5(%arg0: i32) -> (i32, i32) {
    %c0_i32 = arith.constant 0 : i32
    %c0_i32_0 = arith.constant 0 : i32
    %c0_i32_1 = arith.constant 0 : i32
    return %c0_i32, %c0_i32_0 : i32, i32
  }
  func.func @transform_6(%arg0: i32) -> (i32, i32) {
    %c0_i32 = arith.constant 0 : i32
    %c0_i32_0 = arith.constant 0 : i32
    %c0_i32_1 = arith.constant 0 : i32
    return %c0_i32, %c0_i32_0 : i32, i32
  }
  func.func @transform_7(%arg0: i32) -> (i32, i32) {
    %c0_i32 = arith.constant 0 : i32
    %c0_i32_0 = arith.constant 0 : i32
    %c0_i32_1 = arith.constant 0 : i32
    return %c0_i32, %c0_i32_0 : i32, i32
  }
  func.func @transform_8(%arg0: i32) -> (i32, i32) {
    %c0_i32 = arith.constant 0 : i32
    %c0_i32_0 = arith.constant 0 : i32
    %c0_i32_1 = arith.constant 0 : i32
    return %c0_i32, %c0_i32_0 : i32, i32
  }
  func.func @transform_9(%arg0: i32) -> (i32, i32) {
    %c0_i32 = arith.constant 0 : i32
    %c0_i32_0 = arith.constant 0 : i32
    %c0_i32_1 = arith.constant 0 : i32
    return %c0_i32, %c0_i32_0 : i32, i32
  }
  func.func @transform_10(%arg0: i32) -> (i32, i32) {
    %c0_i32 = arith.constant 0 : i32
    %c0_i32_0 = arith.constant 0 : i32
    %c0_i32_1 = arith.constant 0 : i32
    return %c0_i32, %c0_i32_0 : i32, i32
  }
  func.func @transform_11(%arg0: i32) -> (i32, i32) {
    %c0_i32 = arith.constant 0 : i32
    %c0_i32_0 = arith.constant 0 : i32
    %c0_i32_1 = arith.constant 0 : i32
    return %c0_i32, %c0_i32_0 : i32, i32
  }
  func.func @transform_12(%arg0: i32) -> (i32, i32) {
    %c0_i32 = arith.constant 0 : i32
    %c0_i32_0 = arith.constant 0 : i32
    %c0_i32_1 = arith.constant 0 : i32
    return %c0_i32, %c0_i32_0 : i32, i32
  }
  func.func @transform_13(%arg0: i32) -> (i32, i32) {
    %c0_i32 = arith.constant 0 : i32
    %c0_i32_0 = arith.constant 0 : i32
    %c0_i32_1 = arith.constant 0 : i32
    return %c0_i32, %c0_i32_0 : i32, i32
  }
  func.func @transform_14(%arg0: i32) -> (i32, i32) {
    %c0_i32 = arith.constant 0 : i32
    %c0_i32_0 = arith.constant 0 : i32
    %c0_i32_1 = arith.constant 0 : i32
    return %c0_i32, %c0_i32_0 : i32, i32
  }
  func.func @transform_15(%arg0: i32) -> (i32, i32) {
    %c0_i32 = arith.constant 0 : i32
    %c0_i32_0 = arith.constant 0 : i32
    %c0_i32_1 = arith.constant 0 : i32
    return %c0_i32, %c0_i32_0 : i32, i32
  }
  func.func @transform_16(%arg0: i32) -> (i32, i32) {
    %c0_i32 = arith.constant 0 : i32
    %c0_i32_0 = arith.constant 0 : i32
    %c0_i32_1 = arith.constant 0 : i32
    return %c0_i32, %c0_i32_0 : i32, i32
  }
  func.func @transform_17(%arg0: i32) -> (i32, i32) {
    %c0_i32 = arith.constant 0 : i32
    %c0_i32_0 = arith.constant 0 : i32
    %c0_i32_1 = arith.constant 0 : i32
    return %c0_i32, %c0_i32_0 : i32, i32
  }
  func.func @transform_18(%arg0: i32) -> (i32, i32) {
    %c0_i32 = arith.constant 0 : i32
    %c0_i32_0 = arith.constant 0 : i32
    %c0_i32_1 = arith.constant 0 : i32
    return %c0_i32, %c0_i32_0 : i32, i32
  }
  func.func @transform_19(%arg0: i32) -> (i32, i32) {
    %c0_i32 = arith.constant 0 : i32
    %c0_i32_0 = arith.constant 0 : i32
    %c0_i32_1 = arith.constant 0 : i32
    return %c0_i32, %c0_i32_0 : i32, i32
  }
  func.func @transform_20(%arg0: i32) -> (i32, i32) {
    %c0_i32 = arith.constant 0 : i32
    %c0_i32_0 = arith.constant 0 : i32
    %c0_i32_1 = arith.constant 0 : i32
    return %c0_i32, %c0_i32_0 : i32, i32
  }
  func.func @transform_21(%arg0: i32) -> (i32, i32) {
    %c0_i32 = arith.constant 0 : i32
    %c0_i32_0 = arith.constant 0 : i32
    %c0_i32_1 = arith.constant 0 : i32
    return %c0_i32, %c0_i32_0 : i32, i32
  }
  func.func @transform_22(%arg0: i32) -> (i32, i32) {
    %c0_i32 = arith.constant 0 : i32
    %c0_i32_0 = arith.constant 0 : i32
    %c0_i32_1 = arith.constant 0 : i32
    return %c0_i32, %c0_i32_0 : i32, i32
  }
  func.func @transform_23(%arg0: i32) -> (i32, i32, i32) {
    %c0_i32 = arith.constant 0 : i32
    %c0_i32_0 = arith.constant 0 : i32
    %c0_i32_1 = arith.constant 0 : i32
    return %arg0, %c0_i32, %c0_i32_0 : i32, i32, i32
  }
}

module attributes {stable_mosaic.version = 11 : i64} {
  func.func @_head_kernel(%arg0: i32, %arg1: memref<1x16x32xf32, #tpu.memory_space<vmem>>, %arg2: memref<1x8x32xf32, #tpu.memory_space<vmem>>, %arg3: memref<1x1x8xf32, #tpu.memory_space<vmem>>, %arg4: memref<32x128xbf16, #tpu.memory_space<vmem>>, %arg5: memref<1x128xf32, #tpu.memory_space<vmem>>, %arg6: memref<32x128xbf16, #tpu.memory_space<vmem>>, %arg7: memref<1x128xf32, #tpu.memory_space<vmem>>, %arg8: memref<32x128xbf16, #tpu.memory_space<vmem>>, %arg9: memref<1x128xf32, #tpu.memory_space<vmem>>, %arg10: memref<4x32xf32, #tpu.memory_space<vmem>>, %arg11: memref<1x16x128xf32, #tpu.memory_space<vmem>>, %arg12: memref<1x4x16x8xf32, #tpu.memory_space<vmem>>) attributes {dimension_semantics = [#tpu.dimension_semantics<parallel>], iteration_bounds = array<i64: 2>, scalar_prefetch = 0 : i64, scratch_operands = 0 : i64, tpu.core_type = #tpu.core_type<tc>, window_params = [{transform_indices = @transform_0, window_bounds = array<i64: 1, 16, 32>}, {transform_indices = @transform_1, window_bounds = array<i64: 1, 8, 32>}, {transform_indices = @transform_2, window_bounds = array<i64: 1, 1, 8>}, {pipeline_mode = #tpu.pipeline_mode<synchronous>, transform_indices = @transform_3, window_bounds = array<i64: 32, 128>}, {pipeline_mode = #tpu.pipeline_mode<synchronous>, transform_indices = @transform_4, window_bounds = array<i64: 1, 128>}, {pipeline_mode = #tpu.pipeline_mode<synchronous>, transform_indices = @transform_5, window_bounds = array<i64: 32, 128>}, {pipeline_mode = #tpu.pipeline_mode<synchronous>, transform_indices = @transform_6, window_bounds = array<i64: 1, 128>}, {pipeline_mode = #tpu.pipeline_mode<synchronous>, transform_indices = @transform_7, window_bounds = array<i64: 32, 128>}, {pipeline_mode = #tpu.pipeline_mode<synchronous>, transform_indices = @transform_8, window_bounds = array<i64: 1, 128>}, {pipeline_mode = #tpu.pipeline_mode<synchronous>, transform_indices = @transform_9, window_bounds = array<i64: 4, 32>}, {transform_indices = @transform_10, window_bounds = array<i64: 1, 16, 128>}, {transform_indices = @transform_11, window_bounds = array<i64: 1, 4, 16, 8>}]} {
    %c0 = arith.constant 0 : index
    %c0_0 = arith.constant 0 : index
    %c0_1 = arith.constant 0 : index
    %0 = vector.load %arg1[%c0, %c0_0, %c0_1] : memref<1x16x32xf32, #tpu.memory_space<vmem>>, vector<1x16x32xf32>
    %1 = vector.shape_cast %0 : vector<1x16x32xf32> to vector<16x32xf32>
    %c0_2 = arith.constant 0 : index
    %c0_3 = arith.constant 0 : index
    %2 = vector.load %arg4[%c0_2, %c0_3] : memref<32x128xbf16, #tpu.memory_space<vmem>>, vector<32x128xbf16>
    %3 = arith.truncf %1 : vector<16x32xf32> to vector<16x32xbf16>
    %cst = arith.constant dense<0.000000e+00> : vector<16x128xf32>
    %4 = tpu.matmul %3, %2, %cst {dimension_numbers = #tpu.dot_dimension_numbers<[1], [0], [0], [1], [0, 0, 1, 1], [], []>} : vector<16x32xbf16>, vector<32x128xbf16>, vector<16x128xf32> -> vector<16x128xf32>
    %c0_4 = arith.constant 0 : index
    %c0_5 = arith.constant 0 : index
    %5 = vector.load %arg5[%c0_4, %c0_5] : memref<1x128xf32, #tpu.memory_space<vmem>>, vector<1x128xf32>
    %6 = vector.broadcast %5 : vector<1x128xf32> to vector<16x128xf32>
    %7 = arith.addf %4, %6 : vector<16x128xf32>
    %c0_6 = arith.constant 0 : index
    %c0_7 = arith.constant 0 : index
    %c0_8 = arith.constant 0 : index
    %8 = vector.load %arg11[%c0_6, %c0_7, %c0_8] : memref<1x16x128xf32, #tpu.memory_space<vmem>>, vector<1x16x128xf32>
    %9 = vector.shape_cast %8 : vector<1x16x128xf32> to vector<16x128xf32>
    %10 = vector.shape_cast %7 : vector<16x128xf32> to vector<1x16x128xf32>
    tpu.vector_store %arg11[%c0_6, %c0_7, %c0_8], %10 {strides = array<i32>} : memref<1x16x128xf32, #tpu.memory_space<vmem>>, vector<1x16x128xf32>,
    %c0_9 = arith.constant 0 : index
    %c0_10 = arith.constant 0 : index
    %11 = vector.load %arg6[%c0_9, %c0_10] : memref<32x128xbf16, #tpu.memory_space<vmem>>, vector<32x128xbf16>
    %12 = arith.truncf %1 : vector<16x32xf32> to vector<16x32xbf16>
    %cst_11 = arith.constant dense<0.000000e+00> : vector<16x128xf32>
    %13 = tpu.matmul %12, %11, %cst_11 {dimension_numbers = #tpu.dot_dimension_numbers<[1], [0], [0], [1], [0, 0, 1, 1], [], []>} : vector<16x32xbf16>, vector<32x128xbf16>, vector<16x128xf32> -> vector<16x128xf32>
    %c0_12 = arith.constant 0 : index
    %c0_13 = arith.constant 0 : index
    %14 = vector.load %arg7[%c0_12, %c0_13] : memref<1x128xf32, #tpu.memory_space<vmem>>, vector<1x128xf32>
    %15 = vector.broadcast %14 : vector<1x128xf32> to vector<16x128xf32>
    %16 = arith.addf %13, %15 : vector<16x128xf32>
    %c0_14 = arith.constant 0 : index
    %c0_15 = arith.constant 0 : index
    %17 = vector.load %arg10[%c0_14, %c0_15] : memref<4x32xf32, #tpu.memory_space<vmem>>, vector<4x32xf32>
    %c0_16 = arith.constant 0 : index
    %c0_17 = arith.constant 0 : index
    %c0_18 = arith.constant 0 : index
    %18 = vector.load %arg2[%c0_16, %c0_17, %c0_18] : memref<1x8x32xf32, #tpu.memory_space<vmem>>, vector<1x8x32xf32>
    %19 = vector.shape_cast %18 : vector<1x8x32xf32> to vector<8x32xf32>
    %c0_19 = arith.constant 0 : index
    %c0_20 = arith.constant 0 : index
    %20 = vector.load %arg8[%c0_19, %c0_20] : memref<32x128xbf16, #tpu.memory_space<vmem>>, vector<32x128xbf16>
    %21 = arith.truncf %19 : vector<8x32xf32> to vector<8x32xbf16>
    %cst_21 = arith.constant dense<0.000000e+00> : vector<8x128xf32>
    %22 = tpu.matmul %21, %20, %cst_21 {dimension_numbers = #tpu.dot_dimension_numbers<[1], [0], [0], [1], [0, 0, 1, 1], [], []>} : vector<8x32xbf16>, vector<32x128xbf16>, vector<8x128xf32> -> vector<8x128xf32>
    %c0_22 = arith.constant 0 : index
    %c0_23 = arith.constant 0 : index
    %23 = vector.load %arg9[%c0_22, %c0_23] : memref<1x128xf32, #tpu.memory_space<vmem>>, vector<1x128xf32>
    %24 = vector.broadcast %23 : vector<1x128xf32> to vector<8x128xf32>
    %25 = arith.addf %22, %24 : vector<8x128xf32>
    %c0_24 = arith.constant 0 : index
    %c0_25 = arith.constant 0 : index
    %c0_26 = arith.constant 0 : index
    %26 = vector.load %arg3[%c0_24, %c0_25, %c0_26] : memref<1x1x8xf32, #tpu.memory_space<vmem>>, vector<1x1x8xf32>
    %27 = vector.shape_cast %26 : vector<1x1x8xf32> to vector<1x8xf32>
    %cst_27 = arith.constant 5.000000e-01 : f32
    %28 = vector.broadcast %cst_27 : f32 to vector<1x8xf32>
    %29 = arith.cmpf ogt, %27, %28 : vector<1x8xf32>
    %30 = vector.extract_strided_slice %16 {offsets = [0, 0], sizes = [16, 32], strides = [1, 1]} : vector<16x128xf32> to vector<16x32xf32>
    %31 = vector.shape_cast %30 : vector<16x32xf32> to vector<16x1x32xf32>
    %32 = vector.extract_strided_slice %25 {offsets = [0, 0], sizes = [8, 32], strides = [1, 1]} : vector<8x128xf32> to vector<8x32xf32>
    %33 = vector.shape_cast %32 : vector<8x32xf32> to vector<1x8x32xf32>
    %34 = vector.broadcast %31 : vector<16x1x32xf32> to vector<16x8x32xf32>
    %35 = vector.broadcast %33 : vector<1x8x32xf32> to vector<16x8x32xf32>
    %36 = arith.addf %34, %35 : vector<16x8x32xf32>
    %37 = arith.truncf %36 : vector<16x8x32xf32> to vector<16x8x32xbf16>
    %38 = math.tanh %37 : vector<16x8x32xbf16>
    %39 = arith.extf %38 : vector<16x8x32xbf16> to vector<16x8x32xf32>
    %40 = vector.extract_strided_slice %17 {offsets = [0, 0], sizes = [1, 32], strides = [1, 1]} : vector<4x32xf32> to vector<1x32xf32>
    %41 = vector.shape_cast %40 : vector<1x32xf32> to vector<1x1x32xf32>
    %42 = vector.broadcast %41 : vector<1x1x32xf32> to vector<16x8x32xf32>
    %43 = arith.mulf %39, %42 : vector<16x8x32xf32>
    %cst_28 = arith.constant dense<0.000000e+00> : vector<16x8xf32>
    %44 = vector.multi_reduction <add>, %43, %cst_28 [2] : vector<16x8x32xf32> to vector<16x8xf32>
    %cst_29 = arith.constant -1.000000e+04 : f32
    %45 = vector.shape_cast %29 : vector<1x8xi1> to vector<1x8xi1>
    %46 = vector.broadcast %45 : vector<1x8xi1> to vector<16x8xi1>
    %47 = vector.broadcast %cst_29 : f32 to vector<16x8xf32>
    %48 = arith.select %46, %44, %47 : vector<16x8xi1>, vector<16x8xf32>
    %c0_30 = arith.constant 0 : index
    %c0_31 = arith.constant 0 : index
    %c0_32 = arith.constant 0 : index
    %c0_33 = arith.constant 0 : index
    %49 = vector.load %arg12[%c0_30, %c0_31, %c0_32, %c0_33] : memref<1x4x16x8xf32, #tpu.memory_space<vmem>>, vector<1x1x16x8xf32>
    %50 = vector.shape_cast %49 : vector<1x1x16x8xf32> to vector<16x8xf32>
    %51 = vector.shape_cast %48 : vector<16x8xf32> to vector<1x1x16x8xf32>
    tpu.vector_store %arg12[%c0_30, %c0_31, %c0_32, %c0_33], %51 {strides = array<i32>} : memref<1x4x16x8xf32, #tpu.memory_space<vmem>>, vector<1x1x16x8xf32>,
    %52 = vector.extract_strided_slice %16 {offsets = [0, 32], sizes = [16, 32], strides = [1, 1]} : vector<16x128xf32> to vector<16x32xf32>
    %53 = vector.shape_cast %52 : vector<16x32xf32> to vector<16x1x32xf32>
    %54 = vector.extract_strided_slice %25 {offsets = [0, 32], sizes = [8, 32], strides = [1, 1]} : vector<8x128xf32> to vector<8x32xf32>
    %55 = vector.shape_cast %54 : vector<8x32xf32> to vector<1x8x32xf32>
    %56 = vector.broadcast %53 : vector<16x1x32xf32> to vector<16x8x32xf32>
    %57 = vector.broadcast %55 : vector<1x8x32xf32> to vector<16x8x32xf32>
    %58 = arith.addf %56, %57 : vector<16x8x32xf32>
    %59 = arith.truncf %58 : vector<16x8x32xf32> to vector<16x8x32xbf16>
    %60 = math.tanh %59 : vector<16x8x32xbf16>
    %61 = arith.extf %60 : vector<16x8x32xbf16> to vector<16x8x32xf32>
    %62 = vector.extract_strided_slice %17 {offsets = [1, 0], sizes = [1, 32], strides = [1, 1]} : vector<4x32xf32> to vector<1x32xf32>
    %63 = vector.shape_cast %62 : vector<1x32xf32> to vector<1x1x32xf32>
    %64 = vector.broadcast %63 : vector<1x1x32xf32> to vector<16x8x32xf32>
    %65 = arith.mulf %61, %64 : vector<16x8x32xf32>
    %cst_34 = arith.constant dense<0.000000e+00> : vector<16x8xf32>
    %66 = vector.multi_reduction <add>, %65, %cst_34 [2] : vector<16x8x32xf32> to vector<16x8xf32>
    %cst_35 = arith.constant -1.000000e+04 : f32
    %67 = vector.shape_cast %29 : vector<1x8xi1> to vector<1x8xi1>
    %68 = vector.broadcast %67 : vector<1x8xi1> to vector<16x8xi1>
    %69 = vector.broadcast %cst_35 : f32 to vector<16x8xf32>
    %70 = arith.select %68, %66, %69 : vector<16x8xi1>, vector<16x8xf32>
    %c0_36 = arith.constant 0 : index
    %c1 = arith.constant 1 : index
    %c0_37 = arith.constant 0 : index
    %c0_38 = arith.constant 0 : index
    %71 = vector.load %arg12[%c0_36, %c1, %c0_37, %c0_38] : memref<1x4x16x8xf32, #tpu.memory_space<vmem>>, vector<1x1x16x8xf32>
    %72 = vector.shape_cast %71 : vector<1x1x16x8xf32> to vector<16x8xf32>
    %73 = vector.shape_cast %70 : vector<16x8xf32> to vector<1x1x16x8xf32>
    tpu.vector_store %arg12[%c0_36, %c1, %c0_37, %c0_38], %73 {strides = array<i32>} : memref<1x4x16x8xf32, #tpu.memory_space<vmem>>, vector<1x1x16x8xf32>,
    %74 = vector.extract_strided_slice %16 {offsets = [0, 64], sizes = [16, 32], strides = [1, 1]} : vector<16x128xf32> to vector<16x32xf32>
    %75 = vector.shape_cast %74 : vector<16x32xf32> to vector<16x1x32xf32>
    %76 = vector.extract_strided_slice %25 {offsets = [0, 64], sizes = [8, 32], strides = [1, 1]} : vector<8x128xf32> to vector<8x32xf32>
    %77 = vector.shape_cast %76 : vector<8x32xf32> to vector<1x8x32xf32>
    %78 = vector.broadcast %75 : vector<16x1x32xf32> to vector<16x8x32xf32>
    %79 = vector.broadcast %77 : vector<1x8x32xf32> to vector<16x8x32xf32>
    %80 = arith.addf %78, %79 : vector<16x8x32xf32>
    %81 = arith.truncf %80 : vector<16x8x32xf32> to vector<16x8x32xbf16>
    %82 = math.tanh %81 : vector<16x8x32xbf16>
    %83 = arith.extf %82 : vector<16x8x32xbf16> to vector<16x8x32xf32>
    %84 = vector.extract_strided_slice %17 {offsets = [2, 0], sizes = [1, 32], strides = [1, 1]} : vector<4x32xf32> to vector<1x32xf32>
    %85 = vector.shape_cast %84 : vector<1x32xf32> to vector<1x1x32xf32>
    %86 = vector.broadcast %85 : vector<1x1x32xf32> to vector<16x8x32xf32>
    %87 = arith.mulf %83, %86 : vector<16x8x32xf32>
    %cst_39 = arith.constant dense<0.000000e+00> : vector<16x8xf32>
    %88 = vector.multi_reduction <add>, %87, %cst_39 [2] : vector<16x8x32xf32> to vector<16x8xf32>
    %cst_40 = arith.constant -1.000000e+04 : f32
    %89 = vector.shape_cast %29 : vector<1x8xi1> to vector<1x8xi1>
    %90 = vector.broadcast %89 : vector<1x8xi1> to vector<16x8xi1>
    %91 = vector.broadcast %cst_40 : f32 to vector<16x8xf32>
    %92 = arith.select %90, %88, %91 : vector<16x8xi1>, vector<16x8xf32>
    %c0_41 = arith.constant 0 : index
    %c2 = arith.constant 2 : index
    %c0_42 = arith.constant 0 : index
    %c0_43 = arith.constant 0 : index
    %93 = vector.load %arg12[%c0_41, %c2, %c0_42, %c0_43] : memref<1x4x16x8xf32, #tpu.memory_space<vmem>>, vector<1x1x16x8xf32>
    %94 = vector.shape_cast %93 : vector<1x1x16x8xf32> to vector<16x8xf32>
    %95 = vector.shape_cast %92 : vector<16x8xf32> to vector<1x1x16x8xf32>
    tpu.vector_store %arg12[%c0_41, %c2, %c0_42, %c0_43], %95 {strides = array<i32>} : memref<1x4x16x8xf32, #tpu.memory_space<vmem>>, vector<1x1x16x8xf32>,
    %96 = vector.extract_strided_slice %16 {offsets = [0, 96], sizes = [16, 32], strides = [1, 1]} : vector<16x128xf32> to vector<16x32xf32>
    %97 = vector.shape_cast %96 : vector<16x32xf32> to vector<16x1x32xf32>
    %98 = vector.extract_strided_slice %25 {offsets = [0, 96], sizes = [8, 32], strides = [1, 1]} : vector<8x128xf32> to vector<8x32xf32>
    %99 = vector.shape_cast %98 : vector<8x32xf32> to vector<1x8x32xf32>
    %100 = vector.broadcast %97 : vector<16x1x32xf32> to vector<16x8x32xf32>
    %101 = vector.broadcast %99 : vector<1x8x32xf32> to vector<16x8x32xf32>
    %102 = arith.addf %100, %101 : vector<16x8x32xf32>
    %103 = arith.truncf %102 : vector<16x8x32xf32> to vector<16x8x32xbf16>
    %104 = math.tanh %103 : vector<16x8x32xbf16>
    %105 = arith.extf %104 : vector<16x8x32xbf16> to vector<16x8x32xf32>
    %106 = vector.extract_strided_slice %17 {offsets = [3, 0], sizes = [1, 32], strides = [1, 1]} : vector<4x32xf32> to vector<1x32xf32>
    %107 = vector.shape_cast %106 : vector<1x32xf32> to vector<1x1x32xf32>
    %108 = vector.broadcast %107 : vector<1x1x32xf32> to vector<16x8x32xf32>
    %109 = arith.mulf %105, %108 : vector<16x8x32xf32>
    %cst_44 = arith.constant dense<0.000000e+00> : vector<16x8xf32>
    %110 = vector.multi_reduction <add>, %109, %cst_44 [2] : vector<16x8x32xf32> to vector<16x8xf32>
    %cst_45 = arith.constant -1.000000e+04 : f32
    %111 = vector.shape_cast %29 : vector<1x8xi1> to vector<1x8xi1>
    %112 = vector.broadcast %111 : vector<1x8xi1> to vector<16x8xi1>
    %113 = vector.broadcast %cst_45 : f32 to vector<16x8xf32>
    %114 = arith.select %112, %110, %113 : vector<16x8xi1>, vector<16x8xf32>
    %c0_46 = arith.constant 0 : index
    %c3 = arith.constant 3 : index
    %c0_47 = arith.constant 0 : index
    %c0_48 = arith.constant 0 : index
    %115 = vector.load %arg12[%c0_46, %c3, %c0_47, %c0_48] : memref<1x4x16x8xf32, #tpu.memory_space<vmem>>, vector<1x1x16x8xf32>
    %116 = vector.shape_cast %115 : vector<1x1x16x8xf32> to vector<16x8xf32>
    %117 = vector.shape_cast %114 : vector<16x8xf32> to vector<1x1x16x8xf32>
    tpu.vector_store %arg12[%c0_46, %c3, %c0_47, %c0_48], %117 {strides = array<i32>} : memref<1x4x16x8xf32, #tpu.memory_space<vmem>>, vector<1x1x16x8xf32>,
    return
  }
  func.func @transform_0(%arg0: i32) -> (i32, i32, i32) {
    %c0_i32 = arith.constant 0 : i32
    %c0_i32_0 = arith.constant 0 : i32
    %c0_i32_1 = arith.constant 0 : i32
    return %arg0, %c0_i32, %c0_i32_0 : i32, i32, i32
  }
  func.func @transform_1(%arg0: i32) -> (i32, i32, i32) {
    %c0_i32 = arith.constant 0 : i32
    %c0_i32_0 = arith.constant 0 : i32
    %c0_i32_1 = arith.constant 0 : i32
    return %arg0, %c0_i32, %c0_i32_0 : i32, i32, i32
  }
  func.func @transform_2(%arg0: i32) -> (i32, i32, i32) {
    %c0_i32 = arith.constant 0 : i32
    %c0_i32_0 = arith.constant 0 : i32
    %c0_i32_1 = arith.constant 0 : i32
    return %arg0, %c0_i32, %c0_i32_0 : i32, i32, i32
  }
  func.func @transform_3(%arg0: i32) -> (i32, i32) {
    %c0_i32 = arith.constant 0 : i32
    %c0_i32_0 = arith.constant 0 : i32
    %c0_i32_1 = arith.constant 0 : i32
    return %c0_i32, %c0_i32_0 : i32, i32
  }
  func.func @transform_4(%arg0: i32) -> (i32, i32) {
    %c0_i32 = arith.constant 0 : i32
    %c0_i32_0 = arith.constant 0 : i32
    %c0_i32_1 = arith.constant 0 : i32
    return %c0_i32, %c0_i32_0 : i32, i32
  }
  func.func @transform_5(%arg0: i32) -> (i32, i32) {
    %c0_i32 = arith.constant 0 : i32
    %c0_i32_0 = arith.constant 0 : i32
    %c0_i32_1 = arith.constant 0 : i32
    return %c0_i32, %c0_i32_0 : i32, i32
  }
  func.func @transform_6(%arg0: i32) -> (i32, i32) {
    %c0_i32 = arith.constant 0 : i32
    %c0_i32_0 = arith.constant 0 : i32
    %c0_i32_1 = arith.constant 0 : i32
    return %c0_i32, %c0_i32_0 : i32, i32
  }
  func.func @transform_7(%arg0: i32) -> (i32, i32) {
    %c0_i32 = arith.constant 0 : i32
    %c0_i32_0 = arith.constant 0 : i32
    %c0_i32_1 = arith.constant 0 : i32
    return %c0_i32, %c0_i32_0 : i32, i32
  }
  func.func @transform_8(%arg0: i32) -> (i32, i32) {
    %c0_i32 = arith.constant 0 : i32
    %c0_i32_0 = arith.constant 0 : i32
    %c0_i32_1 = arith.constant 0 : i32
    return %c0_i32, %c0_i32_0 : i32, i32
  }
  func.func @transform_9(%arg0: i32) -> (i32, i32) {
    %c0_i32 = arith.constant 0 : i32
    %c0_i32_0 = arith.constant 0 : i32
    %c0_i32_1 = arith.constant 0 : i32
    return %c0_i32, %c0_i32_0 : i32, i32
  }
  func.func @transform_10(%arg0: i32) -> (i32, i32, i32) {
    %c0_i32 = arith.constant 0 : i32
    %c0_i32_0 = arith.constant 0 : i32
    %c0_i32_1 = arith.constant 0 : i32
    return %arg0, %c0_i32, %c0_i32_0 : i32, i32, i32
  }
  func.func @transform_11(%arg0: i32) -> (i32, i32, i32, i32) {
    %c0_i32 = arith.constant 0 : i32
    %c0_i32_0 = arith.constant 0 : i32
    %c0_i32_1 = arith.constant 0 : i32
    %c0_i32_2 = arith.constant 0 : i32
    return %arg0, %c0_i32, %c0_i32_0, %c0_i32_1 : i32, i32, i32, i32
  }
}

</mosaic_0001>

<bundles_post_ra>
// kernel: set_pred_forward.8
= control target key start
LH: loop header
LB: loop body
LE: loop exit
PB: predicated region body
PF: predicated region fallthrough
CT: control target
= control target key end

     0   :  { %vm18_vm0 = vcmask 261120   ;;  %s118_s0 = inlined_call_operand.vmem [shape: f32[16,32], index: 0, kind: input, shape index: {}]   ;;  %s119_s1 = inlined_call_operand.vmem [shape: f32[1,32], index: 1, kind: input, shape index: {}]   ;;  %s120_s2 = inlined_call_operand.vmem [shape: f32[1,32], index: 2, kind: input, shape index: {}]   ;;  %s121_s3 = inlined_call_operand.vmem [shape: f32[16,32], index: 3, kind: output, shape index: {}]  }
   0x1   :  { %v14_v0 = vld [vmem:[%s118_s0] sm:$0xff]  ;;  %v15_v1 = vld [vmem:[%s118_s0 + $0x8] sm:$0xff] }
   0x2   :  { %v19_v2 = vsel %vm18_vm0, %v14_v0, 0.0  ;;  %v22_v3 = vsel %vm18_vm0, %v15_v1, 0.0  ;;  %v68_v21 = vld [vmem:[%s119_s1] ss:$0 sm:$0xff] }
   0x3   :  { %20 = vadd.xlane.f32.xlu0 %v19_v2  ;;  %v69_v23 = vld [vmem:[%s120_s2] ss:$0 sm:$0xff] }
   0x7   :  { %23 = vadd.xlane.f32.xlu0 %v22_v3 }
  0x90   :  { %v21_v4 = vpop.xlane.xlu0 %20 }
  0x91   :  { %v26_v5 = vmul.f32 0.03125, %v21_v4 }
  0x93   :  { %v28_v6 = vsub.f32 %v14_v0, %v26_v5 }
  0x94   :  { %v24_v7 = vpop.xlane.xlu0 %23 }
  0x95   :  { %v27_v8 = vmul.f32 0.03125, %v24_v7  ;;  %v30_v9 = vmul.f32 %v28_v6, %v28_v6 }
  0x97   :  { %v29_v10 = vsub.f32 %v15_v1, %v27_v8  ;;  %v32_v11 = vsel %vm18_vm0, %v30_v9, 0.0 }
  0x98   :  { %33 = vadd.xlane.f32.xlu1 %v32_v11 }
  0x99   :  { %v31_v12 = vmul.f32 %v29_v10, %v29_v10 }
  0x9b   :  { %v35_v13 = vsel %vm18_vm0, %v31_v12, 0.0 }
  0x9c   :  { %36 = vadd.xlane.f32.xlu1 %v35_v13 }
 0x125   :  { %v34_v14 = vpop.xlane.xlu1 %33 }
 0x126   :  { %v38_v15 = vmul.f32 0.03125, %v34_v14 }
 0x128   :  { %v40_v16 = vadd.f32 1e-12, %v38_v15 }
 0x129   :  { %v37_v17 = vpop.xlane.xlu1 %36 }
 0x12a   :  { %70 = vrsqrt.f32 %v40_v16  ;;  %v39_v18 = vmul.f32 0.03125, %v37_v17 }
 0x12c   :  { %v41_v19 = vadd.f32 1e-12, %v39_v18 }
 0x12e   :  { %72 = vrsqrt.f32 %v41_v19 }
 0x134   :  { %v71_v20 = vpop.eup %70 }
 0x135   :  { %v44_v22 = vmul.f32 %v71_v20, %v28_v6 }
 0x137   :  { %v52_v24 = vmul.f32 %v68_v21, %v44_v22 }
 0x138   :  { %v73_v25 = vpop.eup %72 }
 0x139   :  { %v60_v26 = vadd.f32 %v69_v23, %v52_v24  ;;  %v45_v27 = vmul.f32 %v73_v25, %v29_v10 }
 0x13b   :  { %62 = vst.msk [vmem:[%s121_s3] sm:$0xff] %vm18_vm0, %v60_v26  ;;  %v53_v28 = vmul.f32 %v68_v21, %v45_v27 }
 0x13d   :  { %v61_v29 = vadd.f32 %v69_v23, %v53_v28 }
 0x13f   :  { %63 = vst.msk [vmem:[%s121_s3 + $0x8] sm:$0xff] %vm18_vm0, %v61_v29 }

// kernel: set_pred_forward.9
= control target key start
LH: loop header
LB: loop body
LE: loop exit
PB: predicated region body
PF: predicated region fallthrough
CT: control target
= control target key end

     0   :  { %s1695_s29 = smov 0   ;;  %s1866_s0 = inlined_call_operand.vmem [shape: f32[2,8,32], index: 0, kind: input, shape index: {}]   ;;  %s1867_s1 = inlined_call_operand.vmem [shape: f32[2,1,8], index: 1, kind: input, shape index: {}]   ;;  %s1868_s2 = inlined_call_operand.vmem [shape: bf16[32,96], index: 2, kind: input, shape index: {}]   ;;  %s1869_s3 = inlined_call_operand.vmem [shape: f32[1,96], index: 3, kind: input, shape index: {}]   ;;  %s1870_s4 = inlined_call_operand.vmem [shape: bf16[32,32], index: 4, kind: input, shape index: {}]   ;;  %s1871_s5 = inlined_call_operand.vmem [shape: f32[1,32], index: 5, kind: input, shape index: {}]   ;;  %s1872_s6 = inlined_call_operand.vmem [shape: f32[1,32], index: 6, kind: input, shape index: {}]   ;;  %s1873_s7 = inlined_call_operand.vmem [shape: f32[1,32], index: 7, kind: input, shape index: {}]   ;;  %s1874_s8 = inlined_call_operand.vmem [shape: bf16[32,64], index: 8, kind: input, shape index: {}]   ;;  %s1875_s9 = inlined_call_operand.vmem [shape: f32[1,64], index: 9, kind: input, shape index: {}]   ;;  %s1876_s10 = inlined_call_operand.vmem [shape: bf16[64,32], index: 10, kind: input, shape index: {}]   ;;  %s1877_s11 = inlined_call_operand.vmem [shape: f32[1,32], index: 11, kind: input, shape index: {}]   ;;  %s1878_s12 = inlined_call_operand.vmem [shape: f32[1,32], index: 12, kind: input, shape index: {}]   ;;  %s1879_s13 = inlined_call_operand.vmem [shape: f32[1,32], index: 13, kind: input, shape index: {}]   ;;  %s1880_s14 = inlined_call_operand.vmem [shape: f32[2,8,32], index: 14, kind: output, shape index: {}]  }
   0x1 LB: > { %s1380_s30 = sadd.s32 4294967295, %s1602_s29   ;;  %p1384_p0 = scmp.ge.s32.totalorder %s1602_s29, 1  ;;  %s1602_s29 = sphi %s1695_s29, %s24_s29  }
   0x2   : > { %p419_p1 = scmp.lt.s32.totalorder %s1602_s29, 3 }
   0x4   : > { %p420_p2 = pnand %p1384_p0, %p419_p1 }
   0x5   : > { %v1564_v0 = vld [vmem:[%s1868_s2] sm:$0xff] (!%p420_p2)   ;;  %v1604_v1 = vmov (!%p420_p2), 0.0   ;;  %v1565_v2 = vld [vmem:[%s1868_s2 + $0x8] sm:$0xff] (!%p420_p2)   ;;  %vm1605_vm0 = vmmov (!%p420_p2), 0   ;;  %p466_p3 = scmp.lt.s32.totalorder (!%p420_p2), %s1380_s30, 1  ;;  %vm503_vm1 = vcmask (!%p420_p2), 261120  }
   0x6   : > { %423 = sbr.rel (%p420_p2) target bundleno = 2589 (0xa1d), region = 76  ;;  %1456 = vmatprep.subr.bf16.mxu0 (!%p420_p2), %v1604_v1  ;;  %1464 = vmatprep.subr.bf16.mxu1 (!%p420_p2), %v1604_v1  ;;  %v1387_v5 = vld [vmem:[%s1869_s3] ss:$0 sm:$0xff] (!%p420_p2)  ;;  %s1606_s25 = smov (!%p420_p2), 96   ;;  %vm560_vm2 = vcmask (!%p420_p2), 64512   ;;  %vm624_vm3 = vcmask (!%p420_p2), 1043456  }
   0x7   : > { %1457 = vmatpush3.bf16.msra.mxu0 (!%p420_p2), %v1564_v0  ;;  %1460 = vmatprep.mubr.msk.bf16.mxu0 (!%p420_p2), %vm1605_vm0, %v1604_v1  ;;  %s1607_s26 = smov (!%p420_p2), 120   ;;  %s1608_s27 = smov (!%p420_p2), 88   ;;  %vm669_vm4 = vcmask (!%p420_p2), 60416   ;;  %vm789_vm5 = vcmask (!%p420_p2), 126016   ;;  %vm908_vm6 = vcmask (!%p420_p2), 191616   ;;  %vm1027_vm7 = vcmask (!%p420_p2), 257216  }
   0x8   : > { %1458 = vmatprep.subr.bf16.mxu0 (!%p420_p2), %v1604_v1  ;;  %1466 = vmatprep.mubr.msk.bf16.mxu1 (!%p420_p2), %vm1605_vm0, %v1604_v1  ;;  %s1609_s28 = smov (!%p420_p2), 80   ;;  %s1610_s15 = smov (!%p420_p2), 112   ;;  %vm1243_vm8 = vcmask (!%p420_p2), 523264  }
   0x9   : > { %s1611_s16 = smov (!%p420_p2), 72   ;;  %s1612_s17 = smov (!%p420_p2), 104  }
   0xa   : > { %s1614_s23 = smov (!%p420_p2), 64   ;;  %s1615_s24 = smov (!%p420_p2), 40  }
   0xb   : > { %1459 = vmatpush3.bf16.msra.mxu0 (!%p420_p2), %v1565_v2  ;;  %s1619_s18 = smov (!%p420_p2), 24  }
   0xc   : > { %1470 = vmatprep.subr.bf16.mxu0 (!%p420_p2), %v1604_v1 }
   0xd   : > { %s1882_s30 = smov (!%p466_p3, %s1380_s30), 1 }
   0xe   : > { %s1385_s19 = sshll.u32 %s1882_s30, 3  ;;  %s472_s21 = scalar_lea.vmem %s1867_s1, %s1882_s30 }
   0xf   : > { %s469_s22 = scalar_lea.vmem %s1866_s0, %s1385_s19  ;;  %v1391_v25 = vld [vmem:[%s472_s21] ss:$0 sm:$0xff] }
  0x10   : > { %v1725_v3 = vld [vmem:[%s469_s22] sm:$0xff]  ;;  %s1613_s22 = smov 56  }
  0x11   : > { %v483_v4 = vpack.c.bf16 %v1725_v3, %v1725_v3 }
  0x13   : > { %1461 = vmatmul.mubr.msk.bf16.vlgmr.msra.gmra.mrb[0].mxu0 %vm503_vm1, %v483_v4 }
  0x14   : > { %1472 = vmatprep.mubr.msk.bf16.mxu0 %vm1605_vm0, %v1604_v1 }
  0xe6   : > { %v541_v6 = vpop.f32.mrb[0].mxu0 }
  0xe7   : > { %v542_v7 = vadd.f32 %v1387_v5, %v541_v6  ;;  %v1462_v8 = vpop.f32.mrb[1].mxu0 }
  0xe8   : > { %v544_v9 = vpop.f32.mrb[2].mxu0 }
  0xe9   : > { %v547_v10 = vmul.f32 0.35355338, %v542_v7  ;;  %v1735_v11 = vpack.c.bf16 %v542_v7, %v542_v7  ;;  %v1463_v12 = vpop.f32.mrb[3].mxu0 }
  0xeb   : > { %v548_v13 = vpack.c.bf16 %v547_v10, %v547_v10  ;;  %558 = vrot.lane.b32.xlu0 %v1735_v11, %s1606_s25  ;;  %s1616_s25 = smov 48  }
  0xed   : > { %672 = vrot.lane.b32.xlu1 %v548_v13, %s1607_s26  ;;  %s1617_s26 = smov 8  }
  0xef   : > { %674 = vrot.lane.b32.xlu0 %v1735_v11, %s1608_s27 }
  0xf1   : > { %793 = vrot.lane.b32.xlu1 %v1735_v11, %s1609_s28 }
  0xf3   : > { %791 = vrot.lane.b32.xlu0 %v548_v13, %s1610_s15 }
  0xf5   : > { %912 = vrot.lane.b32.xlu1 %v1735_v11, %s1611_s16 }
  0xf7   : > { %910 = vrot.lane.b32.xlu0 %v548_v13, %s1612_s17  ;;  %s1618_s17 = smov 16  }
 0x15d   : > { %v559_v14 = vpop.permute.xlu0 %558 }
 0x15e   : > { %v565_v15 = vsel %vm560_vm2, %v559_v14, 0 }
 0x15f   : > { %1465 = vmatpush3.bf16.xpose.msra.mxu1 %v565_v15  ;;  %v673_v17 = vpop.permute.xlu1 %672 }
 0x160   : > { %1476 = vmatprep.subr.bf16.mxu1 %v1604_v1 }
 0x161   : > { %v675_v16 = vpop.permute.xlu0 %674 }
 0x162   : > { %v680_v18 = vsel %vm560_vm2, %v675_v16, 0 }
 0x163   : > { %v794_v19 = vpop.permute.xlu1 %793 }
 0x164   : > { %v799_v20 = vsel %vm560_vm2, %v794_v19, 0 }
 0x165   : > { %v792_v22 = vpop.permute.xlu0 %791 }
 0x166   : > { %1467 = vmatmul.mubr.msk.bf16.vlgmr.msra.gmra.mrb[0].mxu1 %vm560_vm2, %v548_v13 }
 0x167   : > { %1477 = vmatpush3.bf16.xpose.msra.mxu1 %v680_v18  ;;  %1478 = vmatprep.mubr.msk.bf16.mxu1 %vm1605_vm0, %v1604_v1  ;;  %v913_v21 = vpop.permute.xlu1 %912 }
 0x168   : > { %1488 = vmatprep.subr.bf16.mxu1 %v1604_v1  ;;  %v918_v23 = vsel %vm560_vm2, %v913_v21, 0 }
 0x169   : > { %v911_v24 = vpop.permute.xlu0 %910 }
 0x16e   : > { %1479 = vmatmul.mubr.msk.bf16.vlgmr.msra.gmra.mrb[4].mxu1 %vm560_vm2, %v673_v17 }
 0x16f   : > { %1489 = vmatpush3.bf16.xpose.msra.mxu1 %v799_v20  ;;  %1490 = vmatprep.mubr.msk.bf16.mxu1 %vm1605_vm0, %v1604_v1 }
 0x170   : > { %1500 = vmatprep.subr.bf16.mxu1 %v1604_v1 }
 0x176   : > { %1491 = vmatmul.mubr.msk.bf16.vlgmr.msra.gmra.mrb[8].mxu1 %vm560_vm2, %v792_v22 }
 0x177   : > { %1501 = vmatpush3.bf16.xpose.msra.mxu1 %v918_v23  ;;  %1502 = vmatprep.mubr.msk.bf16.mxu1 %vm1605_vm0, %v1604_v1 }
 0x178   : > { %1512 = vmatprep.subr.bf16.mxu1 %v1604_v1 }
 0x17e   : > { %1503 = vmatmul.mubr.msk.bf16.vlgmr.msra.gmra.mrb[12].mxu1 %vm560_vm2, %v911_v24 }
 0x17f   : > { %1516 = vmatprep.mubr.msk.bf16.mxu1 %vm1605_vm0, %v1604_v1 }
 0x239   : > { %v601_v26 = vpop.f32.mrb[0].mxu1 }
 0x23a   : > { %v602_v27 = vadd.f32 %v1391_v25, %v601_v26  ;;  %v1468_v28 = vpop.f32.mrb[1].mxu1 }
 0x23b   : > { %v604_v29 = vpop.f32.mrb[2].mxu1 }
 0x23c   : > { %v1469_v30 = vpop.f32.mrb[3].mxu1  ;;  %v607_v31 = vsel %vm560_vm2, %v602_v27, -inf }
 0x23d   : > { %608 = vmax.xlane.f32.xlu1 %v607_v31 }
 0x241   : > { %v716_v32 = vpop.f32.mrb[4].mxu1 }
 0x242   : > { %v717_v33 = vadd.f32 %v1391_v25, %v716_v32  ;;  %v1480_v34 = vpop.f32.mrb[5].mxu1 }
 0x243   : > { %v719_v35 = vpop.f32.mrb[6].mxu1 }
 0x244   : > { %v1481_v36 = vpop.f32.mrb[7].mxu1  ;;  %v722_v37 = vsel %vm560_vm2, %v717_v33, -inf }
 0x245   : > { %723 = vmax.xlane.f32.xlu0 %v722_v37 }
 0x249   : > { %v835_v38 = vpop.f32.mrb[8].mxu1 }
 0x24a   : > { %v836_v39 = vadd.f32 %v1391_v25, %v835_v38  ;;  %v1492_v40 = vpop.f32.mrb[9].mxu1 }
 0x24b   : > { %v838_v41 = vpop.f32.mrb[10].mxu1 }
 0x24c   : > { %v1493_v42 = vpop.f32.mrb[11].mxu1  ;;  %v841_v43 = vsel %vm560_vm2, %v836_v39, -inf }
 0x24d   : > { %842 = vmax.xlane.f32.xlu0 %v841_v43  ;;  %v1566_v42 = vld [vmem:[%s1870_s4] sm:$0xff]   ;;  %v1567_v43 = vld [vmem:[%s1870_s4 + $0x8] sm:$0xff]  }
 0x24e   : > { %1513 = vmatpush3.bf16.msra.mxu1 %v1566_v42 }
 0x24f   : > { %1514 = vmatprep.subr.bf16.mxu1 %v1604_v1 }
 0x251   : > { %v954_v44 = vpop.f32.mrb[12].mxu1 }
 0x252   : > { %v955_v45 = vadd.f32 %v1391_v25, %v954_v44  ;;  %v1504_v46 = vpop.f32.mrb[13].mxu1  ;;  %1515 = vmatpush3.bf16.msra.mxu1 %v1567_v43 }
 0x253   : > { %v957_v47 = vpop.f32.mrb[14].mxu1  ;;  %1528 = vmatprep.subr.bf16.mxu1 %v1604_v1 }
 0x254   : > { %v1505_v48 = vpop.f32.mrb[15].mxu1  ;;  %v960_v49 = vsel %vm560_vm2, %v955_v45, -inf }
 0x255   : > { %961 = vmax.xlane.f32.xlu1 %v960_v49 }
 0x2ca   : > { %v609_v50 = vpop.xlane.xlu1 %608 }
 0x2cb   : > { %v610_v51 = vsub.f32 %v602_v27, %v609_v50 }
 0x2cd   : > { %v611_v52 = vmul.f32 1.442695, %v610_v51 }
 0x2cf   : > { %1574 = vpow2.f32 %v611_v52 }
 0x2d2   : > { %v724_v53 = vpop.xlane.xlu0 %723 }
 0x2d3   : > { %v725_v54 = vsub.f32 %v717_v33, %v724_v53 }
 0x2d5   : > { %v726_v55 = vmul.f32 1.442695, %v725_v54 }
 0x2d7   : > { %1576 = vpow2.f32 %v726_v55 }
 0x2d9   : > { %v1575_v56 = vpop.eup %1574 }
 0x2da   : > { %v843_v57 = vpop.xlane.xlu0 %842  ;;  %v613_v58 = vsel %vm560_vm2, %v1575_v56, 0.0 }
 0x2db   : > { %v844_v59 = vsub.f32 %v836_v39, %v843_v57  ;;  %614 = vadd.xlane.f32.xlu0 %v613_v58  ;;  %v1403_v58 = vld [vmem:[%s1871_s5] ss:$0 sm:$0xff] }
 0x2dd   : > { %v845_v60 = vmul.f32 1.442695, %v844_v59 }
 0x2df   : > { %1578 = vpow2.f32 %v845_v60 }
 0x2e1   : > { %v1577_v61 = vpop.eup %1576 }
 0x2e2   : > { %v728_v62 = vsel %vm560_vm2, %v1577_v61, 0.0  ;;  %v962_v2 = vpop.xlane.xlu1 %961 }
 0x2e3   : > { %729 = vadd.xlane.f32.xlu1 %v728_v62  ;;  %v963_v4 = vsub.f32 %v955_v45, %v962_v2 }
 0x2e5   : > { %v964_v5 = vmul.f32 1.442695, %v963_v4 }
 0x2e7   : > { %1580 = vpow2.f32 %v964_v5 }
 0x2e9   : > { %v1579_v63 = vpop.eup %1578 }
 0x2ea   : > { %v847_v0 = vsel %vm560_vm2, %v1579_v63, 0.0 }
 0x2eb   : > { %848 = vadd.xlane.f32.xlu0 %v847_v0 }
 0x2f1   : > { %v1581_v6 = vpop.eup %1580 }
 0x2f2   : > { %v966_v7 = vsel %vm560_vm2, %v1581_v6, 0.0 }
 0x2f4   : > { %734 = vrot.lane.b32.xlu1 %v1735_v11, %s1613_s22  ;;  %s476_s22 = scalar_lea.vmem %s1880_s14, %s1385_s19 }
 0x301   : > { %619 = vrot.lane.b32.xlu0 %v1735_v11, %s1614_s23 }
 0x305   : > { %972 = vrot.lane.b32.xlu0 %v1735_v11, %s1615_s24 }
 0x318   : > { %967 = vadd.xlane.f32.xlu1 %v966_v7 }
 0x329   : > { %853 = vrot.lane.b32.xlu1 %v1735_v11, %s1616_s25 }
 0x368   : > { %v615_v8 = vpop.xlane.xlu0 %614 }
 0x369   : > { %1582 = vrcp.f32 %v615_v8 }
 0x370   : > { %v730_v9 = vpop.xlane.xlu1 %729 }
 0x371   : > { %1584 = vrcp.f32 %v730_v9  ;;  %v1568_v9 = vld [vmem:[%s1874_s8] sm:$0xff]  }
 0x373   : > { %v1583_v10 = vpop.eup %1582 }
 0x374   : > { %v617_v13 = vmul.f32 %v1583_v10, %v1575_v56  ;;  %v735_v16 = vpop.permute.xlu1 %734 }
 0x375   : > { %v740_v19 = vsel %vm624_vm3, %v735_v16, 0 }
 0x376   : > { %v618_v17 = vpack.c.bf16 %v617_v13, %v617_v13 }
 0x378   : > { %v849_v12 = vpop.xlane.xlu0 %848 }
 0x379   : > { %1586 = vrcp.f32 %v849_v12 }
 0x37b   : > { %v1585_v18 = vpop.eup %1584 }
 0x37c   : > { %v620_v14 = vpop.permute.xlu0 %619  ;;  %v732_v11 = vmul.f32 %v1585_v18, %v1577_v61 }
 0x37d   : > { %v626_v15 = vsel %vm624_vm3, %v620_v14, 0 }
 0x37e   : > { %1471 = vmatpush3.bf16.msra.mxu0 %v626_v15  ;;  %v733_v20 = vpack.c.bf16 %v732_v11, %v732_v11  ;;  %v1407_v15 = vld [vmem:[%s1872_s6] ss:$0 sm:$0xff] }
 0x37f   : > { %1482 = vmatprep.subr.bf16.mxu0 %v1604_v1 }
 0x380   : > { %v973_v26 = vpop.permute.xlu0 %972 }
 0x381   : > { %1473 = vmatmul.mubr.msk.bf16.vlgmr.msra.gmra.mrb[4].mxu0 %vm560_vm2, %v618_v17  ;;  %v978_v28 = vsel %vm624_vm3, %v973_v26, 0  ;;  %v1408_v17 = vld [vmem:[%s1873_s7] ss:$0 sm:$0xff] }
 0x382   : > { %1483 = vmatpush3.bf16.msra.mxu0 %v740_v19  ;;  %1484 = vmatprep.mubr.msk.bf16.mxu0 %vm1605_vm0, %v1604_v1 }
 0x383   : > { %1494 = vmatprep.subr.bf16.mxu0 %v1604_v1  ;;  %v1587_v21 = vpop.eup %1586 }
 0x384   : > { %v851_v23 = vmul.f32 %v1587_v21, %v1579_v63  ;;  %v1571_v21 = vld [vmem:[%s1876_s10 + $0x8] sm:$0xff]  }
 0x386   : > { %v852_v27 = vpack.c.bf16 %v851_v23, %v851_v23  ;;  %v1573_v23 = vld [vmem:[%s1876_s10 + $0x18] sm:$0xff]  }
 0x389   : > { %1485 = vmatmul.mubr.msk.bf16.vlgmr.msra.gmra.mrb[8].mxu0 %vm560_vm2, %v733_v20  ;;  %v1570_v20 = vld [vmem:[%s1876_s10] sm:$0xff]  }
 0x38a   : > { %1496 = vmatprep.mubr.msk.bf16.mxu0 %vm1605_vm0, %v1604_v1 }
 0x3a5   : > { %v968_v22 = vpop.xlane.xlu1 %967 }
 0x3a6   : > { %1588 = vrcp.f32 %v968_v22  ;;  %v1572_v22 = vld [vmem:[%s1876_s10 + $0x10] sm:$0xff]  }
 0x3a9   : > { %v854_v24 = vpop.permute.xlu1 %853 }
 0x3aa   : > { %v859_v25 = vsel %vm624_vm3, %v854_v24, 0  ;;  %v1409_v24 = vld [vmem:[%s1875_s9] ss:$0 sm:$0xff] }
 0x3ab   : > { %1495 = vmatpush3.bf16.msra.mxu0 %v859_v25 }
 0x3ac   : > { %1506 = vmatprep.subr.bf16.mxu0 %v1604_v1 }
 0x3ae   : > { %1497 = vmatmul.mubr.msk.bf16.vlgmr.msra.gmra.mrb[12].mxu0 %vm560_vm2, %v852_v27 }
 0x3af   : > { %1507 = vmatpush3.bf16.msra.mxu0 %v978_v28  ;;  %1508 = vmatprep.mubr.msk.bf16.mxu0 %vm1605_vm0, %v1604_v1 }
 0x3b0   : > { %v1589_v29 = vpop.eup %1588  ;;  %1520 = vmatprep.subr.bf16.mxu0 %v1604_v1 }
 0x3b1   : > { %v970_v30 = vmul.f32 %v1589_v29, %v1581_v6 }
 0x3b3   : > { %v971_v31 = vpack.c.bf16 %v970_v30, %v970_v30 }
 0x3b6   : > { %1509 = vmatmul.mubr.msk.bf16.vlgmr.msra.gmra.mrb[16].mxu0 %vm560_vm2, %v971_v31 }
 0x3b7   : > { %1524 = vmatprep.mubr.msk.bf16.mxu0 %vm1605_vm0, %v1604_v1  ;;  %1521 = vmatpush3.bf16.msra.mxu0 %v1568_v9 }
 0x3b8   : > { %1522 = vmatprep.subr.bf16.mxu0 %v1604_v1 }
 0x454   : > { %v662_v32 = vpop.f32.mrb[4].mxu0 }
 0x455   : > { %v668_v33 = vpack.c.bf16 %v662_v32, %v662_v32  ;;  %v1474_v34 = vpop.f32.mrb[5].mxu0 }
 0x456   : > { %v665_v35 = vpop.f32.mrb[6].mxu0 }
 0x457   : > { %670 = vst.msk [vmem:[#allocation2] sm:$0xf] %vm669_vm4, %v668_v33  ;;  %v1475_v36 = vpop.f32.mrb[7].mxu0 }
 0x45c   : > { %v776_v37 = vpop.f32.mrb[8].mxu0 }
 0x45d   : > { %v1423_v38 = vpack.c.bf16 %v776_v37, %v776_v37  ;;  %v1486_v39 = vpop.f32.mrb[9].mxu0 }
 0x45e   : > { %v779_v40 = vpop.f32.mrb[10].mxu0  ;;  %v1413_v39 = vld [vmem:[%s1877_s11] ss:$0 sm:$0xff] }
 0x45f   : > { %786 = vrot.lane.b32.xlu1 %v1423_v38, %s1617_s26  ;;  %v1487_v41 = vpop.f32.mrb[11].mxu0 }
 0x481   : > { %v895_v44 = vpop.f32.mrb[12].mxu0 }
 0x482   : > { %v1424_v45 = vpack.c.bf16 %v895_v44, %v895_v44  ;;  %v1498_v46 = vpop.f32.mrb[13].mxu0 }
 0x483   : > { %v898_v47 = vpop.f32.mrb[14].mxu0 }
 0x484   : > { %905 = vrot.lane.b32.xlu0 %v1424_v45, %s1618_s17  ;;  %v1499_v48 = vpop.f32.mrb[15].mxu0 }
 0x489   : > { %v1014_v49 = vpop.f32.mrb[16].mxu0 }
 0x48a   : > { %v1425_v50 = vpack.c.bf16 %v1014_v49, %v1014_v49  ;;  %v1510_v51 = vpop.f32.mrb[17].mxu0 }
 0x48b   : > { %v1017_v52 = vpop.f32.mrb[18].mxu0 }
 0x48c   : > { %1024 = vrot.lane.b32.xlu1 %v1425_v50, %s1619_s18  ;;  %v1511_v53 = vpop.f32.mrb[19].mxu0 }
 0x4d1   : > { %v787_v54 = vpop.permute.xlu1 %786 }
 0x4d2   : > { %790 = vst.msk [vmem:[#allocation2] sm:$0xf] %vm789_vm5, %v787_v54 }
 0x4f6   : > { %v906_v55 = vpop.permute.xlu0 %905 }
 0x4f7   : > { %909 = vst.msk [vmem:[#allocation2] sm:$0xf] %vm908_vm6, %v906_v55 }
 0x4fe   : > { %v1025_v56 = vpop.permute.xlu1 %1024 }
 0x4ff   : > { %1028 = vst.msk [vmem:[#allocation2] sm:$0xf] %vm1027_vm7, %v1025_v56  ;;  %v1419_v56 = vld [vmem:[%s1878_s12] ss:$0 sm:$0xff] }
 0x506   : > { %v1029_v57 = vld [vmem:[#allocation2] sm:$0xf] }
 0x507   : > { %1517 = vmatmul.mubr.msk.bf16.vlgmr.msra.gmra.mrb[16].mxu1 %vm503_vm1, %v1029_v57 }
 0x508   : > { %1536 = vmatprep.mubr.msk.bf16.mxu1 %vm1605_vm0, %v1604_v1  ;;  %1529 = vmatpush3.bf16.msra.mxu1 %v1570_v20 }
 0x509   : > { %1530 = vmatprep.subr.bf16.mxu1 %v1604_v1 }
 0x50c   : > { %1531 = vmatpush3.bf16.msra.mxu1 %v1571_v21 }
 0x50d   : > { %1532 = vmatprep.subr.bf16.mxu1 %v1604_v1 }
 0x510   : > { %1533 = vmatpush3.bf16.msra.mxu1 %v1572_v22 }
 0x511   : > { %1534 = vmatprep.subr.bf16.mxu1 %v1604_v1 }
 0x514   : > { %1535 = vmatpush3.bf16.msra.mxu1 %v1573_v23 }
 0x5da   : > { %v1090_v59 = vpop.f32.mrb[16].mxu1 }
 0x5db   : > { %v1091_v60 = vadd.f32 %v1403_v58, %v1090_v59  ;;  %v1518_v61 = vpop.f32.mrb[17].mxu1  ;;  %v1420_v58 = vld [vmem:[%s1879_s13] ss:$0 sm:$0xff] }
 0x5dc   : > { %v1093_v62 = vpop.f32.mrb[18].mxu1 }
 0x5dd   : > { %v1519_v63 = vpop.f32.mrb[19].mxu1  ;;  %v1096_v0 = vadd.f32 %v1091_v60, %v1725_v3  ;;  %v1569_v3 = vld [vmem:[%s1874_s8 + $0x8] sm:$0xff]  }
 0x5de   : > { %1523 = vmatpush3.bf16.msra.mxu0 %v1569_v3 }
 0x5df   : > { %v1099_v2 = vsel %vm503_vm1, %v1096_v0, 0.0 }
 0x5e0   : > { %1100 = vadd.xlane.f32.xlu0 %v1099_v2 }
 0x66d   : > { %v1101_v4 = vpop.xlane.xlu0 %1100 }
 0x66e   : > { %v1103_v5 = vmul.f32 0.03125, %v1101_v4 }
 0x670   : > { %v1104_v6 = vsub.f32 %v1096_v0, %v1103_v5 }
 0x672   : > { %v1105_v7 = vmul.f32 %v1104_v6, %v1104_v6 }
 0x674   : > { %v1106_v8 = vsel %vm503_vm1, %v1105_v7, 0.0 }
 0x675   : > { %1107 = vadd.xlane.f32.xlu1 %v1106_v8 }
 0x702   : > { %v1108_v10 = vpop.xlane.xlu1 %1107 }
 0x703   : > { %v1109_v12 = vmul.f32 0.03125, %v1108_v10 }
 0x705   : > { %v1110_v13 = vadd.f32 1e-12, %v1109_v12 }
 0x707   : > { %1590 = vrsqrt.f32 %v1110_v13 }
 0x711   : > { %v1591_v14 = vpop.eup %1590 }
 0x712   : > { %v1112_v16 = vmul.f32 %v1591_v14, %v1104_v6 }
 0x714   : > { %v1119_v18 = vmul.f32 %v1407_v15, %v1112_v16 }
 0x716   : > { %v1126_v19 = vadd.f32 %v1408_v17, %v1119_v18 }
 0x718   : > { %v1127_v11 = vpack.c.bf16 %v1126_v19, %v1126_v19 }
 0x71a   : > { %1525 = vmatmul.mubr.msk.bf16.vlgmr.msra.gmra.mrb[20].mxu0 %vm503_vm1, %v1127_v11 }
 0x7ed   : > { %v1188_v25 = vpop.f32.mrb[20].mxu0 }
 0x7ee   : > { %v1189_v26 = vadd.f32 %v1409_v24, %v1188_v25  ;;  %v1526_v27 = vpop.f32.mrb[21].mxu0 }
 0x7ef   : > { %v1191_v28 = vpop.f32.mrb[22].mxu0 }
 0x7f0   : > { %v1195_v29 = vmul.f32 0.044715, %v1189_v26  ;;  %v1527_v30 = vpop.f32.mrb[23].mxu0  ;;  %v1194_v36 = vmul.f32 0.5, %v1189_v26 }
 0x7f2   : > { %v1196_v31 = vmul.f32 %v1195_v29, %v1189_v26 }
 0x7f4   : > { %v1197_v32 = vmul.f32 %v1196_v31, %v1189_v26 }
 0x7f6   : > { %v1198_v33 = vadd.f32 %v1197_v32, %v1189_v26 }
 0x7f8   : > { %v1199_v34 = vmul.f32 0.7978846, %v1198_v33 }
 0x7fa   : > { %1592 = vtanh.f32 %v1199_v34 }
 0x804   : > { %v1593_v35 = vpop.eup %1592 }
 0x805   : > { %v1201_v37 = vadd.f32 1.0, %v1593_v35 }
 0x807   : > { %v1202_v1 = vmul.f32 %v1201_v37, %v1194_v36 }
 0x809   : > { %v1203_v38 = vpack.c.bf16 %v1202_v1, %v1202_v1 }
 0x80b   : > { %1537 = vmatmul.mubr.msk.bf16.vlgmr.msra.gmra.mrb[20].mxu1 %vm1243_vm8, %v1203_v38 }
 0x8de   : > { %v1281_v40 = vpop.f32.mrb[20].mxu1 }
 0x8df   : > { %v1282_v41 = vadd.f32 %v1413_v39, %v1281_v40  ;;  %v1538_v42 = vpop.f32.mrb[21].mxu1 }
 0x8e0   : > { %v1284_v43 = vpop.f32.mrb[22].mxu1 }
 0x8e1   : > { %v1539_v44 = vpop.f32.mrb[23].mxu1  ;;  %v1287_v45 = vadd.f32 %v1282_v41, %v1126_v19 }
 0x8e3   : > { %v1290_v46 = vsel %vm503_vm1, %v1287_v45, 0.0 }
 0x8e4   : > { %1291 = vadd.xlane.f32.xlu0 %v1290_v46 }
 0x971   : > { %v1292_v47 = vpop.xlane.xlu0 %1291 }
 0x972   : > { %v1293_v48 = vmul.f32 0.03125, %v1292_v47 }
 0x974   : > { %v1294_v49 = vsub.f32 %v1287_v45, %v1293_v48 }
 0x976   : > { %v1295_v50 = vmul.f32 %v1294_v49, %v1294_v49 }
 0x978   : > { %v1296_v51 = vsel %vm503_vm1, %v1295_v50, 0.0 }
 0x979   : > { %1297 = vadd.xlane.f32.xlu0 %v1296_v51 }
 0xa06   : > { %v1298_v52 = vpop.xlane.xlu0 %1297 }
 0xa07   : > { %v1299_v53 = vmul.f32 0.03125, %v1298_v52 }
 0xa09   : > { %v1300_v54 = vadd.f32 1e-12, %v1299_v53 }
 0xa0b   : > { %1594 = vrsqrt.f32 %v1300_v54 }
 0xa15   : > { %v1595_v55 = vpop.eup %1594 }
 0xa16   : > { %v1302_v57 = vmul.f32 %v1595_v55, %v1294_v49 }
 0xa18   : > { %v1309_v59 = vmul.f32 %v1419_v56, %v1302_v57 }
 0xa1a   : > { %v1316_v60 = vadd.f32 %v1420_v58, %v1309_v59 }
 0xa1c   : > { %1317 = vst.msk [vmem:[%s476_s22] sm:$0xff] %vm503_vm1, %v1316_v60 }
 0xa1d PF: > { %s24_s29 = sadd.s32 1, %s1602_s29  }
 0xa1e   : > { %p21_p4 = scmp.ge.s32.totalorder %s24_s29, 4  }
 0xa20   :  { %23 = sbr.rel (!%p21_p4) target bundleno = 1 (0x1), region = 109 }

// kernel: set_pred_forward.12
= control target key start
LH: loop header
LB: loop body
LE: loop exit
PB: predicated region body
PF: predicated region fallthrough
CT: control target
= control target key end

     0   :  { %s3413_s0 = inlined_call_operand.vmem [shape: f32[2,16,32], index: 0, kind: input, shape index: {}]   ;;  %s3414_s1 = inlined_call_operand.vmem [shape: f32[2,8,32], index: 1, kind: input, shape index: {}]   ;;  %s3415_s2 = inlined_call_operand.vmem [shape: f32[2,1,8], index: 2, kind: input, shape index: {}]   ;;  %s3416_s3 = inlined_call_operand.vmem [shape: bf16[32,96], index: 3, kind: input, shape index: {}]   ;;  %s3417_s4 = inlined_call_operand.vmem [shape: f32[1,96], index: 4, kind: input, shape index: {}]   ;;  %s3418_s5 = inlined_call_operand.vmem [shape: bf16[32,32], index: 5, kind: input, shape index: {}]   ;;  %s3419_s6 = inlined_call_operand.vmem [shape: f32[1,32], index: 6, kind: input, shape index: {}]   ;;  %s3420_s7 = inlined_call_operand.vmem [shape: f32[1,32], index: 7, kind: input, shape index: {}]   ;;  %s3421_s8 = inlined_call_operand.vmem [shape: f32[1,32], index: 8, kind: input, shape index: {}]   ;;  %s3422_s9 = inlined_call_operand.vmem [shape: bf16[32,32], index: 9, kind: input, shape index: {}]   ;;  %s3423_s10 = inlined_call_operand.vmem [shape: f32[1,32], index: 10, kind: input, shape index: {}]   ;;  %s3424_s11 = inlined_call_operand.vmem [shape: bf16[32,64], index: 11, kind: input, shape index: {}]   ;;  %s3425_s12 = inlined_call_operand.vmem [shape: f32[1,64], index: 12, kind: input, shape index: {}]   ;;  %s3426_s13 = inlined_call_operand.vmem [shape: bf16[32,32], index: 13, kind: input, shape index: {}]   ;;  %s3427_s14 = inlined_call_operand.vmem [shape: f32[1,32], index: 14, kind: input, shape index: {}]   ;;  %s3428_s15 = inlined_call_operand.vmem [shape: f32[1,32], index: 15, kind: input, shape index: {}]   ;;  %s3429_s16 = inlined_call_operand.vmem [shape: f32[1,32], index: 16, kind: input, shape index: {}]   ;;  %s3430_s17 = inlined_call_operand.vmem [shape: bf16[32,64], index: 17, kind: input, shape index: {}]   ;;  %s3431_s18 = inlined_call_operand.vmem [shape: f32[1,64], index: 18, kind: input, shape index: {}]   ;;  %s3432_s19 = inlined_call_operand.vmem [shape: bf16[64,32], index: 19, kind: input, shape index: {}]   ;;  %s3433_s20 = inlined_call_operand.vmem [shape: f32[1,32], index: 20, kind: input, shape index: {}]   ;;  %s3434_s21 = inlined_call_operand.vmem [shape: f32[1,32], index: 21, kind: input, shape index: {}]   ;;  %s3435_s22 = inlined_call_operand.vmem [shape: f32[1,32], index: 22, kind: input, shape index: {}]   ;;  %s3436_s23 = inlined_call_operand.vmem [shape: f32[2,16,32], index: 23, kind: output, shape index: {}]  }
   0x1   :  { %3451 = sst [smem:[#allocation3_spill]] %s3413_s0 }
   0x2   :  { %3452 = sst [smem:[#allocation4_spill]] %s3414_s1 }
   0x3   :  { %3453 = sst [smem:[#allocation5_spill]] %s3415_s2 }
   0x4   :  { %3454 = sst [smem:[#allocation6_spill]] %s3416_s3 }
   0x5   :  { %3455 = sst [smem:[#allocation7_spill]] %s3417_s4  ;;  %s3057_s4 = smov 0  }
   0x6   :  { %3456 = sst [smem:[#allocation8_spill]] %s3418_s5 }
   0x7   :  { %3457 = sst [smem:[#allocation9_spill]] %s3419_s6 }
   0x8   :  { %3458 = sst [smem:[#allocation10_spill]] %s3420_s7 }
   0x9 LB: > { %s2513_s30 = sadd.s32 4294967295, %s2918_s4   ;;  %p2517_p0 = scmp.ge.s32.totalorder %s2918_s4, 1  ;;  %s2918_s4 = sphi %s3057_s4, %s33_s4  }
   0xa   : > { %p654_p1 = scmp.lt.s32.totalorder %s2918_s4, 3 }
   0xc   : > { %p655_p2 = pnand %p2517_p0, %p654_p1 }
   0xd   : > { %s3459_s5 = sld [smem:[#allocation6_spill]] (!%p655_p2)  ;;  %v2920_v1 = vmov (!%p655_p2), 0.0   ;;  %vm2921_vm0 = vmmov (!%p655_p2), 0   ;;  %p725_p3 = scmp.lt.s32.totalorder (!%p655_p2), %s2513_s30, 1  ;;  %vm774_vm1 = vcmask (!%p655_p2), 261120   ;;  %vm826_vm2 = vcmask (!%p655_p2), 64512  }
   0xe   : > { %658 = sbr.rel (%p655_p2) target bundleno = 4382 (0x111e), region = 112  ;;  %2635 = vmatprep.subr.bf16.mxu1 (!%p655_p2), %v2920_v1  ;;  %2649 = vmatprep.subr.bf16.mxu0 (!%p655_p2), %v2920_v1  ;;  %s3460_s7 = sld [smem:[#allocation3_spill]] (!%p655_p2)  ;;  %v746_v28 = vlaneseq (!%p655_p2)  ;;  %v2929_v30 = vmov (!%p655_p2), -10000.0   ;;  %vm874_vm4 = vcmask (!%p655_p2), 130048   ;;  %vm1074_vm5 = vcmask (!%p655_p2), 130112  }
   0xf   : > { %2639 = vmatprep.mubr.msk.bf16.mxu1 (!%p655_p2), %vm2921_vm0, %v2920_v1  ;;  %2651 = vmatprep.mubr.msk.bf16.mxu0 (!%p655_p2), %vm2921_vm0, %v2920_v1  ;;  %s3461_s0 = sld [smem:[#allocation7_spill]] (!%p655_p2)  ;;  %s3446_s24 = smov (!%p655_p2), 96   ;;  %vm1202_vm6 = vcmask (!%p655_p2), 195712   ;;  %vm1330_vm7 = vcmask (!%p655_p2), 261312   ;;  %vm1669_vm8 = vcmask (!%p655_p2), 1043456   ;;  %vm2344_vm9 = vcmask (!%p655_p2), 523264  }
  0x10   : > { %s2923_s25 = smov (!%p655_p2), 120   ;;  %s3440_s1 = smov (!%p655_p2), 88   ;;  %v747_v29 = vand.u32 (!%p655_p2), 127, %v746_v28 }
  0x11   : > { %s3445_s26 = smov (!%p655_p2), 80   ;;  %s3449_s6 = smov (!%p655_p2), 112  }
  0x12   : > { %s3441_s27 = smov (!%p655_p2), 72   ;;  %vm748_vm3 = vcmp.lt.s32.totalorder (!%p655_p2), %v747_v29, 15  ;;  %s2931_s29 = smov (!%p655_p2), 64  }
  0x13   : > { %v2816_v0 = vld [vmem:[%s3459_s5] sm:$0xff] (!%p655_p2)   ;;  %v2817_v2 = vld [vmem:[%s3459_s5 + $0x8] sm:$0xff] (!%p655_p2)   ;;  %v749_v31 = vsel (!%p655_p2), %vm748_vm3, 0.0, %v2929_v30  ;;  %s2932_s3 = smov (!%p655_p2), 48  }
  0x14   : > { %2636 = vmatpush3.bf16.msra.mxu1 (!%p655_p2), %v2816_v0 }
  0x15   : > { %2637 = vmatprep.subr.bf16.mxu1 %v2920_v1  ;;  %s3478_s30 = smov (!%p725_p3, %s2513_s30), 1  ;;  %v2523_v6 = vld [vmem:[%s3461_s0] ss:$0 sm:$0xff]  ;;  %s2933_s0 = smov 40  }
  0x16   : > { %s3439_s2 = sshll.u32 %s3478_s30, 4 }
  0x17   : > { %s729_s28 = scalar_lea.vmem %s3460_s7, %s3439_s2  ;;  %s3447_s7 = smov 104  }
  0x18   : > { %2638 = vmatpush3.bf16.msra.mxu1 %v2817_v2  ;;  %v3087_v3 = vld [vmem:[%s729_s28] sm:$0xff]  ;;  %v3089_v4 = vld [vmem:[%s729_s28 + $0x8] sm:$0xff]  ;;  %s2930_s28 = smov 56   ;;  %s3466_s2 = smov 112  }
  0x19   : > { %2643 = vmatprep.subr.bf16.mxu1 %v2920_v1  ;;  %v754_v5 = vpack.c.bf16 %v3089_v4, %v3087_v3 }
  0x1b   : > { %2640 = vmatmul.mubr.msk.bf16.vlgmr.msra.gmra.mrb[0].mxu1 %vm774_vm1, %v754_v5 }
  0x1c   : > { %2645 = vmatprep.mubr.msk.bf16.mxu1 %vm2921_vm0, %v2920_v1 }
  0xee   : > { %v812_v7 = vpop.f32.mrb[0].mxu1 }
  0xef   : > { %v813_v8 = vadd.f32 %v2523_v6, %v812_v7  ;;  %v2641_v9 = vpop.f32.mrb[1].mxu1 }
  0xf0   : > { %v815_v10 = vpop.f32.mrb[2].mxu1 }
  0xf1   : > { %v816_v11 = vadd.f32 %v2523_v6, %v815_v10  ;;  %v2642_v12 = vpop.f32.mrb[3].mxu1  ;;  %v819_v13 = vmul.f32 0.35355338, %v813_v8 }
  0xf3   : > { %v820_v14 = vmul.f32 0.35355338, %v816_v11  ;;  %v3099_v15 = vpack.c.bf16 %v816_v11, %v813_v8 }
  0xf5   : > { %v821_v16 = vpack.c.bf16 %v820_v14, %v819_v13  ;;  %824 = vrot.lane.b32.xlu0 %v3099_v15, %s3446_s24  ;;  %s3464_s24 = sld [smem:[#allocation4_spill]] }
  0xf7   : > { %948 = vrot.lane.b32.xlu1 %v821_v16, %s2923_s25 }
  0xf9   : > { %950 = vrot.lane.b32.xlu0 %v3099_v15, %s3440_s1  ;;  %s3473_s1 = smov 8  }
  0xfb   : > { %1078 = vrot.lane.b32.xlu1 %v3099_v15, %s3445_s26 }
  0xfd   : > { %1076 = vrot.lane.b32.xlu0 %v821_v16, %s3449_s6  ;;  %s3465_s6 = sld [smem:[#allocation10_spill]] }
  0xff   : > { %1206 = vrot.lane.b32.xlu1 %v3099_v15, %s3441_s27  ;;  %s3443_s27 = smov 16  }
 0x101   : > { %1204 = vrot.lane.b32.xlu0 %v821_v16, %s3447_s7 }
 0x167   : > { %v825_v17 = vpop.permute.xlu0 %824 }
 0x168   : > { %v831_v18 = vsel %vm826_vm2, %v825_v17, 0 }
 0x169   : > { %2644 = vmatpush3.bf16.xpose.msra.mxu1 %v831_v18  ;;  %v949_v20 = vpop.permute.xlu1 %948 }
 0x16a   : > { %2655 = vmatprep.subr.bf16.mxu1 %v2920_v1 }
 0x16b   : > { %v951_v19 = vpop.permute.xlu0 %950 }
 0x16c   : > { %v956_v21 = vsel %vm826_vm2, %v951_v19, 0 }
 0x16d   : > { %v1079_v22 = vpop.permute.xlu1 %1078 }
 0x16e   : > { %v1084_v23 = vsel %vm826_vm2, %v1079_v22, 0 }
 0x16f   : > { %v1077_v25 = vpop.permute.xlu0 %1076 }
 0x170   : > { %2646 = vmatmul.mubr.msk.bf16.vlgmr.msra.gmra.mrb[4].mxu1 %vm826_vm2, %v821_v16 }
 0x171   : > { %2656 = vmatpush3.bf16.xpose.msra.mxu1 %v956_v21  ;;  %2657 = vmatprep.mubr.msk.bf16.mxu1 %vm2921_vm0, %v2920_v1  ;;  %v1207_v24 = vpop.permute.xlu1 %1206 }
 0x172   : > { %2667 = vmatprep.subr.bf16.mxu1 %v2920_v1  ;;  %v1212_v26 = vsel %vm826_vm2, %v1207_v24, 0 }
 0x173   : > { %v1205_v27 = vpop.permute.xlu0 %1204 }
 0x178   : > { %2658 = vmatmul.mubr.msk.bf16.vlgmr.msra.gmra.mrb[8].mxu1 %vm826_vm2, %v949_v20 }
 0x179   : > { %2668 = vmatpush3.bf16.xpose.msra.mxu1 %v1084_v23  ;;  %2669 = vmatprep.mubr.msk.bf16.mxu1 %vm2921_vm0, %v2920_v1 }
 0x17a   : > { %2679 = vmatprep.subr.bf16.mxu1 %v2920_v1 }
 0x180   : > { %2670 = vmatmul.mubr.msk.bf16.vlgmr.msra.gmra.mrb[12].mxu1 %vm826_vm2, %v1077_v25 }
 0x181   : > { %2680 = vmatpush3.bf16.xpose.msra.mxu1 %v1212_v26  ;;  %2681 = vmatprep.mubr.msk.bf16.mxu1 %vm2921_vm0, %v2920_v1 }
 0x182   : > { %2691 = vmatprep.subr.bf16.mxu1 %v2920_v1 }
 0x188   : > { %2682 = vmatmul.mubr.msk.bf16.vlgmr.msra.gmra.mrb[16].mxu1 %vm826_vm2, %v1205_v27 }
 0x189   : > { %2695 = vmatprep.mubr.msk.bf16.mxu1 %vm2921_vm0, %v2920_v1 }
 0x243   : > { %v867_v32 = vpop.f32.mrb[4].mxu1 }
 0x244   : > { %v868_v33 = vadd.f32 %v867_v32, %v749_v31  ;;  %v2647_v34 = vpop.f32.mrb[5].mxu1 }
 0x245   : > { %v870_v35 = vpop.f32.mrb[6].mxu1 }
 0x246   : > { %v871_v36 = vadd.f32 %v870_v35, %v749_v31  ;;  %v2648_v37 = vpop.f32.mrb[7].mxu1  ;;  %v875_v38 = vsel %vm874_vm4, %v868_v33, -inf }
 0x247   : > { %876 = vmax.xlane.f32.xlu1 %v875_v38 }
 0x248   : > { %v878_v39 = vsel %vm874_vm4, %v871_v36, -inf }
 0x249   : > { %879 = vmax.xlane.f32.xlu0 %v878_v39 }
 0x24b   : > { %v992_v40 = vpop.f32.mrb[8].mxu1 }
 0x24c   : > { %v993_v41 = vadd.f32 %v992_v40, %v749_v31  ;;  %v2659_v42 = vpop.f32.mrb[9].mxu1 }
 0x24d   : > { %v995_v43 = vpop.f32.mrb[10].mxu1 }
 0x24e   : > { %v996_v44 = vadd.f32 %v995_v43, %v749_v31  ;;  %v2660_v45 = vpop.f32.mrb[11].mxu1  ;;  %v999_v46 = vsel %vm874_vm4, %v993_v41, -inf }
 0x24f   : > { %1000 = vmax.xlane.f32.xlu0 %v999_v46 }
 0x250   : > { %v1002_v47 = vsel %vm874_vm4, %v996_v44, -inf }
 0x251   : > { %1003 = vmax.xlane.f32.xlu1 %v1002_v47 }
 0x253   : > { %v1120_v48 = vpop.f32.mrb[12].mxu1 }
 0x254   : > { %v1121_v49 = vadd.f32 %v1120_v48, %v749_v31  ;;  %v2671_v50 = vpop.f32.mrb[13].mxu1 }
 0x255   : > { %v1123_v51 = vpop.f32.mrb[14].mxu1 }
 0x256   : > { %v1124_v52 = vadd.f32 %v1123_v51, %v749_v31  ;;  %v2672_v53 = vpop.f32.mrb[15].mxu1  ;;  %v1127_v54 = vsel %vm874_vm4, %v1121_v49, -inf }
 0x257   : > { %1128 = vmax.xlane.f32.xlu0 %v1127_v54 }
 0x258   : > { %v1130_v55 = vsel %vm874_vm4, %v1124_v52, -inf }
 0x259   : > { %1131 = vmax.xlane.f32.xlu1 %v1130_v55 }
 0x25b   : > { %v1248_v56 = vpop.f32.mrb[16].mxu1 }
 0x25c   : > { %v1249_v57 = vadd.f32 %v1248_v56, %v749_v31  ;;  %v2683_v58 = vpop.f32.mrb[17].mxu1 }
 0x25d   : > { %v1251_v59 = vpop.f32.mrb[18].mxu1 }
 0x25e   : > { %v1252_v60 = vadd.f32 %v1251_v59, %v749_v31  ;;  %v2684_v61 = vpop.f32.mrb[19].mxu1  ;;  %v1255_v62 = vsel %vm874_vm4, %v1249_v57, -inf }
 0x25f   : > { %1256 = vmax.xlane.f32.xlu0 %v1255_v62 }
 0x260   : > { %v1258_v63 = vsel %vm874_vm4, %v1252_v60, -inf }
 0x261   : > { %1259 = vmax.xlane.f32.xlu1 %v1258_v63 }
 0x2d4   : > { %v877_v0 = vpop.xlane.xlu1 %876 }
 0x2d5   : > { %v881_v2 = vsub.f32 %v868_v33, %v877_v0 }
 0x2d6   : > { %v880_v5 = vpop.xlane.xlu0 %879 }
 0x2d7   : > { %v883_v6 = vmul.f32 1.442695, %v881_v2  ;;  %v882_v7 = vsub.f32 %v871_v36, %v880_v5 }
 0x2d9   : > { %2832 = vpow2.f32 %v883_v6  ;;  %v885_v8 = vmul.f32 1.442695, %v882_v7 }
 0x2db   : > { %2834 = vpow2.f32 %v885_v8 }
 0x2dc   : > { %v1001_v9 = vpop.xlane.xlu0 %1000 }
 0x2dd   : > { %v1005_v10 = vsub.f32 %v993_v41, %v1001_v9 }
 0x2de   : > { %v1004_v19 = vpop.xlane.xlu1 %1003 }
 0x2df   : > { %v1007_v11 = vmul.f32 1.442695, %v1005_v10  ;;  %v1006_v20 = vsub.f32 %v996_v44, %v1004_v19 }
 0x2e1   : > { %2836 = vpow2.f32 %v1007_v11  ;;  %v1009_v23 = vmul.f32 1.442695, %v1006_v20 }
 0x2e3   : > { %v2833_v12 = vpop.eup %2832  ;;  %2838 = vpow2.f32 %v1009_v23 }
 0x2e4   : > { %v887_v13 = vsel %vm874_vm4, %v2833_v12, 0.0  ;;  %v1129_v22 = vpop.xlane.xlu0 %1128 }
 0x2e5   : > { %v2835_v14 = vpop.eup %2834  ;;  %888 = vadd.xlane.f32.xlu0 %v887_v13  ;;  %v1133_v26 = vsub.f32 %v1121_v49, %v1129_v22 }
 0x2e6   : > { %v890_v16 = vsel %vm874_vm4, %v2835_v14, 0.0  ;;  %v1132_v21 = vpop.xlane.xlu1 %1131 }
 0x2e7   : > { %891 = vadd.xlane.f32.xlu1 %v890_v16  ;;  %v1134_v24 = vsub.f32 %v1124_v52, %v1132_v21  ;;  %v1135_v30 = vmul.f32 1.442695, %v1133_v26 }
 0x2e9   : > { %v1137_v28 = vmul.f32 1.442695, %v1134_v24 }
 0x2eb   : > { %v3142_v17 = vpop.eup %2836  ;;  %2840 = vpow2.f32 %v1137_v28 }
 0x2ec   : > { %v1011_v18 = vsel %vm874_vm4, %v3142_v17, 0.0  ;;  %v1257_v27 = vpop.xlane.xlu0 %1256  ;;  %2842 = vpow2.f32 %v1135_v30 }
 0x2ed   : > { %1012 = vadd.xlane.f32.xlu0 %v1011_v18  ;;  %v1261_v31 = vsub.f32 %v1249_v57, %v1257_v27  ;;  %v2839_v34 = vpop.eup %2838 }
 0x2ee   : > { %v1260_v25 = vpop.xlane.xlu1 %1259  ;;  %v1014_v35 = vsel %vm874_vm4, %v2839_v34, 0.0 }
 0x2ef   : > { %v1262_v29 = vsub.f32 %v1252_v60, %v1260_v25  ;;  %v1263_v33 = vmul.f32 1.442695, %v1261_v31 }
 0x2f1   : > { %v1265_v32 = vmul.f32 1.442695, %v1262_v29 }
 0x2f3   : > { %2844 = vpow2.f32 %v1265_v32 }
 0x2f4   : > { %2846 = vpow2.f32 %v1263_v33 }
 0x2f5   : > { %v2841_v36 = vpop.eup %2840 }
 0x2f6   : > { %v2843_v37 = vpop.eup %2842  ;;  %v1142_v38 = vsel %vm874_vm4, %v2841_v36, 0.0 }
 0x2f7   : > { %v1139_v40 = vsel %vm874_vm4, %v2843_v37, 0.0 }
 0x2f8   : > { %1022 = vrot.lane.b32.xlu1 %v3099_v15, %s2930_s28  ;;  %s3444_s28 = smov 8  }
 0x2fd   : > { %v3150_v39 = vpop.eup %2844 }
 0x2fe   : > { %v2847_v41 = vpop.eup %2846  ;;  %v1270_v42 = vsel %vm874_vm4, %v3150_v39, 0.0 }
 0x2ff   : > { %v1267_v43 = vsel %vm874_vm4, %v2847_v41, 0.0 }
 0x303   : > { %898 = vrot.lane.b32.xlu0 %v3099_v15, %s2931_s29  ;;  %s3442_s29 = smov 24  }
 0x31c   : > { %1015 = vadd.xlane.f32.xlu1 %v1014_v35 }
 0x320   : > { %1143 = vadd.xlane.f32.xlu1 %v1142_v38 }
 0x322   : > { %1140 = vadd.xlane.f32.xlu0 %v1139_v40 }
 0x324   : > { %1271 = vadd.xlane.f32.xlu1 %v1270_v42 }
 0x326   : > { %1268 = vadd.xlane.f32.xlu0 %v1267_v43 }
 0x335   : > { %1150 = vrot.lane.b32.xlu1 %v3099_v15, %s2932_s3  ;;  %s3463_s3 = sld [smem:[#allocation9_spill]] }
 0x33c   : > { %1278 = vrot.lane.b32.xlu0 %v3099_v15, %s2933_s0  ;;  %s3462_s0 = sld [smem:[#allocation8_spill]] }
 0x342   : > { %v2818_v26 = vld [vmem:[%s3462_s0] sm:$0xff]   ;;  %v2819_v29 = vld [vmem:[%s3462_s0 + $0x8] sm:$0xff]  }
 0x343   : > { %2692 = vmatpush3.bf16.msra.mxu1 %v2818_v26 }
 0x344   : > { %2693 = vmatprep.subr.bf16.mxu1 %v2920_v1 }
 0x347   : > { %2694 = vmatpush3.bf16.msra.mxu1 %v2819_v29 }
 0x348   : > { %2707 = vmatprep.subr.bf16.mxu1 %v2920_v1 }
 0x372   : > { %v889_v44 = vpop.xlane.xlu0 %888 }
 0x373   : > { %2848 = vrcp.f32 %v889_v44 }
 0x374   : > { %v892_v45 = vpop.xlane.xlu1 %891 }
 0x375   : > { %2850 = vrcp.f32 %v892_v45 }
 0x378   : > { %v1023_v53 = vpop.permute.xlu1 %1022 }
 0x37a   : > { %v1013_v46 = vpop.xlane.xlu0 %1012 }
 0x37b   : > { %2852 = vrcp.f32 %v1013_v46 }
 0x37d   : > { %v2849_v47 = vpop.eup %2848 }
 0x37e   : > { %v899_v48 = vpop.permute.xlu0 %898  ;;  %v895_v50 = vmul.f32 %v2849_v47, %v2833_v12 }
 0x37f   : > { %v2851_v49 = vpop.eup %2850  ;;  %2650 = vmatpush3.bf16.msra.mxu0 %v899_v48 }
 0x380   : > { %2661 = vmatprep.subr.bf16.mxu0 %v2920_v1  ;;  %v896_v51 = vmul.f32 %v2851_v49, %v2835_v14 }
 0x382   : > { %v897_v52 = vpack.c.bf16 %v896_v51, %v895_v50 }
 0x384   : > { %2652 = vmatmul.mubr.msk.bf16.vlgmr.msra.gmra.mrb[0].mxu0 %vm874_vm4, %v897_v52 }
 0x385   : > { %2662 = vmatpush3.bf16.msra.mxu0 %v1023_v53  ;;  %2663 = vmatprep.mubr.msk.bf16.mxu0 %vm2921_vm0, %v2920_v1  ;;  %v2853_v56 = vpop.eup %2852 }
 0x386   : > { %2673 = vmatprep.subr.bf16.mxu0 %v2920_v1  ;;  %v1019_v60 = vmul.f32 %v2853_v56, %v3142_v17 }
 0x3a9   : > { %v1016_v15 = vpop.xlane.xlu1 %1015 }
 0x3aa   : > { %2854 = vrcp.f32 %v1016_v15 }
 0x3ad   : > { %v1144_v54 = vpop.xlane.xlu1 %1143 }
 0x3ae   : > { %2856 = vrcp.f32 %v1144_v54 }
 0x3af   : > { %v1141_v55 = vpop.xlane.xlu0 %1140 }
 0x3b0   : > { %2858 = vrcp.f32 %v1141_v55 }
 0x3b1   : > { %v1272_v57 = vpop.xlane.xlu1 %1271 }
 0x3b3   : > { %v1269_v58 = vpop.xlane.xlu0 %1268 }
 0x3b4   : > { %v2855_v59 = vpop.eup %2854  ;;  %2860 = vrcp.f32 %v1269_v58 }
 0x3b5   : > { %v1020_v61 = vmul.f32 %v2855_v59, %v2839_v34  ;;  %2862 = vrcp.f32 %v1272_v57  ;;  %v1151_v0 = vpop.permute.xlu1 %1150 }
 0x3b7   : > { %v1021_v62 = vpack.c.bf16 %v1020_v61, %v1019_v60  ;;  %v1279_v9 = vpop.permute.xlu0 %1278  ;;  %v2821_v60 = vld [vmem:[%s3424_s11 + $0x8] sm:$0xff]  }
 0x3b8   : > { %v2857_v63 = vpop.eup %2856 }
 0x3b9   : > { %2664 = vmatmul.mubr.msk.bf16.vlgmr.msra.gmra.mrb[4].mxu0 %vm874_vm4, %v1021_v62  ;;  %v1148_v6 = vmul.f32 %v2857_v63, %v2841_v36  ;;  %v2822_v63 = vld [vmem:[%s3422_s9] sm:$0xff]  }
 0x3ba   : > { %v2859_v2 = vpop.eup %2858  ;;  %2674 = vmatpush3.bf16.msra.mxu0 %v1151_v0  ;;  %2675 = vmatprep.mubr.msk.bf16.mxu0 %vm2921_vm0, %v2920_v1  ;;  %v2823_v0 = vld [vmem:[%s3422_s9 + $0x8] sm:$0xff]  }
 0x3bb   : > { %v1147_v5 = vmul.f32 %v2859_v2, %v2843_v37  ;;  %2685 = vmatprep.subr.bf16.mxu0 %v2920_v1 }
 0x3bd   : > { %v1149_v7 = vpack.c.bf16 %v1148_v6, %v1147_v5 }
 0x3be   : > { %v2861_v8 = vpop.eup %2860 }
 0x3bf   : > { %v2863_v10 = vpop.eup %2862  ;;  %v1275_v11 = vmul.f32 %v2861_v8, %v2847_v41  ;;  %v2535_v41 = vld [vmem:[%s3463_s3] ss:$0 sm:$0xff]  ;;  %s3471_s3 = smov 72  }
 0x3c0   : > { %v1276_v12 = vmul.f32 %v2863_v10, %v3150_v39 }
 0x3c1   : > { %2676 = vmatmul.mubr.msk.bf16.vlgmr.msra.gmra.mrb[8].mxu0 %vm874_vm4, %v1149_v7 }
 0x3c2   : > { %2686 = vmatpush3.bf16.msra.mxu0 %v1279_v9  ;;  %2687 = vmatprep.mubr.msk.bf16.mxu0 %vm2921_vm0, %v2920_v1  ;;  %v1277_v13 = vpack.c.bf16 %v1276_v12, %v1275_v11  ;;  %v2539_v12 = vld [vmem:[%s3465_s6] ss:$0 sm:$0xff]  ;;  %s3468_s6 = sld [smem:[#allocation5_spill]] }
 0x3c3   : > { %2699 = vmatprep.subr.bf16.mxu0 %v2920_v1 }
 0x3c9   : > { %2688 = vmatmul.mubr.msk.bf16.vlgmr.msra.gmra.mrb[12].mxu0 %vm874_vm4, %v1277_v13 }
 0x3ca   : > { %2703 = vmatprep.mubr.msk.bf16.mxu0 %vm2921_vm0, %v2920_v1  ;;  %2700 = vmatpush3.bf16.msra.mxu0 %v2822_v63 }
 0x3cb   : > { %2701 = vmatprep.subr.bf16.mxu0 %v2920_v1 }
 0x3ce   : > { %2702 = vmatpush3.bf16.msra.mxu0 %v2823_v0 }
 0x3cf   : > { %2715 = vmatprep.subr.bf16.mxu0 %v2920_v1 }
 0x457   : > { %v938_v14 = vpop.f32.mrb[0].mxu0 }
 0x458   : > { %v2653_v16 = vpop.f32.mrb[1].mxu0 }
 0x459   : > { %v941_v17 = vpop.f32.mrb[2].mxu0 }
 0x45a   : > { %v945_v18 = vpack.c.bf16 %v941_v17, %v938_v14  ;;  %v2654_v19 = vpop.f32.mrb[3].mxu0  ;;  %v2540_v17 = vld [vmem:[%s3421_s8] ss:$0 sm:$0xff] }
 0x45c   : > { %946 = vst.msk [vmem:[#allocation2] sm:$0xff] %vm826_vm2, %v945_v18 }
 0x48c   : > { %v1062_v20 = vpop.f32.mrb[4].mxu0 }
 0x48d   : > { %v2665_v21 = vpop.f32.mrb[5].mxu0 }
 0x48e   : > { %v1065_v22 = vpop.f32.mrb[6].mxu0 }
 0x48f   : > { %v1069_v23 = vpack.c.bf16 %v1065_v22, %v1062_v20  ;;  %v2666_v24 = vpop.f32.mrb[7].mxu0  ;;  %v2545_v22 = vld [vmem:[%s3425_s12] ss:$0 sm:$0xff] }
 0x491   : > { %1071 = vrot.lane.b32.xlu1 %v1069_v23, %s3444_s28  ;;  %s3470_s28 = smov 80  }
 0x494   : > { %v1190_v25 = vpop.f32.mrb[8].mxu0 }
 0x495   : > { %v2677_v27 = vpop.f32.mrb[9].mxu0 }
 0x496   : > { %v1193_v28 = vpop.f32.mrb[10].mxu0 }
 0x497   : > { %v1197_v30 = vpack.c.bf16 %v1193_v28, %v1190_v25  ;;  %v2678_v31 = vpop.f32.mrb[11].mxu0 }
 0x499   : > { %1199 = vrot.lane.b32.xlu0 %v1197_v30, %s3443_s27  ;;  %s2520_s27 = sshll.u32 %s3478_s30, 3  ;;  %v2541_v30 = vld [vmem:[%s3423_s10] ss:$0 sm:$0xff] }
 0x49a   : > { %s733_s7 = scalar_lea.vmem %s3464_s24, %s2520_s27  ;;  %s3467_s24 = smov 104  }
 0x49b   : > { %v745_v61 = vld [vmem:[%s733_s7] sm:$0xff]  ;;  %s736_s27 = scalar_lea.vmem %s3468_s6, %s3478_s30  ;;  %s3469_s7 = smov 96  }
 0x49c   : > { %v1318_v32 = vpop.f32.mrb[12].mxu0  ;;  %v1522_v62 = vpack.c.bf16 %v745_v61, %v745_v61  ;;  %s3474_s6 = smov 16  }
 0x49d   : > { %v2689_v33 = vpop.f32.mrb[13].mxu0 }
 0x49e   : > { %v1321_v34 = vpop.f32.mrb[14].mxu0 }
 0x49f   : > { %v1325_v35 = vpack.c.bf16 %v1321_v34, %v1318_v32  ;;  %v2690_v36 = vpop.f32.mrb[15].mxu0 }
 0x4a1   : > { %1327 = vrot.lane.b32.xlu1 %v1325_v35, %s3442_s29 }
 0x503   : > { %v1072_v37 = vpop.permute.xlu1 %1071 }
 0x504   : > { %1075 = vst.msk [vmem:[#allocation2] sm:$0xff] %vm1074_vm5, %v1072_v37 }
 0x50b   : > { %v1200_v38 = vpop.permute.xlu0 %1199 }
 0x50c   : > { %1203 = vst.msk [vmem:[#allocation2] sm:$0xff] %vm1202_vm6, %v1200_v38 }
 0x513   : > { %v1328_v39 = vpop.permute.xlu1 %1327 }
 0x514   : > { %1331 = vst.msk [vmem:[#allocation2] sm:$0xff] %vm1330_vm7, %v1328_v39 }
 0x51b   : > { %v1332_v40 = vld [vmem:[#allocation2] sm:$0xff] }
 0x51c   : > { %2696 = vmatmul.mubr.msk.bf16.vlgmr.msra.gmra.mrb[20].mxu1 %vm774_vm1, %v1332_v40 }
 0x51d   : > { %2711 = vmatprep.mubr.msk.bf16.mxu1 %vm2921_vm0, %v2920_v1 }
 0x5ef   : > { %v1393_v42 = vpop.f32.mrb[20].mxu1 }
 0x5f0   : > { %v1394_v43 = vadd.f32 %v2535_v41, %v1393_v42  ;;  %v2697_v44 = vpop.f32.mrb[21].mxu1 }
 0x5f1   : > { %v1396_v45 = vpop.f32.mrb[22].mxu1 }
 0x5f2   : > { %v1397_v46 = vadd.f32 %v2535_v41, %v1396_v45  ;;  %v2698_v47 = vpop.f32.mrb[23].mxu1  ;;  %v1400_v48 = vadd.f32 %v1394_v43, %v3087_v3 }
 0x5f4   : > { %v1404_v49 = vsel %vm774_vm1, %v1400_v48, 0.0  ;;  %v1401_v50 = vadd.f32 %v1397_v46, %v3089_v4  ;;  %v2820_v4 = vld [vmem:[%s3424_s11] sm:$0xff]  }
 0x5f5   : > { %1405 = vadd.xlane.f32.xlu0 %v1404_v49  ;;  %2708 = vmatpush3.bf16.msra.mxu1 %v2820_v4  ;;  %v2549_v49 = vld [vmem:[%s736_s27] ss:$0 sm:$0xff]  ;;  %s3475_s27 = smov 24  }
 0x5f6   : > { %v1407_v51 = vsel %vm774_vm1, %v1401_v50, 0.0  ;;  %2709 = vmatprep.subr.bf16.mxu1 %v2920_v1 }
 0x5f7   : > { %1408 = vadd.xlane.f32.xlu1 %v1407_v51 }
 0x5f9   : > { %2710 = vmatpush3.bf16.msra.mxu1 %v2821_v60 }
 0x5fa   : > { %2721 = vmatprep.subr.bf16.mxu1 %v2920_v1 }
 0x5fc   : > { %2712 = vmatmul.mubr.msk.bf16.vlgmr.msra.gmra.mrb[24].mxu1 %vm774_vm1, %v1522_v62 }
 0x5fd   : > { %2723 = vmatprep.mubr.msk.bf16.mxu1 %vm2921_vm0, %v2920_v1 }
 0x682   : > { %v1406_v52 = vpop.xlane.xlu0 %1405 }
 0x683   : > { %v1411_v53 = vmul.f32 0.03125, %v1406_v52 }
 0x684   : > { %v1409_v15 = vpop.xlane.xlu1 %1408 }
 0x685   : > { %v1413_v54 = vsub.f32 %v1400_v48, %v1411_v53  ;;  %v1412_v55 = vmul.f32 0.03125, %v1409_v15 }
 0x687   : > { %v1414_v56 = vsub.f32 %v1401_v50, %v1412_v55  ;;  %v1415_v57 = vmul.f32 %v1413_v54, %v1413_v54 }
 0x689   : > { %v1417_v58 = vsel %vm774_vm1, %v1415_v57, 0.0  ;;  %v1416_v59 = vmul.f32 %v1414_v56, %v1414_v56 }
 0x68a   : > { %1418 = vadd.xlane.f32.xlu0 %v1417_v58 }
 0x68b   : > { %v1420_v3 = vsel %vm774_vm1, %v1416_v59, 0.0 }
 0x68e   : > { %1421 = vadd.xlane.f32.xlu0 %v1420_v3 }
 0x6cf   : > { %v1579_v23 = vpop.f32.mrb[24].mxu1 }
 0x6d0   : > { %v1580_v24 = vadd.f32 %v2545_v22, %v1579_v23  ;;  %v2713_v25 = vpop.f32.mrb[25].mxu1 }
 0x6d1   : > { %v1582_v26 = vpop.f32.mrb[26].mxu1 }
 0x6d2   : > { %v3244_v27 = vpack.c.bf16 %v1580_v24, %v1580_v24  ;;  %v2714_v28 = vpop.f32.mrb[27].mxu1 }
 0x6d4   : > { %1719 = vrot.lane.b32.xlu1 %v3244_v27, %s2923_s25  ;;  %v1597_v29 = vsel %vm826_vm2, %v3244_v27, 0 }
 0x6d8   : > { %1848 = vrot.lane.b32.xlu1 %v3244_v27, %s3466_s2 }
 0x717   : > { %v1419_v2 = vpop.xlane.xlu0 %1418 }
 0x718   : > { %v1423_v5 = vmul.f32 0.03125, %v1419_v2 }
 0x71a   : > { %v1425_v6 = vadd.f32 1e-12, %v1423_v5 }
 0x71b   : > { %v1422_v7 = vpop.xlane.xlu0 %1421 }
 0x71c   : > { %2864 = vrsqrt.f32 %v1425_v6  ;;  %v1424_v8 = vmul.f32 0.03125, %v1422_v7 }
 0x71e   : > { %v1426_v9 = vadd.f32 1e-12, %v1424_v8 }
 0x720   : > { %2866 = vrsqrt.f32 %v1426_v9 }
 0x726   : > { %v2865_v10 = vpop.eup %2864 }
 0x727   : > { %v1429_v11 = vmul.f32 %v2865_v10, %v1413_v54 }
 0x729   : > { %v1437_v14 = vmul.f32 %v2539_v12, %v1429_v11 }
 0x72a   : > { %v2867_v13 = vpop.eup %2866 }
 0x72b   : > { %v1430_v16 = vmul.f32 %v2867_v13, %v1414_v56  ;;  %v3232_v19 = vadd.f32 %v2540_v17, %v1437_v14 }
 0x72d   : > { %v1438_v18 = vmul.f32 %v2539_v12, %v1430_v16 }
 0x72f   : > { %v3234_v20 = vadd.f32 %v2540_v17, %v1438_v18 }
 0x731   : > { %v1451_v21 = vpack.c.bf16 %v3234_v20, %v3232_v19 }
 0x733   : > { %2704 = vmatmul.mubr.msk.bf16.vlgmr.msra.gmra.mrb[16].mxu0 %vm774_vm1, %v1451_v21 }
 0x734   : > { %2717 = vmatprep.mubr.msk.bf16.mxu0 %vm2921_vm0, %v2920_v1  ;;  %2716 = vmatpush3.bf16.xpose.msra.mxu0 %v1597_v29 }
 0x735   : > { %2727 = vmatprep.subr.bf16.mxu0 %v2920_v1 }
 0x746   : > { %v1720_v40 = vpop.permute.xlu1 %1719 }
 0x747   : > { %v1725_v41 = vsel %vm826_vm2, %v1720_v40, 0 }
 0x74a   : > { %v1849_v42 = vpop.permute.xlu1 %1848 }
 0x74b   : > { %v1854_v44 = vsel %vm826_vm2, %v1849_v42, 0 }
 0x806   : > { %v1508_v31 = vpop.f32.mrb[16].mxu0 }
 0x807   : > { %v1509_v32 = vadd.f32 %v2541_v30, %v1508_v31  ;;  %v2705_v33 = vpop.f32.mrb[17].mxu0 }
 0x808   : > { %v1511_v34 = vpop.f32.mrb[18].mxu0 }
 0x809   : > { %v1512_v35 = vadd.f32 %v2541_v30, %v1511_v34  ;;  %v2706_v36 = vpop.f32.mrb[19].mxu0  ;;  %v1515_v37 = vmul.f32 0.35355338, %v1509_v32 }
 0x80b   : > { %v1516_v38 = vmul.f32 0.35355338, %v1512_v35 }
 0x80d   : > { %v1517_v39 = vpack.c.bf16 %v1516_v38, %v1515_v37 }
 0x80f   : > { %1717 = vrot.lane.b32.xlu0 %v1517_v39, %s2923_s25  ;;  %1846 = vrot.lane.b32.xlu1 %v1517_v39, %s3466_s2  ;;  %s3472_s2 = smov 88  }
 0x810   : > { %2718 = vmatmul.mubr.msk.bf16.vlgmr.msra.gmra.mrb[20].mxu0 %vm826_vm2, %v1517_v39 }
 0x811   : > { %2728 = vmatpush3.bf16.xpose.msra.mxu0 %v1725_v41  ;;  %2729 = vmatprep.mubr.msk.bf16.mxu0 %vm2921_vm0, %v2920_v1 }
 0x812   : > { %2739 = vmatprep.subr.bf16.mxu0 %v2920_v1 }
 0x813   : > { %1977 = vrot.lane.b32.xlu0 %v3244_v27, %s3467_s24  ;;  %1975 = vrot.lane.b32.xlu1 %v1517_v39, %s3467_s24 }
 0x881   : > { %v1718_v43 = vpop.permute.xlu0 %1717  ;;  %v1847_v46 = vpop.permute.xlu1 %1846 }
 0x882   : > { %2730 = vmatmul.mubr.msk.bf16.vlgmr.msra.gmra.mrb[24].mxu0 %vm826_vm2, %v1718_v43 }
 0x883   : > { %2740 = vmatpush3.bf16.xpose.msra.mxu0 %v1854_v44  ;;  %2741 = vmatprep.mubr.msk.bf16.mxu0 %vm2921_vm0, %v2920_v1 }
 0x884   : > { %2751 = vmatprep.subr.bf16.mxu0 %v2920_v1 }
 0x885   : > { %v1978_v45 = vpop.permute.xlu0 %1977  ;;  %v1976_v48 = vpop.permute.xlu1 %1975 }
 0x886   : > { %v1983_v47 = vsel %vm826_vm2, %v1978_v45, 0 }
 0x88a   : > { %2742 = vmatmul.mubr.msk.bf16.vlgmr.msra.gmra.mrb[28].mxu0 %vm826_vm2, %v1847_v46 }
 0x88b   : > { %2752 = vmatpush3.bf16.xpose.msra.mxu0 %v1983_v47  ;;  %2753 = vmatprep.mubr.msk.bf16.mxu0 %vm2921_vm0, %v2920_v1 }
 0x88c   : > { %2763 = vmatprep.subr.bf16.mxu0 %v2920_v1 }
 0x892   : > { %2754 = vmatmul.mubr.msk.bf16.vlgmr.msra.gmra.mrb[32].mxu0 %vm826_vm2, %v1976_v48 }
 0x893   : > { %2767 = vmatprep.mubr.msk.bf16.mxu0 %vm2921_vm0, %v2920_v1 }
 0x8e3   : > { %v1633_v50 = vpop.f32.mrb[20].mxu0 }
 0x8e4   : > { %v1634_v51 = vadd.f32 %v2549_v49, %v1633_v50  ;;  %v2719_v52 = vpop.f32.mrb[21].mxu0 }
 0x8e5   : > { %v1636_v53 = vpop.f32.mrb[22].mxu0 }
 0x8e6   : > { %v1637_v15 = vadd.f32 %v2549_v49, %v1636_v53  ;;  %v2720_v54 = vpop.f32.mrb[23].mxu0  ;;  %v1640_v55 = vsel %vm826_vm2, %v1634_v51, -inf }
 0x8e7   : > { %1641 = vmax.xlane.f32.xlu0 %v1640_v55 }
 0x8e8   : > { %v1643_v56 = vsel %vm826_vm2, %v1637_v15, -inf }
 0x8e9   : > { %1644 = vmax.xlane.f32.xlu1 %v1643_v56 }
 0x955   : > { %v1761_v57 = vpop.f32.mrb[24].mxu0 }
 0x956   : > { %v1762_v58 = vadd.f32 %v2549_v49, %v1761_v57  ;;  %v2731_v59 = vpop.f32.mrb[25].mxu0 }
 0x957   : > { %v1764_v3 = vpop.f32.mrb[26].mxu0 }
 0x958   : > { %v1765_v4 = vadd.f32 %v2549_v49, %v1764_v3  ;;  %v2732_v60 = vpop.f32.mrb[27].mxu0  ;;  %v1768_v61 = vsel %vm826_vm2, %v1762_v58, -inf }
 0x959   : > { %1769 = vmax.xlane.f32.xlu0 %v1768_v61 }
 0x95a   : > { %v1771_v62 = vsel %vm826_vm2, %v1765_v4, -inf }
 0x95d   : > { %1772 = vmax.xlane.f32.xlu0 %v1771_v62  ;;  %v1890_v63 = vpop.f32.mrb[28].mxu0 }
 0x95e   : > { %v1891_v0 = vadd.f32 %v2549_v49, %v1890_v63  ;;  %v2743_v2 = vpop.f32.mrb[29].mxu0 }
 0x95f   : > { %v1893_v5 = vpop.f32.mrb[30].mxu0 }
 0x960   : > { %v1894_v6 = vadd.f32 %v2549_v49, %v1893_v5  ;;  %v2744_v7 = vpop.f32.mrb[31].mxu0  ;;  %v1897_v8 = vsel %vm826_vm2, %v1891_v0, -inf }
 0x961   : > { %1898 = vmax.xlane.f32.xlu1 %v1897_v8 }
 0x962   : > { %v1900_v9 = vsel %vm826_vm2, %v1894_v6, -inf }
 0x963   : > { %1901 = vmax.xlane.f32.xlu0 %v1900_v9 }
 0x965   : > { %v2019_v10 = vpop.f32.mrb[32].mxu0 }
 0x966   : > { %v2020_v11 = vadd.f32 %v2549_v49, %v2019_v10  ;;  %v2755_v12 = vpop.f32.mrb[33].mxu0 }
 0x967   : > { %v2022_v13 = vpop.f32.mrb[34].mxu0 }
 0x968   : > { %v2023_v14 = vadd.f32 %v2549_v49, %v2022_v13  ;;  %v2756_v16 = vpop.f32.mrb[35].mxu0  ;;  %v2026_v17 = vsel %vm826_vm2, %v2020_v11, -inf }
 0x969   : > { %2027 = vmax.xlane.f32.xlu1 %v2026_v17 }
 0x96a   : > { %v2029_v18 = vsel %vm826_vm2, %v2023_v14, -inf }
 0x96b   : > { %2030 = vmax.xlane.f32.xlu0 %v2029_v18 }
 0x974   : > { %v1642_v25 = vpop.xlane.xlu0 %1641 }
 0x975   : > { %v1646_v28 = vsub.f32 %v1634_v51, %v1642_v25 }
 0x976   : > { %v1645_v21 = vpop.xlane.xlu1 %1644 }
 0x977   : > { %v1647_v22 = vsub.f32 %v1637_v15, %v1645_v21  ;;  %v1648_v29 = vmul.f32 1.442695, %v1646_v28 }
 0x979   : > { %v1650_v23 = vmul.f32 1.442695, %v1647_v22 }
 0x97a   : > { %1664 = vrot.lane.b32.xlu1 %v3244_v27, %s3469_s7 }
 0x97b   : > { %2868 = vpow2.f32 %v1650_v23 }
 0x97c   : > { %2870 = vpow2.f32 %v1648_v29 }
 0x985   : > { %v3293_v24 = vpop.eup %2868 }
 0x986   : > { %v1655_v26 = vsel %vm826_vm2, %v3293_v24, 0.0  ;;  %v2871_v30 = vpop.eup %2870 }
 0x987   : > { %1656 = vadd.xlane.f32.xlu0 %v1655_v26  ;;  %v1652_v31 = vsel %vm826_vm2, %v2871_v30, 0.0 }
 0x99e   : > { %1653 = vadd.xlane.f32.xlu1 %v1652_v31 }
 0x9e6   : > { %v1770_v32 = vpop.xlane.xlu0 %1769 }
 0x9e7   : > { %v1774_v33 = vsub.f32 %v1762_v58, %v1770_v32 }
 0x9e9   : > { %v1776_v34 = vmul.f32 1.442695, %v1774_v33 }
 0x9ea   : > { %v1773_v35 = vpop.xlane.xlu0 %1772 }
 0x9eb   : > { %2872 = vpow2.f32 %v1776_v34  ;;  %v1775_v36 = vsub.f32 %v1765_v4, %v1773_v35 }
 0x9ed   : > { %v1778_v37 = vmul.f32 1.442695, %v1775_v36 }
 0x9ee   : > { %v1899_v38 = vpop.xlane.xlu1 %1898 }
 0x9ef   : > { %2874 = vpow2.f32 %v1778_v37  ;;  %v1903_v39 = vsub.f32 %v1891_v0, %v1899_v38 }
 0x9f0   : > { %v1902_v40 = vpop.xlane.xlu0 %1901 }
 0x9f1   : > { %v1905_v41 = vmul.f32 1.442695, %v1903_v39  ;;  %v1904_v42 = vsub.f32 %v1894_v6, %v1902_v40 }
 0x9f3   : > { %2876 = vpow2.f32 %v1905_v41  ;;  %v1907_v43 = vmul.f32 1.442695, %v1904_v42 }
 0x9f5   : > { %v2873_v44 = vpop.eup %2872  ;;  %2878 = vpow2.f32 %v1907_v43 }
 0x9f6   : > { %v2028_v45 = vpop.xlane.xlu1 %2027  ;;  %v1780_v46 = vsel %vm826_vm2, %v2873_v44, 0.0 }
 0x9f7   : > { %v2032_v47 = vsub.f32 %v2020_v11, %v2028_v45  ;;  %1781 = vadd.xlane.f32.xlu1 %v1780_v46 }
 0x9f8   : > { %v2031_v48 = vpop.xlane.xlu0 %2030 }
 0x9f9   : > { %v2875_v49 = vpop.eup %2874  ;;  %v2034_v50 = vmul.f32 1.442695, %v2032_v47  ;;  %v2033_v51 = vsub.f32 %v2023_v14, %v2031_v48  ;;  %v2824_v48 = vld [vmem:[%s3426_s13] sm:$0xff]  }
 0x9fa   : > { %v1665_v52 = vpop.permute.xlu1 %1664  ;;  %v1783_v53 = vsel %vm826_vm2, %v2875_v49, 0.0  ;;  %2764 = vmatpush3.bf16.msra.mxu0 %v2824_v48 }
 0x9fb   : > { %2880 = vpow2.f32 %v2034_v50  ;;  %v2036_v15 = vmul.f32 1.442695, %v2033_v51  ;;  %v1671_v54 = vsel %vm1669_vm8, %v1665_v52, 0  ;;  %1784 = vadd.xlane.f32.xlu0 %v1783_v53  ;;  %v2825_v51 = vld [vmem:[%s3426_s13 + $0x8] sm:$0xff]   ;;  %2765 = vmatprep.subr.bf16.mxu0 %v2920_v1 }
 0x9fc   : > { %2722 = vmatpush3.bf16.msra.mxu1 %v1671_v54 }
 0x9fd   : > { %v2877_v55 = vpop.eup %2876  ;;  %2882 = vpow2.f32 %v2036_v15  ;;  %2733 = vmatprep.subr.bf16.mxu1 %v2920_v1 }
 0x9fe   : > { %v1909_v56 = vsel %vm826_vm2, %v2877_v55, 0.0  ;;  %2766 = vmatpush3.bf16.msra.mxu0 %v2825_v51 }
 0x9ff   : > { %v2879_v57 = vpop.eup %2878  ;;  %1910 = vadd.xlane.f32.xlu1 %v1909_v56  ;;  %2779 = vmatprep.subr.bf16.mxu0 %v2920_v1 }
 0xa00   : > { %v1912_v58 = vsel %vm826_vm2, %v2879_v57, 0.0 }
 0xa01   : > { %1913 = vadd.xlane.f32.xlu0 %v1912_v58 }
 0xa05   : > { %v2881_v59 = vpop.eup %2880 }
 0xa06   : > { %v2038_v3 = vsel %vm826_vm2, %v2881_v59, 0.0 }
 0xa07   : > { %v2883_v4 = vpop.eup %2882  ;;  %2039 = vadd.xlane.f32.xlu1 %v2038_v3 }
 0xa08   : > { %v2041_v60 = vsel %vm826_vm2, %v2883_v4, 0.0 }
 0xa09   : > { %2042 = vadd.xlane.f32.xlu0 %v2041_v60  ;;  %v2558_v60 = vld [vmem:[%s3427_s14] ss:$0 sm:$0xff] }
 0xa14   : > { %v1657_v61 = vpop.xlane.xlu0 %1656 }
 0xa15   : > { %2884 = vrcp.f32 %v1657_v61 }
 0xa18   : > { %1920 = vrot.lane.b32.xlu1 %v3244_v27, %s3470_s28 }
 0xa1c   : > { %2049 = vrot.lane.b32.xlu1 %v3244_v27, %s3471_s3 }
 0xa1f   : > { %1791 = vrot.lane.b32.xlu0 %v3244_v27, %s3472_s2  ;;  %v2885_v63 = vpop.eup %2884 }
 0xa20   : > { %v1661_v2 = vmul.f32 %v2885_v63, %v3293_v24 }
 0xa2b   : > { %v1654_v62 = vpop.xlane.xlu1 %1653 }
 0xa2c   : > { %2886 = vrcp.f32 %v1654_v62 }
 0xa36   : > { %v2887_v0 = vpop.eup %2886 }
 0xa37   : > { %v1660_v5 = vmul.f32 %v2887_v0, %v2871_v30 }
 0xa39   : > { %v1662_v6 = vpack.c.bf16 %v1661_v2, %v1660_v5 }
 0xa3b   : > { %2724 = vmatmul.mubr.msk.bf16.vlgmr.msra.gmra.mrb[28].mxu1 %vm826_vm2, %v1662_v6 }
 0xa3c   : > { %2735 = vmatprep.mubr.msk.bf16.mxu1 %vm2921_vm0, %v2920_v1 }
 0xa84   : > { %v1782_v8 = vpop.xlane.xlu1 %1781 }
 0xa88   : > { %v1785_v7 = vpop.xlane.xlu0 %1784 }
 0xa89   : > { %2888 = vrcp.f32 %v1785_v7 }
 0xa8a   : > { %2890 = vrcp.f32 %v1782_v8 }
 0xa8c   : > { %v1911_v9 = vpop.xlane.xlu1 %1910 }
 0xa8e   : > { %v1914_v27 = vpop.xlane.xlu0 %1913 }
 0xa8f   : > { %2892 = vrcp.f32 %v1914_v27 }
 0xa90   : > { %2894 = vrcp.f32 %v1911_v9 }
 0xa93   : > { %v2889_v10 = vpop.eup %2888 }
 0xa94   : > { %v2040_v11 = vpop.xlane.xlu1 %2039  ;;  %v2891_v13 = vpop.eup %2890  ;;  %v1789_v14 = vmul.f32 %v2889_v10, %v2875_v49 }
 0xa95   : > { %v1788_v17 = vmul.f32 %v2891_v13, %v2873_v44 }
 0xa96   : > { %v2043_v12 = vpop.xlane.xlu0 %2042 }
 0xa97   : > { %2896 = vrcp.f32 %v2043_v12  ;;  %v1790_v22 = vpack.c.bf16 %v1789_v14, %v1788_v17 }
 0xa98   : > { %v1921_v21 = vpop.permute.xlu1 %1920  ;;  %2898 = vrcp.f32 %v2040_v11 }
 0xa99   : > { %v2893_v23 = vpop.eup %2892  ;;  %v1926_v24 = vsel %vm1669_vm8, %v1921_v21, 0  ;;  %v2827_v21 = vld [vmem:[%s3430_s17 + $0x8] sm:$0xff]  }
 0xa9a   : > { %v1792_v16 = vpop.permute.xlu0 %1791  ;;  %v2895_v25 = vpop.eup %2894  ;;  %v1918_v26 = vmul.f32 %v2893_v23, %v2879_v57 }
 0xa9b   : > { %v1797_v18 = vsel %vm1669_vm8, %v1792_v16, 0  ;;  %v1917_v28 = vmul.f32 %v2895_v25, %v2877_v55 }
 0xa9c   : > { %2734 = vmatpush3.bf16.msra.mxu1 %v1797_v18  ;;  %v2050_v29 = vpop.permute.xlu1 %2049 }
 0xa9d   : > { %2745 = vmatprep.subr.bf16.mxu1 %v2920_v1  ;;  %v1919_v30 = vpack.c.bf16 %v1918_v26, %v1917_v28  ;;  %v2055_v32 = vsel %vm1669_vm8, %v2050_v29, 0 }
 0xa9f   : > { %2736 = vmatmul.mubr.msk.bf16.vlgmr.msra.gmra.mrb[32].mxu1 %vm826_vm2, %v1790_v22 }
 0xaa0   : > { %2746 = vmatpush3.bf16.msra.mxu1 %v1926_v24  ;;  %2747 = vmatprep.mubr.msk.bf16.mxu1 %vm2921_vm0, %v2920_v1 }
 0xaa1   : > { %2757 = vmatprep.subr.bf16.mxu1 %v2920_v1  ;;  %v2897_v31 = vpop.eup %2896 }
 0xaa2   : > { %v2899_v33 = vpop.eup %2898  ;;  %v2047_v34 = vmul.f32 %v2897_v31, %v2883_v4 }
 0xaa3   : > { %v2046_v35 = vmul.f32 %v2899_v33, %v2881_v59 }
 0xaa5   : > { %v2048_v36 = vpack.c.bf16 %v2047_v34, %v2046_v35  ;;  %v2563_v35 = vld [vmem:[%s3429_s16] ss:$0 sm:$0xff] }
 0xaa7   : > { %2748 = vmatmul.mubr.msk.bf16.vlgmr.msra.gmra.mrb[36].mxu1 %vm826_vm2, %v1919_v30  ;;  %v2562_v30 = vld [vmem:[%s3428_s15] ss:$0 sm:$0xff] }
 0xaa8   : > { %2758 = vmatpush3.bf16.msra.mxu1 %v2055_v32  ;;  %2759 = vmatprep.mubr.msk.bf16.mxu1 %vm2921_vm0, %v2920_v1 }
 0xaa9   : > { %2771 = vmatprep.subr.bf16.mxu1 %v2920_v1 }
 0xaaf   : > { %2760 = vmatmul.mubr.msk.bf16.vlgmr.msra.gmra.mrb[40].mxu1 %vm826_vm2, %v2048_v36 }
 0xab0   : > { %2775 = vmatprep.mubr.msk.bf16.mxu1 %vm2921_vm0, %v2920_v1 }
 0xb0e   : > { %v1707_v37 = vpop.f32.mrb[28].mxu1 }
 0xb0f   : > { %v2725_v38 = vpop.f32.mrb[29].mxu1 }
 0xb10   : > { %v1710_v39 = vpop.f32.mrb[30].mxu1 }
 0xb11   : > { %v1714_v40 = vpack.c.bf16 %v1710_v39, %v1707_v37  ;;  %v2726_v41 = vpop.f32.mrb[31].mxu1 }
 0xb12   : > { %v2829_v41 = vld [vmem:[%s3432_s19 + $0x8] sm:$0xff]  }
 0xb13   : > { %1715 = vst.msk [vmem:[#allocation2] sm:$0xff] %vm826_vm2, %v1714_v40  ;;  %v2828_v40 = vld [vmem:[%s3432_s19] sm:$0xff]  }
 0xb72   : > { %v1833_v42 = vpop.f32.mrb[32].mxu1 }
 0xb73   : > { %v2737_v43 = vpop.f32.mrb[33].mxu1 }
 0xb74   : > { %v1836_v44 = vpop.f32.mrb[34].mxu1  ;;  %v2831_v43 = vld [vmem:[%s3432_s19 + $0x18] sm:$0xff]  }
 0xb75   : > { %v1840_v45 = vpack.c.bf16 %v1836_v44, %v1833_v42  ;;  %v2738_v46 = vpop.f32.mrb[35].mxu1  ;;  %v2830_v42 = vld [vmem:[%s3432_s19 + $0x10] sm:$0xff]   ;;  %v2564_v44 = vld [vmem:[%s3431_s18] ss:$0 sm:$0xff] }
 0xb77   : > { %1842 = vrot.lane.b32.xlu0 %v1840_v45, %s3473_s1  ;;  %s3476_s1 = sshll.u32 %s3478_s30, 4 }
 0xb78   : > { %s741_s25 = scalar_lea.vmem %s3436_s23, %s3476_s1 }
 0xb7a   : > { %v1962_v47 = vpop.f32.mrb[36].mxu1 }
 0xb7b   : > { %v2749_v49 = vpop.f32.mrb[37].mxu1 }
 0xb7c   : > { %v1965_v50 = vpop.f32.mrb[38].mxu1 }
 0xb7d   : > { %v1969_v52 = vpack.c.bf16 %v1965_v50, %v1962_v47  ;;  %v2750_v53 = vpop.f32.mrb[39].mxu1 }
 0xb7f   : > { %1971 = vrot.lane.b32.xlu1 %v1969_v52, %s3474_s6 }
 0xb82   : > { %v2091_v15 = vpop.f32.mrb[40].mxu1 }
 0xb83   : > { %v2761_v54 = vpop.f32.mrb[41].mxu1 }
 0xb84   : > { %v2094_v55 = vpop.f32.mrb[42].mxu1 }
 0xb85   : > { %v2098_v56 = vpack.c.bf16 %v2094_v55, %v2091_v15  ;;  %v2762_v57 = vpop.f32.mrb[43].mxu1 }
 0xb87   : > { %2100 = vrot.lane.b32.xlu0 %v2098_v56, %s3475_s27 }
 0xbe9   : > { %v1843_v58 = vpop.permute.xlu0 %1842 }
 0xbea   : > { %1845 = vst.msk [vmem:[#allocation2] sm:$0xff] %vm1074_vm5, %v1843_v58 }
 0xbf1   : > { %v1972_v59 = vpop.permute.xlu1 %1971 }
 0xbf2   : > { %1974 = vst.msk [vmem:[#allocation2] sm:$0xff] %vm1202_vm6, %v1972_v59 }
 0xbf9   : > { %v2101_v3 = vpop.permute.xlu0 %2100 }
 0xbfa   : > { %2103 = vst.msk [vmem:[#allocation2] sm:$0xff] %vm1330_vm7, %v2101_v3 }
 0xc01   : > { %v2104_v4 = vld [vmem:[#allocation2] sm:$0xff] }
 0xc02   : > { %2768 = vmatmul.mubr.msk.bf16.vlgmr.msra.gmra.mrb[36].mxu0 %vm774_vm1, %v2104_v4 }
 0xc03   : > { %2787 = vmatprep.mubr.msk.bf16.mxu0 %vm2921_vm0, %v2920_v1  ;;  %2780 = vmatpush3.bf16.msra.mxu0 %v2828_v40 }
 0xc04   : > { %2781 = vmatprep.subr.bf16.mxu0 %v2920_v1 }
 0xc07   : > { %2782 = vmatpush3.bf16.msra.mxu0 %v2829_v41 }
 0xc08   : > { %2783 = vmatprep.subr.bf16.mxu0 %v2920_v1 }
 0xc0b   : > { %2784 = vmatpush3.bf16.msra.mxu0 %v2830_v42 }
 0xc0c   : > { %2785 = vmatprep.subr.bf16.mxu0 %v2920_v1 }
 0xc0f   : > { %2786 = vmatpush3.bf16.msra.mxu0 %v2831_v43 }
 0xcd5   : > { %v2165_v61 = vpop.f32.mrb[36].mxu0 }
 0xcd6   : > { %v2166_v62 = vadd.f32 %v2558_v60, %v2165_v61  ;;  %v2769_v63 = vpop.f32.mrb[37].mxu0 }
 0xcd7   : > { %v2168_v0 = vpop.f32.mrb[38].mxu0 }
 0xcd8   : > { %v2169_v2 = vadd.f32 %v2558_v60, %v2168_v0  ;;  %v2770_v5 = vpop.f32.mrb[39].mxu0  ;;  %v2172_v6 = vadd.f32 %v2166_v62, %v3232_v19 }
 0xcd9   : > { %v2568_v5 = vld [vmem:[%s3433_s20] ss:$0 sm:$0xff] }
 0xcda   : > { %v2176_v7 = vsel %vm774_vm1, %v2172_v6, 0.0  ;;  %v2173_v8 = vadd.f32 %v2169_v2, %v3234_v20  ;;  %v2826_v20 = vld [vmem:[%s3430_s17] sm:$0xff]  }
 0xcdb   : > { %2177 = vadd.xlane.f32.xlu1 %v2176_v7  ;;  %2772 = vmatpush3.bf16.msra.mxu1 %v2826_v20 }
 0xcdc   : > { %v2179_v27 = vsel %vm774_vm1, %v2173_v8, 0.0  ;;  %2773 = vmatprep.subr.bf16.mxu1 %v2920_v1 }
 0xcdd   : > { %2180 = vadd.xlane.f32.xlu0 %v2179_v27 }
 0xcdf   : > { %2774 = vmatpush3.bf16.msra.mxu1 %v2827_v21 }
 0xd68   : > { %v2178_v9 = vpop.xlane.xlu1 %2177 }
 0xd69   : > { %v2182_v10 = vmul.f32 0.03125, %v2178_v9 }
 0xd6a   : > { %v2181_v11 = vpop.xlane.xlu0 %2180 }
 0xd6b   : > { %v2184_v12 = vsub.f32 %v2172_v6, %v2182_v10  ;;  %v2183_v13 = vmul.f32 0.03125, %v2181_v11 }
 0xd6d   : > { %v2185_v14 = vsub.f32 %v2173_v8, %v2183_v13  ;;  %v2186_v16 = vmul.f32 %v2184_v12, %v2184_v12 }
 0xd6f   : > { %v2188_v17 = vsel %vm774_vm1, %v2186_v16, 0.0  ;;  %v2187_v18 = vmul.f32 %v2185_v14, %v2185_v14 }
 0xd70   : > { %2189 = vadd.xlane.f32.xlu0 %v2188_v17 }
 0xd71   : > { %v2191_v19 = vsel %vm774_vm1, %v2187_v18, 0.0 }
 0xd72   : > { %2192 = vadd.xlane.f32.xlu1 %v2191_v19 }
 0xdfd   : > { %v2190_v22 = vpop.xlane.xlu0 %2189 }
 0xdfe   : > { %v2194_v23 = vmul.f32 0.03125, %v2190_v22 }
 0xdff   : > { %v2193_v24 = vpop.xlane.xlu1 %2192 }
 0xe00   : > { %v2196_v25 = vadd.f32 1e-12, %v2194_v23  ;;  %v2195_v26 = vmul.f32 0.03125, %v2193_v24 }
 0xe02   : > { %2900 = vrsqrt.f32 %v2196_v25  ;;  %v2197_v28 = vadd.f32 1e-12, %v2195_v26 }
 0xe04   : > { %2902 = vrsqrt.f32 %v2197_v28 }
 0xe0c   : > { %v2901_v29 = vpop.eup %2900 }
 0xe0d   : > { %v2200_v31 = vmul.f32 %v2901_v29, %v2184_v12 }
 0xe0e   : > { %v2903_v32 = vpop.eup %2902 }
 0xe0f   : > { %v2208_v33 = vmul.f32 %v2562_v30, %v2200_v31  ;;  %v2201_v34 = vmul.f32 %v2903_v32, %v2185_v14 }
 0xe11   : > { %v2209_v36 = vmul.f32 %v2562_v30, %v2201_v34  ;;  %v2216_v37 = vadd.f32 %v2563_v35, %v2208_v33  ;;  %v2574_v34 = vld [vmem:[%s3434_s21] ss:$0 sm:$0xff] }
 0xe13   : > { %v2217_v38 = vadd.f32 %v2563_v35, %v2209_v36 }
 0xe15   : > { %v2218_v39 = vpack.c.bf16 %v2217_v38, %v2216_v37 }
 0xe17   : > { %2776 = vmatmul.mubr.msk.bf16.vlgmr.msra.gmra.mrb[44].mxu1 %vm774_vm1, %v2218_v39 }
 0xeea   : > { %v2279_v45 = vpop.f32.mrb[44].mxu1 }
 0xeeb   : > { %v2280_v46 = vadd.f32 %v2564_v44, %v2279_v45  ;;  %v2777_v47 = vpop.f32.mrb[45].mxu1 }
 0xeec   : > { %v2282_v48 = vpop.f32.mrb[46].mxu1 }
 0xeed   : > { %v2288_v49 = vmul.f32 0.044715, %v2280_v46  ;;  %v2283_v50 = vadd.f32 %v2564_v44, %v2282_v48  ;;  %v2778_v51 = vpop.f32.mrb[47].mxu1  ;;  %v2286_v60 = vmul.f32 0.5, %v2280_v46 }
 0xeef   : > { %v2290_v52 = vmul.f32 %v2288_v49, %v2280_v46  ;;  %v2289_v53 = vmul.f32 0.044715, %v2283_v50  ;;  %v2287_v61 = vmul.f32 0.5, %v2283_v50 }
 0xef1   : > { %v2292_v15 = vmul.f32 %v2290_v52, %v2280_v46  ;;  %v2291_v54 = vmul.f32 %v2289_v53, %v2283_v50 }
 0xef3   : > { %v2294_v55 = vadd.f32 %v2292_v15, %v2280_v46  ;;  %v2293_v56 = vmul.f32 %v2291_v54, %v2283_v50 }
 0xef5   : > { %v2296_v57 = vmul.f32 0.7978846, %v2294_v55  ;;  %v2295_v1 = vadd.f32 %v2293_v56, %v2283_v50 }
 0xef7   : > { %2904 = vtanh.f32 %v2296_v57  ;;  %v2297_v58 = vmul.f32 0.7978846, %v2295_v1 }
 0xef9   : > { %2906 = vtanh.f32 %v2297_v58 }
 0xf01   : > { %v2905_v59 = vpop.eup %2904 }
 0xf02   : > { %v2300_v3 = vadd.f32 1.0, %v2905_v59 }
 0xf03   : > { %v2907_v4 = vpop.eup %2906 }
 0xf04   : > { %v2301_v62 = vadd.f32 1.0, %v2907_v4  ;;  %v2302_v63 = vmul.f32 %v2300_v3, %v2286_v60 }
 0xf06   : > { %v2303_v0 = vmul.f32 %v2301_v62, %v2287_v61 }
 0xf08   : > { %v2304_v2 = vpack.c.bf16 %v2303_v0, %v2302_v63 }
 0xf0a   : > { %2788 = vmatmul.mubr.msk.bf16.vlgmr.msra.gmra.mrb[40].mxu0 %vm2344_vm9, %v2304_v2 }
 0xfdd   : > { %v2382_v6 = vpop.f32.mrb[40].mxu0 }
 0xfde   : > { %v2383_v7 = vadd.f32 %v2568_v5, %v2382_v6  ;;  %v2789_v8 = vpop.f32.mrb[41].mxu0 }
 0xfdf   : > { %v2385_v27 = vpop.f32.mrb[42].mxu0 }
 0xfe0   : > { %v2386_v9 = vadd.f32 %v2568_v5, %v2385_v27  ;;  %v2790_v10 = vpop.f32.mrb[43].mxu0  ;;  %v2389_v11 = vadd.f32 %v2383_v7, %v2216_v37  ;;  %v2575_v37 = vld [vmem:[%s3435_s22] ss:$0 sm:$0xff] }
 0xfe2   : > { %v2393_v12 = vsel %vm774_vm1, %v2389_v11, 0.0  ;;  %v2390_v13 = vadd.f32 %v2386_v9, %v2217_v38 }
 0xfe3   : > { %2394 = vadd.xlane.f32.xlu0 %v2393_v12 }
 0xfe4   : > { %v2396_v14 = vsel %vm774_vm1, %v2390_v13, 0.0 }
 0xfe5   : > { %2397 = vadd.xlane.f32.xlu1 %v2396_v14 }
0x1070   : > { %v2395_v16 = vpop.xlane.xlu0 %2394 }
0x1071   : > { %v2399_v17 = vmul.f32 0.03125, %v2395_v16 }
0x1072   : > { %v2398_v18 = vpop.xlane.xlu1 %2397 }
0x1073   : > { %v2401_v19 = vsub.f32 %v2389_v11, %v2399_v17  ;;  %v2400_v20 = vmul.f32 0.03125, %v2398_v18 }
0x1075   : > { %v2402_v21 = vsub.f32 %v2390_v13, %v2400_v20  ;;  %v2403_v22 = vmul.f32 %v2401_v19, %v2401_v19 }
0x1077   : > { %v2405_v23 = vsel %vm774_vm1, %v2403_v22, 0.0  ;;  %v2404_v24 = vmul.f32 %v2402_v21, %v2402_v21 }
0x1078   : > { %2406 = vadd.xlane.f32.xlu0 %v2405_v23 }
0x1079   : > { %v2408_v25 = vsel %vm774_vm1, %v2404_v24, 0.0 }
0x107a   : > { %2409 = vadd.xlane.f32.xlu1 %v2408_v25 }
0x1105   : > { %v2407_v26 = vpop.xlane.xlu0 %2406 }
0x1106   : > { %v2411_v28 = vmul.f32 0.03125, %v2407_v26 }
0x1107   : > { %v2410_v29 = vpop.xlane.xlu1 %2409 }
0x1108   : > { %v2413_v30 = vadd.f32 1e-12, %v2411_v28  ;;  %v2412_v31 = vmul.f32 0.03125, %v2410_v29 }
0x110a   : > { %2908 = vrsqrt.f32 %v2413_v30  ;;  %v2414_v32 = vadd.f32 1e-12, %v2412_v31 }
0x110c   : > { %2910 = vrsqrt.f32 %v2414_v32 }
0x1114   : > { %v2909_v33 = vpop.eup %2908 }
0x1115   : > { %v2417_v35 = vmul.f32 %v2909_v33, %v2401_v19 }
0x1116   : > { %v2911_v36 = vpop.eup %2910 }
0x1117   : > { %v2425_v38 = vmul.f32 %v2574_v34, %v2417_v35  ;;  %v2418_v39 = vmul.f32 %v2911_v36, %v2402_v21 }
0x1119   : > { %v2433_v40 = vadd.f32 %v2575_v37, %v2425_v38  ;;  %v2426_v41 = vmul.f32 %v2574_v34, %v2418_v39 }
0x111b   : > { %2435 = vst.msk [vmem:[%s741_s25] sm:$0xff] %vm774_vm1, %v2433_v40  ;;  %v2434_v42 = vadd.f32 %v2575_v37, %v2426_v41 }
0x111d   : > { %2436 = vst.msk [vmem:[%s741_s25 + $0x8] sm:$0xff] %vm774_vm1, %v2434_v42 }
0x111e PF: > { %s33_s4 = sadd.s32 1, %s2918_s4  }
0x111f   : > { %p30_p4 = scmp.ge.s32.totalorder %s33_s4, 4  }
0x1121   :  { %32 = sbr.rel (!%p30_p4) target bundleno = 9 (0x9), region = 148 }

// kernel: set_pred_forward.13
= control target key start
LH: loop header
LB: loop body
LE: loop exit
PB: predicated region body
PF: predicated region fallthrough
CT: control target
= control target key end

     0   :  { %s4544_s0 = inlined_call_operand.vmem [shape: f32[2,16,32], index: 0, kind: input, shape index: {}]   ;;  %s4545_s1 = inlined_call_operand.vmem [shape: f32[2,8,32], index: 1, kind: input, shape index: {}]   ;;  %s4546_s2 = inlined_call_operand.vmem [shape: f32[2,1,8], index: 2, kind: input, shape index: {}]   ;;  %s4547_s3 = inlined_call_operand.vmem [shape: bf16[32,96], index: 3, kind: input, shape index: {}]   ;;  %s4548_s4 = inlined_call_operand.hbm [shape: f32[1,96], index: 4, kind: input, shape index: {}]   ;;  %s4549_s5 = inlined_call_operand.vmem [shape: bf16[32,32], index: 5, kind: input, shape index: {}]   ;;  %s4550_s6 = inlined_call_operand.hbm [shape: f32[1,32], index: 6, kind: input, shape index: {}]   ;;  %s4551_s7 = inlined_call_operand.hbm [shape: f32[1,32], index: 7, kind: input, shape index: {}]   ;;  %s4552_s8 = inlined_call_operand.hbm [shape: f32[1,32], index: 8, kind: input, shape index: {}]   ;;  %s4553_s9 = inlined_call_operand.vmem [shape: bf16[32,32], index: 9, kind: input, shape index: {}]   ;;  %s4554_s10 = inlined_call_operand.hbm [shape: f32[1,32], index: 10, kind: input, shape index: {}]   ;;  %s4555_s11 = inlined_call_operand.vmem [shape: bf16[32,64], index: 11, kind: input, shape index: {}]   ;;  %s4556_s12 = inlined_call_operand.hbm [shape: f32[1,64], index: 12, kind: input, shape index: {}]   ;;  %s4557_s13 = inlined_call_operand.vmem [shape: bf16[32,32], index: 13, kind: input, shape index: {}]   ;;  %s4558_s14 = inlined_call_operand.hbm [shape: f32[1,32], index: 14, kind: input, shape index: {}]   ;;  %s4559_s15 = inlined_call_operand.hbm [shape: f32[1,32], index: 15, kind: input, shape index: {}]   ;;  %s4560_s16 = inlined_call_operand.hbm [shape: f32[1,32], index: 16, kind: input, shape index: {}]   ;;  %s4561_s17 = inlined_call_operand.vmem [shape: bf16[32,64], index: 17, kind: input, shape index: {}]   ;;  %s4562_s18 = inlined_call_operand.hbm [shape: f32[1,64], index: 18, kind: input, shape index: {}]   ;;  %s4563_s19 = inlined_call_operand.vmem [shape: bf16[64,32], index: 19, kind: input, shape index: {}]   ;;  %s4564_s20 = inlined_call_operand.hbm [shape: f32[1,32], index: 20, kind: input, shape index: {}]   ;;  %s4565_s21 = inlined_call_operand.hbm [shape: f32[1,32], index: 21, kind: input, shape index: {}]   ;;  %s4566_s22 = inlined_call_operand.hbm [shape: f32[1,32], index: 22, kind: input, shape index: {}]   ;;  %s4567_s23 = inlined_call_operand.vmem [shape: f32[2,16,32], index: 23, kind: output, shape index: {}]  }
   0x1   :  { %4586 = sst [smem:[#allocation31_spill]] %s4544_s0 }
   0x2   :  { %4587 = sst [smem:[#allocation32_spill]] %s4545_s1 }
   0x3   :  { %4588 = sst [smem:[#allocation33_spill]] %s4546_s2 }
   0x4   :  { %4589 = sst [smem:[#allocation34_spill]] %s4547_s3 }
   0x5   :  { %4590 = sst [smem:[#allocation35_spill]] %s4548_s4 }
   0x6   :  { %4591 = sst [smem:[#allocation36_spill]] %s4549_s5 }
   0x7   :  { %4592 = sst [smem:[#allocation37_spill]] %s4550_s6 }
   0x8   :  { %4593 = sst [smem:[#allocation38_spill]] %s4551_s7 }
   0x9   :  { %4594 = sst [smem:[#allocation39_spill]] %s4552_s8 }
   0xa   :  { %4595 = sst [smem:[#allocation40_spill]] %s4561_s17 }
   0xb   :  { %4596 = sst [smem:[#allocation41_spill]] %s4563_s19 }
   0xc   :  { %4597 = sst [smem:[#allocation42_spill]] %s4567_s23 }
   0xd   :  { %28 = vsyncpa [#allocation4], 0 }
   0xe   :  { %29 = vsyncpa [#allocation6], 0 }
   0xf   :  { %30 = vsyncpa [#allocation9], 0 }
  0x10   :  { %31 = vsyncpa [#allocation12], 0 }
  0x11   :  { %32 = vsyncpa [#allocation15], 0 }
  0x12   :  { %33 = vsyncpa [#allocation18], 0 }
  0x13   :  { %34 = vsyncpa [#allocation21], 0  ;;  %s3908_s4 = smov 0  }
  0x14 LB: > { %4598 = sst [smem:[#allocation30_spill]] %s3756_s4  ;;  %s3758_s30 = smov [#allocation5]   ;;  %s3756_s4 = sphi %s3908_s4, %s40_s4  }
  0x15   : > { %s599_s24 = sshll.u32 %s3758_s30, 4  ;;  %s3914_s25 = sadd.s32 4294967295, %s3756_s4   ;;  %s3919_s24 = int_to_ptr.vmem [resolvable:$true] %s599_s24 }
  0x16   : > { %p2804_p0 = scmp.ge.s32.totalorder %s3756_s4, 1  ;;  %p569_p1 = scmp.lt.s32.totalorder %s3756_s4, 3 }
  0x17   : > { %p4576_p2 = scmp.eq.s32.totalorder %s3914_s25, 0  ;;  %s3759_s1 = smov [#allocation8]  }
  0x18   : > { %p3921_p3 = pnand %p2804_p0, %p569_p1  ;;  %s621_s26 = sshll.u32 %s3759_s1, 4  ;;  %s3927_s26 = int_to_ptr.vmem [resolvable:$true] %s621_s26 }
  0x19   : > { %s3760_s2 = smov [#allocation11]   ;;  %s3761_s7 = smov [#allocation14]  }
  0x1a   : > { %s4599_s5 = scalar_select %p3921_p3, 1, 0 }
  0x1b   : > { %p3158_p4 = pneg %p3921_p3  ;;  %s649_s6 = sshll.u32 %s3760_s2, 4  ;;  %s3935_s6 = int_to_ptr.vmem [resolvable:$true] %s649_s6 }
  0x1c   : > { %s674_s28 = sshll.u32 %s3761_s7, 4  ;;  %s4601_s0 = sld [smem:[#allocation37_spill]]  ;;  %s3937_s28 = int_to_ptr.vmem [resolvable:$true] %s674_s28 }
  0x1d   : > { %p3931_p5 = pnand %p4576_p2, %p3158_p4 }
  0x1f   : > { %p3947_p7 = pneg %p3931_p5 }
  0x22   : > { %s3358_s30 = scalar_lea.hbm %s4601_s0, 16 }
  0x23   : > { %p3359_p6 = scmp.ne.s32.totalorder %s4601_s0, %s3358_s30  ;;  %p3365_p10 = scmp.lt.u32.totalorder %s3358_s30, %s4601_s0 }
  0x25   : > { %p3361_p8 = pnand %p3947_p7, %p3359_p6 }
  0x27   : > { %p3362_p9 = pneg %p3361_p8 }
  0x29   : > { %p3367_p11 = pnand %p3365_p10, %p3362_p9 }
  0x2b   : > { %3370 = shalt.err (!%p3367_p11)
}
  0x2c   : > { %s3371_s4 = scalar_lea.vmem %s3919_s24, 16  ;;  %s3378_s29 = scalar_lea.vmem %s3919_s24, 32 }
  0x2d   : > { %p3372_p12 = scmp.ne.s32.totalorder %s3919_s24, %s3371_s4  ;;  %p3379_p1 = scmp.lt.s32.totalorder %s3919_s24, %s3919_s24 }
  0x2e   : > { %p3380_p4 = scmp.lt.s32.totalorder %s3378_s29, %s3371_s4 }
  0x2f   : > { %p3374_p13 = pnand %p3372_p12, %p3947_p7 }
  0x30   : > { %p3381_p6 = por %p3380_p4, %p3379_p1 }
  0x31   : > { %p3375_p0 = pneg %p3374_p13 }
  0x33   : > { %p3382_p8 = pnand %p3381_p6, %p3375_p0 }
  0x35   : > { %3385 = shalt.err (!%p3382_p8)
}
  0x36   : > { %3164 = dma.hbm_to_vmem [thread:$0]  (!%p3931_p5), %s4601_s0, 16, %s3919_s24, [#allocation6]  }
  0x37   : > { %s4603_s8 = sld [smem:[#allocation39_spill]] }
  0x3d   : > { %s3386_s7 = scalar_lea.hbm %s4603_s8, 16 }
  0x3e   : > { %p3387_p9 = scmp.ne.s32.totalorder %s4603_s8, %s3386_s7  ;;  %p3393_p12 = scmp.lt.u32.totalorder %s3386_s7, %s4603_s8 }
  0x40   : > { %p3389_p10 = pnand %p3387_p9, %p3947_p7 }
  0x42   : > { %p3390_p11 = pneg %p3389_p10 }
  0x44   : > { %p3395_p13 = pnand %p3393_p12, %p3390_p11 }
  0x46   : > { %3398 = shalt.err (!%p3395_p13)
}
  0x47   : > { %s3399_s24 = scalar_lea.vmem %s3927_s26, 16  ;;  %s3406_s17 = scalar_lea.vmem %s3927_s26, 32 }
  0x48   : > { %p3400_p0 = scmp.ne.s32.totalorder %s3927_s26, %s3399_s24  ;;  %p3407_p6 = scmp.lt.s32.totalorder %s3927_s26, %s3927_s26 }
  0x49   : > { %p3408_p8 = scmp.lt.s32.totalorder %s3406_s17, %s3399_s24 }
  0x4a   : > { %p3402_p1 = pnand %p3400_p0, %p3947_p7 }
  0x4b   : > { %p3409_p9 = por %p3408_p8, %p3407_p6 }
  0x4c   : > { %p3403_p4 = pneg %p3402_p1 }
  0x4e   : > { %p3410_p10 = pnand %p3409_p9, %p3403_p4 }
  0x50   : > { %3413 = shalt.err (!%p3410_p10)
}
  0x51   : > { %3170 = dma.hbm_to_vmem [thread:$0]  (!%p3931_p5), %s4603_s8, 16, %s3927_s26, [#allocation9]  }
  0x52   : > { %s3414_s1 = scalar_lea.hbm %s4556_s12, 16 }
  0x53   : > { %p3415_p11 = scmp.ne.s32.totalorder %s4556_s12, %s3414_s1  ;;  %p3421_p0 = scmp.lt.u32.totalorder %s3414_s1, %s4556_s12 }
  0x55   : > { %p3417_p12 = pnand %p3415_p11, %p3947_p7 }
  0x57   : > { %p3418_p13 = pneg %p3417_p12 }
  0x59   : > { %p3423_p1 = pnand %p3421_p0, %p3418_p13 }
  0x5b   : > { %3426 = shalt.err (!%p3423_p1)
}
  0x5c   : > { %s3427_s26 = scalar_lea.vmem %s3935_s6, 16  ;;  %s3434_s17 = scalar_lea.vmem %s3935_s6, 32 }
  0x5d   : > { %p3428_p4 = scmp.ne.s32.totalorder %s3935_s6, %s3427_s26  ;;  %p3435_p9 = scmp.lt.s32.totalorder %s3935_s6, %s3935_s6 }
  0x5e   : > { %p3436_p10 = scmp.lt.s32.totalorder %s3434_s17, %s3427_s26 }
  0x5f   : > { %p3430_p6 = pnand %p3428_p4, %p3947_p7 }
  0x60   : > { %p3437_p11 = por %p3436_p10, %p3435_p9 }
  0x61   : > { %p3431_p8 = pneg %p3430_p6 }
  0x63   : > { %p3438_p12 = pnand %p3437_p11, %p3431_p8 }
  0x65   : > { %3441 = shalt.err (!%p3438_p12)
}
  0x66   : > { %3176 = dma.hbm_to_vmem [thread:$0]  (!%p3931_p5), %s4556_s12, 16, %s3935_s6, [#allocation12]  }
  0x67   : > { %s3442_s1 = scalar_lea.hbm %s4559_s15, 16 }
  0x68   : > { %p3443_p13 = scmp.ne.s32.totalorder %s4559_s15, %s3442_s1  ;;  %p3449_p4 = scmp.lt.u32.totalorder %s3442_s1, %s4559_s15 }
  0x6a   : > { %p3445_p0 = pnand %p3443_p13, %p3947_p7 }
  0x6c   : > { %p3446_p1 = pneg %p3445_p0 }
  0x6e   : > { %p3451_p6 = pnand %p3449_p4, %p3446_p1 }
  0x70   : > { %3454 = shalt.err (!%p3451_p6)
}
  0x71   : > { %s3455_s6 = scalar_lea.vmem %s3937_s28, 16  ;;  %s3462_s26 = scalar_lea.vmem %s3937_s28, 32 }
  0x72   : > { %p3456_p8 = scmp.ne.s32.totalorder %s3937_s28, %s3455_s6  ;;  %p3463_p11 = scmp.lt.s32.totalorder %s3937_s28, %s3937_s28 }
  0x73   : > { %p3464_p12 = scmp.lt.s32.totalorder %s3462_s26, %s3455_s6 }
  0x74   : > { %p3458_p9 = pnand %p3456_p8, %p3947_p7 }
  0x75   : > { %p3465_p13 = por %p3464_p12, %p3463_p11 }
  0x76   : > { %p3459_p10 = pneg %p3458_p9 }
  0x78   : > { %p3466_p0 = pnand %p3465_p13, %p3459_p10 }
  0x7a   : > { %3469 = shalt.err (!%p3466_p0)
}
  0x7b   : > { %3182 = dma.hbm_to_vmem [thread:$0]  (!%p3931_p5), %s4559_s15, 16, %s3937_s28, [#allocation15]  }
  0x7c   : > { %s3762_s23 = smov [#allocation17]   ;;  %s3763_s30 = smov [#allocation20]  }
  0x7d   : > { %s699_s3 = sshll.u32 %s3762_s23, 4  ;;  %s724_s1 = sshll.u32 %s3763_s30, 4  ;;  %s700_s3 = int_to_ptr.vmem [resolvable:$true] %s699_s3  ;;  %s725_s1 = int_to_ptr.vmem [resolvable:$true] %s724_s1 }
  0x7e   : > { %s3470_s29 = scalar_lea.hbm %s4562_s18, 16 }
  0x7f   : > { %p3471_p1 = scmp.ne.s32.totalorder %s4562_s18, %s3470_s29  ;;  %p3477_p8 = scmp.lt.u32.totalorder %s3470_s29, %s4562_s18 }
  0x81   : > { %p3473_p4 = pnand %p3471_p1, %p3947_p7 }
  0x83   : > { %p3474_p6 = pneg %p3473_p4 }
  0x85   : > { %p3479_p9 = pnand %p3477_p8, %p3474_p6 }
  0x87   : > { %3482 = shalt.err (!%p3479_p9)
}
  0x88   : > { %s3483_s28 = scalar_lea.vmem %s700_s3, 16  ;;  %s3490_s19 = scalar_lea.vmem %s700_s3, 32 }
  0x89   : > { %p3484_p10 = scmp.ne.s32.totalorder %s700_s3, %s3483_s28  ;;  %p3491_p13 = scmp.lt.s32.totalorder %s700_s3, %s700_s3 }
  0x8a   : > { %p3492_p0 = scmp.lt.s32.totalorder %s3490_s19, %s3483_s28 }
  0x8b   : > { %p3486_p11 = pnand %p3484_p10, %p3947_p7 }
  0x8c   : > { %p3493_p2 = por %p3492_p0, %p3491_p13 }
  0x8d   : > { %p3487_p12 = pneg %p3486_p11 }
  0x8f   : > { %p3494_p3 = pnand %p3493_p2, %p3487_p12 }
  0x91   : > { %3497 = shalt.err (!%p3494_p3)
}
  0x92   : > { %3188 = dma.hbm_to_vmem [thread:$0]  (!%p3931_p5), %s4562_s18, 16, %s700_s3, [#allocation18]  }
  0x93   : > { %s3498_s29 = scalar_lea.hbm %s4565_s21, 16 }
  0x94   : > { %p3499_p1 = scmp.ne.s32.totalorder %s4565_s21, %s3498_s29  ;;  %p3505_p3 = scmp.lt.u32.totalorder %s3498_s29, %s4565_s21 }
  0x96   : > { %p3501_p4 = pnand %p3499_p1, %p3947_p7 }
  0x98   : > { %p3502_p2 = pneg %p3501_p4 }
  0x9a   : > { %p3507_p6 = pnand %p3505_p3, %p3502_p2 }
  0x9c   : > { %3510 = shalt.err (!%p3507_p6)
}
  0x9d   : > { %s3511_s28 = scalar_lea.vmem %s725_s1, 16  ;;  %s3518_s3 = scalar_lea.vmem %s725_s1, 32 }
  0x9e   : > { %p3512_p8 = scmp.ne.s32.totalorder %s725_s1, %s3511_s28  ;;  %p3519_p11 = scmp.lt.s32.totalorder %s725_s1, %s725_s1 }
  0x9f   : > { %p3520_p12 = scmp.lt.s32.totalorder %s3518_s3, %s3511_s28 }
  0xa0   : > { %p3514_p9 = pnand %p3512_p8, %p3947_p7 }
  0xa1   : > { %p3521_p13 = por %p3520_p12, %p3519_p11 }
  0xa2   : > { %p3515_p10 = pneg %p3514_p9 }
  0xa4   : > { %p3522_p0 = pnand %p3521_p13, %p3515_p10 }
  0xa6   : > { %3525 = shalt.err (!%p3522_p0)
}
  0xa7   : > { %3194 = dma.hbm_to_vmem [thread:$0]  (!%p3931_p5), %s4565_s21, 16, %s725_s1, [#allocation21]  }
  0xa8   : > { %s3764_s30 = smov [#allocation3]   ;;  %s3765_s4 = smov [#allocation7]  }
  0xa9   : > { %s585_s7 = sshll.u32 %s3764_s30, 4  ;;  %s610_s29 = sshll.u32 %s3765_s4, 4  ;;  %s586_s7 = int_to_ptr.vmem [resolvable:$true] %s585_s7  ;;  %s611_s29 = int_to_ptr.vmem [resolvable:$true] %s610_s29 }
  0xaa   : > { %s4604_s26 = sld [smem:[#allocation35_spill]] }
  0xb0   : > { %s3526_s17 = scalar_lea.hbm %s4604_s26, 16 }
  0xb1   : > { %p3527_p1 = scmp.ne.s32.totalorder %s4604_s26, %s3526_s17  ;;  %p3533_p3 = scmp.lt.u32.totalorder %s3526_s17, %s4604_s26 }
  0xb3   : > { %p3529_p4 = pnand %p3527_p1, %p3947_p7 }
  0xb5   : > { %p3530_p2 = pneg %p3529_p4 }
  0xb7   : > { %p3535_p6 = pnand %p3533_p3, %p3530_p2 }
  0xb9   : > { %3538 = shalt.err (!%p3535_p6)
}
  0xba   : > { %s3539_s1 = scalar_lea.vmem %s586_s7, 16  ;;  %s3546_s23 = scalar_lea.vmem %s586_s7, 32 }
  0xbb   : > { %p3540_p8 = scmp.ne.s32.totalorder %s586_s7, %s3539_s1  ;;  %p3547_p11 = scmp.lt.s32.totalorder %s586_s7, %s586_s7 }
  0xbc   : > { %p3548_p12 = scmp.lt.s32.totalorder %s3546_s23, %s3539_s1 }
  0xbd   : > { %p3542_p9 = pnand %p3540_p8, %p3947_p7 }
  0xbe   : > { %p3549_p13 = por %p3548_p12, %p3547_p11 }
  0xbf   : > { %p3543_p10 = pneg %p3542_p9 }
  0xc1   : > { %p3550_p0 = pnand %p3549_p13, %p3543_p10 }
  0xc3   : > { %3553 = shalt.err (!%p3550_p0)
}
  0xc4   : > { %3161 = dma.hbm_to_vmem [thread:$0]  (!%p3931_p5), %s4604_s26, 16, %s586_s7, [#allocation4]  }
  0xc5   : > { %s4605_s6 = sld [smem:[#allocation38_spill]] }
  0xcb   : > { %s3554_s17 = scalar_lea.hbm %s4605_s6, 16 }
  0xcc   : > { %p3555_p1 = scmp.ne.s32.totalorder %s4605_s6, %s3554_s17  ;;  %p3561_p3 = scmp.lt.u32.totalorder %s3554_s17, %s4605_s6 }
  0xce   : > { %p3557_p4 = pnand %p3555_p1, %p3947_p7 }
  0xd0   : > { %p3558_p2 = pneg %p3557_p4 }
  0xd2   : > { %p3563_p6 = pnand %p3561_p3, %p3558_p2 }
  0xd4   : > { %3566 = shalt.err (!%p3563_p6)
}
  0xd5   : > { %s3567_s23 = scalar_lea.vmem %s611_s29, 16  ;;  %s3574_s7 = scalar_lea.vmem %s611_s29, 32 }
  0xd6   : > { %p3568_p8 = scmp.ne.s32.totalorder %s611_s29, %s3567_s23  ;;  %p3575_p11 = scmp.lt.s32.totalorder %s611_s29, %s611_s29 }
  0xd7   : > { %p3576_p12 = scmp.lt.s32.totalorder %s3574_s7, %s3567_s23 }
  0xd8   : > { %p3570_p9 = pnand %p3568_p8, %p3947_p7 }
  0xd9   : > { %p3577_p13 = por %p3576_p12, %p3575_p11 }
  0xda   : > { %p3571_p10 = pneg %p3570_p9 }
  0xdc   : > { %p3578_p0 = pnand %p3577_p13, %p3571_p10 }
  0xde   : > { %3581 = shalt.err (!%p3578_p0)
}
  0xdf   : > { %3167 = dma.hbm_to_vmem [thread:$0]  (!%p3931_p5), %s4605_s6, 16, %s611_s29, [#allocation6]  }
  0xe0   : > { %s3766_s0 = smov [#allocation10]   ;;  %s3767_s17 = smov [#allocation13]  }
  0xe1   : > { %s635_s24 = sshll.u32 %s3766_s0, 4  ;;  %s663_s28 = sshll.u32 %s3767_s17, 4  ;;  %s636_s24 = int_to_ptr.vmem [resolvable:$true] %s635_s24  ;;  %s664_s28 = int_to_ptr.vmem [resolvable:$true] %s663_s28 }
  0xe2   : > { %s3582_s1 = scalar_lea.hbm %s4554_s10, 16 }
  0xe3   : > { %p3583_p1 = scmp.ne.s32.totalorder %s4554_s10, %s3582_s1  ;;  %p3589_p3 = scmp.lt.u32.totalorder %s3582_s1, %s4554_s10 }
  0xe5   : > { %p3585_p4 = pnand %p3583_p1, %p3947_p7 }
  0xe7   : > { %p3586_p2 = pneg %p3585_p4 }
  0xe9   : > { %p3591_p6 = pnand %p3589_p3, %p3586_p2 }
  0xeb   : > { %3594 = shalt.err (!%p3591_p6)
}
  0xec   : > { %s3595_s29 = scalar_lea.vmem %s636_s24, 16  ;;  %s3602_s4 = scalar_lea.vmem %s636_s24, 32 }
  0xed   : > { %p3596_p8 = scmp.ne.s32.totalorder %s636_s24, %s3595_s29  ;;  %p3603_p11 = scmp.lt.s32.totalorder %s636_s24, %s636_s24 }
  0xee   : > { %p3604_p12 = scmp.lt.s32.totalorder %s3602_s4, %s3595_s29 }
  0xef   : > { %p3598_p9 = pnand %p3596_p8, %p3947_p7 }
  0xf0   : > { %p3605_p13 = por %p3604_p12, %p3603_p11 }
  0xf1   : > { %p3599_p10 = pneg %p3598_p9 }
  0xf3   : > { %p3606_p0 = pnand %p3605_p13, %p3599_p10 }
  0xf5   : > { %3609 = shalt.err (!%p3606_p0)
}
  0xf6   : > { %3173 = dma.hbm_to_vmem [thread:$0]  (!%p3931_p5), %s4554_s10, 16, %s636_s24, [#allocation9]  }
  0xf7   : > { %s3610_s19 = scalar_lea.hbm %s4558_s14, 16 }
  0xf8   : > { %p3611_p1 = scmp.ne.s32.totalorder %s4558_s14, %s3610_s19  ;;  %p3617_p3 = scmp.lt.u32.totalorder %s3610_s19, %s4558_s14 }
  0xfa   : > { %p3613_p4 = pnand %p3611_p1, %p3947_p7 }
  0xfc   : > { %p3614_p2 = pneg %p3613_p4 }
  0xfe   : > { %p3619_p6 = pnand %p3617_p3, %p3614_p2 }
 0x100   : > { %3622 = shalt.err (!%p3619_p6)
}
 0x101   : > { %s3623_s29 = scalar_lea.vmem %s664_s28, 16  ;;  %s3630_s24 = scalar_lea.vmem %s664_s28, 32 }
 0x102   : > { %p3624_p8 = scmp.ne.s32.totalorder %s664_s28, %s3623_s29  ;;  %p3631_p11 = scmp.lt.s32.totalorder %s664_s28, %s664_s28 }
 0x103   : > { %p3632_p12 = scmp.lt.s32.totalorder %s3630_s24, %s3623_s29 }
 0x104   : > { %p3626_p9 = pnand %p3624_p8, %p3947_p7 }
 0x105   : > { %p3633_p13 = por %p3632_p12, %p3631_p11 }
 0x106   : > { %p3627_p10 = pneg %p3626_p9 }
 0x108   : > { %p3634_p0 = pnand %p3633_p13, %p3627_p10 }
 0x10a   : > { %3637 = shalt.err (!%p3634_p0)
}
 0x10b   : > { %3179 = dma.hbm_to_vmem [thread:$0]  (!%p3931_p5), %s4558_s14, 16, %s664_s28, [#allocation12]  }
 0x10c   : > { %s3768_s17 = smov [#allocation16]   ;;  %s3769_s3 = smov [#allocation19]  }
 0x10d   : > { %s685_s8 = sshll.u32 %s3768_s17, 4  ;;  %s713_s19 = sshll.u32 %s3769_s3, 4  ;;  %s686_s8 = int_to_ptr.vmem [resolvable:$true] %s685_s8  ;;  %s714_s19 = int_to_ptr.vmem [resolvable:$true] %s713_s19 }
 0x10e   : > { %s3638_s7 = scalar_lea.hbm %s4560_s16, 16 }
 0x10f   : > { %p3639_p1 = scmp.ne.s32.totalorder %s4560_s16, %s3638_s7  ;;  %p3645_p3 = scmp.lt.u32.totalorder %s3638_s7, %s4560_s16 }
 0x111   : > { %p3641_p4 = pnand %p3639_p1, %p3947_p7 }
 0x113   : > { %p3642_p2 = pneg %p3641_p4 }
 0x115   : > { %p3647_p6 = pnand %p3645_p3, %p3642_p2 }
 0x117   : > { %3650 = shalt.err (!%p3647_p6)
}
 0x118   : > { %s3651_s28 = scalar_lea.vmem %s686_s8, 16  ;;  %s3658_s0 = scalar_lea.vmem %s686_s8, 32 }
 0x119   : > { %p3652_p8 = scmp.ne.s32.totalorder %s686_s8, %s3651_s28  ;;  %p3659_p11 = scmp.lt.s32.totalorder %s686_s8, %s686_s8 }
 0x11a   : > { %p3660_p12 = scmp.lt.s32.totalorder %s3658_s0, %s3651_s28 }
 0x11b   : > { %p3654_p9 = pnand %p3652_p8, %p3947_p7 }
 0x11c   : > { %p3661_p13 = por %p3660_p12, %p3659_p11 }
 0x11d   : > { %p3655_p10 = pneg %p3654_p9 }
 0x11f   : > { %p3662_p0 = pnand %p3661_p13, %p3655_p10 }
 0x121   : > { %3665 = shalt.err (!%p3662_p0)
}
 0x122   : > { %3185 = dma.hbm_to_vmem [thread:$0]  (!%p3931_p5), %s4560_s16, 16, %s686_s8, [#allocation15]  }
 0x123   : > { %s3666_s7 = scalar_lea.hbm %s4564_s20, 16 }
 0x124   : > { %p3667_p1 = scmp.ne.s32.totalorder %s4564_s20, %s3666_s7  ;;  %p3673_p3 = scmp.lt.u32.totalorder %s3666_s7, %s4564_s20 }
 0x126   : > { %p3669_p4 = pnand %p3667_p1, %p3947_p7 }
 0x128   : > { %p3670_p2 = pneg %p3669_p4 }
 0x12a   : > { %p3675_p6 = pnand %p3673_p3, %p3670_p2 }
 0x12c   : > { %3678 = shalt.err (!%p3675_p6)
}
 0x12d   : > { %s3679_s28 = scalar_lea.vmem %s714_s19, 16  ;;  %s3686_s8 = scalar_lea.vmem %s714_s19, 32 }
 0x12e   : > { %p3680_p8 = scmp.ne.s32.totalorder %s714_s19, %s3679_s28  ;;  %p3687_p11 = scmp.lt.s32.totalorder %s714_s19, %s714_s19 }
 0x12f   : > { %p3688_p12 = scmp.lt.s32.totalorder %s3686_s8, %s3679_s28 }
 0x130   : > { %p3682_p9 = pnand %p3680_p8, %p3947_p7 }
 0x131   : > { %p3689_p13 = por %p3688_p12, %p3687_p11 }
 0x132   : > { %p3683_p10 = pneg %p3682_p9 }
 0x134   : > { %p3690_p0 = pnand %p3689_p13, %p3683_p10 }
 0x136   : > { %3693 = shalt.err (!%p3690_p0)
}
 0x137   : > { %3191 = dma.hbm_to_vmem [thread:$0]  (!%p3931_p5), %s4564_s20, 16, %s714_s19, [#allocation18]  }
 0x138   : > { %s3770_s3 = smov [#allocation22]   ;;  %s3694_s30 = scalar_lea.hbm %s4566_s22, 16 }
 0x139   : > { %s735_s1 = sshll.u32 %s3770_s3, 4  ;;  %p3695_p1 = scmp.ne.s32.totalorder %s4566_s22, %s3694_s30  ;;  %s736_s1 = int_to_ptr.vmem [resolvable:$true] %s735_s1 }
 0x13a   : > { %p3701_p3 = scmp.lt.u32.totalorder %s3694_s30, %s4566_s22 }
 0x13b   : > { %p3697_p4 = pnand %p3695_p1, %p3947_p7 }
 0x13d   : > { %p3698_p2 = pneg %p3697_p4 }
 0x13f   : > { %p3703_p6 = pnand %p3701_p3, %p3698_p2 }
 0x141   : > { %3706 = shalt.err (!%p3703_p6)
}
 0x142   : > { %s3707_s19 = scalar_lea.vmem %s736_s1, 16  ;;  %s3714_s8 = scalar_lea.vmem %s736_s1, 32 }
 0x143   : > { %p3708_p8 = scmp.ne.s32.totalorder %s736_s1, %s3707_s19  ;;  %p3715_p11 = scmp.lt.s32.totalorder %s736_s1, %s736_s1 }
 0x144   : > { %p3716_p12 = scmp.lt.s32.totalorder %s3714_s8, %s3707_s19 }
 0x145   : > { %p3710_p9 = pnand %p3708_p8, %p3947_p7 }
 0x146   : > { %p3717_p13 = por %p3716_p12, %p3715_p11 }
 0x147   : > { %p3711_p10 = pneg %p3710_p9 }
 0x149   : > { %p3718_p0 = pnand %p3717_p13, %p3711_p10 }
 0x14b   : > { %3721 = shalt.err (!%p3718_p0)
}
 0x14c   : > { %3197 = dma.hbm_to_vmem [thread:$0]  (!%p3931_p5), %s4566_s22, 16, %s736_s1, [#allocation21]  }
 0x14d   : > { %p4606_p1 = scmp.ne.s32.totalorder %s4599_s5, 0 }
 0x14e   : > { %p4607_p4 = scmp.eq.s32.totalorder (!%p4606_p1), %s3914_s25, 0 }
 0x14f   : > { %769 = sbr.rel (%p4606_p1) target bundleno = 4731 (0x127b), region = 112 }
 0x156   : > { %3727 = dma.done.wait (%p4607_p4), [#allocation4], 16   ;;  %p4608_p7 = pmov %p4607_p4 }
 0x157   : > { %p4609_p2 = pmov %p4607_p4 }
 0x158   : > { %3729 = vsyncadd (%p4608_p7), [#allocation4], 4294967280 }
 0x159   : > { %3731 = dma.done.wait (%p4609_p2), [#allocation6], 32   ;;  %p4610_p3 = pmov %p4609_p2 }
 0x15a   : > { %p4611_p6 = pmov %p4609_p2 }
 0x15b   : > { %3733 = vsyncadd (%p4610_p3), [#allocation6], 4294967264 }
 0x15c   : > { %3735 = dma.done.wait (%p4611_p6), [#allocation9], 32   ;;  %p4612_p5 = pmov %p4609_p2 }
 0x15d   : > { %p4613_p8 = pmov %p4609_p2 }
 0x15e   : > { %3737 = vsyncadd (%p4612_p5), [#allocation9], 4294967264 }
 0x15f   : > { %3739 = dma.done.wait (%p4613_p8), [#allocation12], 32   ;;  %p4614_p9 = pmov %p4609_p2 }
 0x160   : > { %p4615_p10 = pmov %p4609_p2 }
 0x161   : > { %3741 = vsyncadd (%p4614_p9), [#allocation12], 4294967264 }
 0x162   : > { %3743 = dma.done.wait (%p4615_p10), [#allocation15], 32   ;;  %p4616_p11 = pmov %p4609_p2 }
 0x163   : > { %p4617_p12 = pmov %p4609_p2 }
 0x164   : > { %3745 = vsyncadd (%p4616_p11), [#allocation15], 4294967264 }
 0x165   : > { %3747 = dma.done.wait (%p4617_p12), [#allocation18], 32   ;;  %p4618_p13 = pmov %p4609_p2 }
 0x166   : > { %p4619_p0 = pmov %p4609_p2 }
 0x167   : > { %3749 = vsyncadd (%p4618_p13), [#allocation18], 4294967264 }
 0x168   : > { %3751 = dma.done.wait (%p4619_p0), [#allocation21], 32   ;;  %p4620_p1 = pmov %p4619_p0 }
 0x169   : > { %p888_p4 = scmp.lt.s32.totalorder %s3914_s25, 1  ;;  %v3771_v0 = vmov 0.0   ;;  %vm3772_vm0 = vmmov 0   ;;  %s4621_s3 = sld [smem:[#allocation31_spill]]  ;;  %vm937_vm1 = vcmask 261120   ;;  %vm989_vm2 = vcmask 64512  }
 0x16a   : > { %3753 = vsyncadd (%p4620_p1), [#allocation21], 4294967264  ;;  %2950 = vmatprep.subr.bf16.mxu1 %v3771_v0  ;;  %2954 = vmatprep.mubr.msk.bf16.mxu1 %vm3772_vm0, %v3771_v0  ;;  %s4622_s30 = sld [smem:[#allocation34_spill]]  ;;  %v2838_v6 = vld [vmem:[#allocation3] ss:$0 sm:$0xff]  ;;  %s3773_s4 = smov 96   ;;  %v909_v28 = vlaneseq }
 0x16b   : > { %s4638_s25 = smov (!%p888_p4, %s3914_s25), 1  ;;  %2964 = vmatprep.subr.bf16.mxu0 %v3771_v0  ;;  %2966 = vmatprep.mubr.msk.bf16.mxu0 %vm3772_vm0, %v3771_v0  ;;  %s3774_s28 = smov 120   ;;  %v3780_v30 = vmov -10000.0   ;;  %vm1037_vm4 = vcmask 130048   ;;  %vm1237_vm5 = vcmask 130112   ;;  %vm1365_vm6 = vcmask 195712  }
 0x16c   : > { %s4579_s5 = sshll.u32 %s4638_s25, 4  ;;  %s4583_s19 = smov 88   ;;  %v910_v29 = vand.u32 127, %v909_v28  ;;  %vm1493_vm7 = vcmask 261312   ;;  %vm1832_vm8 = vcmask 1043456   ;;  %vm2507_vm9 = vcmask 523264  }
 0x16d   : > { %s4585_s8 = smov 80   ;;  %s3777_s0 = smov 112  }
 0x16e   : > { %s4584_s17 = smov 72   ;;  %s3779_s27 = smov 104   ;;  %vm911_vm3 = vcmp.lt.s32.totalorder %v910_v29, 15 }
 0x16f   : > { %s892_s1 = scalar_lea.vmem %s4621_s3, %s4579_s5  ;;  %v912_v31 = vsel %vm911_vm3, 0.0, %v3780_v30  ;;  %s3781_s2 = smov 56  }
 0x170   : > { %v3262_v1 = vld [vmem:[%s4622_s30] sm:$0xff]   ;;  %v3263_v2 = vld [vmem:[%s4622_s30 + $0x8] sm:$0xff]   ;;  %s3782_s3 = smov 64   ;;  %s3784_s23 = smov 40  }
 0x171   : > { %2951 = vmatpush3.bf16.msra.mxu1 %v3262_v1  ;;  %v4255_v3 = vld [vmem:[%s892_s1] sm:$0xff]  ;;  %v4257_v4 = vld [vmem:[%s892_s1 + $0x8] sm:$0xff]  ;;  %s3783_s1 = smov 48   ;;  %s4582_s7 = smov 8  }
 0x172   : > { %2952 = vmatprep.subr.bf16.mxu1 %v3771_v0  ;;  %v917_v5 = vpack.c.bf16 %v4257_v4, %v4255_v3  ;;  %s4580_s29 = smov 24   ;;  %s4631_s5 = smov 24  }
 0x175   : > { %2953 = vmatpush3.bf16.msra.mxu1 %v3263_v2 }
 0x176   : > { %2958 = vmatprep.subr.bf16.mxu1 %v3771_v0 }
 0x178   : > { %2955 = vmatmul.mubr.msk.bf16.vlgmr.msra.gmra.mrb[0].mxu1 %vm937_vm1, %v917_v5 }
 0x179   : > { %2960 = vmatprep.mubr.msk.bf16.mxu1 %vm3772_vm0, %v3771_v0 }
 0x24b   : > { %v975_v7 = vpop.f32.mrb[0].mxu1 }
 0x24c   : > { %v976_v8 = vadd.f32 %v2838_v6, %v975_v7  ;;  %v2956_v9 = vpop.f32.mrb[1].mxu1 }
 0x24d   : > { %v978_v10 = vpop.f32.mrb[2].mxu1 }
 0x24e   : > { %v979_v11 = vadd.f32 %v2838_v6, %v978_v10  ;;  %v2957_v12 = vpop.f32.mrb[3].mxu1  ;;  %v982_v13 = vmul.f32 0.35355338, %v976_v8 }
 0x250   : > { %v983_v14 = vmul.f32 0.35355338, %v979_v11  ;;  %v4266_v15 = vpack.c.bf16 %v979_v11, %v976_v8 }
 0x252   : > { %v984_v16 = vpack.c.bf16 %v983_v14, %v982_v13  ;;  %987 = vrot.lane.b32.xlu0 %v4266_v15, %s3773_s4 }
 0x254   : > { %1111 = vrot.lane.b32.xlu1 %v984_v16, %s3774_s28 }
 0x256   : > { %1113 = vrot.lane.b32.xlu0 %v4266_v15, %s4583_s19  ;;  %s4624_s19 = sld [smem:[#allocation32_spill]] }
 0x258   : > { %1241 = vrot.lane.b32.xlu1 %v4266_v15, %s4585_s8  ;;  %s4625_s8 = sld [smem:[#allocation33_spill]] }
 0x25a   : > { %1239 = vrot.lane.b32.xlu0 %v984_v16, %s3777_s0 }
 0x25c   : > { %1369 = vrot.lane.b32.xlu1 %v4266_v15, %s4584_s17 }
 0x25e   : > { %1367 = vrot.lane.b32.xlu0 %v984_v16, %s3779_s27 }
 0x2c4   : > { %v988_v17 = vpop.permute.xlu0 %987 }
 0x2c5   : > { %v994_v18 = vsel %vm989_vm2, %v988_v17, 0 }
 0x2c6   : > { %2959 = vmatpush3.bf16.xpose.msra.mxu1 %v994_v18  ;;  %v1112_v20 = vpop.permute.xlu1 %1111 }
 0x2c7   : > { %2970 = vmatprep.subr.bf16.mxu1 %v3771_v0 }
 0x2c8   : > { %v1114_v19 = vpop.permute.xlu0 %1113 }
 0x2c9   : > { %v1119_v21 = vsel %vm989_vm2, %v1114_v19, 0 }
 0x2ca   : > { %v1242_v22 = vpop.permute.xlu1 %1241 }
 0x2cb   : > { %v1247_v23 = vsel %vm989_vm2, %v1242_v22, 0 }
 0x2cc   : > { %v1240_v25 = vpop.permute.xlu0 %1239 }
 0x2cd   : > { %2961 = vmatmul.mubr.msk.bf16.vlgmr.msra.gmra.mrb[4].mxu1 %vm989_vm2, %v984_v16 }
 0x2ce   : > { %2971 = vmatpush3.bf16.xpose.msra.mxu1 %v1119_v21  ;;  %2972 = vmatprep.mubr.msk.bf16.mxu1 %vm3772_vm0, %v3771_v0  ;;  %v1370_v24 = vpop.permute.xlu1 %1369 }
 0x2cf   : > { %2982 = vmatprep.subr.bf16.mxu1 %v3771_v0  ;;  %v1375_v26 = vsel %vm989_vm2, %v1370_v24, 0 }
 0x2d0   : > { %v1368_v27 = vpop.permute.xlu0 %1367 }
 0x2d5   : > { %2973 = vmatmul.mubr.msk.bf16.vlgmr.msra.gmra.mrb[8].mxu1 %vm989_vm2, %v1112_v20 }
 0x2d6   : > { %2983 = vmatpush3.bf16.xpose.msra.mxu1 %v1247_v23  ;;  %2984 = vmatprep.mubr.msk.bf16.mxu1 %vm3772_vm0, %v3771_v0 }
 0x2d7   : > { %2994 = vmatprep.subr.bf16.mxu1 %v3771_v0 }
 0x2dd   : > { %2985 = vmatmul.mubr.msk.bf16.vlgmr.msra.gmra.mrb[12].mxu1 %vm989_vm2, %v1240_v25 }
 0x2de   : > { %2995 = vmatpush3.bf16.xpose.msra.mxu1 %v1375_v26  ;;  %2996 = vmatprep.mubr.msk.bf16.mxu1 %vm3772_vm0, %v3771_v0 }
 0x2df   : > { %3006 = vmatprep.subr.bf16.mxu1 %v3771_v0 }
 0x2e5   : > { %2997 = vmatmul.mubr.msk.bf16.vlgmr.msra.gmra.mrb[16].mxu1 %vm989_vm2, %v1368_v27 }
 0x2e6   : > { %3010 = vmatprep.mubr.msk.bf16.mxu1 %vm3772_vm0, %v3771_v0 }
 0x3a0   : > { %v1030_v32 = vpop.f32.mrb[4].mxu1 }
 0x3a1   : > { %v1031_v33 = vadd.f32 %v1030_v32, %v912_v31  ;;  %v2962_v34 = vpop.f32.mrb[5].mxu1 }
 0x3a2   : > { %v1033_v35 = vpop.f32.mrb[6].mxu1 }
 0x3a3   : > { %v1034_v36 = vadd.f32 %v1033_v35, %v912_v31  ;;  %v2963_v37 = vpop.f32.mrb[7].mxu1  ;;  %v1038_v38 = vsel %vm1037_vm4, %v1031_v33, -inf }
 0x3a4   : > { %1039 = vmax.xlane.f32.xlu1 %v1038_v38 }
 0x3a5   : > { %v1041_v39 = vsel %vm1037_vm4, %v1034_v36, -inf }
 0x3a6   : > { %1042 = vmax.xlane.f32.xlu0 %v1041_v39 }
 0x3a8   : > { %v1155_v40 = vpop.f32.mrb[8].mxu1 }
 0x3a9   : > { %v1156_v41 = vadd.f32 %v1155_v40, %v912_v31  ;;  %v2974_v42 = vpop.f32.mrb[9].mxu1 }
 0x3aa   : > { %v1158_v43 = vpop.f32.mrb[10].mxu1 }
 0x3ab   : > { %v1159_v44 = vadd.f32 %v1158_v43, %v912_v31  ;;  %v2975_v45 = vpop.f32.mrb[11].mxu1  ;;  %v1162_v46 = vsel %vm1037_vm4, %v1156_v41, -inf }
 0x3ac   : > { %1163 = vmax.xlane.f32.xlu0 %v1162_v46 }
 0x3ad   : > { %v1165_v47 = vsel %vm1037_vm4, %v1159_v44, -inf }
 0x3ae   : > { %1166 = vmax.xlane.f32.xlu1 %v1165_v47 }
 0x3b0   : > { %v1283_v48 = vpop.f32.mrb[12].mxu1 }
 0x3b1   : > { %v1284_v49 = vadd.f32 %v1283_v48, %v912_v31  ;;  %v2986_v50 = vpop.f32.mrb[13].mxu1 }
 0x3b2   : > { %v1286_v51 = vpop.f32.mrb[14].mxu1 }
 0x3b3   : > { %v1287_v52 = vadd.f32 %v1286_v51, %v912_v31  ;;  %v2987_v53 = vpop.f32.mrb[15].mxu1  ;;  %v1290_v54 = vsel %vm1037_vm4, %v1284_v49, -inf }
 0x3b4   : > { %1291 = vmax.xlane.f32.xlu0 %v1290_v54 }
 0x3b5   : > { %v1293_v55 = vsel %vm1037_vm4, %v1287_v52, -inf }
 0x3b6   : > { %1294 = vmax.xlane.f32.xlu1 %v1293_v55 }
 0x3b8   : > { %v1411_v56 = vpop.f32.mrb[16].mxu1 }
 0x3b9   : > { %v1412_v57 = vadd.f32 %v1411_v56, %v912_v31  ;;  %v2998_v58 = vpop.f32.mrb[17].mxu1 }
 0x3ba   : > { %v1414_v59 = vpop.f32.mrb[18].mxu1 }
 0x3bb   : > { %v1415_v60 = vadd.f32 %v1414_v59, %v912_v31  ;;  %v2999_v61 = vpop.f32.mrb[19].mxu1  ;;  %v1418_v62 = vsel %vm1037_vm4, %v1412_v57, -inf }
 0x3bc   : > { %1419 = vmax.xlane.f32.xlu0 %v1418_v62 }
 0x3bd   : > { %v1421_v63 = vsel %vm1037_vm4, %v1415_v60, -inf }
 0x3be   : > { %1422 = vmax.xlane.f32.xlu1 %v1421_v63 }
 0x431   : > { %v1040_v1 = vpop.xlane.xlu1 %1039 }
 0x432   : > { %v1044_v2 = vsub.f32 %v1031_v33, %v1040_v1 }
 0x433   : > { %v1043_v5 = vpop.xlane.xlu0 %1042 }
 0x434   : > { %v1046_v6 = vmul.f32 1.442695, %v1044_v2  ;;  %v1045_v7 = vsub.f32 %v1034_v36, %v1043_v5 }
 0x436   : > { %3278 = vpow2.f32 %v1046_v6  ;;  %v1048_v8 = vmul.f32 1.442695, %v1045_v7 }
 0x438   : > { %3280 = vpow2.f32 %v1048_v8 }
 0x439   : > { %v1164_v9 = vpop.xlane.xlu0 %1163 }
 0x43a   : > { %v1168_v10 = vsub.f32 %v1156_v41, %v1164_v9 }
 0x43b   : > { %v1167_v19 = vpop.xlane.xlu1 %1166 }
 0x43c   : > { %v1170_v11 = vmul.f32 1.442695, %v1168_v10  ;;  %v1169_v20 = vsub.f32 %v1159_v44, %v1167_v19 }
 0x43e   : > { %3282 = vpow2.f32 %v1170_v11  ;;  %v1172_v23 = vmul.f32 1.442695, %v1169_v20 }
 0x440   : > { %v3279_v12 = vpop.eup %3278  ;;  %3284 = vpow2.f32 %v1172_v23 }
 0x441   : > { %v1050_v13 = vsel %vm1037_vm4, %v3279_v12, 0.0  ;;  %v1292_v22 = vpop.xlane.xlu0 %1291 }
 0x442   : > { %v3281_v14 = vpop.eup %3280  ;;  %1051 = vadd.xlane.f32.xlu0 %v1050_v13  ;;  %v1296_v26 = vsub.f32 %v1284_v49, %v1292_v22 }
 0x443   : > { %v1053_v16 = vsel %vm1037_vm4, %v3281_v14, 0.0  ;;  %v1295_v21 = vpop.xlane.xlu1 %1294 }
 0x444   : > { %1054 = vadd.xlane.f32.xlu1 %v1053_v16  ;;  %v1297_v24 = vsub.f32 %v1287_v52, %v1295_v21  ;;  %v1298_v30 = vmul.f32 1.442695, %v1296_v26 }
 0x446   : > { %v1300_v28 = vmul.f32 1.442695, %v1297_v24 }
 0x448   : > { %v4309_v17 = vpop.eup %3282  ;;  %3286 = vpow2.f32 %v1300_v28 }
 0x449   : > { %v1174_v18 = vsel %vm1037_vm4, %v4309_v17, 0.0  ;;  %v1420_v27 = vpop.xlane.xlu0 %1419  ;;  %3288 = vpow2.f32 %v1298_v30 }
 0x44a   : > { %1175 = vadd.xlane.f32.xlu0 %v1174_v18  ;;  %v1424_v31 = vsub.f32 %v1412_v57, %v1420_v27  ;;  %v3285_v34 = vpop.eup %3284 }
 0x44b   : > { %v1423_v25 = vpop.xlane.xlu1 %1422  ;;  %v1177_v35 = vsel %vm1037_vm4, %v3285_v34, 0.0 }
 0x44c   : > { %v1425_v29 = vsub.f32 %v1415_v60, %v1423_v25  ;;  %v1426_v33 = vmul.f32 1.442695, %v1424_v31 }
 0x44e   : > { %v1428_v32 = vmul.f32 1.442695, %v1425_v29 }
 0x450   : > { %3290 = vpow2.f32 %v1428_v32 }
 0x451   : > { %3292 = vpow2.f32 %v1426_v33 }
 0x452   : > { %v3287_v36 = vpop.eup %3286 }
 0x453   : > { %v3289_v37 = vpop.eup %3288  ;;  %v1305_v38 = vsel %vm1037_vm4, %v3287_v36, 0.0 }
 0x454   : > { %v1302_v40 = vsel %vm1037_vm4, %v3289_v37, 0.0 }
 0x455   : > { %1185 = vrot.lane.b32.xlu1 %v4266_v15, %s3781_s2  ;;  %s4623_s2 = sld [smem:[#allocation36_spill]] }
 0x45a   : > { %v4317_v39 = vpop.eup %3290 }
 0x45b   : > { %v3293_v41 = vpop.eup %3292  ;;  %v1433_v42 = vsel %vm1037_vm4, %v4317_v39, 0.0  ;;  %v3264_v26 = vld [vmem:[%s4623_s2] sm:$0xff]   ;;  %v3265_v29 = vld [vmem:[%s4623_s2 + $0x8] sm:$0xff]  }
 0x45c   : > { %v1430_v43 = vsel %vm1037_vm4, %v3293_v41, 0.0  ;;  %3007 = vmatpush3.bf16.msra.mxu1 %v3264_v26 }
 0x45d   : > { %3008 = vmatprep.subr.bf16.mxu1 %v3771_v0 }
 0x460   : > { %1061 = vrot.lane.b32.xlu0 %v4266_v15, %s3782_s3  ;;  %3009 = vmatpush3.bf16.msra.mxu1 %v3265_v29  ;;  %s4630_s3 = smov 16  }
 0x461   : > { %3022 = vmatprep.subr.bf16.mxu1 %v3771_v0 }
 0x479   : > { %1178 = vadd.xlane.f32.xlu1 %v1177_v35 }
 0x47d   : > { %1306 = vadd.xlane.f32.xlu1 %v1305_v38 }
 0x47f   : > { %1303 = vadd.xlane.f32.xlu0 %v1302_v40 }
 0x481   : > { %1434 = vadd.xlane.f32.xlu1 %v1433_v42 }
 0x483   : > { %1431 = vadd.xlane.f32.xlu0 %v1430_v43 }
 0x492   : > { %1313 = vrot.lane.b32.xlu1 %v4266_v15, %s3783_s1 }
 0x499   : > { %1441 = vrot.lane.b32.xlu0 %v4266_v15, %s3784_s23  ;;  %s4581_s23 = smov 16  }
 0x4cf   : > { %v1052_v44 = vpop.xlane.xlu0 %1051 }
 0x4d0   : > { %3294 = vrcp.f32 %v1052_v44 }
 0x4d1   : > { %v1055_v45 = vpop.xlane.xlu1 %1054 }
 0x4d2   : > { %3296 = vrcp.f32 %v1055_v45 }
 0x4d5   : > { %v1186_v53 = vpop.permute.xlu1 %1185 }
 0x4d7   : > { %v1176_v46 = vpop.xlane.xlu0 %1175 }
 0x4d8   : > { %3298 = vrcp.f32 %v1176_v46 }
 0x4da   : > { %v3295_v47 = vpop.eup %3294 }
 0x4db   : > { %v1062_v48 = vpop.permute.xlu0 %1061  ;;  %v1058_v50 = vmul.f32 %v3295_v47, %v3279_v12 }
 0x4dc   : > { %v3297_v49 = vpop.eup %3296  ;;  %2965 = vmatpush3.bf16.msra.mxu0 %v1062_v48 }
 0x4dd   : > { %2976 = vmatprep.subr.bf16.mxu0 %v3771_v0  ;;  %v1059_v51 = vmul.f32 %v3297_v49, %v3281_v14 }
 0x4df   : > { %v1060_v52 = vpack.c.bf16 %v1059_v51, %v1058_v50 }
 0x4e1   : > { %2967 = vmatmul.mubr.msk.bf16.vlgmr.msra.gmra.mrb[0].mxu0 %vm1037_vm4, %v1060_v52 }
 0x4e2   : > { %2977 = vmatpush3.bf16.msra.mxu0 %v1186_v53  ;;  %2978 = vmatprep.mubr.msk.bf16.mxu0 %vm3772_vm0, %v3771_v0  ;;  %v3299_v56 = vpop.eup %3298 }
 0x4e3   : > { %2988 = vmatprep.subr.bf16.mxu0 %v3771_v0  ;;  %v1182_v60 = vmul.f32 %v3299_v56, %v4309_v17 }
 0x506   : > { %v1179_v15 = vpop.xlane.xlu1 %1178 }
 0x507   : > { %3300 = vrcp.f32 %v1179_v15 }
 0x50a   : > { %v1307_v54 = vpop.xlane.xlu1 %1306 }
 0x50b   : > { %3302 = vrcp.f32 %v1307_v54 }
 0x50c   : > { %v1304_v55 = vpop.xlane.xlu0 %1303 }
 0x50d   : > { %3304 = vrcp.f32 %v1304_v55 }
 0x50e   : > { %v1435_v57 = vpop.xlane.xlu1 %1434 }
 0x510   : > { %v1432_v58 = vpop.xlane.xlu0 %1431 }
 0x511   : > { %v3301_v59 = vpop.eup %3300  ;;  %3306 = vrcp.f32 %v1432_v58 }
 0x512   : > { %v1183_v61 = vmul.f32 %v3301_v59, %v3285_v34  ;;  %3308 = vrcp.f32 %v1435_v57  ;;  %v1314_v1 = vpop.permute.xlu1 %1313 }
 0x514   : > { %v1184_v62 = vpack.c.bf16 %v1183_v61, %v1182_v60  ;;  %v1442_v9 = vpop.permute.xlu0 %1441  ;;  %v3267_v60 = vld [vmem:[%s4555_s11 + $0x8] sm:$0xff]  }
 0x515   : > { %v3303_v63 = vpop.eup %3302 }
 0x516   : > { %2979 = vmatmul.mubr.msk.bf16.vlgmr.msra.gmra.mrb[4].mxu0 %vm1037_vm4, %v1184_v62  ;;  %v1311_v6 = vmul.f32 %v3303_v63, %v3287_v36  ;;  %v3268_v63 = vld [vmem:[%s4553_s9] sm:$0xff]  }
 0x517   : > { %v3305_v2 = vpop.eup %3304  ;;  %2989 = vmatpush3.bf16.msra.mxu0 %v1314_v1  ;;  %2990 = vmatprep.mubr.msk.bf16.mxu0 %vm3772_vm0, %v3771_v0  ;;  %v3269_v1 = vld [vmem:[%s4553_s9 + $0x8] sm:$0xff]  }
 0x518   : > { %v1310_v5 = vmul.f32 %v3305_v2, %v3289_v37  ;;  %3000 = vmatprep.subr.bf16.mxu0 %v3771_v0 }
 0x51a   : > { %v1312_v7 = vpack.c.bf16 %v1311_v6, %v1310_v5 }
 0x51b   : > { %v3307_v8 = vpop.eup %3306 }
 0x51c   : > { %v3309_v10 = vpop.eup %3308  ;;  %v1438_v11 = vmul.f32 %v3307_v8, %v3293_v41  ;;  %v2850_v41 = vld [vmem:[#allocation5] ss:$0 sm:$0xff] }
 0x51d   : > { %v1439_v12 = vmul.f32 %v3309_v10, %v4317_v39 }
 0x51e   : > { %2991 = vmatmul.mubr.msk.bf16.vlgmr.msra.gmra.mrb[8].mxu0 %vm1037_vm4, %v1312_v7 }
 0x51f   : > { %3001 = vmatpush3.bf16.msra.mxu0 %v1442_v9  ;;  %3002 = vmatprep.mubr.msk.bf16.mxu0 %vm3772_vm0, %v3771_v0  ;;  %v1440_v13 = vpack.c.bf16 %v1439_v12, %v1438_v11  ;;  %v2854_v12 = vld [vmem:[#allocation7] ss:$0 sm:$0xff] }
 0x520   : > { %3014 = vmatprep.subr.bf16.mxu0 %v3771_v0 }
 0x526   : > { %3003 = vmatmul.mubr.msk.bf16.vlgmr.msra.gmra.mrb[12].mxu0 %vm1037_vm4, %v1440_v13 }
 0x527   : > { %3018 = vmatprep.mubr.msk.bf16.mxu0 %vm3772_vm0, %v3771_v0  ;;  %3015 = vmatpush3.bf16.msra.mxu0 %v3268_v63 }
 0x528   : > { %3016 = vmatprep.subr.bf16.mxu0 %v3771_v0 }
 0x52b   : > { %3017 = vmatpush3.bf16.msra.mxu0 %v3269_v1 }
 0x52c   : > { %3030 = vmatprep.subr.bf16.mxu0 %v3771_v0 }
 0x5b4   : > { %v1101_v14 = vpop.f32.mrb[0].mxu0 }
 0x5b5   : > { %v2968_v16 = vpop.f32.mrb[1].mxu0 }
 0x5b6   : > { %v1104_v17 = vpop.f32.mrb[2].mxu0 }
 0x5b7   : > { %v1108_v18 = vpack.c.bf16 %v1104_v17, %v1101_v14  ;;  %v2969_v19 = vpop.f32.mrb[3].mxu0  ;;  %v2855_v17 = vld [vmem:[#allocation8] ss:$0 sm:$0xff] }
 0x5b9   : > { %1109 = vst.msk [vmem:[#allocation2] sm:$0xff] %vm989_vm2, %v1108_v18 }
 0x5e9   : > { %v1225_v20 = vpop.f32.mrb[4].mxu0 }
 0x5ea   : > { %v2980_v21 = vpop.f32.mrb[5].mxu0 }
 0x5eb   : > { %v1228_v22 = vpop.f32.mrb[6].mxu0 }
 0x5ec   : > { %v1232_v23 = vpack.c.bf16 %v1228_v22, %v1225_v20  ;;  %v2981_v24 = vpop.f32.mrb[7].mxu0  ;;  %v2860_v22 = vld [vmem:[#allocation11] ss:$0 sm:$0xff] }
 0x5ee   : > { %1234 = vrot.lane.b32.xlu1 %v1232_v23, %s4582_s7  ;;  %s4629_s7 = smov 8  }
 0x5f1   : > { %v1353_v25 = vpop.f32.mrb[8].mxu0 }
 0x5f2   : > { %v2992_v27 = vpop.f32.mrb[9].mxu0 }
 0x5f3   : > { %v1356_v28 = vpop.f32.mrb[10].mxu0 }
 0x5f4   : > { %v1360_v30 = vpack.c.bf16 %v1356_v28, %v1353_v25  ;;  %v2993_v31 = vpop.f32.mrb[11].mxu0 }
 0x5f6   : > { %1362 = vrot.lane.b32.xlu0 %v1360_v30, %s4581_s23  ;;  %v2856_v30 = vld [vmem:[#allocation10] ss:$0 sm:$0xff] }
 0x5f9   : > { %v1481_v32 = vpop.f32.mrb[12].mxu0 }
 0x5fa   : > { %v3004_v33 = vpop.f32.mrb[13].mxu0 }
 0x5fb   : > { %v1484_v34 = vpop.f32.mrb[14].mxu0 }
 0x5fc   : > { %v1488_v35 = vpack.c.bf16 %v1484_v34, %v1481_v32  ;;  %v3005_v36 = vpop.f32.mrb[15].mxu0 }
 0x5fe   : > { %1490 = vrot.lane.b32.xlu1 %v1488_v35, %s4580_s29  ;;  %s2835_s29 = sshll.u32 %s4638_s25, 3 }
 0x5ff   : > { %s896_s17 = scalar_lea.vmem %s4624_s19, %s2835_s29 }
 0x600   : > { %v908_v61 = vld [vmem:[%s896_s17] sm:$0xff]  ;;  %s4627_s17 = smov 72  }
 0x601   : > { %v1685_v62 = vpack.c.bf16 %v908_v61, %v908_v61 }
 0x660   : > { %v1235_v37 = vpop.permute.xlu1 %1234 }
 0x661   : > { %1238 = vst.msk [vmem:[#allocation2] sm:$0xff] %vm1237_vm5, %v1235_v37 }
 0x668   : > { %v1363_v38 = vpop.permute.xlu0 %1362 }
 0x669   : > { %1366 = vst.msk [vmem:[#allocation2] sm:$0xff] %vm1365_vm6, %v1363_v38 }
 0x670   : > { %v1491_v39 = vpop.permute.xlu1 %1490 }
 0x671   : > { %1494 = vst.msk [vmem:[#allocation2] sm:$0xff] %vm1493_vm7, %v1491_v39 }
 0x678   : > { %v1495_v40 = vld [vmem:[#allocation2] sm:$0xff] }
 0x679   : > { %3011 = vmatmul.mubr.msk.bf16.vlgmr.msra.gmra.mrb[20].mxu1 %vm937_vm1, %v1495_v40 }
 0x67a   : > { %3026 = vmatprep.mubr.msk.bf16.mxu1 %vm3772_vm0, %v3771_v0 }
 0x74c   : > { %v1556_v42 = vpop.f32.mrb[20].mxu1 }
 0x74d   : > { %v1557_v43 = vadd.f32 %v2850_v41, %v1556_v42  ;;  %v3012_v44 = vpop.f32.mrb[21].mxu1 }
 0x74e   : > { %v1559_v45 = vpop.f32.mrb[22].mxu1 }
 0x74f   : > { %v1560_v46 = vadd.f32 %v2850_v41, %v1559_v45  ;;  %v3013_v47 = vpop.f32.mrb[23].mxu1  ;;  %v1563_v48 = vadd.f32 %v1557_v43, %v4255_v3 }
 0x751   : > { %v1567_v49 = vsel %vm937_vm1, %v1563_v48, 0.0  ;;  %v1564_v50 = vadd.f32 %v1560_v46, %v4257_v4  ;;  %v3266_v4 = vld [vmem:[%s4555_s11] sm:$0xff]  }
 0x752   : > { %1568 = vadd.xlane.f32.xlu0 %v1567_v49  ;;  %3023 = vmatpush3.bf16.msra.mxu1 %v3266_v4 }
 0x753   : > { %v1570_v51 = vsel %vm937_vm1, %v1564_v50, 0.0  ;;  %3024 = vmatprep.subr.bf16.mxu1 %v3771_v0 }
 0x754   : > { %1571 = vadd.xlane.f32.xlu1 %v1570_v51 }
 0x756   : > { %3025 = vmatpush3.bf16.msra.mxu1 %v3267_v60 }
 0x757   : > { %3036 = vmatprep.subr.bf16.mxu1 %v3771_v0 }
 0x759   : > { %3027 = vmatmul.mubr.msk.bf16.vlgmr.msra.gmra.mrb[24].mxu1 %vm937_vm1, %v1685_v62 }
 0x75a   : > { %3038 = vmatprep.mubr.msk.bf16.mxu1 %vm3772_vm0, %v3771_v0 }
 0x7df   : > { %v1569_v52 = vpop.xlane.xlu0 %1568 }
 0x7e0   : > { %v1574_v53 = vmul.f32 0.03125, %v1569_v52 }
 0x7e1   : > { %v1572_v15 = vpop.xlane.xlu1 %1571 }
 0x7e2   : > { %v1576_v54 = vsub.f32 %v1563_v48, %v1574_v53  ;;  %v1575_v55 = vmul.f32 0.03125, %v1572_v15 }
 0x7e4   : > { %v1577_v56 = vsub.f32 %v1564_v50, %v1575_v55  ;;  %v1578_v57 = vmul.f32 %v1576_v54, %v1576_v54 }
 0x7e6   : > { %v1580_v58 = vsel %vm937_vm1, %v1578_v57, 0.0  ;;  %v1579_v59 = vmul.f32 %v1577_v56, %v1577_v56 }
 0x7e7   : > { %1581 = vadd.xlane.f32.xlu0 %v1580_v58 }
 0x7e8   : > { %v1583_v3 = vsel %vm937_vm1, %v1579_v59, 0.0 }
 0x7eb   : > { %1584 = vadd.xlane.f32.xlu0 %v1583_v3 }
 0x82c   : > { %v1742_v23 = vpop.f32.mrb[24].mxu1 }
 0x82d   : > { %v1743_v24 = vadd.f32 %v2860_v22, %v1742_v23  ;;  %v3028_v25 = vpop.f32.mrb[25].mxu1 }
 0x82e   : > { %v1745_v26 = vpop.f32.mrb[26].mxu1 }
 0x82f   : > { %v4399_v27 = vpack.c.bf16 %v1743_v24, %v1743_v24  ;;  %v3029_v28 = vpop.f32.mrb[27].mxu1 }
 0x831   : > { %1882 = vrot.lane.b32.xlu1 %v4399_v27, %s3774_s28  ;;  %v1760_v29 = vsel %vm989_vm2, %v4399_v27, 0 }
 0x835   : > { %2011 = vrot.lane.b32.xlu1 %v4399_v27, %s3777_s0 }
 0x874   : > { %v1582_v2 = vpop.xlane.xlu0 %1581 }
 0x875   : > { %v1586_v5 = vmul.f32 0.03125, %v1582_v2 }
 0x877   : > { %v1588_v6 = vadd.f32 1e-12, %v1586_v5 }
 0x878   : > { %v1585_v7 = vpop.xlane.xlu0 %1584 }
 0x879   : > { %3310 = vrsqrt.f32 %v1588_v6  ;;  %v1587_v8 = vmul.f32 0.03125, %v1585_v7 }
 0x87b   : > { %v1589_v9 = vadd.f32 1e-12, %v1587_v8 }
 0x87d   : > { %3312 = vrsqrt.f32 %v1589_v9 }
 0x883   : > { %v3311_v10 = vpop.eup %3310 }
 0x884   : > { %v1592_v11 = vmul.f32 %v3311_v10, %v1576_v54 }
 0x886   : > { %v1600_v14 = vmul.f32 %v2854_v12, %v1592_v11 }
 0x887   : > { %v3313_v13 = vpop.eup %3312 }
 0x888   : > { %v1593_v16 = vmul.f32 %v3313_v13, %v1577_v56  ;;  %v4390_v19 = vadd.f32 %v2855_v17, %v1600_v14 }
 0x88a   : > { %v1601_v18 = vmul.f32 %v2854_v12, %v1593_v16 }
 0x88c   : > { %v4392_v20 = vadd.f32 %v2855_v17, %v1601_v18 }
 0x88e   : > { %v1614_v21 = vpack.c.bf16 %v4392_v20, %v4390_v19 }
 0x890   : > { %3019 = vmatmul.mubr.msk.bf16.vlgmr.msra.gmra.mrb[16].mxu0 %vm937_vm1, %v1614_v21 }
 0x891   : > { %3032 = vmatprep.mubr.msk.bf16.mxu0 %vm3772_vm0, %v3771_v0  ;;  %3031 = vmatpush3.bf16.xpose.msra.mxu0 %v1760_v29 }
 0x892   : > { %3042 = vmatprep.subr.bf16.mxu0 %v3771_v0 }
 0x8a3   : > { %v1883_v40 = vpop.permute.xlu1 %1882 }
 0x8a4   : > { %v1888_v41 = vsel %vm989_vm2, %v1883_v40, 0 }
 0x8a7   : > { %v2012_v42 = vpop.permute.xlu1 %2011 }
 0x8a8   : > { %v2017_v44 = vsel %vm989_vm2, %v2012_v42, 0 }
 0x963   : > { %v1671_v31 = vpop.f32.mrb[16].mxu0 }
 0x964   : > { %v1672_v32 = vadd.f32 %v2856_v30, %v1671_v31  ;;  %v3020_v33 = vpop.f32.mrb[17].mxu0 }
 0x965   : > { %v1674_v34 = vpop.f32.mrb[18].mxu0 }
 0x966   : > { %v1675_v35 = vadd.f32 %v2856_v30, %v1674_v34  ;;  %v3021_v36 = vpop.f32.mrb[19].mxu0  ;;  %v1678_v37 = vmul.f32 0.35355338, %v1672_v32 }
 0x968   : > { %v1679_v38 = vmul.f32 0.35355338, %v1675_v35 }
 0x96a   : > { %v1680_v39 = vpack.c.bf16 %v1679_v38, %v1678_v37 }
 0x96c   : > { %1880 = vrot.lane.b32.xlu0 %v1680_v39, %s3774_s28  ;;  %2009 = vrot.lane.b32.xlu1 %v1680_v39, %s3777_s0  ;;  %s899_s0 = scalar_lea.vmem %s4625_s8, %s4638_s25  ;;  %s4632_s8 = sld [smem:[#allocation40_spill]] }
 0x96d   : > { %3033 = vmatmul.mubr.msk.bf16.vlgmr.msra.gmra.mrb[20].mxu0 %vm989_vm2, %v1680_v39  ;;  %v2864_v49 = vld [vmem:[%s899_s0] ss:$0 sm:$0xff]  ;;  %s4634_s28 = sshll.u32 %s4638_s25, 4 }
 0x96e   : > { %3043 = vmatpush3.bf16.xpose.msra.mxu0 %v1888_v41  ;;  %3044 = vmatprep.mubr.msk.bf16.mxu0 %vm3772_vm0, %v3771_v0 }
 0x96f   : > { %3054 = vmatprep.subr.bf16.mxu0 %v3771_v0 }
 0x970   : > { %2140 = vrot.lane.b32.xlu0 %v4399_v27, %s3779_s27  ;;  %2138 = vrot.lane.b32.xlu1 %v1680_v39, %s3779_s27  ;;  %s4628_s27 = smov 88  }
 0x9de   : > { %v1881_v43 = vpop.permute.xlu0 %1880  ;;  %v2010_v46 = vpop.permute.xlu1 %2009 }
 0x9df   : > { %3045 = vmatmul.mubr.msk.bf16.vlgmr.msra.gmra.mrb[24].mxu0 %vm989_vm2, %v1881_v43 }
 0x9e0   : > { %3055 = vmatpush3.bf16.xpose.msra.mxu0 %v2017_v44  ;;  %3056 = vmatprep.mubr.msk.bf16.mxu0 %vm3772_vm0, %v3771_v0 }
 0x9e1   : > { %3066 = vmatprep.subr.bf16.mxu0 %v3771_v0 }
 0x9e2   : > { %v2141_v45 = vpop.permute.xlu0 %2140  ;;  %v2139_v48 = vpop.permute.xlu1 %2138 }
 0x9e3   : > { %v2146_v47 = vsel %vm989_vm2, %v2141_v45, 0 }
 0x9e7   : > { %3057 = vmatmul.mubr.msk.bf16.vlgmr.msra.gmra.mrb[28].mxu0 %vm989_vm2, %v2010_v46 }
 0x9e8   : > { %3067 = vmatpush3.bf16.xpose.msra.mxu0 %v2146_v47  ;;  %3068 = vmatprep.mubr.msk.bf16.mxu0 %vm3772_vm0, %v3771_v0 }
 0x9e9   : > { %3078 = vmatprep.subr.bf16.mxu0 %v3771_v0 }
 0x9ef   : > { %3069 = vmatmul.mubr.msk.bf16.vlgmr.msra.gmra.mrb[32].mxu0 %vm989_vm2, %v2139_v48 }
 0x9f0   : > { %3082 = vmatprep.mubr.msk.bf16.mxu0 %vm3772_vm0, %v3771_v0 }
 0xa40   : > { %v1796_v50 = vpop.f32.mrb[20].mxu0 }
 0xa41   : > { %v1797_v51 = vadd.f32 %v2864_v49, %v1796_v50  ;;  %v3034_v52 = vpop.f32.mrb[21].mxu0 }
 0xa42   : > { %v1799_v53 = vpop.f32.mrb[22].mxu0 }
 0xa43   : > { %v1800_v15 = vadd.f32 %v2864_v49, %v1799_v53  ;;  %v3035_v54 = vpop.f32.mrb[23].mxu0  ;;  %v1803_v55 = vsel %vm989_vm2, %v1797_v51, -inf }
 0xa44   : > { %1804 = vmax.xlane.f32.xlu0 %v1803_v55 }
 0xa45   : > { %v1806_v56 = vsel %vm989_vm2, %v1800_v15, -inf }
 0xa46   : > { %1807 = vmax.xlane.f32.xlu1 %v1806_v56 }
 0xab2   : > { %v1924_v57 = vpop.f32.mrb[24].mxu0 }
 0xab3   : > { %v1925_v58 = vadd.f32 %v2864_v49, %v1924_v57  ;;  %v3046_v59 = vpop.f32.mrb[25].mxu0 }
 0xab4   : > { %v1927_v3 = vpop.f32.mrb[26].mxu0 }
 0xab5   : > { %v1928_v4 = vadd.f32 %v2864_v49, %v1927_v3  ;;  %v3047_v60 = vpop.f32.mrb[27].mxu0  ;;  %v1931_v61 = vsel %vm989_vm2, %v1925_v58, -inf }
 0xab6   : > { %1932 = vmax.xlane.f32.xlu0 %v1931_v61 }
 0xab7   : > { %v1934_v62 = vsel %vm989_vm2, %v1928_v4, -inf }
 0xaba   : > { %1935 = vmax.xlane.f32.xlu0 %v1934_v62  ;;  %v2053_v63 = vpop.f32.mrb[28].mxu0 }
 0xabb   : > { %v2054_v1 = vadd.f32 %v2864_v49, %v2053_v63  ;;  %v3058_v2 = vpop.f32.mrb[29].mxu0 }
 0xabc   : > { %v2056_v5 = vpop.f32.mrb[30].mxu0 }
 0xabd   : > { %v2057_v6 = vadd.f32 %v2864_v49, %v2056_v5  ;;  %v3059_v7 = vpop.f32.mrb[31].mxu0  ;;  %v2060_v8 = vsel %vm989_vm2, %v2054_v1, -inf }
 0xabe   : > { %2061 = vmax.xlane.f32.xlu1 %v2060_v8 }
 0xabf   : > { %v2063_v9 = vsel %vm989_vm2, %v2057_v6, -inf }
 0xac0   : > { %2064 = vmax.xlane.f32.xlu0 %v2063_v9 }
 0xac2   : > { %v2182_v10 = vpop.f32.mrb[32].mxu0 }
 0xac3   : > { %v2183_v11 = vadd.f32 %v2864_v49, %v2182_v10  ;;  %v3070_v12 = vpop.f32.mrb[33].mxu0 }
 0xac4   : > { %v2185_v13 = vpop.f32.mrb[34].mxu0 }
 0xac5   : > { %v2186_v14 = vadd.f32 %v2864_v49, %v2185_v13  ;;  %v3071_v16 = vpop.f32.mrb[35].mxu0  ;;  %v2189_v17 = vsel %vm989_vm2, %v2183_v11, -inf }
 0xac6   : > { %2190 = vmax.xlane.f32.xlu1 %v2189_v17 }
 0xac7   : > { %v2192_v18 = vsel %vm989_vm2, %v2186_v14, -inf }
 0xac8   : > { %2193 = vmax.xlane.f32.xlu0 %v2192_v18 }
 0xad1   : > { %v1805_v25 = vpop.xlane.xlu0 %1804 }
 0xad2   : > { %v1809_v28 = vsub.f32 %v1797_v51, %v1805_v25 }
 0xad3   : > { %v1808_v21 = vpop.xlane.xlu1 %1807 }
 0xad4   : > { %v1810_v22 = vsub.f32 %v1800_v15, %v1808_v21  ;;  %v1811_v29 = vmul.f32 1.442695, %v1809_v28 }
 0xad6   : > { %v1813_v23 = vmul.f32 1.442695, %v1810_v22 }
 0xad7   : > { %1827 = vrot.lane.b32.xlu1 %v4399_v27, %s3773_s4  ;;  %s4626_s4 = smov 80  }
 0xad8   : > { %3314 = vpow2.f32 %v1813_v23 }
 0xad9   : > { %3316 = vpow2.f32 %v1811_v29 }
 0xae2   : > { %v4445_v24 = vpop.eup %3314 }
 0xae3   : > { %v1818_v26 = vsel %vm989_vm2, %v4445_v24, 0.0  ;;  %v3317_v30 = vpop.eup %3316 }
 0xae4   : > { %1819 = vadd.xlane.f32.xlu0 %v1818_v26  ;;  %v1815_v31 = vsel %vm989_vm2, %v3317_v30, 0.0 }
 0xafb   : > { %1816 = vadd.xlane.f32.xlu1 %v1815_v31 }
 0xb43   : > { %v1933_v32 = vpop.xlane.xlu0 %1932 }
 0xb44   : > { %v1937_v33 = vsub.f32 %v1925_v58, %v1933_v32 }
 0xb46   : > { %v1939_v34 = vmul.f32 1.442695, %v1937_v33 }
 0xb47   : > { %v1936_v35 = vpop.xlane.xlu0 %1935 }
 0xb48   : > { %3318 = vpow2.f32 %v1939_v34  ;;  %v1938_v36 = vsub.f32 %v1928_v4, %v1936_v35 }
 0xb4a   : > { %v1941_v37 = vmul.f32 1.442695, %v1938_v36 }
 0xb4b   : > { %v2062_v38 = vpop.xlane.xlu1 %2061 }
 0xb4c   : > { %3320 = vpow2.f32 %v1941_v37  ;;  %v2066_v39 = vsub.f32 %v2054_v1, %v2062_v38 }
 0xb4d   : > { %v2065_v40 = vpop.xlane.xlu0 %2064 }
 0xb4e   : > { %v2068_v41 = vmul.f32 1.442695, %v2066_v39  ;;  %v2067_v42 = vsub.f32 %v2057_v6, %v2065_v40 }
 0xb50   : > { %3322 = vpow2.f32 %v2068_v41  ;;  %v2070_v43 = vmul.f32 1.442695, %v2067_v42 }
 0xb52   : > { %v3319_v44 = vpop.eup %3318  ;;  %3324 = vpow2.f32 %v2070_v43 }
 0xb53   : > { %v2191_v45 = vpop.xlane.xlu1 %2190  ;;  %v1943_v46 = vsel %vm989_vm2, %v3319_v44, 0.0 }
 0xb54   : > { %v2195_v47 = vsub.f32 %v2183_v11, %v2191_v45  ;;  %1944 = vadd.xlane.f32.xlu1 %v1943_v46 }
 0xb55   : > { %v2194_v48 = vpop.xlane.xlu0 %2193 }
 0xb56   : > { %v3321_v49 = vpop.eup %3320  ;;  %v2197_v50 = vmul.f32 1.442695, %v2195_v47  ;;  %v2196_v51 = vsub.f32 %v2186_v14, %v2194_v48  ;;  %v3270_v48 = vld [vmem:[%s4557_s13] sm:$0xff]  }
 0xb57   : > { %v1828_v52 = vpop.permute.xlu1 %1827  ;;  %v1946_v53 = vsel %vm989_vm2, %v3321_v49, 0.0  ;;  %3079 = vmatpush3.bf16.msra.mxu0 %v3270_v48 }
 0xb58   : > { %3326 = vpow2.f32 %v2197_v50  ;;  %v2199_v15 = vmul.f32 1.442695, %v2196_v51  ;;  %v1834_v54 = vsel %vm1832_vm8, %v1828_v52, 0  ;;  %1947 = vadd.xlane.f32.xlu0 %v1946_v53  ;;  %v3271_v51 = vld [vmem:[%s4557_s13 + $0x8] sm:$0xff]   ;;  %3080 = vmatprep.subr.bf16.mxu0 %v3771_v0 }
 0xb59   : > { %3037 = vmatpush3.bf16.msra.mxu1 %v1834_v54 }
 0xb5a   : > { %v3323_v55 = vpop.eup %3322  ;;  %3328 = vpow2.f32 %v2199_v15  ;;  %3048 = vmatprep.subr.bf16.mxu1 %v3771_v0 }
 0xb5b   : > { %v2072_v56 = vsel %vm989_vm2, %v3323_v55, 0.0  ;;  %3081 = vmatpush3.bf16.msra.mxu0 %v3271_v51 }
 0xb5c   : > { %v3325_v57 = vpop.eup %3324  ;;  %2073 = vadd.xlane.f32.xlu1 %v2072_v56  ;;  %3094 = vmatprep.subr.bf16.mxu0 %v3771_v0 }
 0xb5d   : > { %v2075_v58 = vsel %vm989_vm2, %v3325_v57, 0.0 }
 0xb5e   : > { %2076 = vadd.xlane.f32.xlu0 %v2075_v58 }
 0xb62   : > { %v3327_v59 = vpop.eup %3326 }
 0xb63   : > { %v2201_v3 = vsel %vm989_vm2, %v3327_v59, 0.0 }
 0xb64   : > { %v3329_v4 = vpop.eup %3328  ;;  %2202 = vadd.xlane.f32.xlu1 %v2201_v3 }
 0xb65   : > { %v2204_v60 = vsel %vm989_vm2, %v3329_v4, 0.0 }
 0xb66   : > { %2205 = vadd.xlane.f32.xlu0 %v2204_v60  ;;  %v2873_v60 = vld [vmem:[#allocation13] ss:$0 sm:$0xff] }
 0xb71   : > { %v1820_v61 = vpop.xlane.xlu0 %1819 }
 0xb72   : > { %3330 = vrcp.f32 %v1820_v61 }
 0xb75   : > { %2083 = vrot.lane.b32.xlu1 %v4399_v27, %s4626_s4  ;;  %s4635_s4 = sld [smem:[#allocation42_spill]] }
 0xb79   : > { %2212 = vrot.lane.b32.xlu1 %v4399_v27, %s4627_s17 }
 0xb7b   : > { %s904_s17 = scalar_lea.vmem %s4635_s4, %s4634_s28 }
 0xb7c   : > { %1954 = vrot.lane.b32.xlu0 %v4399_v27, %s4628_s27  ;;  %v3331_v63 = vpop.eup %3330 }
 0xb7d   : > { %v1824_v2 = vmul.f32 %v3331_v63, %v4445_v24 }
 0xb88   : > { %v1817_v62 = vpop.xlane.xlu1 %1816 }
 0xb89   : > { %3332 = vrcp.f32 %v1817_v62 }
 0xb93   : > { %v3333_v1 = vpop.eup %3332 }
 0xb94   : > { %v1823_v5 = vmul.f32 %v3333_v1, %v3317_v30 }
 0xb96   : > { %v1825_v6 = vpack.c.bf16 %v1824_v2, %v1823_v5 }
 0xb98   : > { %3039 = vmatmul.mubr.msk.bf16.vlgmr.msra.gmra.mrb[28].mxu1 %vm989_vm2, %v1825_v6 }
 0xb99   : > { %3050 = vmatprep.mubr.msk.bf16.mxu1 %vm3772_vm0, %v3771_v0 }
 0xbe1   : > { %v1945_v8 = vpop.xlane.xlu1 %1944 }
 0xbe5   : > { %v1948_v7 = vpop.xlane.xlu0 %1947 }
 0xbe6   : > { %3334 = vrcp.f32 %v1948_v7 }
 0xbe7   : > { %3336 = vrcp.f32 %v1945_v8 }
 0xbe9   : > { %v2074_v9 = vpop.xlane.xlu1 %2073 }
 0xbeb   : > { %v2077_v27 = vpop.xlane.xlu0 %2076 }
 0xbec   : > { %3338 = vrcp.f32 %v2077_v27 }
 0xbed   : > { %3340 = vrcp.f32 %v2074_v9 }
 0xbf0   : > { %v3335_v10 = vpop.eup %3334 }
 0xbf1   : > { %v2203_v11 = vpop.xlane.xlu1 %2202  ;;  %v3337_v13 = vpop.eup %3336  ;;  %v1952_v14 = vmul.f32 %v3335_v10, %v3321_v49 }
 0xbf2   : > { %v1951_v17 = vmul.f32 %v3337_v13, %v3319_v44 }
 0xbf3   : > { %v2206_v12 = vpop.xlane.xlu0 %2205 }
 0xbf4   : > { %3342 = vrcp.f32 %v2206_v12  ;;  %v1953_v22 = vpack.c.bf16 %v1952_v14, %v1951_v17 }
 0xbf5   : > { %v2084_v21 = vpop.permute.xlu1 %2083  ;;  %3344 = vrcp.f32 %v2203_v11 }
 0xbf6   : > { %v3339_v23 = vpop.eup %3338  ;;  %v2089_v24 = vsel %vm1832_vm8, %v2084_v21, 0  ;;  %v3273_v21 = vld [vmem:[%s4632_s8 + $0x8] sm:$0xff]  }
 0xbf7   : > { %v1955_v16 = vpop.permute.xlu0 %1954  ;;  %v3341_v25 = vpop.eup %3340  ;;  %v2081_v26 = vmul.f32 %v3339_v23, %v3325_v57 }
 0xbf8   : > { %v1960_v18 = vsel %vm1832_vm8, %v1955_v16, 0  ;;  %v2080_v28 = vmul.f32 %v3341_v25, %v3323_v55 }
 0xbf9   : > { %3049 = vmatpush3.bf16.msra.mxu1 %v1960_v18  ;;  %v2213_v29 = vpop.permute.xlu1 %2212 }
 0xbfa   : > { %3060 = vmatprep.subr.bf16.mxu1 %v3771_v0  ;;  %v2082_v30 = vpack.c.bf16 %v2081_v26, %v2080_v28  ;;  %v2218_v32 = vsel %vm1832_vm8, %v2213_v29, 0 }
 0xbfc   : > { %3051 = vmatmul.mubr.msk.bf16.vlgmr.msra.gmra.mrb[32].mxu1 %vm989_vm2, %v1953_v22 }
 0xbfd   : > { %3061 = vmatpush3.bf16.msra.mxu1 %v2089_v24  ;;  %3062 = vmatprep.mubr.msk.bf16.mxu1 %vm3772_vm0, %v3771_v0 }
 0xbfe   : > { %3072 = vmatprep.subr.bf16.mxu1 %v3771_v0  ;;  %v3343_v31 = vpop.eup %3342 }
 0xbff   : > { %v3345_v33 = vpop.eup %3344  ;;  %v2210_v34 = vmul.f32 %v3343_v31, %v3329_v4 }
 0xc00   : > { %v2209_v35 = vmul.f32 %v3345_v33, %v3327_v59 }
 0xc02   : > { %v2211_v36 = vpack.c.bf16 %v2210_v34, %v2209_v35  ;;  %v2878_v35 = vld [vmem:[#allocation16] ss:$0 sm:$0xff] }
 0xc04   : > { %3063 = vmatmul.mubr.msk.bf16.vlgmr.msra.gmra.mrb[36].mxu1 %vm989_vm2, %v2082_v30  ;;  %v2877_v30 = vld [vmem:[#allocation14] ss:$0 sm:$0xff] }
 0xc05   : > { %3073 = vmatpush3.bf16.msra.mxu1 %v2218_v32  ;;  %3074 = vmatprep.mubr.msk.bf16.mxu1 %vm3772_vm0, %v3771_v0 }
 0xc06   : > { %3086 = vmatprep.subr.bf16.mxu1 %v3771_v0 }
 0xc0c   : > { %3075 = vmatmul.mubr.msk.bf16.vlgmr.msra.gmra.mrb[40].mxu1 %vm989_vm2, %v2211_v36 }
 0xc0d   : > { %3090 = vmatprep.mubr.msk.bf16.mxu1 %vm3772_vm0, %v3771_v0 }
 0xc6b   : > { %v1870_v37 = vpop.f32.mrb[28].mxu1 }
 0xc6c   : > { %v3040_v38 = vpop.f32.mrb[29].mxu1 }
 0xc6d   : > { %v1873_v39 = vpop.f32.mrb[30].mxu1 }
 0xc6e   : > { %v1877_v40 = vpack.c.bf16 %v1873_v39, %v1870_v37  ;;  %v3041_v41 = vpop.f32.mrb[31].mxu1 }
 0xc70   : > { %1878 = vst.msk [vmem:[#allocation2] sm:$0xff] %vm989_vm2, %v1877_v40 }
 0xccf   : > { %v1996_v42 = vpop.f32.mrb[32].mxu1 }
 0xcd0   : > { %v3052_v43 = vpop.f32.mrb[33].mxu1 }
 0xcd1   : > { %v1999_v44 = vpop.f32.mrb[34].mxu1 }
 0xcd2   : > { %v2003_v45 = vpack.c.bf16 %v1999_v44, %v1996_v42  ;;  %v3053_v46 = vpop.f32.mrb[35].mxu1  ;;  %v2879_v44 = vld [vmem:[#allocation17] ss:$0 sm:$0xff] }
 0xcd4   : > { %2005 = vrot.lane.b32.xlu0 %v2003_v45, %s4629_s7  ;;  %s4633_s7 = sld [smem:[#allocation41_spill]] }
 0xcd7   : > { %v2125_v47 = vpop.f32.mrb[36].mxu1 }
 0xcd8   : > { %v3064_v49 = vpop.f32.mrb[37].mxu1 }
 0xcd9   : > { %v2128_v50 = vpop.f32.mrb[38].mxu1 }
 0xcda   : > { %v2132_v52 = vpack.c.bf16 %v2128_v50, %v2125_v47  ;;  %v3065_v53 = vpop.f32.mrb[39].mxu1  ;;  %v3274_v40 = vld [vmem:[%s4633_s7] sm:$0xff]   ;;  %v3275_v41 = vld [vmem:[%s4633_s7 + $0x8] sm:$0xff]   ;;  %v3276_v42 = vld [vmem:[%s4633_s7 + $0x10] sm:$0xff]  }
 0xcdb   : > { %v3277_v43 = vld [vmem:[%s4633_s7 + $0x18] sm:$0xff]  }
 0xcdc   : > { %2134 = vrot.lane.b32.xlu1 %v2132_v52, %s4630_s3 }
 0xcdf   : > { %v2254_v15 = vpop.f32.mrb[40].mxu1 }
 0xce0   : > { %v3076_v54 = vpop.f32.mrb[41].mxu1 }
 0xce1   : > { %v2257_v55 = vpop.f32.mrb[42].mxu1 }
 0xce2   : > { %v2261_v56 = vpack.c.bf16 %v2257_v55, %v2254_v15  ;;  %v3077_v57 = vpop.f32.mrb[43].mxu1 }
 0xce4   : > { %2263 = vrot.lane.b32.xlu0 %v2261_v56, %s4631_s5 }
 0xd46   : > { %v2006_v58 = vpop.permute.xlu0 %2005 }
 0xd47   : > { %2008 = vst.msk [vmem:[#allocation2] sm:$0xff] %vm1237_vm5, %v2006_v58 }
 0xd4e   : > { %v2135_v59 = vpop.permute.xlu1 %2134 }
 0xd4f   : > { %2137 = vst.msk [vmem:[#allocation2] sm:$0xff] %vm1365_vm6, %v2135_v59 }
 0xd56   : > { %v2264_v3 = vpop.permute.xlu0 %2263 }
 0xd57   : > { %2266 = vst.msk [vmem:[#allocation2] sm:$0xff] %vm1493_vm7, %v2264_v3 }
 0xd5e   : > { %v2267_v4 = vld [vmem:[#allocation2] sm:$0xff] }
 0xd5f   : > { %3083 = vmatmul.mubr.msk.bf16.vlgmr.msra.gmra.mrb[36].mxu0 %vm937_vm1, %v2267_v4 }
 0xd60   : > { %3102 = vmatprep.mubr.msk.bf16.mxu0 %vm3772_vm0, %v3771_v0  ;;  %3095 = vmatpush3.bf16.msra.mxu0 %v3274_v40 }
 0xd61   : > { %3096 = vmatprep.subr.bf16.mxu0 %v3771_v0 }
 0xd64   : > { %3097 = vmatpush3.bf16.msra.mxu0 %v3275_v41 }
 0xd65   : > { %3098 = vmatprep.subr.bf16.mxu0 %v3771_v0 }
 0xd68   : > { %3099 = vmatpush3.bf16.msra.mxu0 %v3276_v42 }
 0xd69   : > { %3100 = vmatprep.subr.bf16.mxu0 %v3771_v0 }
 0xd6c   : > { %3101 = vmatpush3.bf16.msra.mxu0 %v3277_v43 }
 0xe32   : > { %v2328_v61 = vpop.f32.mrb[36].mxu0 }
 0xe33   : > { %v2329_v62 = vadd.f32 %v2873_v60, %v2328_v61  ;;  %v3084_v63 = vpop.f32.mrb[37].mxu0 }
 0xe34   : > { %v2331_v1 = vpop.f32.mrb[38].mxu0 }
 0xe35   : > { %v2332_v2 = vadd.f32 %v2873_v60, %v2331_v1  ;;  %v3085_v5 = vpop.f32.mrb[39].mxu0  ;;  %v2335_v6 = vadd.f32 %v2329_v62, %v4390_v19 }
 0xe36   : > { %v2883_v5 = vld [vmem:[#allocation19] ss:$0 sm:$0xff] }
 0xe37   : > { %v2339_v7 = vsel %vm937_vm1, %v2335_v6, 0.0  ;;  %v2336_v8 = vadd.f32 %v2332_v2, %v4392_v20  ;;  %v3272_v20 = vld [vmem:[%s4632_s8] sm:$0xff]  }
 0xe38   : > { %2340 = vadd.xlane.f32.xlu1 %v2339_v7  ;;  %3087 = vmatpush3.bf16.msra.mxu1 %v3272_v20 }
 0xe39   : > { %v2342_v27 = vsel %vm937_vm1, %v2336_v8, 0.0  ;;  %3088 = vmatprep.subr.bf16.mxu1 %v3771_v0 }
 0xe3a   : > { %2343 = vadd.xlane.f32.xlu0 %v2342_v27 }
 0xe3c   : > { %3089 = vmatpush3.bf16.msra.mxu1 %v3273_v21 }
 0xec5   : > { %v2341_v9 = vpop.xlane.xlu1 %2340 }
 0xec6   : > { %v2345_v10 = vmul.f32 0.03125, %v2341_v9 }
 0xec7   : > { %v2344_v11 = vpop.xlane.xlu0 %2343 }
 0xec8   : > { %v2347_v12 = vsub.f32 %v2335_v6, %v2345_v10  ;;  %v2346_v13 = vmul.f32 0.03125, %v2344_v11 }
 0xeca   : > { %v2348_v14 = vsub.f32 %v2336_v8, %v2346_v13  ;;  %v2349_v16 = vmul.f32 %v2347_v12, %v2347_v12 }
 0xecc   : > { %v2351_v17 = vsel %vm937_vm1, %v2349_v16, 0.0  ;;  %v2350_v18 = vmul.f32 %v2348_v14, %v2348_v14 }
 0xecd   : > { %2352 = vadd.xlane.f32.xlu0 %v2351_v17 }
 0xece   : > { %v2354_v19 = vsel %vm937_vm1, %v2350_v18, 0.0 }
 0xecf   : > { %2355 = vadd.xlane.f32.xlu1 %v2354_v19 }
 0xf5a   : > { %v2353_v22 = vpop.xlane.xlu0 %2352 }
 0xf5b   : > { %v2357_v23 = vmul.f32 0.03125, %v2353_v22 }
 0xf5c   : > { %v2356_v24 = vpop.xlane.xlu1 %2355 }
 0xf5d   : > { %v2359_v25 = vadd.f32 1e-12, %v2357_v23  ;;  %v2358_v26 = vmul.f32 0.03125, %v2356_v24 }
 0xf5f   : > { %3346 = vrsqrt.f32 %v2359_v25  ;;  %v2360_v28 = vadd.f32 1e-12, %v2358_v26 }
 0xf61   : > { %3348 = vrsqrt.f32 %v2360_v28 }
 0xf69   : > { %v3347_v29 = vpop.eup %3346 }
 0xf6a   : > { %v2363_v31 = vmul.f32 %v3347_v29, %v2347_v12 }
 0xf6b   : > { %v3349_v32 = vpop.eup %3348 }
 0xf6c   : > { %v2371_v33 = vmul.f32 %v2877_v30, %v2363_v31  ;;  %v2364_v34 = vmul.f32 %v3349_v32, %v2348_v14 }
 0xf6e   : > { %v2372_v36 = vmul.f32 %v2877_v30, %v2364_v34  ;;  %v2379_v37 = vadd.f32 %v2878_v35, %v2371_v33  ;;  %v2889_v34 = vld [vmem:[#allocation20] ss:$0 sm:$0xff] }
 0xf70   : > { %v2380_v38 = vadd.f32 %v2878_v35, %v2372_v36 }
 0xf72   : > { %v2381_v39 = vpack.c.bf16 %v2380_v38, %v2379_v37 }
 0xf74   : > { %3091 = vmatmul.mubr.msk.bf16.vlgmr.msra.gmra.mrb[44].mxu1 %vm937_vm1, %v2381_v39 }
0x1047   : > { %v2442_v45 = vpop.f32.mrb[44].mxu1 }
0x1048   : > { %v2443_v46 = vadd.f32 %v2879_v44, %v2442_v45  ;;  %v3092_v47 = vpop.f32.mrb[45].mxu1 }
0x1049   : > { %v2445_v48 = vpop.f32.mrb[46].mxu1 }
0x104a   : > { %v2451_v49 = vmul.f32 0.044715, %v2443_v46  ;;  %v2446_v50 = vadd.f32 %v2879_v44, %v2445_v48  ;;  %v3093_v51 = vpop.f32.mrb[47].mxu1  ;;  %v2449_v60 = vmul.f32 0.5, %v2443_v46 }
0x104c   : > { %v2453_v52 = vmul.f32 %v2451_v49, %v2443_v46  ;;  %v2452_v53 = vmul.f32 0.044715, %v2446_v50  ;;  %v2450_v61 = vmul.f32 0.5, %v2446_v50 }
0x104e   : > { %v2455_v15 = vmul.f32 %v2453_v52, %v2443_v46  ;;  %v2454_v54 = vmul.f32 %v2452_v53, %v2446_v50 }
0x1050   : > { %v2457_v55 = vadd.f32 %v2455_v15, %v2443_v46  ;;  %v2456_v56 = vmul.f32 %v2454_v54, %v2446_v50 }
0x1052   : > { %v2459_v57 = vmul.f32 0.7978846, %v2457_v55  ;;  %v2458_v58 = vadd.f32 %v2456_v56, %v2446_v50 }
0x1054   : > { %3350 = vtanh.f32 %v2459_v57  ;;  %v2460_v59 = vmul.f32 0.7978846, %v2458_v58 }
0x1056   : > { %3352 = vtanh.f32 %v2460_v59 }
0x105e   : > { %v3351_v0 = vpop.eup %3350 }
0x105f   : > { %v2463_v3 = vadd.f32 1.0, %v3351_v0 }
0x1060   : > { %v3353_v4 = vpop.eup %3352 }
0x1061   : > { %v2464_v62 = vadd.f32 1.0, %v3353_v4  ;;  %v2465_v63 = vmul.f32 %v2463_v3, %v2449_v60 }
0x1063   : > { %v2466_v1 = vmul.f32 %v2464_v62, %v2450_v61 }
0x1065   : > { %v2467_v2 = vpack.c.bf16 %v2466_v1, %v2465_v63 }
0x1067   : > { %3103 = vmatmul.mubr.msk.bf16.vlgmr.msra.gmra.mrb[40].mxu0 %vm2507_vm9, %v2467_v2 }
0x113a   : > { %v2545_v6 = vpop.f32.mrb[40].mxu0 }
0x113b   : > { %v2546_v7 = vadd.f32 %v2883_v5, %v2545_v6  ;;  %v3104_v8 = vpop.f32.mrb[41].mxu0 }
0x113c   : > { %v2548_v27 = vpop.f32.mrb[42].mxu0 }
0x113d   : > { %v2549_v9 = vadd.f32 %v2883_v5, %v2548_v27  ;;  %v3105_v10 = vpop.f32.mrb[43].mxu0  ;;  %v2552_v11 = vadd.f32 %v2546_v7, %v2379_v37  ;;  %v2890_v37 = vld [vmem:[#allocation22] ss:$0 sm:$0xff] }
0x113f   : > { %v2556_v12 = vsel %vm937_vm1, %v2552_v11, 0.0  ;;  %v2553_v13 = vadd.f32 %v2549_v9, %v2380_v38 }
0x1140   : > { %2557 = vadd.xlane.f32.xlu0 %v2556_v12 }
0x1141   : > { %v2559_v14 = vsel %vm937_vm1, %v2553_v13, 0.0 }
0x1142   : > { %2560 = vadd.xlane.f32.xlu1 %v2559_v14 }
0x11cd   : > { %v2558_v16 = vpop.xlane.xlu0 %2557 }
0x11ce   : > { %v2562_v17 = vmul.f32 0.03125, %v2558_v16 }
0x11cf   : > { %v2561_v18 = vpop.xlane.xlu1 %2560 }
0x11d0   : > { %v2564_v19 = vsub.f32 %v2552_v11, %v2562_v17  ;;  %v2563_v20 = vmul.f32 0.03125, %v2561_v18 }
0x11d2   : > { %v2565_v21 = vsub.f32 %v2553_v13, %v2563_v20  ;;  %v2566_v22 = vmul.f32 %v2564_v19, %v2564_v19 }
0x11d4   : > { %v2568_v23 = vsel %vm937_vm1, %v2566_v22, 0.0  ;;  %v2567_v24 = vmul.f32 %v2565_v21, %v2565_v21 }
0x11d5   : > { %2569 = vadd.xlane.f32.xlu0 %v2568_v23 }
0x11d6   : > { %v2571_v25 = vsel %vm937_vm1, %v2567_v24, 0.0 }
0x11d7   : > { %2572 = vadd.xlane.f32.xlu1 %v2571_v25 }
0x1262   : > { %v2570_v26 = vpop.xlane.xlu0 %2569 }
0x1263   : > { %v2574_v28 = vmul.f32 0.03125, %v2570_v26 }
0x1264   : > { %v2573_v29 = vpop.xlane.xlu1 %2572 }
0x1265   : > { %v2576_v30 = vadd.f32 1e-12, %v2574_v28  ;;  %v2575_v31 = vmul.f32 0.03125, %v2573_v29 }
0x1267   : > { %3354 = vrsqrt.f32 %v2576_v30  ;;  %v2577_v32 = vadd.f32 1e-12, %v2575_v31 }
0x1269   : > { %3356 = vrsqrt.f32 %v2577_v32 }
0x1271   : > { %v3355_v33 = vpop.eup %3354 }
0x1272   : > { %v2580_v35 = vmul.f32 %v3355_v33, %v2564_v19 }
0x1273   : > { %v3357_v36 = vpop.eup %3356 }
0x1274   : > { %v2588_v38 = vmul.f32 %v2889_v34, %v2580_v35  ;;  %v2581_v39 = vmul.f32 %v3357_v36, %v2565_v21 }
0x1276   : > { %v2596_v40 = vadd.f32 %v2890_v37, %v2588_v38  ;;  %v2589_v41 = vmul.f32 %v2889_v34, %v2581_v39 }
0x1278   : > { %2598 = vst.msk [vmem:[%s904_s17] sm:$0xff] %vm937_vm1, %v2596_v40  ;;  %v2597_v42 = vadd.f32 %v2890_v37, %v2589_v41 }
0x127a   : > { %2599 = vst.msk [vmem:[%s904_s17 + $0x8] sm:$0xff] %vm937_vm1, %v2597_v42 }
0x127b PF: > { %s4636_s27 = sld [smem:[#allocation30_spill]] }
0x1281   : > { %s40_s4 = sadd.s32 1, %s4636_s27  }
0x1282   : > { %p37_p7 = scmp.ge.s32.totalorder %s40_s4, 4  }
0x1284   :  { %39 = sbr.rel (!%p37_p7) target bundleno = 20 (0x14), region = 201 }
0x128b   :  { %2621 = vsyncpa [#allocation4], 1 }
0x128c   :  { %2623 = vsyncpa [#allocation4 + $0x1], 1 }
0x128d   :  { %2624 = vsyncpa [#allocation6], 1 }
0x128e   :  { %2625 = vsyncpa [#allocation9], 1 }
0x128f   :  { %2626 = vsyncpa [#allocation12], 1 }
0x1290   :  { %2627 = vsyncpa [#allocation15], 1 }
0x1291   :  { %2628 = vsyncpa [#allocation18], 1 }
0x1292   :  { %2629 = vsyncpa [#allocation21], 1 }

// kernel: set_pred_forward.14
= control target key start
LH: loop header
LB: loop body
LE: loop exit
PB: predicated region body
PF: predicated region fallthrough
CT: control target
= control target key end

     0   :  { %s4139_s0 = inlined_call_operand.vmem [shape: f32[2,16,32], index: 0, kind: input, shape index: {}]   ;;  %s4140_s1 = inlined_call_operand.vmem [shape: f32[2,8,32], index: 1, kind: input, shape index: {}]   ;;  %s4141_s2 = inlined_call_operand.vmem [shape: f32[2,1,8], index: 2, kind: input, shape index: {}]   ;;  %s4142_s3 = inlined_call_operand.vmem [shape: bf16[32,96], index: 3, kind: input, shape index: {}]   ;;  %s4143_s4 = inlined_call_operand.vmem [shape: f32[1,96], index: 4, kind: input, shape index: {}]   ;;  %s4144_s5 = inlined_call_operand.vmem [shape: bf16[32,32], index: 5, kind: input, shape index: {}]   ;;  %s4145_s6 = inlined_call_operand.vmem [shape: f32[1,32], index: 6, kind: input, shape index: {}]   ;;  %s4146_s7 = inlined_call_operand.vmem [shape: f32[1,32], index: 7, kind: input, shape index: {}]   ;;  %s4147_s8 = inlined_call_operand.vmem [shape: f32[1,32], index: 8, kind: input, shape index: {}]   ;;  %s4148_s9 = inlined_call_operand.vmem [shape: bf16[32,32], index: 9, kind: input, shape index: {}]   ;;  %s4149_s10 = inlined_call_operand.vmem [shape: f32[1,32], index: 10, kind: input, shape index: {}]   ;;  %s4150_s11 = inlined_call_operand.vmem [shape: bf16[32,64], index: 11, kind: input, shape index: {}]   ;;  %s4151_s12 = inlined_call_operand.hbm [shape: f32[1,64], index: 12, kind: input, shape index: {}]   ;;  %s4152_s13 = inlined_call_operand.vmem [shape: bf16[32,32], index: 13, kind: input, shape index: {}]   ;;  %s4153_s14 = inlined_call_operand.hbm [shape: f32[1,32], index: 14, kind: input, shape index: {}]   ;;  %s4154_s15 = inlined_call_operand.hbm [shape: f32[1,32], index: 15, kind: input, shape index: {}]   ;;  %s4155_s16 = inlined_call_operand.hbm [shape: f32[1,32], index: 16, kind: input, shape index: {}]   ;;  %s4156_s17 = inlined_call_operand.vmem [shape: bf16[32,64], index: 17, kind: input, shape index: {}]   ;;  %s4157_s18 = inlined_call_operand.hbm [shape: f32[1,64], index: 18, kind: input, shape index: {}]   ;;  %s4158_s19 = inlined_call_operand.vmem [shape: bf16[64,32], index: 19, kind: input, shape index: {}]   ;;  %s4159_s20 = inlined_call_operand.hbm [shape: f32[1,32], index: 20, kind: input, shape index: {}]   ;;  %s4160_s21 = inlined_call_operand.hbm [shape: f32[1,32], index: 21, kind: input, shape index: {}]   ;;  %s4161_s22 = inlined_call_operand.hbm [shape: f32[1,32], index: 22, kind: input, shape index: {}]   ;;  %s4162_s23 = inlined_call_operand.vmem [shape: f32[2,16,32], index: 23, kind: output, shape index: {}]  }
   0x1   :  { %4176 = sst [smem:[#allocation22_spill]] %s4139_s0 }
   0x2   :  { %4177 = sst [smem:[#allocation23_spill]] %s4140_s1 }
   0x3   :  { %4178 = sst [smem:[#allocation24_spill]] %s4141_s2 }
   0x4   :  { %4179 = sst [smem:[#allocation25_spill]] %s4142_s3 }
   0x5   :  { %4180 = sst [smem:[#allocation26_spill]] %s4143_s4 }
   0x6   :  { %4181 = sst [smem:[#allocation27_spill]] %s4144_s5 }
   0x7   :  { %4182 = sst [smem:[#allocation28_spill]] %s4145_s6 }
   0x8   :  { %4183 = sst [smem:[#allocation29_spill]] %s4146_s7 }
   0x9   :  { %4184 = sst [smem:[#allocation30_spill]] %s4158_s19 }
   0xa   :  { %4185 = sst [smem:[#allocation31_spill]] %s4162_s23 }
   0xb   :  { %28 = vsyncpa [#allocation4], 0 }
   0xc   :  { %29 = vsyncpa [#allocation6], 0 }
   0xd   :  { %30 = vsyncpa [#allocation9], 0 }
   0xe   :  { %31 = vsyncpa [#allocation12], 0 }
   0xf   :  { %32 = vsyncpa [#allocation15], 0  ;;  %s3586_s4 = smov 0  }
  0x10 LB: > { %4186 = sst [smem:[#allocation21_spill]] %s3439_s4  ;;  %s3441_s30 = smov [#allocation5]   ;;  %s3439_s4 = sphi %s3586_s4, %s38_s4  }
  0x11   : > { %s621_s24 = sshll.u32 %s3441_s30, 4  ;;  %s3592_s25 = sadd.s32 4294967295, %s3439_s4   ;;  %s3597_s24 = int_to_ptr.vmem [resolvable:$true] %s621_s24 }
  0x12   : > { %p2695_p0 = scmp.ge.s32.totalorder %s3439_s4, 1  ;;  %p567_p1 = scmp.lt.s32.totalorder %s3439_s4, 3 }
  0x13   : > { %p4167_p2 = scmp.eq.s32.totalorder %s3592_s25, 0  ;;  %s3442_s1 = smov [#allocation8]  }
  0x14   : > { %p3599_p3 = pnand %p2695_p0, %p567_p1  ;;  %s643_s26 = sshll.u32 %s3442_s1, 4  ;;  %s3605_s26 = int_to_ptr.vmem [resolvable:$true] %s643_s26 }
  0x15   : > { %s3443_s2 = smov [#allocation11]   ;;  %s3444_s7 = smov [#allocation3]  }
  0x16   : > { %s4187_s5 = scalar_select %p3599_p3, 1, 0 }
  0x17   : > { %p3019_p4 = pneg %p3599_p3  ;;  %s671_s6 = sshll.u32 %s3443_s2, 4  ;;  %s3613_s6 = int_to_ptr.vmem [resolvable:$true] %s671_s6 }
  0x18   : > { %s607_s28 = sshll.u32 %s3444_s7, 4  ;;  %s3189_s0 = scalar_lea.hbm %s4153_s14, 16  ;;  %s3615_s28 = int_to_ptr.vmem [resolvable:$true] %s607_s28 }
  0x19   : > { %p3609_p5 = pnand %p4167_p2, %p3019_p4  ;;  %p3190_p6 = scmp.ne.s32.totalorder %s4153_s14, %s3189_s0 }
  0x1a   : > { %p3196_p10 = scmp.lt.u32.totalorder %s3189_s0, %s4153_s14 }
  0x1b   : > { %p3625_p7 = pneg %p3609_p5 }
  0x1d   : > { %p3192_p8 = pnand %p3625_p7, %p3190_p6 }
  0x1f   : > { %p3193_p9 = pneg %p3192_p8 }
  0x21   : > { %p3198_p11 = pnand %p3196_p10, %p3193_p9 }
  0x23   : > { %3201 = shalt.err (!%p3198_p11)
}
  0x24   : > { %s3202_s29 = scalar_lea.vmem %s3597_s24, 16  ;;  %s3209_s3 = scalar_lea.vmem %s3597_s24, 32 }
  0x25   : > { %p3203_p12 = scmp.ne.s32.totalorder %s3597_s24, %s3202_s29  ;;  %p3210_p1 = scmp.lt.s32.totalorder %s3597_s24, %s3597_s24 }
  0x26   : > { %p3211_p4 = scmp.lt.s32.totalorder %s3209_s3, %s3202_s29 }
  0x27   : > { %p3205_p13 = pnand %p3203_p12, %p3625_p7 }
  0x28   : > { %p3212_p6 = por %p3211_p4, %p3210_p1 }
  0x29   : > { %p3206_p0 = pneg %p3205_p13 }
  0x2b   : > { %p3213_p8 = pnand %p3212_p6, %p3206_p0 }
  0x2d   : > { %3216 = shalt.err (!%p3213_p8)
}
  0x2e   : > { %3025 = dma.hbm_to_vmem [thread:$0]  (!%p3609_p5), %s4153_s14, 16, %s3597_s24, [#allocation6]  }
  0x2f   : > { %s3217_s7 = scalar_lea.hbm %s4155_s16, 16 }
  0x30   : > { %p3218_p9 = scmp.ne.s32.totalorder %s4155_s16, %s3217_s7  ;;  %p3224_p12 = scmp.lt.u32.totalorder %s3217_s7, %s4155_s16 }
  0x32   : > { %p3220_p10 = pnand %p3218_p9, %p3625_p7 }
  0x34   : > { %p3221_p11 = pneg %p3220_p10 }
  0x36   : > { %p3226_p13 = pnand %p3224_p12, %p3221_p11 }
  0x38   : > { %3229 = shalt.err (!%p3226_p13)
}
  0x39   : > { %s3230_s24 = scalar_lea.vmem %s3605_s26, 16  ;;  %s3237_s19 = scalar_lea.vmem %s3605_s26, 32 }
  0x3a   : > { %p3231_p0 = scmp.ne.s32.totalorder %s3605_s26, %s3230_s24  ;;  %p3238_p6 = scmp.lt.s32.totalorder %s3605_s26, %s3605_s26 }
  0x3b   : > { %p3239_p8 = scmp.lt.s32.totalorder %s3237_s19, %s3230_s24 }
  0x3c   : > { %p3233_p1 = pnand %p3231_p0, %p3625_p7 }
  0x3d   : > { %p3240_p9 = por %p3239_p8, %p3238_p6 }
  0x3e   : > { %p3234_p4 = pneg %p3233_p1 }
  0x40   : > { %p3241_p10 = pnand %p3240_p9, %p3234_p4 }
  0x42   : > { %3244 = shalt.err (!%p3241_p10)
}
  0x43   : > { %3031 = dma.hbm_to_vmem [thread:$0]  (!%p3609_p5), %s4155_s16, 16, %s3605_s26, [#allocation9]  }
  0x44   : > { %s3245_s1 = scalar_lea.hbm %s4159_s20, 16 }
  0x45   : > { %p3246_p11 = scmp.ne.s32.totalorder %s4159_s20, %s3245_s1  ;;  %p3252_p0 = scmp.lt.u32.totalorder %s3245_s1, %s4159_s20 }
  0x47   : > { %p3248_p12 = pnand %p3246_p11, %p3625_p7 }
  0x49   : > { %p3249_p13 = pneg %p3248_p12 }
  0x4b   : > { %p3254_p1 = pnand %p3252_p0, %p3249_p13 }
  0x4d   : > { %3257 = shalt.err (!%p3254_p1)
}
  0x4e   : > { %s3258_s26 = scalar_lea.vmem %s3613_s6, 16  ;;  %s3265_s19 = scalar_lea.vmem %s3613_s6, 32 }
  0x4f   : > { %p3259_p4 = scmp.ne.s32.totalorder %s3613_s6, %s3258_s26  ;;  %p3266_p9 = scmp.lt.s32.totalorder %s3613_s6, %s3613_s6 }
  0x50   : > { %p3267_p10 = scmp.lt.s32.totalorder %s3265_s19, %s3258_s26 }
  0x51   : > { %p3261_p6 = pnand %p3259_p4, %p3625_p7 }
  0x52   : > { %p3268_p11 = por %p3267_p10, %p3266_p9 }
  0x53   : > { %p3262_p8 = pneg %p3261_p6 }
  0x55   : > { %p3269_p12 = pnand %p3268_p11, %p3262_p8 }
  0x57   : > { %3272 = shalt.err (!%p3269_p12)
}
  0x58   : > { %3037 = dma.hbm_to_vmem [thread:$0]  (!%p3609_p5), %s4159_s20, 16, %s3613_s6, [#allocation12]  }
  0x59   : > { %s3273_s1 = scalar_lea.hbm %s4151_s12, 16 }
  0x5a   : > { %p3274_p13 = scmp.ne.s32.totalorder %s4151_s12, %s3273_s1  ;;  %p3280_p4 = scmp.lt.u32.totalorder %s3273_s1, %s4151_s12 }
  0x5c   : > { %p3276_p0 = pnand %p3274_p13, %p3625_p7 }
  0x5e   : > { %p3277_p1 = pneg %p3276_p0 }
  0x60   : > { %p3282_p6 = pnand %p3280_p4, %p3277_p1 }
  0x62   : > { %3285 = shalt.err (!%p3282_p6)
}
  0x63   : > { %s3286_s6 = scalar_lea.vmem %s3615_s28, 16  ;;  %s3293_s26 = scalar_lea.vmem %s3615_s28, 32 }
  0x64   : > { %p3287_p8 = scmp.ne.s32.totalorder %s3615_s28, %s3286_s6  ;;  %p3294_p11 = scmp.lt.s32.totalorder %s3615_s28, %s3615_s28 }
  0x65   : > { %p3295_p12 = scmp.lt.s32.totalorder %s3293_s26, %s3286_s6 }
  0x66   : > { %p3289_p9 = pnand %p3287_p8, %p3625_p7 }
  0x67   : > { %p3296_p13 = por %p3295_p12, %p3294_p11 }
  0x68   : > { %p3290_p10 = pneg %p3289_p9 }
  0x6a   : > { %p3297_p0 = pnand %p3296_p13, %p3290_p10 }
  0x6c   : > { %3300 = shalt.err (!%p3297_p0)
}
  0x6d   : > { %3022 = dma.hbm_to_vmem [thread:$0]  (!%p3609_p5), %s4151_s12, 16, %s3615_s28, [#allocation4]  }
  0x6e   : > { %s3445_s4 = smov [#allocation7]   ;;  %s3446_s30 = smov [#allocation10]  }
  0x6f   : > { %s632_s0 = sshll.u32 %s3445_s4, 4  ;;  %s657_s1 = sshll.u32 %s3446_s30, 4  ;;  %s633_s0 = int_to_ptr.vmem [resolvable:$true] %s632_s0  ;;  %s658_s1 = int_to_ptr.vmem [resolvable:$true] %s657_s1 }
  0x70   : > { %s3301_s3 = scalar_lea.hbm %s4154_s15, 16 }
  0x71   : > { %p3302_p1 = scmp.ne.s32.totalorder %s4154_s15, %s3301_s3  ;;  %p3308_p8 = scmp.lt.u32.totalorder %s3301_s3, %s4154_s15 }
  0x73   : > { %p3304_p4 = pnand %p3302_p1, %p3625_p7 }
  0x75   : > { %p3305_p6 = pneg %p3304_p4 }
  0x77   : > { %p3310_p9 = pnand %p3308_p8, %p3305_p6 }
  0x79   : > { %3313 = shalt.err (!%p3310_p9)
}
  0x7a   : > { %s3314_s28 = scalar_lea.vmem %s633_s0, 16  ;;  %s3321_s23 = scalar_lea.vmem %s633_s0, 32 }
  0x7b   : > { %p3315_p10 = scmp.ne.s32.totalorder %s633_s0, %s3314_s28  ;;  %p3322_p13 = scmp.lt.s32.totalorder %s633_s0, %s633_s0 }
  0x7c   : > { %p3323_p0 = scmp.lt.s32.totalorder %s3321_s23, %s3314_s28 }
  0x7d   : > { %p3317_p11 = pnand %p3315_p10, %p3625_p7 }
  0x7e   : > { %p3324_p2 = por %p3323_p0, %p3322_p13 }
  0x7f   : > { %p3318_p12 = pneg %p3317_p11 }
  0x81   : > { %p3325_p3 = pnand %p3324_p2, %p3318_p12 }
  0x83   : > { %3328 = shalt.err (!%p3325_p3)
}
  0x84   : > { %3028 = dma.hbm_to_vmem [thread:$0]  (!%p3609_p5), %s4154_s15, 16, %s633_s0, [#allocation6]  }
  0x85   : > { %s3329_s3 = scalar_lea.hbm %s4157_s18, 16 }
  0x86   : > { %p3330_p1 = scmp.ne.s32.totalorder %s4157_s18, %s3329_s3  ;;  %p3336_p3 = scmp.lt.u32.totalorder %s3329_s3, %s4157_s18 }
  0x88   : > { %p3332_p4 = pnand %p3330_p1, %p3625_p7 }
  0x8a   : > { %p3333_p2 = pneg %p3332_p4 }
  0x8c   : > { %p3338_p6 = pnand %p3336_p3, %p3333_p2 }
  0x8e   : > { %3341 = shalt.err (!%p3338_p6)
}
  0x8f   : > { %s3342_s28 = scalar_lea.vmem %s658_s1, 16  ;;  %s3349_s0 = scalar_lea.vmem %s658_s1, 32 }
  0x90   : > { %p3343_p8 = scmp.ne.s32.totalorder %s658_s1, %s3342_s28  ;;  %p3350_p11 = scmp.lt.s32.totalorder %s658_s1, %s658_s1 }
  0x91   : > { %p3351_p12 = scmp.lt.s32.totalorder %s3349_s0, %s3342_s28 }
  0x92   : > { %p3345_p9 = pnand %p3343_p8, %p3625_p7 }
  0x93   : > { %p3352_p13 = por %p3351_p12, %p3350_p11 }
  0x94   : > { %p3346_p10 = pneg %p3345_p9 }
  0x96   : > { %p3353_p0 = pnand %p3352_p13, %p3346_p10 }
  0x98   : > { %3356 = shalt.err (!%p3353_p0)
}
  0x99   : > { %3034 = dma.hbm_to_vmem [thread:$0]  (!%p3609_p5), %s4157_s18, 16, %s658_s1, [#allocation9]  }
  0x9a   : > { %s3447_s30 = smov [#allocation13]   ;;  %s3448_s29 = smov [#allocation14]  }
  0x9b   : > { %s682_s7 = sshll.u32 %s3447_s30, 4  ;;  %s693_s3 = sshll.u32 %s3448_s29, 4  ;;  %s683_s7 = int_to_ptr.vmem [resolvable:$true] %s682_s7  ;;  %s694_s3 = int_to_ptr.vmem [resolvable:$true] %s693_s3 }
  0x9c   : > { %s3357_s26 = scalar_lea.hbm %s4160_s21, 16 }
  0x9d   : > { %p3358_p1 = scmp.ne.s32.totalorder %s4160_s21, %s3357_s26  ;;  %p3364_p3 = scmp.lt.u32.totalorder %s3357_s26, %s4160_s21 }
  0x9f   : > { %p3360_p4 = pnand %p3358_p1, %p3625_p7 }
  0xa1   : > { %p3361_p2 = pneg %p3360_p4 }
  0xa3   : > { %p3366_p6 = pnand %p3364_p3, %p3361_p2 }
  0xa5   : > { %3369 = shalt.err (!%p3366_p6)
}
  0xa6   : > { %s3370_s1 = scalar_lea.vmem %s683_s7, 16  ;;  %s3377_s4 = scalar_lea.vmem %s683_s7, 32 }
  0xa7   : > { %p3371_p8 = scmp.ne.s32.totalorder %s683_s7, %s3370_s1  ;;  %p3378_p11 = scmp.lt.s32.totalorder %s683_s7, %s683_s7 }
  0xa8   : > { %p3379_p12 = scmp.lt.s32.totalorder %s3377_s4, %s3370_s1 }
  0xa9   : > { %p3373_p9 = pnand %p3371_p8, %p3625_p7 }
  0xaa   : > { %p3380_p13 = por %p3379_p12, %p3378_p11 }
  0xab   : > { %p3374_p10 = pneg %p3373_p9 }
  0xad   : > { %p3381_p0 = pnand %p3380_p13, %p3374_p10 }
  0xaf   : > { %3384 = shalt.err (!%p3381_p0)
}
  0xb0   : > { %3040 = dma.hbm_to_vmem [thread:$0]  (!%p3609_p5), %s4160_s21, 16, %s683_s7, [#allocation12]  }
  0xb1   : > { %s3385_s26 = scalar_lea.hbm %s4161_s22, 16 }
  0xb2   : > { %p3386_p1 = scmp.ne.s32.totalorder %s4161_s22, %s3385_s26  ;;  %p3392_p3 = scmp.lt.u32.totalorder %s3385_s26, %s4161_s22 }
  0xb4   : > { %p3388_p4 = pnand %p3386_p1, %p3625_p7 }
  0xb6   : > { %p3389_p2 = pneg %p3388_p4 }
  0xb8   : > { %p3394_p6 = pnand %p3392_p3, %p3389_p2 }
  0xba   : > { %3397 = shalt.err (!%p3394_p6)
}
  0xbb   : > { %s3398_s1 = scalar_lea.vmem %s694_s3, 16  ;;  %s3405_s7 = scalar_lea.vmem %s694_s3, 32 }
  0xbc   : > { %p3399_p8 = scmp.ne.s32.totalorder %s694_s3, %s3398_s1  ;;  %p3406_p11 = scmp.lt.s32.totalorder %s694_s3, %s694_s3 }
  0xbd   : > { %p3407_p12 = scmp.lt.s32.totalorder %s3405_s7, %s3398_s1 }
  0xbe   : > { %p3401_p9 = pnand %p3399_p8, %p3625_p7 }
  0xbf   : > { %p3408_p13 = por %p3407_p12, %p3406_p11 }
  0xc0   : > { %p3402_p10 = pneg %p3401_p9 }
  0xc2   : > { %p3409_p0 = pnand %p3408_p13, %p3402_p10 }
  0xc4   : > { %3412 = shalt.err (!%p3409_p0)
}
  0xc5   : > { %3043 = dma.hbm_to_vmem [thread:$0]  (!%p3609_p5), %s4161_s22, 16, %s694_s3, [#allocation15]  }
  0xc6   : > { %p4190_p1 = scmp.ne.s32.totalorder %s4187_s5, 0 }
  0xc7   : > { %p4191_p4 = scmp.eq.s32.totalorder (!%p4190_p1), %s3592_s25, 0 }
  0xc8   : > { %727 = sbr.rel (%p4190_p1) target bundleno = 4590 (0x11ee), region = 112 }
  0xcf   : > { %3418 = dma.done.wait (%p4191_p4), [#allocation4], 16   ;;  %p4192_p7 = pmov %p4191_p4 }
  0xd0   : > { %p4193_p2 = pmov %p4191_p4 }
  0xd1   : > { %3420 = vsyncadd (%p4192_p7), [#allocation4], 4294967280 }
  0xd2   : > { %3422 = dma.done.wait (%p4193_p2), [#allocation6], 32   ;;  %p4194_p3 = pmov %p4193_p2 }
  0xd3   : > { %p4195_p6 = pmov %p4193_p2 }
  0xd4   : > { %3424 = vsyncadd (%p4194_p3), [#allocation6], 4294967264 }
  0xd5   : > { %3426 = dma.done.wait (%p4195_p6), [#allocation9], 32   ;;  %p4196_p5 = pmov %p4193_p2 }
  0xd6   : > { %p4197_p8 = pmov %p4193_p2 }
  0xd7   : > { %3428 = vsyncadd (%p4196_p5), [#allocation9], 4294967264 }
  0xd8   : > { %3430 = dma.done.wait (%p4197_p8), [#allocation12], 32   ;;  %p4198_p9 = pmov %p4193_p2 }
  0xd9   : > { %p4199_p10 = pmov %p4193_p2 }
  0xda   : > { %3432 = vsyncadd (%p4198_p9), [#allocation12], 4294967264 }
  0xdb   : > { %3434 = dma.done.wait (%p4199_p10), [#allocation15], 16   ;;  %p4200_p11 = pmov %p4193_p2 }
  0xdc   : > { %p826_p12 = scmp.lt.s32.totalorder %s3592_s25, 1  ;;  %v3449_v0 = vmov 0.0   ;;  %vm3450_vm0 = vmmov 0   ;;  %s4201_s3 = sld [smem:[#allocation22_spill]]  ;;  %vm875_vm1 = vcmask 261120   ;;  %vm927_vm2 = vcmask 64512  }
  0xdd   : > { %3436 = vsyncadd (%p4200_p11), [#allocation15], 4294967280  ;;  %2831 = vmatprep.subr.bf16.mxu1 %v3449_v0  ;;  %2835 = vmatprep.mubr.msk.bf16.mxu1 %vm3450_vm0, %v3449_v0  ;;  %s4202_s26 = sld [smem:[#allocation25_spill]]  ;;  %s4203_s1 = sld [smem:[#allocation26_spill]]  ;;  %v847_v28 = vlaneseq  ;;  %v3458_v30 = vmov -10000.0   ;;  %vm975_vm4 = vcmask 130048  }
  0xde   : > { %s4220_s25 = smov (!%p826_p12, %s3592_s25), 1  ;;  %2845 = vmatprep.subr.bf16.mxu0 %v3449_v0  ;;  %2847 = vmatprep.mubr.msk.bf16.mxu0 %vm3450_vm0, %v3449_v0  ;;  %s3451_s7 = smov 96   ;;  %vm1175_vm5 = vcmask 130112   ;;  %vm1303_vm6 = vcmask 195712   ;;  %vm1431_vm7 = vcmask 261312   ;;  %vm1770_vm8 = vcmask 1043456  }
  0xdf   : > { %s4169_s5 = sshll.u32 %s4220_s25, 4  ;;  %s3452_s4 = smov 120   ;;  %v848_v29 = vand.u32 127, %v847_v28  ;;  %vm2445_vm9 = vcmask 523264  }
  0xe0   : > { %s4173_s30 = smov 88   ;;  %s4175_s27 = smov 80  }
  0xe1   : > { %s3455_s2 = smov 112   ;;  %vm849_vm3 = vcmp.lt.s32.totalorder %v848_v29, 15  ;;  %s3459_s24 = smov 56  }
  0xe2   : > { %s830_s29 = scalar_lea.vmem %s4201_s3, %s4169_s5  ;;  %s4174_s3 = smov 72   ;;  %v850_v31 = vsel %vm849_vm3, 0.0, %v3458_v30 }
  0xe3   : > { %v3093_v1 = vld [vmem:[%s4202_s26] sm:$0xff]   ;;  %v3094_v2 = vld [vmem:[%s4202_s26 + $0x8] sm:$0xff]   ;;  %s3460_s6 = smov 64   ;;  %s3461_s19 = smov 48  }
  0xe4   : > { %2832 = vmatpush3.bf16.msra.mxu1 %v3093_v1  ;;  %v3835_v3 = vld [vmem:[%s830_s29] sm:$0xff]  ;;  %v3837_v4 = vld [vmem:[%s830_s29 + $0x8] sm:$0xff]  ;;  %s3457_s29 = smov 104   ;;  %s3462_s28 = smov 40  }
  0xe5   : > { %2833 = vmatprep.subr.bf16.mxu1 %v3449_v0  ;;  %v855_v5 = vpack.c.bf16 %v3837_v4, %v3835_v3  ;;  %v2719_v6 = vld [vmem:[%s4203_s1] ss:$0 sm:$0xff]  ;;  %s4172_s0 = smov 8   ;;  %s4170_s23 = smov 24  }
  0xe6   : > { %s4211_s5 = smov 88  }
  0xe8   : > { %2834 = vmatpush3.bf16.msra.mxu1 %v3094_v2 }
  0xe9   : > { %2839 = vmatprep.subr.bf16.mxu1 %v3449_v0 }
  0xeb   : > { %2836 = vmatmul.mubr.msk.bf16.vlgmr.msra.gmra.mrb[0].mxu1 %vm875_vm1, %v855_v5 }
  0xec   : > { %2841 = vmatprep.mubr.msk.bf16.mxu1 %vm3450_vm0, %v3449_v0 }
 0x1be   : > { %v913_v7 = vpop.f32.mrb[0].mxu1 }
 0x1bf   : > { %v914_v8 = vadd.f32 %v2719_v6, %v913_v7  ;;  %v2837_v9 = vpop.f32.mrb[1].mxu1 }
 0x1c0   : > { %v916_v10 = vpop.f32.mrb[2].mxu1 }
 0x1c1   : > { %v917_v11 = vadd.f32 %v2719_v6, %v916_v10  ;;  %v2838_v12 = vpop.f32.mrb[3].mxu1  ;;  %v920_v13 = vmul.f32 0.35355338, %v914_v8 }
 0x1c3   : > { %v921_v14 = vmul.f32 0.35355338, %v917_v11  ;;  %v3849_v15 = vpack.c.bf16 %v917_v11, %v914_v8 }
 0x1c5   : > { %v922_v16 = vpack.c.bf16 %v921_v14, %v920_v13  ;;  %925 = vrot.lane.b32.xlu0 %v3849_v15, %s3451_s7 }
 0x1c7   : > { %1049 = vrot.lane.b32.xlu1 %v922_v16, %s3452_s4 }
 0x1c9   : > { %1051 = vrot.lane.b32.xlu0 %v3849_v15, %s4173_s30  ;;  %s4206_s30 = sld [smem:[#allocation23_spill]] }
 0x1cb   : > { %1179 = vrot.lane.b32.xlu1 %v3849_v15, %s4175_s27 }
 0x1cd   : > { %1177 = vrot.lane.b32.xlu0 %v922_v16, %s3455_s2 }
 0x1cf   : > { %1307 = vrot.lane.b32.xlu1 %v3849_v15, %s4174_s3 }
 0x1d1   : > { %1305 = vrot.lane.b32.xlu0 %v922_v16, %s3457_s29 }
 0x237   : > { %v926_v17 = vpop.permute.xlu0 %925 }
 0x238   : > { %v932_v18 = vsel %vm927_vm2, %v926_v17, 0 }
 0x239   : > { %2840 = vmatpush3.bf16.xpose.msra.mxu1 %v932_v18  ;;  %v1050_v20 = vpop.permute.xlu1 %1049 }
 0x23a   : > { %2851 = vmatprep.subr.bf16.mxu1 %v3449_v0 }
 0x23b   : > { %v1052_v19 = vpop.permute.xlu0 %1051 }
 0x23c   : > { %v1057_v21 = vsel %vm927_vm2, %v1052_v19, 0 }
 0x23d   : > { %v1180_v22 = vpop.permute.xlu1 %1179 }
 0x23e   : > { %v1185_v23 = vsel %vm927_vm2, %v1180_v22, 0 }
 0x23f   : > { %v1178_v25 = vpop.permute.xlu0 %1177 }
 0x240   : > { %2842 = vmatmul.mubr.msk.bf16.vlgmr.msra.gmra.mrb[4].mxu1 %vm927_vm2, %v922_v16 }
 0x241   : > { %2852 = vmatpush3.bf16.xpose.msra.mxu1 %v1057_v21  ;;  %2853 = vmatprep.mubr.msk.bf16.mxu1 %vm3450_vm0, %v3449_v0  ;;  %v1308_v24 = vpop.permute.xlu1 %1307 }
 0x242   : > { %2863 = vmatprep.subr.bf16.mxu1 %v3449_v0  ;;  %v1313_v26 = vsel %vm927_vm2, %v1308_v24, 0 }
 0x243   : > { %v1306_v27 = vpop.permute.xlu0 %1305 }
 0x248   : > { %2854 = vmatmul.mubr.msk.bf16.vlgmr.msra.gmra.mrb[8].mxu1 %vm927_vm2, %v1050_v20 }
 0x249   : > { %2864 = vmatpush3.bf16.xpose.msra.mxu1 %v1185_v23  ;;  %2865 = vmatprep.mubr.msk.bf16.mxu1 %vm3450_vm0, %v3449_v0 }
 0x24a   : > { %2875 = vmatprep.subr.bf16.mxu1 %v3449_v0 }
 0x250   : > { %2866 = vmatmul.mubr.msk.bf16.vlgmr.msra.gmra.mrb[12].mxu1 %vm927_vm2, %v1178_v25 }
 0x251   : > { %2876 = vmatpush3.bf16.xpose.msra.mxu1 %v1313_v26  ;;  %2877 = vmatprep.mubr.msk.bf16.mxu1 %vm3450_vm0, %v3449_v0 }
 0x252   : > { %2887 = vmatprep.subr.bf16.mxu1 %v3449_v0 }
 0x258   : > { %2878 = vmatmul.mubr.msk.bf16.vlgmr.msra.gmra.mrb[16].mxu1 %vm927_vm2, %v1306_v27 }
 0x259   : > { %2891 = vmatprep.mubr.msk.bf16.mxu1 %vm3450_vm0, %v3449_v0 }
 0x313   : > { %v968_v32 = vpop.f32.mrb[4].mxu1 }
 0x314   : > { %v969_v33 = vadd.f32 %v968_v32, %v850_v31  ;;  %v2843_v34 = vpop.f32.mrb[5].mxu1 }
 0x315   : > { %v971_v35 = vpop.f32.mrb[6].mxu1 }
 0x316   : > { %v972_v36 = vadd.f32 %v971_v35, %v850_v31  ;;  %v2844_v37 = vpop.f32.mrb[7].mxu1  ;;  %v976_v38 = vsel %vm975_vm4, %v969_v33, -inf }
 0x317   : > { %977 = vmax.xlane.f32.xlu1 %v976_v38 }
 0x318   : > { %v979_v39 = vsel %vm975_vm4, %v972_v36, -inf }
 0x319   : > { %980 = vmax.xlane.f32.xlu0 %v979_v39 }
 0x31b   : > { %v1093_v40 = vpop.f32.mrb[8].mxu1 }
 0x31c   : > { %v1094_v41 = vadd.f32 %v1093_v40, %v850_v31  ;;  %v2855_v42 = vpop.f32.mrb[9].mxu1 }
 0x31d   : > { %v1096_v43 = vpop.f32.mrb[10].mxu1 }
 0x31e   : > { %v1097_v44 = vadd.f32 %v1096_v43, %v850_v31  ;;  %v2856_v45 = vpop.f32.mrb[11].mxu1  ;;  %v1100_v46 = vsel %vm975_vm4, %v1094_v41, -inf }
 0x31f   : > { %1101 = vmax.xlane.f32.xlu0 %v1100_v46 }
 0x320   : > { %v1103_v47 = vsel %vm975_vm4, %v1097_v44, -inf }
 0x321   : > { %1104 = vmax.xlane.f32.xlu1 %v1103_v47 }
 0x323   : > { %v1221_v48 = vpop.f32.mrb[12].mxu1 }
 0x324   : > { %v1222_v49 = vadd.f32 %v1221_v48, %v850_v31  ;;  %v2867_v50 = vpop.f32.mrb[13].mxu1 }
 0x325   : > { %v1224_v51 = vpop.f32.mrb[14].mxu1 }
 0x326   : > { %v1225_v52 = vadd.f32 %v1224_v51, %v850_v31  ;;  %v2868_v53 = vpop.f32.mrb[15].mxu1  ;;  %v1228_v54 = vsel %vm975_vm4, %v1222_v49, -inf }
 0x327   : > { %1229 = vmax.xlane.f32.xlu0 %v1228_v54 }
 0x328   : > { %v1231_v55 = vsel %vm975_vm4, %v1225_v52, -inf }
 0x329   : > { %1232 = vmax.xlane.f32.xlu1 %v1231_v55 }
 0x32b   : > { %v1349_v56 = vpop.f32.mrb[16].mxu1 }
 0x32c   : > { %v1350_v57 = vadd.f32 %v1349_v56, %v850_v31  ;;  %v2879_v58 = vpop.f32.mrb[17].mxu1 }
 0x32d   : > { %v1352_v59 = vpop.f32.mrb[18].mxu1 }
 0x32e   : > { %v1353_v60 = vadd.f32 %v1352_v59, %v850_v31  ;;  %v2880_v61 = vpop.f32.mrb[19].mxu1  ;;  %v1356_v62 = vsel %vm975_vm4, %v1350_v57, -inf }
 0x32f   : > { %1357 = vmax.xlane.f32.xlu0 %v1356_v62 }
 0x330   : > { %v1359_v63 = vsel %vm975_vm4, %v1353_v60, -inf }
 0x331   : > { %1360 = vmax.xlane.f32.xlu1 %v1359_v63 }
 0x3a4   : > { %v978_v1 = vpop.xlane.xlu1 %977 }
 0x3a5   : > { %v982_v2 = vsub.f32 %v969_v33, %v978_v1 }
 0x3a6   : > { %v981_v5 = vpop.xlane.xlu0 %980 }
 0x3a7   : > { %v984_v6 = vmul.f32 1.442695, %v982_v2  ;;  %v983_v7 = vsub.f32 %v972_v36, %v981_v5 }
 0x3a9   : > { %3109 = vpow2.f32 %v984_v6  ;;  %v986_v8 = vmul.f32 1.442695, %v983_v7 }
 0x3ab   : > { %3111 = vpow2.f32 %v986_v8 }
 0x3ac   : > { %v1102_v9 = vpop.xlane.xlu0 %1101 }
 0x3ad   : > { %v1106_v10 = vsub.f32 %v1094_v41, %v1102_v9 }
 0x3ae   : > { %v1105_v19 = vpop.xlane.xlu1 %1104 }
 0x3af   : > { %v1108_v11 = vmul.f32 1.442695, %v1106_v10  ;;  %v1107_v20 = vsub.f32 %v1097_v44, %v1105_v19 }
 0x3b1   : > { %3113 = vpow2.f32 %v1108_v11  ;;  %v1110_v23 = vmul.f32 1.442695, %v1107_v20 }
 0x3b3   : > { %v3110_v12 = vpop.eup %3109  ;;  %3115 = vpow2.f32 %v1110_v23 }
 0x3b4   : > { %v988_v13 = vsel %vm975_vm4, %v3110_v12, 0.0  ;;  %v1230_v22 = vpop.xlane.xlu0 %1229 }
 0x3b5   : > { %v3112_v14 = vpop.eup %3111  ;;  %989 = vadd.xlane.f32.xlu0 %v988_v13  ;;  %v1234_v26 = vsub.f32 %v1222_v49, %v1230_v22 }
 0x3b6   : > { %v991_v16 = vsel %vm975_vm4, %v3112_v14, 0.0  ;;  %v1233_v21 = vpop.xlane.xlu1 %1232 }
 0x3b7   : > { %992 = vadd.xlane.f32.xlu1 %v991_v16  ;;  %v1235_v24 = vsub.f32 %v1225_v52, %v1233_v21  ;;  %v1236_v30 = vmul.f32 1.442695, %v1234_v26 }
 0x3b9   : > { %v1238_v28 = vmul.f32 1.442695, %v1235_v24 }
 0x3bb   : > { %v3892_v17 = vpop.eup %3113  ;;  %3117 = vpow2.f32 %v1238_v28 }
 0x3bc   : > { %v1112_v18 = vsel %vm975_vm4, %v3892_v17, 0.0  ;;  %v1358_v27 = vpop.xlane.xlu0 %1357  ;;  %3119 = vpow2.f32 %v1236_v30 }
 0x3bd   : > { %1113 = vadd.xlane.f32.xlu0 %v1112_v18  ;;  %v1362_v31 = vsub.f32 %v1350_v57, %v1358_v27  ;;  %v3116_v34 = vpop.eup %3115 }
 0x3be   : > { %v1361_v25 = vpop.xlane.xlu1 %1360  ;;  %v1115_v35 = vsel %vm975_vm4, %v3116_v34, 0.0 }
 0x3bf   : > { %v1363_v29 = vsub.f32 %v1353_v60, %v1361_v25  ;;  %v1364_v33 = vmul.f32 1.442695, %v1362_v31 }
 0x3c1   : > { %v1366_v32 = vmul.f32 1.442695, %v1363_v29 }
 0x3c3   : > { %3121 = vpow2.f32 %v1366_v32 }
 0x3c4   : > { %3123 = vpow2.f32 %v1364_v33 }
 0x3c5   : > { %v3118_v36 = vpop.eup %3117 }
 0x3c6   : > { %v3120_v37 = vpop.eup %3119  ;;  %v1243_v38 = vsel %vm975_vm4, %v3118_v36, 0.0 }
 0x3c7   : > { %v1240_v40 = vsel %vm975_vm4, %v3120_v37, 0.0 }
 0x3c8   : > { %1123 = vrot.lane.b32.xlu1 %v3849_v15, %s3459_s24  ;;  %s4204_s24 = sld [smem:[#allocation27_spill]] }
 0x3cd   : > { %v3900_v39 = vpop.eup %3121 }
 0x3ce   : > { %v3124_v41 = vpop.eup %3123  ;;  %v1371_v42 = vsel %vm975_vm4, %v3900_v39, 0.0  ;;  %v3095_v26 = vld [vmem:[%s4204_s24] sm:$0xff]   ;;  %v3096_v29 = vld [vmem:[%s4204_s24 + $0x8] sm:$0xff]  }
 0x3cf   : > { %v1368_v43 = vsel %vm975_vm4, %v3124_v41, 0.0  ;;  %2888 = vmatpush3.bf16.msra.mxu1 %v3095_v26 }
 0x3d0   : > { %2889 = vmatprep.subr.bf16.mxu1 %v3449_v0 }
 0x3d3   : > { %999 = vrot.lane.b32.xlu0 %v3849_v15, %s3460_s6  ;;  %2890 = vmatpush3.bf16.msra.mxu1 %v3096_v29  ;;  %s4210_s6 = smov 72  }
 0x3d4   : > { %2903 = vmatprep.subr.bf16.mxu1 %v3449_v0 }
 0x3ec   : > { %1116 = vadd.xlane.f32.xlu1 %v1115_v35 }
 0x3f0   : > { %1244 = vadd.xlane.f32.xlu1 %v1243_v38 }
 0x3f2   : > { %1241 = vadd.xlane.f32.xlu0 %v1240_v40 }
 0x3f4   : > { %1372 = vadd.xlane.f32.xlu1 %v1371_v42 }
 0x3f6   : > { %1369 = vadd.xlane.f32.xlu0 %v1368_v43 }
 0x405   : > { %1251 = vrot.lane.b32.xlu1 %v3849_v15, %s3461_s19  ;;  %s4205_s19 = sld [smem:[#allocation28_spill]] }
 0x40c   : > { %1379 = vrot.lane.b32.xlu0 %v3849_v15, %s3462_s28  ;;  %s4171_s28 = smov 16  }
 0x442   : > { %v990_v44 = vpop.xlane.xlu0 %989 }
 0x443   : > { %3125 = vrcp.f32 %v990_v44 }
 0x444   : > { %v993_v45 = vpop.xlane.xlu1 %992 }
 0x445   : > { %3127 = vrcp.f32 %v993_v45 }
 0x448   : > { %v1124_v53 = vpop.permute.xlu1 %1123 }
 0x44a   : > { %v1114_v46 = vpop.xlane.xlu0 %1113 }
 0x44b   : > { %3129 = vrcp.f32 %v1114_v46 }
 0x44d   : > { %v3126_v47 = vpop.eup %3125 }
 0x44e   : > { %v1000_v48 = vpop.permute.xlu0 %999  ;;  %v996_v50 = vmul.f32 %v3126_v47, %v3110_v12 }
 0x44f   : > { %v3128_v49 = vpop.eup %3127  ;;  %2846 = vmatpush3.bf16.msra.mxu0 %v1000_v48 }
 0x450   : > { %2857 = vmatprep.subr.bf16.mxu0 %v3449_v0  ;;  %v997_v51 = vmul.f32 %v3128_v49, %v3112_v14 }
 0x452   : > { %v998_v52 = vpack.c.bf16 %v997_v51, %v996_v50 }
 0x454   : > { %2848 = vmatmul.mubr.msk.bf16.vlgmr.msra.gmra.mrb[0].mxu0 %vm975_vm4, %v998_v52 }
 0x455   : > { %2858 = vmatpush3.bf16.msra.mxu0 %v1124_v53  ;;  %2859 = vmatprep.mubr.msk.bf16.mxu0 %vm3450_vm0, %v3449_v0  ;;  %v3130_v56 = vpop.eup %3129 }
 0x456   : > { %2869 = vmatprep.subr.bf16.mxu0 %v3449_v0  ;;  %v1120_v60 = vmul.f32 %v3130_v56, %v3892_v17 }
 0x479   : > { %v1117_v15 = vpop.xlane.xlu1 %1116 }
 0x47a   : > { %3131 = vrcp.f32 %v1117_v15 }
 0x47d   : > { %v1245_v54 = vpop.xlane.xlu1 %1244 }
 0x47e   : > { %3133 = vrcp.f32 %v1245_v54 }
 0x47f   : > { %v1242_v55 = vpop.xlane.xlu0 %1241 }
 0x480   : > { %3135 = vrcp.f32 %v1242_v55 }
 0x481   : > { %v1373_v57 = vpop.xlane.xlu1 %1372 }
 0x483   : > { %v1370_v58 = vpop.xlane.xlu0 %1369 }
 0x484   : > { %v3132_v59 = vpop.eup %3131  ;;  %3137 = vrcp.f32 %v1370_v58 }
 0x485   : > { %v1121_v61 = vmul.f32 %v3132_v59, %v3116_v34  ;;  %3139 = vrcp.f32 %v1373_v57  ;;  %v1252_v1 = vpop.permute.xlu1 %1251 }
 0x487   : > { %v1122_v62 = vpack.c.bf16 %v1121_v61, %v1120_v60  ;;  %v1380_v9 = vpop.permute.xlu0 %1379  ;;  %v3098_v60 = vld [vmem:[%s4150_s11 + $0x8] sm:$0xff]  }
 0x488   : > { %v3134_v63 = vpop.eup %3133 }
 0x489   : > { %2860 = vmatmul.mubr.msk.bf16.vlgmr.msra.gmra.mrb[4].mxu0 %vm975_vm4, %v1122_v62  ;;  %v1249_v6 = vmul.f32 %v3134_v63, %v3118_v36  ;;  %v3099_v63 = vld [vmem:[%s4148_s9] sm:$0xff]  }
 0x48a   : > { %v3136_v2 = vpop.eup %3135  ;;  %2870 = vmatpush3.bf16.msra.mxu0 %v1252_v1  ;;  %2871 = vmatprep.mubr.msk.bf16.mxu0 %vm3450_vm0, %v3449_v0  ;;  %v3100_v1 = vld [vmem:[%s4148_s9 + $0x8] sm:$0xff]  }
 0x48b   : > { %v1248_v5 = vmul.f32 %v3136_v2, %v3120_v37  ;;  %2881 = vmatprep.subr.bf16.mxu0 %v3449_v0 }
 0x48d   : > { %v1250_v7 = vpack.c.bf16 %v1249_v6, %v1248_v5 }
 0x48e   : > { %v3138_v8 = vpop.eup %3137 }
 0x48f   : > { %v3140_v10 = vpop.eup %3139  ;;  %v1376_v11 = vmul.f32 %v3138_v8, %v3124_v41  ;;  %v2731_v41 = vld [vmem:[%s4205_s19] ss:$0 sm:$0xff]  ;;  %s4214_s19 = smov 24  }
 0x490   : > { %v1377_v12 = vmul.f32 %v3140_v10, %v3900_v39 }
 0x491   : > { %2872 = vmatmul.mubr.msk.bf16.vlgmr.msra.gmra.mrb[8].mxu0 %vm975_vm4, %v1250_v7 }
 0x492   : > { %2882 = vmatpush3.bf16.msra.mxu0 %v1380_v9  ;;  %2883 = vmatprep.mubr.msk.bf16.mxu0 %vm3450_vm0, %v3449_v0  ;;  %v1378_v13 = vpack.c.bf16 %v1377_v12, %v1376_v11 }
 0x493   : > { %2895 = vmatprep.subr.bf16.mxu0 %v3449_v0 }
 0x499   : > { %2884 = vmatmul.mubr.msk.bf16.vlgmr.msra.gmra.mrb[12].mxu0 %vm975_vm4, %v1378_v13 }
 0x49a   : > { %2899 = vmatprep.mubr.msk.bf16.mxu0 %vm3450_vm0, %v3449_v0  ;;  %2896 = vmatpush3.bf16.msra.mxu0 %v3099_v63 }
 0x49b   : > { %2897 = vmatprep.subr.bf16.mxu0 %v3449_v0 }
 0x49e   : > { %2898 = vmatpush3.bf16.msra.mxu0 %v3100_v1 }
 0x49f   : > { %2911 = vmatprep.subr.bf16.mxu0 %v3449_v0 }
 0x527   : > { %v1039_v14 = vpop.f32.mrb[0].mxu0 }
 0x528   : > { %v2849_v16 = vpop.f32.mrb[1].mxu0 }
 0x529   : > { %v1042_v17 = vpop.f32.mrb[2].mxu0 }
 0x52a   : > { %v1046_v18 = vpack.c.bf16 %v1042_v17, %v1039_v14  ;;  %v2850_v19 = vpop.f32.mrb[3].mxu0  ;;  %v2736_v17 = vld [vmem:[%s4147_s8] ss:$0 sm:$0xff] }
 0x52c   : > { %1047 = vst.msk [vmem:[#allocation2] sm:$0xff] %vm927_vm2, %v1046_v18 }
 0x55c   : > { %v1163_v20 = vpop.f32.mrb[4].mxu0 }
 0x55d   : > { %v2861_v21 = vpop.f32.mrb[5].mxu0 }
 0x55e   : > { %v1166_v22 = vpop.f32.mrb[6].mxu0 }
 0x55f   : > { %v1170_v23 = vpack.c.bf16 %v1166_v22, %v1163_v20  ;;  %v2862_v24 = vpop.f32.mrb[7].mxu0  ;;  %v2741_v22 = vld [vmem:[#allocation3] ss:$0 sm:$0xff] }
 0x561   : > { %1172 = vrot.lane.b32.xlu1 %v1170_v23, %s4172_s0 }
 0x564   : > { %v1291_v25 = vpop.f32.mrb[8].mxu0 }
 0x565   : > { %v2873_v27 = vpop.f32.mrb[9].mxu0 }
 0x566   : > { %v1294_v28 = vpop.f32.mrb[10].mxu0 }
 0x567   : > { %v1298_v30 = vpack.c.bf16 %v1294_v28, %v1291_v25  ;;  %v2874_v31 = vpop.f32.mrb[11].mxu0 }
 0x569   : > { %1300 = vrot.lane.b32.xlu0 %v1298_v30, %s4171_s28  ;;  %v2737_v30 = vld [vmem:[%s4149_s10] ss:$0 sm:$0xff] }
 0x56c   : > { %v1419_v32 = vpop.f32.mrb[12].mxu0 }
 0x56d   : > { %v2885_v33 = vpop.f32.mrb[13].mxu0 }
 0x56e   : > { %v1422_v34 = vpop.f32.mrb[14].mxu0 }
 0x56f   : > { %v1426_v35 = vpack.c.bf16 %v1422_v34, %v1419_v32  ;;  %v2886_v36 = vpop.f32.mrb[15].mxu0 }
 0x571   : > { %1428 = vrot.lane.b32.xlu1 %v1426_v35, %s4170_s23  ;;  %s2716_s23 = sshll.u32 %s4220_s25, 3 }
 0x572   : > { %s834_s3 = scalar_lea.vmem %s4206_s30, %s2716_s23  ;;  %s4212_s30 = smov 8  }
 0x573   : > { %v846_v61 = vld [vmem:[%s834_s3] sm:$0xff]  ;;  %s4207_s3 = sld [smem:[#allocation29_spill]]  ;;  %s4213_s23 = smov 16  }
 0x574   : > { %v1623_v62 = vpack.c.bf16 %v846_v61, %v846_v61 }
 0x579   : > { %v2735_v12 = vld [vmem:[%s4207_s3] ss:$0 sm:$0xff] }
 0x5d3   : > { %v1173_v37 = vpop.permute.xlu1 %1172 }
 0x5d4   : > { %1176 = vst.msk [vmem:[#allocation2] sm:$0xff] %vm1175_vm5, %v1173_v37 }
 0x5db   : > { %v1301_v38 = vpop.permute.xlu0 %1300 }
 0x5dc   : > { %1304 = vst.msk [vmem:[#allocation2] sm:$0xff] %vm1303_vm6, %v1301_v38 }
 0x5e3   : > { %v1429_v39 = vpop.permute.xlu1 %1428 }
 0x5e4   : > { %1432 = vst.msk [vmem:[#allocation2] sm:$0xff] %vm1431_vm7, %v1429_v39 }
 0x5eb   : > { %v1433_v40 = vld [vmem:[#allocation2] sm:$0xff] }
 0x5ec   : > { %2892 = vmatmul.mubr.msk.bf16.vlgmr.msra.gmra.mrb[20].mxu1 %vm875_vm1, %v1433_v40 }
 0x5ed   : > { %2907 = vmatprep.mubr.msk.bf16.mxu1 %vm3450_vm0, %v3449_v0 }
 0x6bf   : > { %v1494_v42 = vpop.f32.mrb[20].mxu1 }
 0x6c0   : > { %v1495_v43 = vadd.f32 %v2731_v41, %v1494_v42  ;;  %v2893_v44 = vpop.f32.mrb[21].mxu1 }
 0x6c1   : > { %v1497_v45 = vpop.f32.mrb[22].mxu1 }
 0x6c2   : > { %v1498_v46 = vadd.f32 %v2731_v41, %v1497_v45  ;;  %v2894_v47 = vpop.f32.mrb[23].mxu1  ;;  %v1501_v48 = vadd.f32 %v1495_v43, %v3835_v3 }
 0x6c4   : > { %v1505_v49 = vsel %vm875_vm1, %v1501_v48, 0.0  ;;  %v1502_v50 = vadd.f32 %v1498_v46, %v3837_v4  ;;  %v3097_v4 = vld [vmem:[%s4150_s11] sm:$0xff]  }
 0x6c5   : > { %1506 = vadd.xlane.f32.xlu0 %v1505_v49  ;;  %2904 = vmatpush3.bf16.msra.mxu1 %v3097_v4 }
 0x6c6   : > { %v1508_v51 = vsel %vm875_vm1, %v1502_v50, 0.0  ;;  %2905 = vmatprep.subr.bf16.mxu1 %v3449_v0 }
 0x6c7   : > { %1509 = vadd.xlane.f32.xlu1 %v1508_v51 }
 0x6c9   : > { %2906 = vmatpush3.bf16.msra.mxu1 %v3098_v60 }
 0x6ca   : > { %2917 = vmatprep.subr.bf16.mxu1 %v3449_v0 }
 0x6cc   : > { %2908 = vmatmul.mubr.msk.bf16.vlgmr.msra.gmra.mrb[24].mxu1 %vm875_vm1, %v1623_v62 }
 0x6cd   : > { %2919 = vmatprep.mubr.msk.bf16.mxu1 %vm3450_vm0, %v3449_v0 }
 0x752   : > { %v1507_v52 = vpop.xlane.xlu0 %1506 }
 0x753   : > { %v1512_v53 = vmul.f32 0.03125, %v1507_v52 }
 0x754   : > { %v1510_v15 = vpop.xlane.xlu1 %1509 }
 0x755   : > { %v1514_v54 = vsub.f32 %v1501_v48, %v1512_v53  ;;  %v1513_v55 = vmul.f32 0.03125, %v1510_v15 }
 0x757   : > { %v1515_v56 = vsub.f32 %v1502_v50, %v1513_v55  ;;  %v1516_v57 = vmul.f32 %v1514_v54, %v1514_v54 }
 0x759   : > { %v1518_v58 = vsel %vm875_vm1, %v1516_v57, 0.0  ;;  %v1517_v59 = vmul.f32 %v1515_v56, %v1515_v56 }
 0x75a   : > { %1519 = vadd.xlane.f32.xlu0 %v1518_v58 }
 0x75b   : > { %v1521_v3 = vsel %vm875_vm1, %v1517_v59, 0.0 }
 0x75e   : > { %1522 = vadd.xlane.f32.xlu0 %v1521_v3 }
 0x79f   : > { %v1680_v23 = vpop.f32.mrb[24].mxu1 }
 0x7a0   : > { %v1681_v24 = vadd.f32 %v2741_v22, %v1680_v23  ;;  %v2909_v25 = vpop.f32.mrb[25].mxu1 }
 0x7a1   : > { %v1683_v26 = vpop.f32.mrb[26].mxu1 }
 0x7a2   : > { %v3991_v27 = vpack.c.bf16 %v1681_v24, %v1681_v24  ;;  %v2910_v28 = vpop.f32.mrb[27].mxu1 }
 0x7a4   : > { %1820 = vrot.lane.b32.xlu1 %v3991_v27, %s3452_s4  ;;  %v1698_v29 = vsel %vm927_vm2, %v3991_v27, 0 }
 0x7a8   : > { %1949 = vrot.lane.b32.xlu1 %v3991_v27, %s3455_s2 }
 0x7e7   : > { %v1520_v2 = vpop.xlane.xlu0 %1519 }
 0x7e8   : > { %v1524_v5 = vmul.f32 0.03125, %v1520_v2 }
 0x7ea   : > { %v1526_v6 = vadd.f32 1e-12, %v1524_v5 }
 0x7eb   : > { %v1523_v7 = vpop.xlane.xlu0 %1522 }
 0x7ec   : > { %3141 = vrsqrt.f32 %v1526_v6  ;;  %v1525_v8 = vmul.f32 0.03125, %v1523_v7 }
 0x7ee   : > { %v1527_v9 = vadd.f32 1e-12, %v1525_v8 }
 0x7f0   : > { %3143 = vrsqrt.f32 %v1527_v9 }
 0x7f6   : > { %v3142_v10 = vpop.eup %3141 }
 0x7f7   : > { %v1530_v11 = vmul.f32 %v3142_v10, %v1514_v54 }
 0x7f9   : > { %v1538_v14 = vmul.f32 %v2735_v12, %v1530_v11 }
 0x7fa   : > { %v3144_v13 = vpop.eup %3143 }
 0x7fb   : > { %v1531_v16 = vmul.f32 %v3144_v13, %v1515_v56  ;;  %v3982_v19 = vadd.f32 %v2736_v17, %v1538_v14 }
 0x7fd   : > { %v1539_v18 = vmul.f32 %v2735_v12, %v1531_v16 }
 0x7ff   : > { %v3984_v20 = vadd.f32 %v2736_v17, %v1539_v18 }
 0x801   : > { %v1552_v21 = vpack.c.bf16 %v3984_v20, %v3982_v19 }
 0x803   : > { %2900 = vmatmul.mubr.msk.bf16.vlgmr.msra.gmra.mrb[16].mxu0 %vm875_vm1, %v1552_v21 }
 0x804   : > { %2913 = vmatprep.mubr.msk.bf16.mxu0 %vm3450_vm0, %v3449_v0  ;;  %2912 = vmatpush3.bf16.xpose.msra.mxu0 %v1698_v29 }
 0x805   : > { %2923 = vmatprep.subr.bf16.mxu0 %v3449_v0 }
 0x816   : > { %v1821_v40 = vpop.permute.xlu1 %1820 }
 0x817   : > { %v1826_v41 = vsel %vm927_vm2, %v1821_v40, 0 }
 0x81a   : > { %v1950_v42 = vpop.permute.xlu1 %1949 }
 0x81b   : > { %v1955_v44 = vsel %vm927_vm2, %v1950_v42, 0 }
 0x8d6   : > { %v1609_v31 = vpop.f32.mrb[16].mxu0 }
 0x8d7   : > { %v1610_v32 = vadd.f32 %v2737_v30, %v1609_v31  ;;  %v2901_v33 = vpop.f32.mrb[17].mxu0 }
 0x8d8   : > { %v1612_v34 = vpop.f32.mrb[18].mxu0 }
 0x8d9   : > { %v1613_v35 = vadd.f32 %v2737_v30, %v1612_v34  ;;  %v2902_v36 = vpop.f32.mrb[19].mxu0  ;;  %v1616_v37 = vmul.f32 0.35355338, %v1610_v32 }
 0x8db   : > { %v1617_v38 = vmul.f32 0.35355338, %v1613_v35 }
 0x8dd   : > { %v1618_v39 = vpack.c.bf16 %v1617_v38, %v1616_v37 }
 0x8df   : > { %1818 = vrot.lane.b32.xlu0 %v1618_v39, %s3452_s4  ;;  %1947 = vrot.lane.b32.xlu1 %v1618_v39, %s3455_s2 }
 0x8e0   : > { %2914 = vmatmul.mubr.msk.bf16.vlgmr.msra.gmra.mrb[20].mxu0 %vm927_vm2, %v1618_v39 }
 0x8e1   : > { %2924 = vmatpush3.bf16.xpose.msra.mxu0 %v1826_v41  ;;  %2925 = vmatprep.mubr.msk.bf16.mxu0 %vm3450_vm0, %v3449_v0 }
 0x8e2   : > { %2935 = vmatprep.subr.bf16.mxu0 %v3449_v0 }
 0x8e3   : > { %2078 = vrot.lane.b32.xlu0 %v3991_v27, %s3457_s29  ;;  %2076 = vrot.lane.b32.xlu1 %v1618_v39, %s3457_s29  ;;  %s4208_s29 = sld [smem:[#allocation24_spill]] }
 0x8e9   : > { %s837_s1 = scalar_lea.vmem %s4208_s29, %s4220_s25  ;;  %s4217_s29 = sld [smem:[#allocation31_spill]] }
 0x8ea   : > { %v2745_v49 = vld [vmem:[%s837_s1] ss:$0 sm:$0xff] }
 0x951   : > { %v1819_v43 = vpop.permute.xlu0 %1818  ;;  %v1948_v46 = vpop.permute.xlu1 %1947 }
 0x952   : > { %2926 = vmatmul.mubr.msk.bf16.vlgmr.msra.gmra.mrb[24].mxu0 %vm927_vm2, %v1819_v43 }
 0x953   : > { %2936 = vmatpush3.bf16.xpose.msra.mxu0 %v1955_v44  ;;  %2937 = vmatprep.mubr.msk.bf16.mxu0 %vm3450_vm0, %v3449_v0 }
 0x954   : > { %2947 = vmatprep.subr.bf16.mxu0 %v3449_v0 }
 0x955   : > { %v2079_v45 = vpop.permute.xlu0 %2078  ;;  %v2077_v48 = vpop.permute.xlu1 %2076 }
 0x956   : > { %v2084_v47 = vsel %vm927_vm2, %v2079_v45, 0 }
 0x95a   : > { %2938 = vmatmul.mubr.msk.bf16.vlgmr.msra.gmra.mrb[28].mxu0 %vm927_vm2, %v1948_v46 }
 0x95b   : > { %2948 = vmatpush3.bf16.xpose.msra.mxu0 %v2084_v47  ;;  %2949 = vmatprep.mubr.msk.bf16.mxu0 %vm3450_vm0, %v3449_v0 }
 0x95c   : > { %2959 = vmatprep.subr.bf16.mxu0 %v3449_v0 }
 0x962   : > { %2950 = vmatmul.mubr.msk.bf16.vlgmr.msra.gmra.mrb[32].mxu0 %vm927_vm2, %v2077_v48 }
 0x963   : > { %2963 = vmatprep.mubr.msk.bf16.mxu0 %vm3450_vm0, %v3449_v0 }
 0x9b3   : > { %v1734_v50 = vpop.f32.mrb[20].mxu0 }
 0x9b4   : > { %v1735_v51 = vadd.f32 %v2745_v49, %v1734_v50  ;;  %v2915_v52 = vpop.f32.mrb[21].mxu0 }
 0x9b5   : > { %v1737_v53 = vpop.f32.mrb[22].mxu0 }
 0x9b6   : > { %v1738_v15 = vadd.f32 %v2745_v49, %v1737_v53  ;;  %v2916_v54 = vpop.f32.mrb[23].mxu0  ;;  %v1741_v55 = vsel %vm927_vm2, %v1735_v51, -inf }
 0x9b7   : > { %1742 = vmax.xlane.f32.xlu0 %v1741_v55 }
 0x9b8   : > { %v1744_v56 = vsel %vm927_vm2, %v1738_v15, -inf }
 0x9b9   : > { %1745 = vmax.xlane.f32.xlu1 %v1744_v56 }
 0xa25   : > { %v1862_v57 = vpop.f32.mrb[24].mxu0 }
 0xa26   : > { %v1863_v58 = vadd.f32 %v2745_v49, %v1862_v57  ;;  %v2927_v59 = vpop.f32.mrb[25].mxu0 }
 0xa27   : > { %v1865_v3 = vpop.f32.mrb[26].mxu0 }
 0xa28   : > { %v1866_v4 = vadd.f32 %v2745_v49, %v1865_v3  ;;  %v2928_v60 = vpop.f32.mrb[27].mxu0  ;;  %v1869_v61 = vsel %vm927_vm2, %v1863_v58, -inf }
 0xa29   : > { %1870 = vmax.xlane.f32.xlu0 %v1869_v61 }
 0xa2a   : > { %v1872_v62 = vsel %vm927_vm2, %v1866_v4, -inf }
 0xa2d   : > { %1873 = vmax.xlane.f32.xlu0 %v1872_v62  ;;  %v1991_v63 = vpop.f32.mrb[28].mxu0 }
 0xa2e   : > { %v1992_v1 = vadd.f32 %v2745_v49, %v1991_v63  ;;  %v2939_v2 = vpop.f32.mrb[29].mxu0 }
 0xa2f   : > { %v1994_v5 = vpop.f32.mrb[30].mxu0 }
 0xa30   : > { %v1995_v6 = vadd.f32 %v2745_v49, %v1994_v5  ;;  %v2940_v7 = vpop.f32.mrb[31].mxu0  ;;  %v1998_v8 = vsel %vm927_vm2, %v1992_v1, -inf }
 0xa31   : > { %1999 = vmax.xlane.f32.xlu1 %v1998_v8 }
 0xa32   : > { %v2001_v9 = vsel %vm927_vm2, %v1995_v6, -inf }
 0xa33   : > { %2002 = vmax.xlane.f32.xlu0 %v2001_v9 }
 0xa35   : > { %v2120_v10 = vpop.f32.mrb[32].mxu0 }
 0xa36   : > { %v2121_v11 = vadd.f32 %v2745_v49, %v2120_v10  ;;  %v2951_v12 = vpop.f32.mrb[33].mxu0 }
 0xa37   : > { %v2123_v13 = vpop.f32.mrb[34].mxu0 }
 0xa38   : > { %v2124_v14 = vadd.f32 %v2745_v49, %v2123_v13  ;;  %v2952_v16 = vpop.f32.mrb[35].mxu0  ;;  %v2127_v17 = vsel %vm927_vm2, %v2121_v11, -inf }
 0xa39   : > { %2128 = vmax.xlane.f32.xlu1 %v2127_v17 }
 0xa3a   : > { %v2130_v18 = vsel %vm927_vm2, %v2124_v14, -inf }
 0xa3b   : > { %2131 = vmax.xlane.f32.xlu0 %v2130_v18 }
 0xa44   : > { %v1743_v25 = vpop.xlane.xlu0 %1742 }
 0xa45   : > { %v1747_v28 = vsub.f32 %v1735_v51, %v1743_v25 }
 0xa46   : > { %v1746_v21 = vpop.xlane.xlu1 %1745 }
 0xa47   : > { %v1748_v22 = vsub.f32 %v1738_v15, %v1746_v21  ;;  %v1749_v29 = vmul.f32 1.442695, %v1747_v28 }
 0xa49   : > { %v1751_v23 = vmul.f32 1.442695, %v1748_v22 }
 0xa4a   : > { %1765 = vrot.lane.b32.xlu1 %v3991_v27, %s3451_s7  ;;  %s4209_s7 = smov 80  }
 0xa4b   : > { %3145 = vpow2.f32 %v1751_v23 }
 0xa4c   : > { %3147 = vpow2.f32 %v1749_v29 }
 0xa55   : > { %v4040_v24 = vpop.eup %3145 }
 0xa56   : > { %v1756_v26 = vsel %vm927_vm2, %v4040_v24, 0.0  ;;  %v3148_v30 = vpop.eup %3147 }
 0xa57   : > { %1757 = vadd.xlane.f32.xlu0 %v1756_v26  ;;  %v1753_v31 = vsel %vm927_vm2, %v3148_v30, 0.0 }
 0xa6e   : > { %1754 = vadd.xlane.f32.xlu1 %v1753_v31 }
 0xab6   : > { %v1871_v32 = vpop.xlane.xlu0 %1870 }
 0xab7   : > { %v1875_v33 = vsub.f32 %v1863_v58, %v1871_v32 }
 0xab9   : > { %v1877_v34 = vmul.f32 1.442695, %v1875_v33 }
 0xaba   : > { %v1874_v35 = vpop.xlane.xlu0 %1873 }
 0xabb   : > { %3149 = vpow2.f32 %v1877_v34  ;;  %v1876_v36 = vsub.f32 %v1866_v4, %v1874_v35 }
 0xabd   : > { %v1879_v37 = vmul.f32 1.442695, %v1876_v36 }
 0xabe   : > { %v2000_v38 = vpop.xlane.xlu1 %1999 }
 0xabf   : > { %3151 = vpow2.f32 %v1879_v37  ;;  %v2004_v39 = vsub.f32 %v1992_v1, %v2000_v38 }
 0xac0   : > { %v2003_v40 = vpop.xlane.xlu0 %2002 }
 0xac1   : > { %v2006_v41 = vmul.f32 1.442695, %v2004_v39  ;;  %v2005_v42 = vsub.f32 %v1995_v6, %v2003_v40 }
 0xac3   : > { %3153 = vpow2.f32 %v2006_v41  ;;  %v2008_v43 = vmul.f32 1.442695, %v2005_v42 }
 0xac5   : > { %v3150_v44 = vpop.eup %3149  ;;  %3155 = vpow2.f32 %v2008_v43 }
 0xac6   : > { %v2129_v45 = vpop.xlane.xlu1 %2128  ;;  %v1881_v46 = vsel %vm927_vm2, %v3150_v44, 0.0 }
 0xac7   : > { %v2133_v47 = vsub.f32 %v2121_v11, %v2129_v45  ;;  %1882 = vadd.xlane.f32.xlu1 %v1881_v46 }
 0xac8   : > { %v2132_v48 = vpop.xlane.xlu0 %2131 }
 0xac9   : > { %v3152_v49 = vpop.eup %3151  ;;  %v2135_v50 = vmul.f32 1.442695, %v2133_v47  ;;  %v2134_v51 = vsub.f32 %v2124_v14, %v2132_v48  ;;  %v3101_v48 = vld [vmem:[%s4152_s13] sm:$0xff]  }
 0xaca   : > { %v1766_v52 = vpop.permute.xlu1 %1765  ;;  %v1884_v53 = vsel %vm927_vm2, %v3152_v49, 0.0  ;;  %2960 = vmatpush3.bf16.msra.mxu0 %v3101_v48 }
 0xacb   : > { %3157 = vpow2.f32 %v2135_v50  ;;  %v2137_v15 = vmul.f32 1.442695, %v2134_v51  ;;  %v1772_v54 = vsel %vm1770_vm8, %v1766_v52, 0  ;;  %1885 = vadd.xlane.f32.xlu0 %v1884_v53  ;;  %v3102_v51 = vld [vmem:[%s4152_s13 + $0x8] sm:$0xff]   ;;  %2961 = vmatprep.subr.bf16.mxu0 %v3449_v0 }
 0xacc   : > { %2918 = vmatpush3.bf16.msra.mxu1 %v1772_v54 }
 0xacd   : > { %v3154_v55 = vpop.eup %3153  ;;  %3159 = vpow2.f32 %v2137_v15  ;;  %2929 = vmatprep.subr.bf16.mxu1 %v3449_v0 }
 0xace   : > { %v2010_v56 = vsel %vm927_vm2, %v3154_v55, 0.0  ;;  %2962 = vmatpush3.bf16.msra.mxu0 %v3102_v51 }
 0xacf   : > { %v3156_v57 = vpop.eup %3155  ;;  %2011 = vadd.xlane.f32.xlu1 %v2010_v56  ;;  %2975 = vmatprep.subr.bf16.mxu0 %v3449_v0 }
 0xad0   : > { %v2013_v58 = vsel %vm927_vm2, %v3156_v57, 0.0 }
 0xad1   : > { %2014 = vadd.xlane.f32.xlu0 %v2013_v58 }
 0xad5   : > { %v3158_v59 = vpop.eup %3157 }
 0xad6   : > { %v2139_v3 = vsel %vm927_vm2, %v3158_v59, 0.0 }
 0xad7   : > { %v3160_v4 = vpop.eup %3159  ;;  %2140 = vadd.xlane.f32.xlu1 %v2139_v3 }
 0xad8   : > { %v2142_v60 = vsel %vm927_vm2, %v3160_v4, 0.0 }
 0xad9   : > { %2143 = vadd.xlane.f32.xlu0 %v2142_v60  ;;  %v2754_v60 = vld [vmem:[#allocation5] ss:$0 sm:$0xff] }
 0xae4   : > { %v1758_v61 = vpop.xlane.xlu0 %1757 }
 0xae5   : > { %3161 = vrcp.f32 %v1758_v61 }
 0xae8   : > { %2021 = vrot.lane.b32.xlu1 %v3991_v27, %s4209_s7 }
 0xaec   : > { %2150 = vrot.lane.b32.xlu1 %v3991_v27, %s4210_s6 }
 0xaef   : > { %1892 = vrot.lane.b32.xlu0 %v3991_v27, %s4211_s5  ;;  %v3162_v63 = vpop.eup %3161  ;;  %s4215_s5 = sld [smem:[#allocation30_spill]] }
 0xaf0   : > { %v1762_v2 = vmul.f32 %v3162_v63, %v4040_v24 }
 0xafb   : > { %v1755_v62 = vpop.xlane.xlu1 %1754 }
 0xafc   : > { %3163 = vrcp.f32 %v1755_v62 }
 0xb06   : > { %v3164_v1 = vpop.eup %3163 }
 0xb07   : > { %v1761_v5 = vmul.f32 %v3164_v1, %v3148_v30 }
 0xb09   : > { %v1763_v6 = vpack.c.bf16 %v1762_v2, %v1761_v5 }
 0xb0b   : > { %2920 = vmatmul.mubr.msk.bf16.vlgmr.msra.gmra.mrb[28].mxu1 %vm927_vm2, %v1763_v6 }
 0xb0c   : > { %2931 = vmatprep.mubr.msk.bf16.mxu1 %vm3450_vm0, %v3449_v0 }
 0xb54   : > { %v1883_v8 = vpop.xlane.xlu1 %1882 }
 0xb58   : > { %v1886_v7 = vpop.xlane.xlu0 %1885 }
 0xb59   : > { %3165 = vrcp.f32 %v1886_v7 }
 0xb5a   : > { %3167 = vrcp.f32 %v1883_v8 }
 0xb5c   : > { %v2012_v9 = vpop.xlane.xlu1 %2011 }
 0xb5e   : > { %v2015_v27 = vpop.xlane.xlu0 %2014 }
 0xb5f   : > { %3169 = vrcp.f32 %v2015_v27 }
 0xb60   : > { %3171 = vrcp.f32 %v2012_v9 }
 0xb63   : > { %v3166_v10 = vpop.eup %3165 }
 0xb64   : > { %v2141_v11 = vpop.xlane.xlu1 %2140  ;;  %v3168_v13 = vpop.eup %3167  ;;  %v1890_v14 = vmul.f32 %v3166_v10, %v3152_v49 }
 0xb65   : > { %v1889_v17 = vmul.f32 %v3168_v13, %v3150_v44 }
 0xb66   : > { %v2144_v12 = vpop.xlane.xlu0 %2143 }
 0xb67   : > { %3173 = vrcp.f32 %v2144_v12  ;;  %v1891_v22 = vpack.c.bf16 %v1890_v14, %v1889_v17 }
 0xb68   : > { %v2022_v21 = vpop.permute.xlu1 %2021  ;;  %3175 = vrcp.f32 %v2141_v11 }
 0xb69   : > { %v3170_v23 = vpop.eup %3169  ;;  %v2027_v24 = vsel %vm1770_vm8, %v2022_v21, 0  ;;  %v3104_v21 = vld [vmem:[%s4156_s17 + $0x8] sm:$0xff]  }
 0xb6a   : > { %v1893_v16 = vpop.permute.xlu0 %1892  ;;  %v3172_v25 = vpop.eup %3171  ;;  %v2019_v26 = vmul.f32 %v3170_v23, %v3156_v57 }
 0xb6b   : > { %v1898_v18 = vsel %vm1770_vm8, %v1893_v16, 0  ;;  %v2018_v28 = vmul.f32 %v3172_v25, %v3154_v55 }
 0xb6c   : > { %2930 = vmatpush3.bf16.msra.mxu1 %v1898_v18  ;;  %v2151_v29 = vpop.permute.xlu1 %2150 }
 0xb6d   : > { %2941 = vmatprep.subr.bf16.mxu1 %v3449_v0  ;;  %v2020_v30 = vpack.c.bf16 %v2019_v26, %v2018_v28  ;;  %v2156_v32 = vsel %vm1770_vm8, %v2151_v29, 0 }
 0xb6f   : > { %2932 = vmatmul.mubr.msk.bf16.vlgmr.msra.gmra.mrb[32].mxu1 %vm927_vm2, %v1891_v22 }
 0xb70   : > { %2942 = vmatpush3.bf16.msra.mxu1 %v2027_v24  ;;  %2943 = vmatprep.mubr.msk.bf16.mxu1 %vm3450_vm0, %v3449_v0 }
 0xb71   : > { %2953 = vmatprep.subr.bf16.mxu1 %v3449_v0  ;;  %v3174_v31 = vpop.eup %3173 }
 0xb72   : > { %v3176_v33 = vpop.eup %3175  ;;  %v2148_v34 = vmul.f32 %v3174_v31, %v3160_v4 }
 0xb73   : > { %v2147_v35 = vmul.f32 %v3176_v33, %v3158_v59 }
 0xb75   : > { %v2149_v36 = vpack.c.bf16 %v2148_v34, %v2147_v35  ;;  %v2759_v35 = vld [vmem:[#allocation8] ss:$0 sm:$0xff] }
 0xb77   : > { %2944 = vmatmul.mubr.msk.bf16.vlgmr.msra.gmra.mrb[36].mxu1 %vm927_vm2, %v2020_v30  ;;  %v2758_v30 = vld [vmem:[#allocation7] ss:$0 sm:$0xff] }
 0xb78   : > { %2954 = vmatpush3.bf16.msra.mxu1 %v2156_v32  ;;  %2955 = vmatprep.mubr.msk.bf16.mxu1 %vm3450_vm0, %v3449_v0 }
 0xb79   : > { %2967 = vmatprep.subr.bf16.mxu1 %v3449_v0 }
 0xb7f   : > { %2956 = vmatmul.mubr.msk.bf16.vlgmr.msra.gmra.mrb[40].mxu1 %vm927_vm2, %v2149_v36 }
 0xb80   : > { %2971 = vmatprep.mubr.msk.bf16.mxu1 %vm3450_vm0, %v3449_v0 }
 0xbde   : > { %v1808_v37 = vpop.f32.mrb[28].mxu1 }
 0xbdf   : > { %v2921_v38 = vpop.f32.mrb[29].mxu1 }
 0xbe0   : > { %v1811_v39 = vpop.f32.mrb[30].mxu1 }
 0xbe1   : > { %v1815_v40 = vpack.c.bf16 %v1811_v39, %v1808_v37  ;;  %v2922_v41 = vpop.f32.mrb[31].mxu1 }
 0xbe2   : > { %v3106_v41 = vld [vmem:[%s4215_s5 + $0x8] sm:$0xff]  }
 0xbe3   : > { %1816 = vst.msk [vmem:[#allocation2] sm:$0xff] %vm927_vm2, %v1815_v40  ;;  %v3105_v40 = vld [vmem:[%s4215_s5] sm:$0xff]  }
 0xc42   : > { %v1934_v42 = vpop.f32.mrb[32].mxu1 }
 0xc43   : > { %v2933_v43 = vpop.f32.mrb[33].mxu1 }
 0xc44   : > { %v1937_v44 = vpop.f32.mrb[34].mxu1  ;;  %v3108_v43 = vld [vmem:[%s4215_s5 + $0x18] sm:$0xff]  }
 0xc45   : > { %v1941_v45 = vpack.c.bf16 %v1937_v44, %v1934_v42  ;;  %v2934_v46 = vpop.f32.mrb[35].mxu1  ;;  %v3107_v42 = vld [vmem:[%s4215_s5 + $0x10] sm:$0xff]  }
 0xc46   : > { %v2760_v44 = vld [vmem:[#allocation10] ss:$0 sm:$0xff] }
 0xc47   : > { %1943 = vrot.lane.b32.xlu0 %v1941_v45, %s4212_s30 }
 0xc4a   : > { %v2063_v47 = vpop.f32.mrb[36].mxu1 }
 0xc4b   : > { %v2945_v49 = vpop.f32.mrb[37].mxu1 }
 0xc4c   : > { %v2066_v50 = vpop.f32.mrb[38].mxu1 }
 0xc4d   : > { %v2070_v52 = vpack.c.bf16 %v2066_v50, %v2063_v47  ;;  %v2946_v53 = vpop.f32.mrb[39].mxu1 }
 0xc4f   : > { %2072 = vrot.lane.b32.xlu1 %v2070_v52, %s4213_s23 }
 0xc52   : > { %v2192_v15 = vpop.f32.mrb[40].mxu1 }
 0xc53   : > { %v2957_v54 = vpop.f32.mrb[41].mxu1 }
 0xc54   : > { %v2195_v55 = vpop.f32.mrb[42].mxu1 }
 0xc55   : > { %v2199_v56 = vpack.c.bf16 %v2195_v55, %v2192_v15  ;;  %v2958_v57 = vpop.f32.mrb[43].mxu1 }
 0xc57   : > { %2201 = vrot.lane.b32.xlu0 %v2199_v56, %s4214_s19  ;;  %s4216_s19 = sshll.u32 %s4220_s25, 4 }
 0xc58   : > { %s842_s1 = scalar_lea.vmem %s4217_s29, %s4216_s19 }
 0xcb9   : > { %v1944_v58 = vpop.permute.xlu0 %1943 }
 0xcba   : > { %1946 = vst.msk [vmem:[#allocation2] sm:$0xff] %vm1175_vm5, %v1944_v58 }
 0xcc1   : > { %v2073_v59 = vpop.permute.xlu1 %2072 }
 0xcc2   : > { %2075 = vst.msk [vmem:[#allocation2] sm:$0xff] %vm1303_vm6, %v2073_v59 }
 0xcc9   : > { %v2202_v3 = vpop.permute.xlu0 %2201 }
 0xcca   : > { %2204 = vst.msk [vmem:[#allocation2] sm:$0xff] %vm1431_vm7, %v2202_v3 }
 0xcd1   : > { %v2205_v4 = vld [vmem:[#allocation2] sm:$0xff] }
 0xcd2   : > { %2964 = vmatmul.mubr.msk.bf16.vlgmr.msra.gmra.mrb[36].mxu0 %vm875_vm1, %v2205_v4 }
 0xcd3   : > { %2983 = vmatprep.mubr.msk.bf16.mxu0 %vm3450_vm0, %v3449_v0  ;;  %2976 = vmatpush3.bf16.msra.mxu0 %v3105_v40 }
 0xcd4   : > { %2977 = vmatprep.subr.bf16.mxu0 %v3449_v0 }
 0xcd7   : > { %2978 = vmatpush3.bf16.msra.mxu0 %v3106_v41 }
 0xcd8   : > { %2979 = vmatprep.subr.bf16.mxu0 %v3449_v0 }
 0xcdb   : > { %2980 = vmatpush3.bf16.msra.mxu0 %v3107_v42 }
 0xcdc   : > { %2981 = vmatprep.subr.bf16.mxu0 %v3449_v0 }
 0xcdf   : > { %2982 = vmatpush3.bf16.msra.mxu0 %v3108_v43 }
 0xda5   : > { %v2266_v61 = vpop.f32.mrb[36].mxu0 }
 0xda6   : > { %v2267_v62 = vadd.f32 %v2754_v60, %v2266_v61  ;;  %v2965_v63 = vpop.f32.mrb[37].mxu0 }
 0xda7   : > { %v2269_v1 = vpop.f32.mrb[38].mxu0 }
 0xda8   : > { %v2270_v2 = vadd.f32 %v2754_v60, %v2269_v1  ;;  %v2966_v5 = vpop.f32.mrb[39].mxu0  ;;  %v2273_v6 = vadd.f32 %v2267_v62, %v3982_v19 }
 0xda9   : > { %v2764_v5 = vld [vmem:[#allocation11] ss:$0 sm:$0xff] }
 0xdaa   : > { %v2277_v7 = vsel %vm875_vm1, %v2273_v6, 0.0  ;;  %v2274_v8 = vadd.f32 %v2270_v2, %v3984_v20  ;;  %v3103_v20 = vld [vmem:[%s4156_s17] sm:$0xff]  }
 0xdab   : > { %2278 = vadd.xlane.f32.xlu1 %v2277_v7  ;;  %2968 = vmatpush3.bf16.msra.mxu1 %v3103_v20 }
 0xdac   : > { %v2280_v27 = vsel %vm875_vm1, %v2274_v8, 0.0  ;;  %2969 = vmatprep.subr.bf16.mxu1 %v3449_v0 }
 0xdad   : > { %2281 = vadd.xlane.f32.xlu0 %v2280_v27 }
 0xdaf   : > { %2970 = vmatpush3.bf16.msra.mxu1 %v3104_v21 }
 0xe38   : > { %v2279_v9 = vpop.xlane.xlu1 %2278 }
 0xe39   : > { %v2283_v10 = vmul.f32 0.03125, %v2279_v9 }
 0xe3a   : > { %v2282_v11 = vpop.xlane.xlu0 %2281 }
 0xe3b   : > { %v2285_v12 = vsub.f32 %v2273_v6, %v2283_v10  ;;  %v2284_v13 = vmul.f32 0.03125, %v2282_v11 }
 0xe3d   : > { %v2286_v14 = vsub.f32 %v2274_v8, %v2284_v13  ;;  %v2287_v16 = vmul.f32 %v2285_v12, %v2285_v12 }
 0xe3f   : > { %v2289_v17 = vsel %vm875_vm1, %v2287_v16, 0.0  ;;  %v2288_v18 = vmul.f32 %v2286_v14, %v2286_v14 }
 0xe40   : > { %2290 = vadd.xlane.f32.xlu0 %v2289_v17 }
 0xe41   : > { %v2292_v19 = vsel %vm875_vm1, %v2288_v18, 0.0 }
 0xe42   : > { %2293 = vadd.xlane.f32.xlu1 %v2292_v19 }
 0xecd   : > { %v2291_v22 = vpop.xlane.xlu0 %2290 }
 0xece   : > { %v2295_v23 = vmul.f32 0.03125, %v2291_v22 }
 0xecf   : > { %v2294_v24 = vpop.xlane.xlu1 %2293 }
 0xed0   : > { %v2297_v25 = vadd.f32 1e-12, %v2295_v23  ;;  %v2296_v26 = vmul.f32 0.03125, %v2294_v24 }
 0xed2   : > { %3177 = vrsqrt.f32 %v2297_v25  ;;  %v2298_v28 = vadd.f32 1e-12, %v2296_v26 }
 0xed4   : > { %3179 = vrsqrt.f32 %v2298_v28 }
 0xedc   : > { %v3178_v29 = vpop.eup %3177 }
 0xedd   : > { %v2301_v31 = vmul.f32 %v3178_v29, %v2285_v12 }
 0xede   : > { %v3180_v32 = vpop.eup %3179 }
 0xedf   : > { %v2309_v33 = vmul.f32 %v2758_v30, %v2301_v31  ;;  %v2302_v34 = vmul.f32 %v3180_v32, %v2286_v14 }
 0xee1   : > { %v2310_v36 = vmul.f32 %v2758_v30, %v2302_v34  ;;  %v2317_v37 = vadd.f32 %v2759_v35, %v2309_v33  ;;  %v2770_v34 = vld [vmem:[#allocation13] ss:$0 sm:$0xff] }
 0xee3   : > { %v2318_v38 = vadd.f32 %v2759_v35, %v2310_v36 }
 0xee5   : > { %v2319_v39 = vpack.c.bf16 %v2318_v38, %v2317_v37 }
 0xee7   : > { %2972 = vmatmul.mubr.msk.bf16.vlgmr.msra.gmra.mrb[44].mxu1 %vm875_vm1, %v2319_v39 }
 0xfba   : > { %v2380_v45 = vpop.f32.mrb[44].mxu1 }
 0xfbb   : > { %v2381_v46 = vadd.f32 %v2760_v44, %v2380_v45  ;;  %v2973_v47 = vpop.f32.mrb[45].mxu1 }
 0xfbc   : > { %v2383_v48 = vpop.f32.mrb[46].mxu1 }
 0xfbd   : > { %v2389_v49 = vmul.f32 0.044715, %v2381_v46  ;;  %v2384_v50 = vadd.f32 %v2760_v44, %v2383_v48  ;;  %v2974_v51 = vpop.f32.mrb[47].mxu1  ;;  %v2387_v60 = vmul.f32 0.5, %v2381_v46 }
 0xfbf   : > { %v2391_v52 = vmul.f32 %v2389_v49, %v2381_v46  ;;  %v2390_v53 = vmul.f32 0.044715, %v2384_v50  ;;  %v2388_v61 = vmul.f32 0.5, %v2384_v50 }
 0xfc1   : > { %v2393_v15 = vmul.f32 %v2391_v52, %v2381_v46  ;;  %v2392_v54 = vmul.f32 %v2390_v53, %v2384_v50 }
 0xfc3   : > { %v2395_v55 = vadd.f32 %v2393_v15, %v2381_v46  ;;  %v2394_v56 = vmul.f32 %v2392_v54, %v2384_v50 }
 0xfc5   : > { %v2397_v57 = vmul.f32 0.7978846, %v2395_v55  ;;  %v2396_v58 = vadd.f32 %v2394_v56, %v2384_v50 }
 0xfc7   : > { %3181 = vtanh.f32 %v2397_v57  ;;  %v2398_v59 = vmul.f32 0.7978846, %v2396_v58 }
 0xfc9   : > { %3183 = vtanh.f32 %v2398_v59 }
 0xfd1   : > { %v3182_v0 = vpop.eup %3181 }
 0xfd2   : > { %v2401_v3 = vadd.f32 1.0, %v3182_v0 }
 0xfd3   : > { %v3184_v4 = vpop.eup %3183 }
 0xfd4   : > { %v2402_v62 = vadd.f32 1.0, %v3184_v4  ;;  %v2403_v63 = vmul.f32 %v2401_v3, %v2387_v60 }
 0xfd6   : > { %v2404_v1 = vmul.f32 %v2402_v62, %v2388_v61 }
 0xfd8   : > { %v2405_v2 = vpack.c.bf16 %v2404_v1, %v2403_v63 }
 0xfda   : > { %2984 = vmatmul.mubr.msk.bf16.vlgmr.msra.gmra.mrb[40].mxu0 %vm2445_vm9, %v2405_v2 }
0x10ad   : > { %v2483_v6 = vpop.f32.mrb[40].mxu0 }
0x10ae   : > { %v2484_v7 = vadd.f32 %v2764_v5, %v2483_v6  ;;  %v2985_v8 = vpop.f32.mrb[41].mxu0 }
0x10af   : > { %v2486_v27 = vpop.f32.mrb[42].mxu0 }
0x10b0   : > { %v2487_v9 = vadd.f32 %v2764_v5, %v2486_v27  ;;  %v2986_v10 = vpop.f32.mrb[43].mxu0  ;;  %v2490_v11 = vadd.f32 %v2484_v7, %v2317_v37  ;;  %v2771_v37 = vld [vmem:[#allocation14] ss:$0 sm:$0xff] }
0x10b2   : > { %v2494_v12 = vsel %vm875_vm1, %v2490_v11, 0.0  ;;  %v2491_v13 = vadd.f32 %v2487_v9, %v2318_v38 }
0x10b3   : > { %2495 = vadd.xlane.f32.xlu0 %v2494_v12 }
0x10b4   : > { %v2497_v14 = vsel %vm875_vm1, %v2491_v13, 0.0 }
0x10b5   : > { %2498 = vadd.xlane.f32.xlu1 %v2497_v14 }
0x1140   : > { %v2496_v16 = vpop.xlane.xlu0 %2495 }
0x1141   : > { %v2500_v17 = vmul.f32 0.03125, %v2496_v16 }
0x1142   : > { %v2499_v18 = vpop.xlane.xlu1 %2498 }
0x1143   : > { %v2502_v19 = vsub.f32 %v2490_v11, %v2500_v17  ;;  %v2501_v20 = vmul.f32 0.03125, %v2499_v18 }
0x1145   : > { %v2503_v21 = vsub.f32 %v2491_v13, %v2501_v20  ;;  %v2504_v22 = vmul.f32 %v2502_v19, %v2502_v19 }
0x1147   : > { %v2506_v23 = vsel %vm875_vm1, %v2504_v22, 0.0  ;;  %v2505_v24 = vmul.f32 %v2503_v21, %v2503_v21 }
0x1148   : > { %2507 = vadd.xlane.f32.xlu0 %v2506_v23 }
0x1149   : > { %v2509_v25 = vsel %vm875_vm1, %v2505_v24, 0.0 }
0x114a   : > { %2510 = vadd.xlane.f32.xlu1 %v2509_v25 }
0x11d5   : > { %v2508_v26 = vpop.xlane.xlu0 %2507 }
0x11d6   : > { %v2512_v28 = vmul.f32 0.03125, %v2508_v26 }
0x11d7   : > { %v2511_v29 = vpop.xlane.xlu1 %2510 }
0x11d8   : > { %v2514_v30 = vadd.f32 1e-12, %v2512_v28  ;;  %v2513_v31 = vmul.f32 0.03125, %v2511_v29 }
0x11da   : > { %3185 = vrsqrt.f32 %v2514_v30  ;;  %v2515_v32 = vadd.f32 1e-12, %v2513_v31 }
0x11dc   : > { %3187 = vrsqrt.f32 %v2515_v32 }
0x11e4   : > { %v3186_v33 = vpop.eup %3185 }
0x11e5   : > { %v2518_v35 = vmul.f32 %v3186_v33, %v2502_v19 }
0x11e6   : > { %v3188_v36 = vpop.eup %3187 }
0x11e7   : > { %v2526_v38 = vmul.f32 %v2770_v34, %v2518_v35  ;;  %v2519_v39 = vmul.f32 %v3188_v36, %v2503_v21 }
0x11e9   : > { %v2534_v40 = vadd.f32 %v2771_v37, %v2526_v38  ;;  %v2527_v41 = vmul.f32 %v2770_v34, %v2519_v39 }
0x11eb   : > { %2536 = vst.msk [vmem:[%s842_s1] sm:$0xff] %vm875_vm1, %v2534_v40  ;;  %v2535_v42 = vadd.f32 %v2771_v37, %v2527_v41 }
0x11ed   : > { %2537 = vst.msk [vmem:[%s842_s1 + $0x8] sm:$0xff] %vm875_vm1, %v2535_v42 }
0x11ee PF: > { %s4218_s7 = sld [smem:[#allocation21_spill]] }
0x11f4   : > { %s38_s4 = sadd.s32 1, %s4218_s7  }
0x11f5   : > { %p35_p13 = scmp.ge.s32.totalorder %s38_s4, 4  }
0x11f7   :  { %37 = sbr.rel (!%p35_p13) target bundleno = 16 (0x10), region = 181 }
0x11fe   :  { %2559 = vsyncpa [#allocation4], 1 }
0x11ff   :  { %2561 = vsyncpa [#allocation4 + $0x1], 1 }
0x1200   :  { %2562 = vsyncpa [#allocation6], 1 }
0x1201   :  { %2563 = vsyncpa [#allocation9], 1 }
0x1202   :  { %2564 = vsyncpa [#allocation12], 1 }
0x1203   :  { %2565 = vsyncpa [#allocation15], 1 }

// kernel: set_pred_forward.15
= control target key start
LH: loop header
LB: loop body
LE: loop exit
PB: predicated region body
PF: predicated region fallthrough
CT: control target
= control target key end

     0   :  { %s2084_s17 = smov 0   ;;  %s2773_s0 = inlined_call_operand.vmem [shape: f32[2,16,32], index: 0, kind: input, shape index: {}]   ;;  %s2774_s1 = inlined_call_operand.vmem [shape: f32[2,8,32], index: 1, kind: input, shape index: {}]   ;;  %s2775_s2 = inlined_call_operand.vmem [shape: f32[2,1,8], index: 2, kind: input, shape index: {}]   ;;  %s2776_s3 = inlined_call_operand.vmem [shape: bf16[32,128], index: 3, kind: input, shape index: {}]   ;;  %s2777_s4 = inlined_call_operand.vmem [shape: f32[1,128], index: 4, kind: input, shape index: {}]   ;;  %s2778_s5 = inlined_call_operand.vmem [shape: bf16[32,128], index: 5, kind: input, shape index: {}]   ;;  %s2779_s6 = inlined_call_operand.vmem [shape: f32[1,128], index: 6, kind: input, shape index: {}]   ;;  %s2780_s7 = inlined_call_operand.vmem [shape: bf16[32,128], index: 7, kind: input, shape index: {}]   ;;  %s2781_s8 = inlined_call_operand.vmem [shape: f32[1,128], index: 8, kind: input, shape index: {}]   ;;  %s2782_s9 = inlined_call_operand.vmem [shape: f32[4,32], index: 9, kind: input, shape index: {}]   ;;  %s2783_s10 = inlined_call_operand.vmem [shape: f32[2,16,128], index: 10, kind: output, shape index: {0}]   ;;  %s2784_s11 = inlined_call_operand.vmem [shape: f32[2,4,16,8], index: 11, kind: output, shape index: {1}]  }
   0x1 LB: > { %s1888_s18 = sadd.s32 4294967295, %s2015_s17   ;;  %p1892_p0 = scmp.ge.s32.totalorder %s2015_s17, 1  ;;  %s2015_s17 = sphi %s2084_s17, %s22_s17  }
   0x2   : > { %p357_p1 = scmp.lt.s32.totalorder %s2015_s17, 3 }
   0x4   : > { %p358_p2 = pnand %p1892_p0, %p357_p1 }
   0x5   : > { %v1971_v0 = vld [vmem:[%s2776_s3] sm:$0xff] (!%p358_p2)   ;;  %v2017_v1 = vmov (!%p358_p2), 0.0   ;;  %v646_v3 = vlaneseq (!%p358_p2)  ;;  %v1973_v4 = vld [vmem:[%s2776_s3 + $0x8] sm:$0xff] (!%p358_p2)   ;;  %vm2018_vm0 = vmmov (!%p358_p2), 0   ;;  %p409_p3 = scmp.lt.s32.totalorder (!%p358_p2), %s1888_s18, 1  ;;  %vm458_vm1 = vcmask (!%p358_p2), 261120  }
   0x6   : > { %361 = sbr.rel (%p358_p2) target bundleno = 794 (0x31a), region = 60  ;;  %1932 = vmatprep.subr.bf16.mxu0 (!%p358_p2), %v2017_v1  ;;  %1940 = vmatprep.subr.bf16.mxu1 (!%p358_p2), %v2017_v1  ;;  %v1972_v2 = vld [vmem:[%s2778_s5] sm:$0xff] (!%p358_p2)   ;;  %v1974_v5 = vld [vmem:[%s2778_s5 + $0x8] sm:$0xff] (!%p358_p2)   ;;  %s2019_s24 = smov (!%p358_p2), 32   ;;  %v2022_v23 = vmov (!%p358_p2), 1966171168  }
   0x7   : > { %1933 = vmatpush3.bf16.msra.mxu0 (!%p358_p2), %v1971_v0  ;;  %1936 = vmatprep.mubr.msk.bf16.mxu0 (!%p358_p2), %vm2018_vm0, %v2017_v1  ;;  %v2108_v6 = vshrl.u32 (!%p358_p2), %v646_v3, 7  ;;  %v2120_v7 = vld [vmem:[%s2782_s9] sm:$0xf] (!%p358_p2)  ;;  %v975_v8 = vand.u32 (!%p358_p2), 127, %v646_v3  ;;  %v1976_v19 = vld [vmem:[%s2780_s7 + $0x8] sm:$0xff] (!%p358_p2)   ;;  %s2020_s25 = smov (!%p358_p2), 96   ;;  %v644_v24 = vunpack.c.l.s4 (!%p358_p2), %v2022_v23 }
   0x8   : > { %1941 = vmatpush3.bf16.msra.mxu1 (!%p358_p2), %v1972_v2  ;;  %1934 = vmatprep.subr.bf16.mxu0 (!%p358_p2), %v2017_v1  ;;  %v1975_v12 = vld [vmem:[%s2780_s7] sm:$0xff] (!%p358_p2)   ;;  %s2021_s26 = smov (!%p358_p2), 64   ;;  %vm1040_vm2 = vcmask (!%p358_p2), 1041409   ;;  %vm1042_vm3 = vcmask (!%p358_p2), 1042434   ;;  %vm1044_vm5 = vcmask (!%p358_p2), 1043459   ;;  %vm1046_vm6 = vcmask (!%p358_p2), 1044484  }
   0x9   : > { %1942 = vmatprep.subr.bf16.mxu1 (!%p358_p2), %v2017_v1  ;;  %1944 = vmatprep.mubr.msk.bf16.mxu1 (!%p358_p2), %vm2018_vm0, %v2017_v1  ;;  %v1070_v9 = vsub.s32 (!%p358_p2), 1, %v2108_v6  ;;  %v1544_v13 = vsub.s32 (!%p358_p2), 3, %v2108_v6  ;;  %v2131_v15 = vsub.s32 (!%p358_p2), %v975_v8, %v2108_v6  ;;  %v1307_v18 = vsub.s32 (!%p358_p2), 2, %v2108_v6  ;;  %v1900_v26 = vld [vmem:[%s2777_s4] ss:$0 sm:$0xff] (!%p358_p2) }
   0xa   : > { %v645_v25 = vunpack.c.0.s8 (!%p358_p2), %v644_v24  ;;  %v1904_v27 = vld [vmem:[%s2779_s6] ss:$0 sm:$0xff] (!%p358_p2)  ;;  %v2160_v47 = vsub.s32 (!%p358_p2), 0, %v2108_v6  ;;  %vm1048_vm7 = vcmask (!%p358_p2), 1045509   ;;  %vm1050_vm8 = vcmask (!%p358_p2), 1046534  }
   0xb   : > { %1935 = vmatpush3.bf16.msra.mxu0 (!%p358_p2), %v1973_v4  ;;  %v1071_v16 = vrot.slane (!%p358_p2), %v2120_v7, %v1070_v9  ;;  %v1545_v17 = vrot.slane (!%p358_p2), %v2120_v7, %v1544_v13  ;;  %v1308_v21 = vrot.slane (!%p358_p2), %v2120_v7, %v1307_v18  ;;  %vm1052_vm9 = vcmask (!%p358_p2), 1047559  }
   0xc   : > { %1943 = vmatpush3.bf16.msra.mxu1 (!%p358_p2), %v1974_v5  ;;  %1948 = vmatprep.subr.bf16.mxu0 (!%p358_p2), %v2017_v1  ;;  %v648_v28 = vsub.s32 (!%p358_p2), %v645_v25, %v2108_v6  ;;  %vm1065_vm11 = vcmask (!%p358_p2), 64512  }
   0xd   : > { %s2788_s18 = smov (!%p409_p3, %s1888_s18), 1  ;;  %1073 = vrot.lane.b32.xlu0 %v1071_v16, %s2019_s24  ;;  %1547 = vrot.lane.b32.xlu1 %v1545_v17, %s2020_s25 }
   0xe   : > { %s1920_s27 = sshll.u32 %s2788_s18, 4  ;;  %s1895_s28 = sshll.u32 %s2788_s18, 3 }
   0xf   : > { %s413_s12 = scalar_lea.vmem %s2773_s0, %s1920_s27  ;;  %s417_s21 = scalar_lea.vmem %s2774_s1, %s1895_s28 }
  0x10   : > { %v432_v10 = vld [vmem:[%s413_s12] sm:$0xff]  ;;  %v433_v11 = vld [vmem:[%s413_s12 + $0x8] sm:$0xff]  ;;  %s425_s15 = scalar_lea.vmem %s2783_s10, %s1920_s27  ;;  %s1922_s22 = sshll.u32 %s2788_s18, 6 }
  0x11   : > { %v438_v14 = vpack.c.bf16 %v433_v11, %v432_v10  ;;  %v570_v20 = vld [vmem:[%s417_s21] sm:$0xff]  ;;  %1310 = vrot.lane.b32.xlu0 %v1308_v21, %s2021_s26  ;;  %s420_s21 = scalar_lea.vmem %s2775_s2, %s2788_s18 }
  0x12   : > { %v575_v22 = vpack.c.bf16 %v570_v20, %v570_v20 }
  0x13   : > { %1937 = vmatmul.mubr.msk.bf16.vlgmr.msra.gmra.mrb[0].mxu0 %vm458_vm1, %v438_v14  ;;  %1945 = vmatmul.mubr.msk.bf16.vlgmr.msra.gmra.mrb[0].mxu1 %vm458_vm1, %v438_v14 }
  0x14   : > { %1949 = vmatpush3.bf16.msra.mxu0 %v1975_v12  ;;  %1952 = vmatprep.mubr.msk.bf16.mxu0 %vm2018_vm0, %v2017_v1 }
  0x15   : > { %1950 = vmatprep.subr.bf16.mxu0 %v2017_v1  ;;  %v1908_v1 = vld [vmem:[%s2781_s8] ss:$0 sm:$0xff] }
  0x18   : > { %1951 = vmatpush3.bf16.msra.mxu0 %v1976_v19 }
  0x1b   : > { %1953 = vmatmul.mubr.msk.bf16.vlgmr.msra.gmra.mrb[4].mxu0 %vm458_vm1, %v575_v22 }
  0xe6   : > { %v496_v29 = vpop.f32.mrb[0].mxu0  ;;  %v562_v30 = vpop.f32.mrb[0].mxu1 }
  0xe7   : > { %v497_v31 = vadd.f32 %v1900_v26, %v496_v29  ;;  %v563_v32 = vadd.f32 %v1904_v27, %v562_v30  ;;  %v1938_v33 = vpop.f32.mrb[1].mxu0  ;;  %v1946_v34 = vpop.f32.mrb[1].mxu1 }
  0xe8   : > { %v499_v35 = vpop.f32.mrb[2].mxu0  ;;  %v565_v36 = vpop.f32.mrb[2].mxu1 }
  0xe9   : > { %503 = vst [vmem:[%s425_s15] sm:$0xff] %v497_v31  ;;  %v642_v37 = vcombine.high %v563_v32, %v563_v32  ;;  %v649_v38 = vrot.slane %v563_v32, %v648_v28  ;;  %v500_v39 = vadd.f32 %v1900_v26, %v499_v35  ;;  %v566_v40 = vadd.f32 %v1904_v27, %v565_v36  ;;  %v1939_v41 = vpop.f32.mrb[3].mxu0  ;;  %v1947_v42 = vpop.f32.mrb[3].mxu1 }
  0xeb   : > { %v656_v43 = vrot.slane %v642_v37, %v648_v28  ;;  %v657_v44 = vcombine.high %v649_v38, %v649_v38  ;;  %v665_v45 = vrot.slane %v649_v38, %v648_v28  ;;  %504 = vst [vmem:[%s425_s15 + $0x8] sm:$0xff] %v500_v39  ;;  %v691_v46 = vcombine.high %v566_v40, %v566_v40 }
  0xec   : > { %v698_v48 = vrot.slane %v566_v40, %v648_v28 }
  0xed   : > { %v658_v49 = vcombine.high %v656_v43, %v656_v43  ;;  %v672_v50 = vrot.slane %v656_v43, %v648_v28  ;;  %v679_v51 = vrot.slane %v657_v44, %v648_v28  ;;  %v687_v52 = vcombine.high %v665_v45, %v665_v45 }
  0xee   : > { %v705_v53 = vrot.slane %v691_v46, %v648_v28  ;;  %v706_v54 = vcombine.high %v698_v48, %v698_v48  ;;  %v714_v55 = vrot.slane %v698_v48, %v648_v28  ;;  %v632_v56 = vpop.f32.mrb[4].mxu0  ;;  %v743_v61 = vrot.slane %v665_v45, %v2160_v47 }
  0xef   : > { %v686_v57 = vrot.slane %v658_v49, %v648_v28  ;;  %v688_v58 = vcombine.high %v672_v50, %v672_v50  ;;  %v689_v59 = vcombine.high %v679_v51, %v679_v51  ;;  %v1954_v60 = vpop.f32.mrb[5].mxu0  ;;  %v747_v62 = vrot.slane %v679_v51, %v2160_v47  ;;  %v2183_v51 = vpop.permute.xlu0 %1073 }
  0xf0   : > { %v707_v63 = vcombine.high %v705_v53, %v705_v53  ;;  %v721_v0 = vrot.slane %v705_v53, %v648_v28  ;;  %v635_v2 = vpop.f32.mrb[6].mxu0  ;;  %v751_v4 = vrot.slane %v687_v52, %v2160_v47  ;;  %v759_v6 = vrot.slane %v672_v50, %v2160_v47 }
  0xf1   : > { %v690_v3 = vcombine.high %v686_v57, %v686_v57  ;;  %v755_v5 = vrot.slane %v689_v59, %v2160_v47  ;;  %v1955_v8 = vpop.f32.mrb[7].mxu0  ;;  %v763_v9 = vrot.slane %v686_v57, %v2160_v47  ;;  %v728_v10 = vrot.slane %v706_v54, %v648_v28 }
  0xf2   : > { %v735_v11 = vrot.slane %v707_v63, %v648_v28  ;;  %v736_v12 = vcombine.high %v714_v55, %v714_v55  ;;  %v767_v13 = vrot.slane %v688_v58, %v2160_v47  ;;  %v737_v14 = vcombine.high %v721_v0, %v721_v0 }
  0xf3   : > { %v775_v16 = vrot.slane %v714_v55, %v2160_v47  ;;  %v633_v17 = vadd.f32 %v1908_v1, %v632_v56  ;;  %v771_v18 = vrot.slane %v690_v3, %v2160_v47  ;;  %v738_v19 = vcombine.high %v728_v10, %v728_v10  ;;  %v2187_v59 = vpop.permute.xlu0 %1310 }
  0xf4   : > { %v779_v20 = vrot.slane %v728_v10, %v2160_v47  ;;  %v791_v21 = vrot.slane %v721_v0, %v2160_v47  ;;  %v739_v22 = vcombine.high %v735_v11, %v735_v11  ;;  %v783_v23 = vrot.slane %v736_v12, %v2160_v47 }
  0xf5   : > { %v821_v24 = vadd.f32 %v747_v62, %v633_v17  ;;  %v820_v25 = vadd.f32 %v743_v61, %v633_v17  ;;  %v787_v26 = vrot.slane %v738_v19, %v2160_v47  ;;  %v795_v27 = vrot.slane %v735_v11, %v2160_v47 }
  0xf6   : > { %v822_v28 = vadd.f32 %v751_v4, %v633_v17  ;;  %v824_v29 = vadd.f32 %v759_v6, %v633_v17  ;;  %v828_v32 = vadd.f32 %v775_v16, %v633_v17  ;;  %v823_v33 = vadd.f32 %v755_v5, %v633_v17  ;;  %v2196_v6 = vpop.permute.xlu1 %1547 }
  0xf7   : > { %v837_v30 = vpack.c.bf16 %v821_v24, %v821_v24  ;;  %v836_v31 = vpack.c.bf16 %v820_v25, %v820_v25  ;;  %v825_v36 = vadd.f32 %v763_v9, %v633_v17  ;;  %v829_v37 = vadd.f32 %v779_v20, %v633_v17 }
  0xf8   : > { %v838_v34 = vpack.c.bf16 %v822_v28, %v822_v28  ;;  %v840_v35 = vpack.c.bf16 %v824_v29, %v824_v29  ;;  %v799_v38 = vrot.slane %v737_v14, %v2160_v47  ;;  %v844_v39 = vpack.c.bf16 %v828_v32, %v828_v32 }
  0xf9   : > { %1977 = vtanh.bf16 %v837_v30  ;;  %v830_v40 = vadd.f32 %v783_v23, %v633_v17  ;;  %v803_v41 = vrot.slane %v739_v22, %v2160_v47  ;;  %v832_v42 = vadd.f32 %v791_v21, %v633_v17 }
  0xfa   : > { %1979 = vtanh.bf16 %v836_v31  ;;  %v826_v43 = vadd.f32 %v767_v13, %v633_v17  ;;  %v827_v44 = vadd.f32 %v771_v18, %v633_v17  ;;  %v839_v45 = vpack.c.bf16 %v823_v33, %v823_v33 }
  0xfb   : > { %1981 = vtanh.bf16 %v838_v34  ;;  %v831_v46 = vadd.f32 %v787_v26, %v633_v17  ;;  %v833_v48 = vadd.f32 %v795_v27, %v633_v17  ;;  %v846_v49 = vpack.c.bf16 %v830_v40, %v830_v40 }
  0xfc   : > { %1983 = vtanh.bf16 %v840_v35  ;;  %v2181_v50 = vadd.f32 %v799_v38, %v633_v17  ;;  %v848_v52 = vpack.c.bf16 %v832_v42, %v832_v42  ;;  %v2185_v53 = vadd.f32 %v803_v41, %v633_v17 }
  0xfd   : > { %1985 = vtanh.bf16 %v844_v39  ;;  %v842_v54 = vpack.c.bf16 %v826_v43, %v826_v43  ;;  %v841_v55 = vpack.c.bf16 %v825_v36, %v825_v36  ;;  %v845_v56 = vpack.c.bf16 %v829_v37, %v829_v37 }
  0xfe   : > { %1987 = vtanh.bf16 %v839_v45  ;;  %v843_v57 = vpack.c.bf16 %v827_v44, %v827_v44  ;;  %v847_v60 = vpack.c.bf16 %v831_v46, %v831_v46  ;;  %v2191_v62 = vrot.slane %v2120_v7, %v2160_v47 }
  0xff   : > { %1989 = vtanh.bf16 %v846_v49  ;;  %v849_v0 = vpack.c.bf16 %v833_v48, %v833_v48  ;;  %v850_v39 = vpack.c.bf16 %v2181_v50, %v2181_v50  ;;  %v851_v40 = vpack.c.bf16 %v2185_v53, %v2185_v53 }
 0x100   : > { %1991 = vtanh.bf16 %v848_v52 }
 0x101   : > { %1993 = vtanh.bf16 %v842_v54 }
 0x102   : > { %1995 = vtanh.bf16 %v841_v55 }
 0x103   : > { %1997 = vtanh.bf16 %v845_v56 }
 0x104   : > { %v1978_v58 = vpop.eup %1977  ;;  %1999 = vtanh.bf16 %v843_v57 }
 0x105   : > { %v1980_v61 = vpop.eup %1979  ;;  %v869_v63 = vunpack.c.l.bf16 %v1978_v58  ;;  %2001 = vtanh.bf16 %v847_v60 }
 0x106   : > { %v1982_v1 = vpop.eup %1981  ;;  %v2193_v2 = vunpack.c.l.bf16 %v1980_v61  ;;  %2003 = vtanh.bf16 %v849_v0 }
 0x107   : > { %v1984_v3 = vpop.eup %1983  ;;  %v1314_v4 = vmul.f32 %v2187_v59, %v869_v63  ;;  %v2208_v11 = vunpack.c.l.bf16 %v1982_v1  ;;  %v2211_v12 = vmul.f32 %v2191_v62, %v869_v63  ;;  %v1551_v16 = vmul.f32 %v2196_v6, %v869_v63 }
 0x108   : > { %v1986_v5 = vpop.eup %1985  ;;  %v1076_v8 = vmul.f32 %v2183_v51, %v2193_v2  ;;  %v2200_v9 = vunpack.c.l.bf16 %v1984_v3  ;;  %v2205_v10 = vmul.f32 %v2191_v62, %v2193_v2  ;;  %v1077_v18 = vmul.f32 %v2183_v51, %v869_v63 }
 0x109   : > { %1347 = vrot.lane.b32.xlu0 %v1314_v4, %s2021_s26  ;;  %v876_v7 = vunpack.c.l.bf16 %v1986_v5  ;;  %v1988_v14 = vpop.eup %1987  ;;  %v2226_v22 = vmul.f32 %v2191_v62, %v2208_v11  ;;  %v1078_v25 = vmul.f32 %v2183_v51, %v2208_v11  ;;  %2005 = vtanh.bf16 %v850_v39 }
 0x10a   : > { %1108 = vrot.lane.b32.xlu1 %v1076_v8, %s2020_s25  ;;  %v2215_v13 = vmul.f32 %v2191_v62, %v2200_v9  ;;  %v1990_v17 = vpop.eup %1989  ;;  %v2237_v30 = vunpack.c.l.bf16 %v1988_v14  ;;  %v1080_v36 = vmul.f32 %v2183_v51, %v2200_v9  ;;  %2007 = vtanh.bf16 %v851_v40 }
 0x10b   : > { %v2220_v19 = vmul.f32 %v2191_v62, %v876_v7  ;;  %v1992_v20 = vpop.eup %1991  ;;  %v2228_v24 = vunpack.c.l.bf16 %v1990_v17  ;;  %v1084_v46 = vmul.f32 %v2183_v51, %v876_v7  ;;  %v1313_v53 = vmul.f32 %v2187_v59, %v2193_v2 }
 0x10c   : > { %v1994_v21 = vpop.eup %1993  ;;  %v2232_v26 = vunpack.c.l.bf16 %v1992_v20  ;;  %v2268_v43 = vmul.f32 %v2191_v62, %v2237_v30  ;;  %v1321_v54 = vmul.f32 %v2187_v59, %v876_v7  ;;  %v1550_v56 = vmul.f32 %v2196_v6, %v2193_v2 }
 0x10d   : > { %1584 = vrot.lane.b32.xlu0 %v1551_v16, %s2019_s24  ;;  %v1996_v23 = vpop.eup %1995  ;;  %v2234_v28 = vunpack.c.l.bf16 %v1994_v21  ;;  %v2247_v34 = vmul.f32 %v2191_v62, %v2228_v24  ;;  %v1558_v63 = vmul.f32 %v2196_v6, %v876_v7  ;;  %v904_v1 = vsel %vm458_vm1, %v2205_v10, 0.0 }
 0x10e   : > { %1110 = vrot.lane.b32.xlu1 %v1077_v18, %s2020_s25  ;;  %v1998_v27 = vpop.eup %1997  ;;  %v2239_v31 = vunpack.c.l.bf16 %v1996_v23  ;;  %v2255_v38 = vmul.f32 %v2191_v62, %v2232_v26  ;;  %v1315_v2 = vmul.f32 %v2187_v59, %v2208_v11  ;;  %v907_v3 = vsel %vm458_vm1, %v2211_v12, 0.0 }
 0x10f   : > { %v2000_v29 = vpop.eup %1999  ;;  %v2243_v33 = vmul.f32 %v2191_v62, %v2234_v28  ;;  %v2251_v37 = vunpack.c.l.bf16 %v1998_v27  ;;  %v1552_v4 = vmul.f32 %v2196_v6, %v2208_v11  ;;  %v1317_v5 = vmul.f32 %v2187_v59, %v2200_v9 }
 0x110   : > { %v2002_v32 = vpop.eup %2001  ;;  %v2262_v41 = vunpack.c.l.bf16 %v2000_v29  ;;  %v2272_v44 = vmul.f32 %v2191_v62, %v2239_v31  ;;  %v928_v8 = vsel %vm458_vm1, %v2220_v19, 0.0  ;;  %v1554_v7 = vmul.f32 %v2196_v6, %v2200_v9 }
 0x111   : > { %v2004_v35 = vpop.eup %2003  ;;  %v2264_v42 = vunpack.c.l.bf16 %v2002_v32  ;;  %v2279_v48 = vmul.f32 %v2191_v62, %v2251_v37  ;;  %v1079_v10 = vmul.f32 %v2183_v51, %v2237_v30  ;;  %v1081_v11 = vmul.f32 %v2183_v51, %v2239_v31 }
 0x112   : > { %1112 = vrot.lane.b32.xlu1 %v1078_v25, %s2020_s25  ;;  %v2274_v45 = vunpack.c.l.bf16 %v2004_v35  ;;  %v2284_v49 = vmul.f32 %v2191_v62, %v2262_v41  ;;  %v1085_v12 = vmul.f32 %v2183_v51, %v2251_v37  ;;  %v1559_v9 = vmul.f32 %v2196_v6, %v2251_v37 }
 0x113   : > { %v2288_v50 = vmul.f32 %v2191_v62, %v2264_v42  ;;  %v910_v14 = vsel %vm458_vm1, %v2226_v22, 0.0  ;;  %v1560_v16 = vmul.f32 %v2196_v6, %v2228_v24  ;;  %v1325_v17 = vmul.f32 %v2187_v59, %v2232_v26 }
 0x114   : > { %v2292_v52 = vmul.f32 %v2191_v62, %v2274_v45  ;;  %v2006_v55 = vpop.eup %2005  ;;  %v1562_v18 = vmul.f32 %v2196_v6, %v2232_v26  ;;  %v1082_v19 = vmul.f32 %v2183_v51, %v2234_v28  ;;  %v1086_v20 = vmul.f32 %v2183_v51, %v2228_v24 }
 0x115   : > { %v2008_v57 = vpop.eup %2007  ;;  %v2301_v58 = vunpack.c.l.bf16 %v2006_v55  ;;  %v1088_v21 = vmul.f32 %v2183_v51, %v2232_v26  ;;  %v1322_v22 = vmul.f32 %v2187_v59, %v2251_v37  ;;  %v1316_v23 = vmul.f32 %v2187_v59, %v2237_v30 }
 0x116   : > { %1116 = vrot.lane.b32.xlu1 %v1080_v36, %s2020_s25  ;;  %v2304_v60 = vunpack.c.l.bf16 %v2008_v57  ;;  %v1318_v25 = vmul.f32 %v2187_v59, %v2239_v31  ;;  %v922_v26 = vsel %vm458_vm1, %v2243_v33, 0.0  ;;  %v1555_v27 = vmul.f32 %v2196_v6, %v2239_v31 }
 0x117   : > { %v2308_v61 = vmul.f32 %v2191_v62, %v2301_v58  ;;  %v934_v29 = vsel %vm458_vm1, %v2247_v34, 0.0  ;;  %v940_v32 = vsel %vm458_vm1, %v2255_v38, 0.0  ;;  %v1556_v33 = vmul.f32 %v2196_v6, %v2234_v28 }
 0x118   : > { %v2313_v0 = vmul.f32 %v2191_v62, %v2304_v60  ;;  %v916_v62 = vsel %vm458_vm1, %v2215_v13, 0.0  ;;  %v1323_v13 = vmul.f32 %v2187_v59, %v2228_v24  ;;  %v1553_v24 = vmul.f32 %v2196_v6, %v2237_v30 }
 0x119   : > { %v1319_v30 = vmul.f32 %v2187_v59, %v2234_v28  ;;  %v1083_v31 = vmul.f32 %v2183_v51, %v2262_v41  ;;  %v1087_v34 = vmul.f32 %v2183_v51, %v2264_v42  ;;  %v1089_v35 = vmul.f32 %v2183_v51, %v2274_v45 }
 0x11a   : > { %1124 = vrot.lane.b32.xlu1 %v1084_v46, %s2020_s25  ;;  %v1324_v28 = vmul.f32 %v2187_v59, %v2264_v42  ;;  %v1561_v36 = vmul.f32 %v2196_v6, %v2264_v42  ;;  %v913_v37 = vsel %vm458_vm1, %v2268_v43, 0.0  ;;  %v1326_v39 = vmul.f32 %v2187_v59, %v2274_v45 }
 0x11b   : > { %v919_v40 = vsel %vm458_vm1, %v2272_v44, 0.0  ;;  %v1563_v46 = vmul.f32 %v2196_v6, %v2274_v45  ;;  %v931_v43 = vsel %vm458_vm1, %v2279_v48, 0.0  ;;  %v1090_v55 = vmul.f32 %v2183_v51, %v2301_v58 }
 0x11e   : > { %1345 = vrot.lane.b32.xlu1 %v1313_v53, %s2021_s26  ;;  %v1327_v53 = vmul.f32 %v2187_v59, %v2301_v58 }
 0x122   : > { %1361 = vrot.lane.b32.xlu1 %v1321_v54, %s2021_s26  ;;  %v1564_v54 = vmul.f32 %v2196_v6, %v2301_v58 }
 0x126   : > { %1582 = vrot.lane.b32.xlu1 %v1550_v56, %s2019_s24  ;;  %v1320_v56 = vmul.f32 %v2187_v59, %v2262_v41 }
 0x12a   : > { %1598 = vrot.lane.b32.xlu1 %v1558_v63, %s2019_s24  ;;  %v1557_v63 = vmul.f32 %v2196_v6, %v2262_v41 }
 0x12c   : > { %905 = vadd.xlane.f32.xlu0 %v904_v1 }
 0x12e   : > { %1349 = vrot.lane.b32.xlu1 %v1315_v2, %s2021_s26 }
 0x130   : > { %908 = vadd.xlane.f32.xlu0 %v907_v3 }
 0x132   : > { %1586 = vrot.lane.b32.xlu1 %v1552_v4, %s2019_s24  ;;  %v946_v4 = vsel %vm458_vm1, %v2308_v61, 0.0  ;;  %v1328_v61 = vmul.f32 %v2187_v59, %v2304_v60 }
 0x134   : > { %917 = vadd.xlane.f32.xlu0 %v916_v62 }
 0x136   : > { %1353 = vrot.lane.b32.xlu1 %v1317_v5, %s2021_s26 }
 0x138   : > { %929 = vadd.xlane.f32.xlu0 %v928_v8 }
 0x13a   : > { %1590 = vrot.lane.b32.xlu1 %v1554_v7, %s2019_s24 }
 0x14e   : > { %1114 = vrot.lane.b32.xlu0 %v1079_v10, %s2020_s25 }
 0x152   : > { %1118 = vrot.lane.b32.xlu0 %v1081_v11, %s2020_s25 }
 0x156   : > { %1126 = vrot.lane.b32.xlu0 %v1085_v12, %s2020_s25 }
 0x15a   : > { %1600 = vrot.lane.b32.xlu0 %v1559_v9, %s2019_s24  ;;  %v1091_v9 = vmul.f32 %v2183_v51, %v2304_v60  ;;  %v1565_v51 = vmul.f32 %v2196_v6, %v2304_v60 }
 0x15e   : > { %911 = vadd.xlane.f32.xlu1 %v910_v14  ;;  %1365 = vrot.lane.b32.xlu0 %v1323_v13, %s2021_s26  ;;  %v925_v13 = vsel %vm458_vm1, %v2284_v49, 0.0  ;;  %v943_v49 = vsel %vm458_vm1, %v2292_v52, 0.0 }
 0x162   : > { %1602 = vrot.lane.b32.xlu0 %v1560_v16, %s2019_s24  ;;  %v937_v16 = vsel %vm458_vm1, %v2288_v50, 0.0 }
 0x166   : > { %1369 = vrot.lane.b32.xlu0 %v1325_v17, %s2021_s26 }
 0x16a   : > { %1606 = vrot.lane.b32.xlu0 %v1562_v18, %s2019_s24 }
 0x16f   : > { %1120 = vrot.lane.b32.xlu1 %v1082_v19, %s2020_s25  ;;  %v949_v19 = vsel %vm458_vm1, %v2313_v0, 0.0 }
 0x173   : > { %1128 = vrot.lane.b32.xlu1 %v1086_v20, %s2020_s25 }
 0x177   : > { %1132 = vrot.lane.b32.xlu1 %v1088_v21, %s2020_s25 }
 0x17b   : > { %1363 = vrot.lane.b32.xlu1 %v1322_v22, %s2021_s26  ;;  %v2446_v2 = vpop.permute.xlu0 %1347 }
 0x17c   : > { %v1109_v38 = vpop.permute.xlu1 %1108 }
 0x17d   : > { %v1156_v21 = vsel %vm458_vm1, %v1109_v38, 0.0 }
 0x17f   : > { %1351 = vrot.lane.b32.xlu1 %v1316_v23, %s2021_s26  ;;  %v2448_v58 = vpop.permute.xlu0 %1584 }
 0x180   : > { %v2422_v42 = vpop.permute.xlu1 %1110 }
 0x183   : > { %1588 = vrot.lane.b32.xlu1 %v1553_v24, %s2019_s24 }
 0x184   : > { %v2430_v44 = vpop.permute.xlu1 %1112 }
 0x187   : > { %1355 = vrot.lane.b32.xlu1 %v1318_v25, %s2021_s26 }
 0x188   : > { %v1117_v45 = vpop.permute.xlu1 %1116 }
 0x189   : > { %923 = vadd.xlane.f32.xlu0 %v922_v26  ;;  %v1168_v6 = vsel %vm458_vm1, %v1117_v45, 0.0 }
 0x18b   : > { %1592 = vrot.lane.b32.xlu1 %v1555_v27, %s2019_s24 }
 0x18c   : > { %v1125_v48 = vpop.permute.xlu1 %1124 }
 0x18d   : > { %935 = vadd.xlane.f32.xlu0 %v934_v29  ;;  %v1180_v22 = vsel %vm458_vm1, %v1125_v48, 0.0 }
 0x18f   : > { %1357 = vrot.lane.b32.xlu1 %v1319_v30, %s2021_s26 }
 0x190   : > { %v1346_v57 = vpop.permute.xlu1 %1345 }
 0x191   : > { %941 = vadd.xlane.f32.xlu0 %v940_v32  ;;  %v1393_v0 = vsel %vm458_vm1, %v1346_v57, 0.0  ;;  %v1159_v32 = vsel %vm458_vm1, %v2422_v42, 0.0 }
 0x193   : > { %1594 = vrot.lane.b32.xlu1 %v1556_v33, %s2019_s24 }
 0x194   : > { %v2444_v1 = vpop.permute.xlu1 %1361 }
 0x198   : > { %v1583_v3 = vpop.permute.xlu1 %1582 }
 0x199   : > { %v1630_v25 = vsel %vm458_vm1, %v1583_v3, 0.0 }
 0x19c   : > { %v1599_v5 = vpop.permute.xlu1 %1598 }
 0x19d   : > { %v1654_v29 = vsel %vm458_vm1, %v1599_v5, 0.0 }
 0x1a0   : > { %v1350_v7 = vpop.permute.xlu1 %1349 }
 0x1a4   : > { %v1587_v10 = vpop.permute.xlu1 %1586 }
 0x1a7   : > { %1122 = vrot.lane.b32.xlu0 %v1083_v31, %s2020_s25  ;;  %v1399_v31 = vsel %vm458_vm1, %v1350_v7, 0.0 }
 0x1a8   : > { %v1354_v12 = vpop.permute.xlu1 %1353 }
 0x1a9   : > { %v1405_v38 = vsel %vm458_vm1, %v1354_v12, 0.0 }
 0x1ab   : > { %1130 = vrot.lane.b32.xlu0 %v1087_v34, %s2020_s25  ;;  %v1162_v34 = vsel %vm458_vm1, %v2430_v44, 0.0 }
 0x1ac   : > { %v1591_v17 = vpop.permute.xlu1 %1590 }
 0x1ad   : > { %v1642_v42 = vsel %vm458_vm1, %v1591_v17, 0.0 }
 0x1af   : > { %1134 = vrot.lane.b32.xlu0 %v1089_v35, %s2020_s25  ;;  %v1636_v35 = vsel %vm458_vm1, %v1587_v10, 0.0 }
 0x1b3   : > { %1367 = vrot.lane.b32.xlu0 %v1324_v28, %s2021_s26 }
 0x1b7   : > { %914 = vadd.xlane.f32.xlu1 %v913_v37  ;;  %1604 = vrot.lane.b32.xlu0 %v1561_v36, %s2019_s24  ;;  %v1396_v37 = vsel %vm458_vm1, %v2446_v2, 0.0 }
 0x1b9   : > { %v2452_v62 = vpop.xlane.xlu0 %905 }
 0x1bb   : > { %920 = vadd.xlane.f32.xlu1 %v919_v40  ;;  %1371 = vrot.lane.b32.xlu0 %v1326_v39, %s2021_s26 }
 0x1bd   : > { %v2454_v8 = vpop.xlane.xlu0 %908 }
 0x1bf   : > { %932 = vadd.xlane.f32.xlu1 %v931_v43  ;;  %1608 = vrot.lane.b32.xlu0 %v1563_v46, %s2019_s24  ;;  %v1417_v46 = vsel %vm458_vm1, %v2444_v1, 0.0  ;;  %v1633_v43 = vsel %vm458_vm1, %v2448_v58, 0.0 }
 0x1c1   : > { %v2456_v41 = vpop.xlane.xlu0 %917 }
 0x1c3   : > { %1373 = vrot.lane.b32.xlu0 %v1327_v53, %s2021_s26 }
 0x1c5   : > { %v2458_v11 = vpop.xlane.xlu0 %929 }
 0x1c7   : > { %1610 = vrot.lane.b32.xlu0 %v1564_v54, %s2019_s24 }
 0x1c9   : > { %v1115_v14 = vpop.permute.xlu0 %1114 }
 0x1ca   : > { %v1165_v45 = vsel %vm458_vm1, %v1115_v14, 0.0 }
 0x1cd   : > { %v1119_v59 = vpop.permute.xlu0 %1118 }
 0x1ce   : > { %v1171_v44 = vsel %vm458_vm1, %v1119_v59, 0.0 }
 0x1d0   : > { %1136 = vrot.lane.b32.xlu1 %v1090_v55, %s2020_s25 }
 0x1d1   : > { %v1127_v20 = vpop.permute.xlu0 %1126 }
 0x1d2   : > { %v1183_v1 = vsel %vm458_vm1, %v1127_v20, 0.0 }
 0x1d4   : > { %1359 = vrot.lane.b32.xlu1 %v1320_v56, %s2021_s26 }
 0x1d5   : > { %v2481_v52 = vpop.permute.xlu0 %1600 }
 0x1d6   : > { %v1657_v12 = vsel %vm458_vm1, %v2481_v52, 0.0 }
 0x1d8   : > { %1596 = vrot.lane.b32.xlu1 %v1557_v63, %s2019_s24 }
 0x1d9   : > { %v2484_v24 = vpop.permute.xlu0 %1365 }
 0x1dd   : > { %v2488_v27 = vpop.permute.xlu0 %1602 }
 0x1e1   : > { %v2493_v33 = vpop.permute.xlu0 %1369 }
 0x1e5   : > { %v1607_v36 = vpop.permute.xlu0 %1606 }
 0x1e6   : > { %947 = vadd.xlane.f32.xlu0 %v946_v4 }
 0x1eb   : > { %v2474_v18 = vpop.xlane.xlu1 %911 }
 0x1ef   : > { %v1121_v50 = vpop.permute.xlu1 %1120 }
 0x1f0   : > { %v1174_v57 = vsel %vm458_vm1, %v1121_v50, 0.0  ;;  %v1429_v50 = vsel %vm458_vm1, %v2493_v33, 0.0 }
 0x1f3   : > { %v1129_v60 = vpop.permute.xlu1 %1128 }
 0x1f4   : > { %v1186_v55 = vsel %vm458_vm1, %v1129_v60, 0.0 }
 0x1f7   : > { %v1133_v23 = vpop.permute.xlu1 %1132 }
 0x1f8   : > { %v1192_v63 = vsel %vm458_vm1, %v1133_v23, 0.0 }
 0x1fb   : > { %v1364_v26 = vpop.permute.xlu1 %1363 }
 0x1fc   : > { %926 = vadd.xlane.f32.xlu1 %v925_v13  ;;  %1138 = vrot.lane.b32.xlu0 %v1091_v9, %s2020_s25  ;;  %v1420_v4 = vsel %vm458_vm1, %v1364_v26, 0.0  ;;  %s2595_s25 = scalar_lea.vmem %s2784_s11, %s1922_s22 }
 0x1ff   : > { %v1352_v30 = vpop.permute.xlu1 %1351 }
 0x200   : > { %938 = vadd.xlane.f32.xlu1 %v937_v16  ;;  %1375 = vrot.lane.b32.xlu0 %v1328_v61, %s2021_s26  ;;  %v1402_v3 = vsel %vm458_vm1, %v1352_v30, 0.0  ;;  %v1423_v61 = vsel %vm458_vm1, %v2484_v24, 0.0 }
 0x203   : > { %v1589_v28 = vpop.permute.xlu1 %1588 }
 0x204   : > { %944 = vadd.xlane.f32.xlu1 %v943_v49  ;;  %1612 = vrot.lane.b32.xlu0 %v1565_v51, %s2019_s24  ;;  %v1639_v5 = vsel %vm458_vm1, %v1589_v28, 0.0  ;;  %v1660_v51 = vsel %vm458_vm1, %v2488_v27, 0.0 }
 0x207   : > { %v1356_v40 = vpop.permute.xlu1 %1355 }
 0x208   : > { %950 = vadd.xlane.f32.xlu1 %v949_v19  ;;  %v1408_v9 = vsel %vm458_vm1, %v1356_v40, 0.0 }
 0x20b   : > { %v1593_v54 = vpop.permute.xlu1 %1592 }
 0x20c   : > { %1157 = vadd.xlane.f32.xlu1 %v1156_v21  ;;  %v1645_v14 = vsel %vm458_vm1, %v1593_v54, 0.0  ;;  %v979_v54 = vrot.slane %v2452_v62, %v2131_v15 }
 0x20f   : > { %v1358_v56 = vpop.permute.xlu1 %1357 }
 0x210   : > { %1169 = vadd.xlane.f32.xlu1 %v1168_v6  ;;  %v1411_v49 = vsel %vm458_vm1, %v1358_v56, 0.0  ;;  %v1666_v6 = vsel %vm458_vm1, %v1607_v36, 0.0 }
 0x213   : > { %v1595_v58 = vpop.permute.xlu1 %1594 }
 0x214   : > { %1181 = vadd.xlane.f32.xlu1 %v1180_v22  ;;  %v1648_v20 = vsel %vm458_vm1, %v1595_v58, 0.0 }
 0x216   : > { %v2502_v39 = vpop.xlane.xlu0 %923 }
 0x218   : > { %1394 = vadd.xlane.f32.xlu1 %v1393_v0 }
 0x21a   : > { %v2509_v53 = vpop.xlane.xlu0 %935 }
 0x21c   : > { %1631 = vadd.xlane.f32.xlu1 %v1630_v25 }
 0x21e   : > { %v2514_v48 = vpop.xlane.xlu0 %941 }
 0x220   : > { %1655 = vadd.xlane.f32.xlu1 %v1654_v29 }
 0x222   : > { %v1123_v2 = vpop.permute.xlu0 %1122 }
 0x223   : > { %1160 = vadd.xlane.f32.xlu0 %v1159_v32  ;;  %v1177_v22 = vsel %vm458_vm1, %v1123_v2, 0.0  ;;  %v995_v2 = vrot.slane %v2456_v41, %v2131_v15 }
 0x224   : > { %1400 = vadd.xlane.f32.xlu1 %v1399_v31 }
 0x226   : > { %v1131_v10 = vpop.permute.xlu0 %1130 }
 0x227   : > { %1163 = vadd.xlane.f32.xlu0 %v1162_v34  ;;  %v1189_v25 = vsel %vm458_vm1, %v1131_v10, 0.0  ;;  %v1003_v10 = vrot.slane %v2502_v39, %v2131_v15 }
 0x228   : > { %1637 = vadd.xlane.f32.xlu1 %v1636_v35 }
 0x22a   : > { %v1135_v16 = vpop.permute.xlu0 %1134 }
 0x22b   : > { %1397 = vadd.xlane.f32.xlu0 %v1396_v37  ;;  %v1195_v27 = vsel %vm458_vm1, %v1135_v16, 0.0 }
 0x22c   : > { %1406 = vadd.xlane.f32.xlu1 %v1405_v38 }
 0x22e   : > { %v1368_v19 = vpop.permute.xlu0 %1367 }
 0x22f   : > { %1418 = vadd.xlane.f32.xlu0 %v1417_v46  ;;  %v1426_v30 = vsel %vm458_vm1, %v1368_v19, 0.0  ;;  %v638_v46 = vld [vmem:[%s420_s21] sm:$0x1] }
 0x230   : > { %1643 = vadd.xlane.f32.xlu1 %v1642_v42  ;;  %v983_v42 = vrot.slane %v2454_v8, %v2131_v15  ;;  %vm639_vm4 = vcmp.gt.f32.partialorder %v638_v46, 0.5 }
 0x232   : > { %v1605_v60 = vpop.permute.xlu0 %1604 }
 0x233   : > { %1634 = vadd.xlane.f32.xlu0 %v1633_v43  ;;  %v1663_v33 = vsel %vm458_vm1, %v1605_v60, 0.0 }
 0x234   : > { %1172 = vadd.xlane.f32.xlu1 %v1171_v44  ;;  %v987_v44 = vrot.slane %v2474_v18, %v2131_v15 }
 0x236   : > { %v1372_v0 = vpop.permute.xlu0 %1371 }
 0x237   : > { %1166 = vadd.xlane.f32.xlu0 %v1165_v45  ;;  %v1432_v31 = vsel %vm458_vm1, %v1372_v0, 0.0 }
 0x238   : > { %1187 = vadd.xlane.f32.xlu1 %v1186_v55  ;;  %v1041_v55 = vsel %vm1040_vm2, %v983_v42, %v979_v54 }
 0x239   : > { %v1043_v56 = vsel %vm1042_vm3, %v987_v44, %v1041_v55 }
 0x23a   : > { %v1609_v29 = vpop.permute.xlu0 %1608 }
 0x23b   : > { %1175 = vadd.xlane.f32.xlu0 %v1174_v57  ;;  %v1669_v35 = vsel %vm458_vm1, %v1609_v29, 0.0 }
 0x23c   : > { %1193 = vadd.xlane.f32.xlu1 %v1192_v63  ;;  %v2023_v63 = vmov 0  }
 0x23d   : > { %v952_v18 = vsel %vm639_vm4, 1, %v2023_v63 }
 0x23e   : > { %v1374_v32 = vpop.permute.xlu0 %1373  ;;  %v956_v58 = vrot.slane %v952_v18, %v2160_v47 }
 0x23f   : > { %1184 = vadd.xlane.f32.xlu0 %v1183_v1  ;;  %v1435_v36 = vsel %vm458_vm1, %v1374_v32, 0.0 }
 0x240   : > { %1403 = vadd.xlane.f32.xlu1 %v1402_v3  ;;  %vm2587_vm10 = vcmp.eq.s32.totalorder %v956_v58, 1 }
 0x242   : > { %v1611_v34 = vpop.permute.xlu0 %1610 }
 0x243   : > { %1421 = vadd.xlane.f32.xlu0 %v1420_v4  ;;  %v1672_v38 = vsel %vm458_vm1, %v1611_v34, 0.0 }
 0x244   : > { %v2522_v7 = vpop.xlane.xlu1 %914  ;;  %1640 = vadd.xlane.f32.xlu1 %v1639_v5 }
 0x245   : > { %v991_v45 = vrot.slane %v2522_v7, %v2131_v15 }
 0x247   : > { %1658 = vadd.xlane.f32.xlu0 %v1657_v12  ;;  %v1045_v1 = vsel %vm1044_vm5, %v991_v45, %v1043_v56  ;;  %v1011_v12 = vrot.slane %v2458_v11, %v2131_v15  ;;  %v1019_v11 = vrot.slane %v2509_v53, %v2131_v15 }
 0x248   : > { %v2527_v13 = vpop.xlane.xlu1 %920  ;;  %1409 = vadd.xlane.f32.xlu1 %v1408_v9  ;;  %v1047_v4 = vsel %vm1046_vm6, %v995_v2, %v1045_v1 }
 0x249   : > { %v999_v62 = vrot.slane %v2527_v13, %v2131_v15 }
 0x24b   : > { %1424 = vadd.xlane.f32.xlu0 %v1423_v61  ;;  %v1049_v5 = vsel %vm1048_vm7, %v999_v62, %v1047_v4 }
 0x24c   : > { %v2532_v17 = vpop.xlane.xlu1 %932  ;;  %1646 = vadd.xlane.f32.xlu1 %v1645_v14  ;;  %v1051_v39 = vsel %vm1050_vm8, %v1003_v10, %v1049_v5 }
 0x24d   : > { %v1015_v7 = vrot.slane %v2532_v17, %v2131_v15 }
 0x24f   : > { %1661 = vadd.xlane.f32.xlu0 %v1660_v51  ;;  %v1054_v13 = vsel %vm1040_vm2, %v1015_v7, %v1011_v12  ;;  %v1027_v51 = vrot.slane %v2514_v48, %v2131_v15 }
 0x250   : > { %v1137_v59 = vpop.permute.xlu1 %1136  ;;  %1412 = vadd.xlane.f32.xlu1 %v1411_v49  ;;  %v1055_v49 = vsel %vm1042_vm3, %v1019_v11, %v1054_v13 }
 0x251   : > { %v1198_v52 = vsel %vm458_vm1, %v1137_v59, 0.0 }
 0x253   : > { %1430 = vadd.xlane.f32.xlu0 %v1429_v50 }
 0x254   : > { %1649 = vadd.xlane.f32.xlu1 %v1648_v20  ;;  %v1360_v21 = vpop.permute.xlu1 %1359 }
 0x255   : > { %v1414_v23 = vsel %vm458_vm1, %v1360_v21, 0.0 }
 0x257   : > { %1667 = vadd.xlane.f32.xlu0 %v1666_v6 }
 0x258   : > { %1199 = vadd.xlane.f32.xlu1 %v1198_v52  ;;  %v1597_v24 = vpop.permute.xlu1 %1596 }
 0x259   : > { %v1651_v26 = vsel %vm458_vm1, %v1597_v24, 0.0 }
 0x25b   : > { %1178 = vadd.xlane.f32.xlu0 %v1177_v22 }
 0x25c   : > { %1415 = vadd.xlane.f32.xlu1 %v1414_v23 }
 0x25f   : > { %1190 = vadd.xlane.f32.xlu0 %v1189_v25 }
 0x260   : > { %1652 = vadd.xlane.f32.xlu1 %v1651_v26 }
 0x263   : > { %1196 = vadd.xlane.f32.xlu0 %v1195_v27 }
 0x267   : > { %1427 = vadd.xlane.f32.xlu0 %v1426_v30 }
 0x26b   : > { %1664 = vadd.xlane.f32.xlu0 %v1663_v33 }
 0x26f   : > { %1433 = vadd.xlane.f32.xlu0 %v1432_v31 }
 0x273   : > { %1670 = vadd.xlane.f32.xlu0 %v1669_v35  ;;  %v2551_v28 = vpop.xlane.xlu0 %947 }
 0x274   : > { %v1035_v21 = vrot.slane %v2551_v28, %v2131_v15 }
 0x277   : > { %1436 = vadd.xlane.f32.xlu0 %v1435_v36  ;;  %v1139_v37 = vpop.permute.xlu0 %1138 }
 0x278   : > { %v1201_v43 = vsel %vm458_vm1, %v1139_v37, 0.0 }
 0x27b   : > { %1673 = vadd.xlane.f32.xlu0 %v1672_v38  ;;  %v1376_v40 = vpop.permute.xlu0 %1375 }
 0x27c   : > { %v1438_v8 = vsel %vm458_vm1, %v1376_v40, 0.0 }
 0x27f   : > { %1202 = vadd.xlane.f32.xlu0 %v1201_v43  ;;  %v1613_v57 = vpop.permute.xlu0 %1612 }
 0x280   : > { %v1675_v3 = vsel %vm458_vm1, %v1613_v57, 0.0 }
 0x283   : > { %1439 = vadd.xlane.f32.xlu0 %v1438_v8 }
 0x287   : > { %1676 = vadd.xlane.f32.xlu0 %v1675_v3 }
 0x289   : > { %v927_v41 = vpop.xlane.xlu1 %926 }
 0x28a   : > { %v1007_v9 = vrot.slane %v927_v41, %v2131_v15 }
 0x28c   : > { %v1053_v61 = vsel %vm1052_vm9, %v1007_v9, %v1051_v39 }
 0x28d   : > { %v1063_v14 = vsel %vm2587_vm10, %v1053_v61, -10000.0  ;;  %v939_v16 = vpop.xlane.xlu1 %938 }
 0x28e   : > { %1066 = vst.msk [vmem:[%s2595_s25] sm:$0xff] %vm1065_vm11, %v1063_v14  ;;  %v1023_v17 = vrot.slane %v939_v16, %v2131_v15 }
 0x290   : > { %v1056_v59 = vsel %vm1044_vm5, %v1023_v17, %v1055_v49 }
 0x291   : > { %v945_v19 = vpop.xlane.xlu1 %944  ;;  %v1057_v50 = vsel %vm1046_vm6, %v1027_v51, %v1056_v59 }
 0x292   : > { %v1031_v53 = vrot.slane %v945_v19, %v2131_v15 }
 0x294   : > { %v1058_v20 = vsel %vm1048_vm7, %v1031_v53, %v1057_v50 }
 0x295   : > { %v951_v6 = vpop.xlane.xlu1 %950  ;;  %v1059_v52 = vsel %vm1050_vm8, %v1035_v21, %v1058_v20 }
 0x296   : > { %v1039_v60 = vrot.slane %v951_v6, %v2131_v15 }
 0x298   : > { %v1060_v48 = vsel %vm1052_vm9, %v1039_v60, %v1059_v52 }
 0x299   : > { %v1064_v22 = vsel %vm2587_vm10, %v1060_v48, -10000.0  ;;  %v1158_v23 = vpop.xlane.xlu1 %1157 }
 0x29a   : > { %1067 = vst.msk [vmem:[%s2595_s25 + $0x8] sm:$0xff] %vm1065_vm11, %v1064_v22  ;;  %v1223_v46 = vrot.slane %v1158_v23, %v2131_v15 }
 0x29d   : > { %v1170_v24 = vpop.xlane.xlu1 %1169 }
 0x29e   : > { %v1239_v45 = vrot.slane %v1170_v24, %v2131_v15 }
 0x2a1   : > { %v1182_v0 = vpop.xlane.xlu1 %1181 }
 0x2a2   : > { %v1255_v1 = vrot.slane %v1182_v0, %v2131_v15 }
 0x2a5   : > { %v1395_v25 = vpop.xlane.xlu1 %1394 }
 0x2a6   : > { %v1460_v11 = vrot.slane %v1395_v25, %v2131_v15 }
 0x2a9   : > { %v1632_v26 = vpop.xlane.xlu1 %1631 }
 0x2aa   : > { %v1697_v59 = vrot.slane %v1632_v26, %v2131_v15 }
 0x2ad   : > { %v2623_v27 = vpop.xlane.xlu1 %1655 }
 0x2b0   : > { %v1161_v29 = vpop.xlane.xlu0 %1160 }
 0x2b1   : > { %v1401_v30 = vpop.xlane.xlu1 %1400  ;;  %v1227_v37 = vrot.slane %v1161_v29, %v2131_v15 }
 0x2b2   : > { %v1468_v19 = vrot.slane %v1401_v30, %v2131_v15 }
 0x2b3   : > { %v1284_v43 = vsel %vm1040_vm2, %v1227_v37, %v1223_v46 }
 0x2b4   : > { %v1164_v32 = vpop.xlane.xlu0 %1163 }
 0x2b5   : > { %v1638_v33 = vpop.xlane.xlu1 %1637  ;;  %v1231_v40 = vrot.slane %v1164_v32, %v2131_v15 }
 0x2b6   : > { %v1705_v24 = vrot.slane %v1638_v33, %v2131_v15 }
 0x2b7   : > { %v1285_v55 = vsel %vm1042_vm3, %v1231_v40, %v1284_v43 }
 0x2b8   : > { %v1398_v31 = vpop.xlane.xlu0 %1397 }
 0x2b9   : > { %v1407_v34 = vpop.xlane.xlu1 %1406  ;;  %v1464_v61 = vrot.slane %v1398_v31, %v2131_v15 }
 0x2ba   : > { %v1476_v0 = vrot.slane %v1407_v34, %v2131_v15 }
 0x2bb   : > { %v1521_v51 = vsel %vm1040_vm2, %v1464_v61, %v1460_v11 }
 0x2bc   : > { %v2625_v35 = vpop.xlane.xlu0 %1418  ;;  %v1522_v6 = vsel %vm1042_vm3, %v1468_v19, %v1521_v51 }
 0x2bd   : > { %v2627_v28 = vpop.xlane.xlu1 %1643 }
 0x2be   : > { %v1713_v40 = vrot.slane %v2627_v28, %v2131_v15 }
 0x2c0   : > { %v1635_v36 = vpop.xlane.xlu0 %1634 }
 0x2c1   : > { %v1173_v38 = vpop.xlane.xlu1 %1172  ;;  %v1701_v16 = vrot.slane %v1635_v36, %v2131_v15 }
 0x2c2   : > { %v1243_v50 = vrot.slane %v1173_v38, %v2131_v15 }
 0x2c3   : > { %v1758_v20 = vsel %vm1040_vm2, %v1701_v16, %v1697_v59 }
 0x2c4   : > { %v1167_v42 = vpop.xlane.xlu0 %1166  ;;  %v1759_v30 = vsel %vm1042_vm3, %v1705_v24, %v1758_v20 }
 0x2c5   : > { %v1188_v44 = vpop.xlane.xlu1 %1187  ;;  %v1235_v54 = vrot.slane %v1167_v42, %v2131_v15 }
 0x2c6   : > { %v1263_v3 = vrot.slane %v1188_v44, %v2131_v15 }
 0x2c7   : > { %v1286_v8 = vsel %vm1044_vm5, %v1235_v54, %v1285_v55 }
 0x2c8   : > { %v1287_v56 = vsel %vm1046_vm6, %v1239_v45, %v1286_v8  ;;  %v1176_v57 = vpop.xlane.xlu0 %1175 }
 0x2c9   : > { %v2638_v63 = vpop.xlane.xlu1 %1193  ;;  %v1247_v21 = vrot.slane %v1176_v57, %v2131_v15  ;;  %v1288_v52 = vsel %vm1048_vm7, %v1243_v50, %v1287_v56 }
 0x2ca   : > { %v1271_v57 = vrot.slane %v2638_v63, %v2131_v15 }
 0x2cb   : > { %v1289_v29 = vsel %vm1050_vm8, %v1247_v21, %v1288_v52 }
 0x2cc   : > { %v1185_v18 = vpop.xlane.xlu0 %1184 }
 0x2cd   : > { %v1404_v62 = vpop.xlane.xlu1 %1403  ;;  %v1259_v2 = vrot.slane %v1185_v18, %v2131_v15 }
 0x2ce   : > { %v1472_v49 = vrot.slane %v1404_v62, %v2131_v15 }
 0x2cf   : > { %v1291_v58 = vsel %vm1040_vm2, %v1259_v2, %v1255_v1 }
 0x2d0   : > { %v2644_v4 = vpop.xlane.xlu0 %1421  ;;  %v1292_v5 = vsel %vm1042_vm3, %v1263_v3, %v1291_v58  ;;  %v1523_v48 = vsel %vm1044_vm5, %v1472_v49, %v1522_v6  ;;  %v1492_v49 = vrot.slane %v2625_v35, %v2131_v15 }
 0x2d1   : > { %v1641_v7 = vpop.xlane.xlu1 %1640  ;;  %v1524_v32 = vsel %vm1046_vm6, %v1476_v0, %v1523_v48  ;;  %v1496_v16 = vrot.slane %v2644_v4, %v2131_v15  ;;  %v1729_v4 = vrot.slane %v2623_v27, %v2131_v15 }
 0x2d2   : > { %v1709_v22 = vrot.slane %v1641_v7, %v2131_v15 }
 0x2d3   : > { %v1528_v19 = vsel %vm1040_vm2, %v1496_v16, %v1492_v49 }
 0x2d4   : > { %v2647_v10 = vpop.xlane.xlu0 %1658  ;;  %v1760_v37 = vsel %vm1044_vm5, %v1709_v22, %v1759_v30 }
 0x2d5   : > { %v1410_v41 = vpop.xlane.xlu1 %1409  ;;  %v1761_v55 = vsel %vm1046_vm6, %v1713_v40, %v1760_v37  ;;  %v1733_v50 = vrot.slane %v2647_v10, %v2131_v15 }
 0x2d6   : > { %v1480_v23 = vrot.slane %v1410_v41, %v2131_v15 }
 0x2d7   : > { %v1765_v24 = vsel %vm1040_vm2, %v1733_v50, %v1729_v4 }
 0x2d8   : > { %v2649_v12 = vpop.xlane.xlu0 %1424  ;;  %v1525_v38 = vsel %vm1048_vm7, %v1480_v23, %v1524_v32 }
 0x2d9   : > { %v1647_v9 = vpop.xlane.xlu1 %1646 }
 0x2da   : > { %v1717_v33 = vrot.slane %v1647_v9, %v2131_v15 }
 0x2dc   : > { %v2651_v39 = vpop.xlane.xlu0 %1661  ;;  %v1762_v18 = vsel %vm1048_vm7, %v1717_v33, %v1761_v55 }
 0x2dd   : > { %v1413_v13 = vpop.xlane.xlu1 %1412 }
 0x2de   : > { %v1484_v25 = vrot.slane %v1413_v13, %v2131_v15 }
 0x2e0   : > { %v2655_v14 = vpop.xlane.xlu0 %1430  ;;  %v1526_v46 = vsel %vm1050_vm8, %v1484_v25, %v1525_v38 }
 0x2e1   : > { %v1650_v17 = vpop.xlane.xlu1 %1649  ;;  %v1508_v27 = vrot.slane %v2655_v14, %v2131_v15 }
 0x2e2   : > { %v1721_v42 = vrot.slane %v1650_v17, %v2131_v15  ;;  %v1500_v17 = vrot.slane %v2649_v12, %v2131_v15  ;;  %v1737_v12 = vrot.slane %v2651_v39, %v2131_v15 }
 0x2e4   : > { %v2663_v53 = vpop.xlane.xlu0 %1667  ;;  %v1763_v62 = vsel %vm1050_vm8, %v1721_v42, %v1762_v18  ;;  %v1529_v21 = vsel %vm1042_vm3, %v1500_v17, %v1528_v19  ;;  %v1766_v0 = vsel %vm1042_vm3, %v1737_v12, %v1765_v24 }
 0x2e5   : > { %v2668_v60 = vpop.xlane.xlu1 %1199 }
 0x2e6   : > { %v1279_v35 = vrot.slane %v2668_v60, %v2131_v15 }
 0x2e8   : > { %v1179_v26 = vpop.xlane.xlu0 %1178 }
 0x2e9   : > { %v1416_v31 = vpop.xlane.xlu1 %1415  ;;  %v1251_v36 = vrot.slane %v1179_v26, %v2131_v15 }
 0x2ea   : > { %v1488_v34 = vrot.slane %v1416_v31, %v2131_v15 }
 0x2eb   : > { %v1290_v43 = vsel %vm1052_vm9, %v1251_v36, %v1289_v29  ;;  %v1745_v36 = vrot.slane %v2663_v53, %v2131_v15 }
 0x2ec   : > { %v1527_v44 = vsel %vm1052_vm9, %v1488_v34, %v1526_v46  ;;  %v1300_v54 = vsel %vm2587_vm10, %v1290_v43, -10000.0  ;;  %v1191_v45 = vpop.xlane.xlu0 %1190 }
 0x2ed   : > { %v1537_v8 = vsel %vm2587_vm10, %v1527_v44, -10000.0  ;;  %1912 = vst.msk [vmem:[%s2595_s25 + $0x10] sm:$0xff] %vm1065_vm11, %v1300_v54  ;;  %v1653_v28 = vpop.xlane.xlu1 %1652  ;;  %v1267_v56 = vrot.slane %v1191_v45, %v2131_v15 }
 0x2ee   : > { %1914 = vst.msk [vmem:[%s2595_s25 + $0x20] sm:$0xff] %vm1065_vm11, %v1537_v8  ;;  %v1725_v1 = vrot.slane %v1653_v28, %v2131_v15 }
 0x2ef   : > { %v1293_v2 = vsel %vm1044_vm5, %v1267_v56, %v1292_v5 }
 0x2f0   : > { %v1764_v3 = vsel %vm1052_vm9, %v1725_v1, %v1763_v62  ;;  %v1294_v58 = vsel %vm1046_vm6, %v1271_v57, %v1293_v2  ;;  %v1197_v7 = vpop.xlane.xlu0 %1196 }
 0x2f1   : > { %v1774_v41 = vsel %vm2587_vm10, %v1764_v3, -10000.0  ;;  %v1275_v5 = vrot.slane %v1197_v7, %v2131_v15 }
 0x2f2   : > { %1916 = vst.msk [vmem:[%s2595_s25 + $0x30] sm:$0xff] %vm1065_vm11, %v1774_v41 }
 0x2f3   : > { %v1295_v20 = vsel %vm1048_vm7, %v1275_v5, %v1294_v58 }
 0x2f4   : > { %v1428_v63 = vpop.xlane.xlu0 %1427  ;;  %v1296_v39 = vsel %vm1050_vm8, %v1279_v35, %v1295_v20 }
 0x2f5   : > { %v1504_v59 = vrot.slane %v1428_v63, %v2131_v15 }
 0x2f7   : > { %v1530_v52 = vsel %vm1044_vm5, %v1504_v59, %v1529_v21 }
 0x2f8   : > { %v1665_v9 = vpop.xlane.xlu0 %1664  ;;  %v1531_v25 = vsel %vm1046_vm6, %v1508_v27, %v1530_v52 }
 0x2f9   : > { %v1741_v48 = vrot.slane %v1665_v9, %v2131_v15 }
 0x2fb   : > { %v1767_v30 = vsel %vm1044_vm5, %v1741_v48, %v1766_v0 }
 0x2fc   : > { %v1434_v13 = vpop.xlane.xlu0 %1433  ;;  %v1768_v34 = vsel %vm1046_vm6, %v1745_v36, %v1767_v30 }
 0x2fd   : > { %v1512_v10 = vrot.slane %v1434_v13, %v2131_v15 }
 0x2ff   : > { %v1532_v14 = vsel %vm1048_vm7, %v1512_v10, %v1531_v25 }
 0x300   : > { %v1671_v61 = vpop.xlane.xlu0 %1670 }
 0x301   : > { %v1749_v32 = vrot.slane %v1671_v61, %v2131_v15 }
 0x303   : > { %v1769_v42 = vsel %vm1048_vm7, %v1749_v32, %v1768_v34 }
 0x304   : > { %v1437_v11 = vpop.xlane.xlu0 %1436 }
 0x305   : > { %v1516_v23 = vrot.slane %v1437_v11, %v2131_v15 }
 0x307   : > { %v1533_v37 = vsel %vm1050_vm8, %v1516_v23, %v1532_v14 }
 0x308   : > { %v1674_v51 = vpop.xlane.xlu0 %1673 }
 0x309   : > { %v1753_v38 = vrot.slane %v1674_v51, %v2131_v15 }
 0x30b   : > { %v1770_v53 = vsel %vm1050_vm8, %v1753_v38, %v1769_v42 }
 0x30c   : > { %v1203_v6 = vpop.xlane.xlu0 %1202 }
 0x30d   : > { %v1283_v22 = vrot.slane %v1203_v6, %v2131_v15 }
 0x30f   : > { %v1297_v60 = vsel %vm1052_vm9, %v1283_v22, %v1296_v39 }
 0x310   : > { %v1301_v26 = vsel %vm2587_vm10, %v1297_v60, -10000.0  ;;  %v1440_v29 = vpop.xlane.xlu0 %1439 }
 0x311   : > { %1913 = vst.msk [vmem:[%s2595_s25 + $0x18] sm:$0xff] %vm1065_vm11, %v1301_v26  ;;  %v1520_v31 = vrot.slane %v1440_v29, %v2131_v15 }
 0x313   : > { %v1534_v33 = vsel %vm1052_vm9, %v1520_v31, %v1533_v37 }
 0x314   : > { %v1538_v40 = vsel %vm2587_vm10, %v1534_v33, -10000.0  ;;  %v1677_v46 = vpop.xlane.xlu0 %1676 }
 0x315   : > { %1915 = vst.msk [vmem:[%s2595_s25 + $0x28] sm:$0xff] %vm1065_vm11, %v1538_v40  ;;  %v1757_v43 = vrot.slane %v1677_v46, %v2131_v15 }
 0x317   : > { %v1771_v44 = vsel %vm1052_vm9, %v1757_v43, %v1770_v53 }
 0x318   : > { %v1775_v54 = vsel %vm2587_vm10, %v1771_v44, -10000.0 }
 0x319   : > { %1917 = vst.msk [vmem:[%s2595_s25 + $0x38] sm:$0xff] %vm1065_vm11, %v1775_v54 }
 0x31a PF: > { %s22_s17 = sadd.s32 1, %s2015_s17  }
 0x31b   : > { %p19_p4 = scmp.ge.s32.totalorder %s22_s17, 4  }
 0x31d   :  { %21 = sbr.rel (!%p19_p4) target bundleno = 1 (0x1), region = 111 }

</bundles_post_ra>
